<compile_context>
chip_gen: v7x
topology: tpu7x:2x2x1
jax: 0.10.0
libtpu: 0.0.40
codegen_flags: <defaults>
</compile_context>

<pallas_src>
import jax
import jax.numpy as jnp
from jax import lax
from jax.experimental import pallas as pl
from jax.experimental.pallas import tpu as pltpu

EPS = 1e-5


def fused_bn_relu_conv_kernel(x_ref, gamma_ref, beta_ref, w_ref, o_ref):
    # x_ref:     [C, M]         f32  (resident across Cout tiles: constant index_map)
    # gamma_ref: [C, 1]         f32
    # beta_ref:  [C, 1]         f32
    # w_ref:     [tile_co, C]   bf16 (1x1-conv weight tile)
    # o_ref:     [tile_co, M]   f32
    #
    # Elementwise BN/ReLU math stays in f32 (v5e-friendly); only the MXU matmul
    # operands are bf16 with f32 accumulation.
    x = x_ref[...]
    inv_m = 1.0 / x.shape[1]

    mean = jnp.sum(x, axis=1, keepdims=True) * inv_m
    xc = x - mean
    var = jnp.sum(xc * xc, axis=1, keepdims=True) * inv_m      # biased (training BN)
    scale = gamma_ref[...] * lax.rsqrt(var + EPS)               # gamma folded into rsqrt

    # BN: (x - mean) * scale + beta   ->  ReLU
    r = jnp.maximum(xc * scale + beta_ref[...], 0.0)

    # 1x1 conv as out[tile_co, M] = w[tile_co, C] @ r[C, M] on the MXU.
    o_ref[...] = jnp.dot(
        w_ref[...], r.astype(jnp.bfloat16), preferred_element_type=jnp.float32
    )


def _num_cout_tiles(cout):
    """1 tile on single-TensorCore chips; 2 'parallel' tiles on dual-TC chips."""
    try:
        kind = jax.devices()[0].device_kind.lower()
    except Exception:
        return 1
    dual_tc = ("v7" in kind) or ("v4" in kind) or ("v5p" in kind)
    if dual_tc and cout % 2 == 0 and (cout // 2) % 8 == 0:
        return 2
    return 1


def bn_relu_conv2d(x_nchw, gamma, beta, w_oihw):
    """x_nchw: [N, C, H, W], w_oihw: [Cout, C, 1, 1] -> [N, Cout, H, W]."""
    N, C, H, W = x_nchw.shape
    Cout = w_oihw.shape[0]
    M = N * H * W

    # [C, M] layout.  For N == 1 (the module's shape) the transpose has a
    # size-1 axis, so this is effectively just a reshape (no HBM transpose).
    x2d = jnp.transpose(x_nchw, (1, 0, 2, 3)).reshape(C, M)
    w2d = w_oihw.reshape(Cout, C).astype(jnp.bfloat16)
    g2d = gamma.reshape(C, 1)
    b2d = beta.reshape(C, 1)

    n_tiles = _num_cout_tiles(Cout)
    tile_co = Cout // n_tiles

    cost = pl.CostEstimate(
        flops=2 * Cout * C * M + 8 * C * M,
        transcendentals=C,
        bytes_accessed=x2d.size * 4 + w2d.size * 2 + Cout * M * 4 + 2 * C * 4,
    )

    out2d = pl.pallas_call(
        fused_bn_relu_conv_kernel,
        out_shape=jax.ShapeDtypeStruct((Cout, M), jnp.float32),
        grid=(n_tiles,),
        in_specs=[
            pl.BlockSpec((C, M), lambda j: (0, 0)),        # x stays resident
            pl.BlockSpec((C, 1), lambda j: (0, 0)),
            pl.BlockSpec((C, 1), lambda j: (0, 0)),
            pl.BlockSpec((tile_co, C), lambda j: (j, 0)),  # weight tile
        ],
        out_specs=pl.BlockSpec((tile_co, M), lambda j: (j, 0)),
        compiler_params=pltpu.CompilerParams(
            dimension_semantics=("parallel",),
            vmem_limit_bytes=32 * 1024 * 1024,
        ),
        cost_estimate=cost,
    )(x2d, g2d, b2d, w2d)

    # [Cout, M] -> [N, Cout, H, W]  (size-1 transpose for N == 1: free).
    return jnp.transpose(out2d.reshape(Cout, N, H, W), (1, 0, 2, 3))


def _reference(x_nchw, gamma, beta, w_oihw, use_bf16_matmul=False):
    # Pure-JAX reference of training-mode BN -> ReLU -> 1x1 conv.
    mean = jnp.mean(x_nchw, axis=(0, 2, 3), keepdims=True)
    var = jnp.mean((x_nchw - mean) ** 2, axis=(0, 2, 3), keepdims=True)
    xn = (x_nchw - mean) * lax.rsqrt(var + EPS)
    xn = xn * gamma[None, :, None, None] + beta[None, :, None, None]
    r = jnp.maximum(xn, 0.0)
    w2 = w_oihw.reshape(w_oihw.shape[0], -1)
    if use_bf16_matmul:
        r = r.astype(jnp.bfloat16)
        w2 = w2.astype(jnp.bfloat16)
    out = jnp.einsum("nchw,oc->nohw", r, w2, preferred_element_type=jnp.float32)
    return out.astype(jnp.float32)


if __name__ == "__main__":
    N, C, H, W = 1, 256, 28, 28   # matches x266 in the PyTorch module
    Cout = 1024

    key = jax.random.PRNGKey(0)
    kx, kg, kb, kw = jax.random.split(key, 4)

    x = jax.random.normal(kx, (N, C, H, W), dtype=jnp.float32)
    gamma = 1.0 + 0.1 * jax.random.normal(kg, (C,), dtype=jnp.float32)
    beta = 0.1 * jax.random.normal(kb, (C,), dtype=jnp.float32)
    # Conv2d default init scale (kaiming-uniform-ish range), deterministic.
    w = jax.random.uniform(
        kw, (Cout, C, 1, 1), dtype=jnp.float32,
        minval=-(1.0 / (C ** 0.5)), maxval=(1.0 / (C ** 0.5)),
    )

    out = jax.block_until_ready(bn_relu_conv2d(x, gamma, beta, w))
    assert out.shape == (N, Cout, H, W), out.shape

    # Tight check vs. a reference using the same bf16 MXU operands.
    ref_bf16 = jax.block_until_ready(_reference(x, gamma, beta, w, True))
    assert jnp.allclose(out, ref_bf16, atol=5e-3, rtol=5e-3), \
        "mismatch vs bf16-matmul reference"

    # Sanity check vs. the full-f32 (PyTorch-equivalent) math.
    ref_f32 = jax.block_until_ready(_reference(x, gamma, beta, w, False))
    assert jnp.allclose(out, ref_f32, atol=1e-2, rtol=1e-2), \
        "mismatch vs f32 reference"

    print("KERNEL_OK")
</pallas_src>

<mosaic_0001>
module attributes {stable_mosaic.version = 11 : i64} {
  func.func @fused_bn_relu_conv_kernel(%arg0: i32, %arg1: memref<256x784xf32, #tpu.memory_space<vmem>>, %arg2: memref<256x1xf32, #tpu.memory_space<vmem>>, %arg3: memref<256x1xf32, #tpu.memory_space<vmem>>, %arg4: memref<1024x256xbf16, #tpu.memory_space<vmem>>, %arg5: memref<1024x784xf32, #tpu.memory_space<vmem>>) attributes {dimension_semantics = [#tpu.dimension_semantics<parallel>], iteration_bounds = array<i64: 1>, scalar_prefetch = 0 : i64, scratch_operands = 0 : i64, tpu.core_type = #tpu.core_type<tc>, window_params = [{pipeline_mode = #tpu.pipeline_mode<synchronous>, transform_indices = @transform_0, window_bounds = array<i64: 256, 784>}, {pipeline_mode = #tpu.pipeline_mode<synchronous>, transform_indices = @transform_1, window_bounds = array<i64: 256, 1>}, {pipeline_mode = #tpu.pipeline_mode<synchronous>, transform_indices = @transform_2, window_bounds = array<i64: 256, 1>}, {transform_indices = @transform_3, window_bounds = array<i64: 1024, 256>}, {transform_indices = @transform_4, window_bounds = array<i64: 1024, 784>}]} {
    %c0 = arith.constant 0 : index
    %c0_0 = arith.constant 0 : index
    %0 = vector.load %arg1[%c0, %c0_0] : memref<256x784xf32, #tpu.memory_space<vmem>>, vector<256x784xf32>
    %cst = arith.constant dense<0.000000e+00> : vector<256xf32>
    %1 = vector.multi_reduction <add>, %0, %cst [1] : vector<256x784xf32> to vector<256xf32>
    %2 = vector.shape_cast %1 : vector<256xf32> to vector<256x1xf32>
    %cst_1 = arith.constant 0.00127551018 : f32
    %3 = vector.broadcast %cst_1 : f32 to vector<256x1xf32>
    %4 = arith.mulf %2, %3 : vector<256x1xf32>
    %5 = vector.broadcast %4 : vector<256x1xf32> to vector<256x784xf32>
    %6 = arith.subf %0, %5 : vector<256x784xf32>
    %7 = arith.mulf %6, %6 : vector<256x784xf32>
    %cst_2 = arith.constant dense<0.000000e+00> : vector<256xf32>
    %8 = vector.multi_reduction <add>, %7, %cst_2 [1] : vector<256x784xf32> to vector<256xf32>
    %9 = vector.shape_cast %8 : vector<256xf32> to vector<256x1xf32>
    %cst_3 = arith.constant 0.00127551018 : f32
    %10 = vector.broadcast %cst_3 : f32 to vector<256x1xf32>
    %11 = arith.mulf %9, %10 : vector<256x1xf32>
    %c0_4 = arith.constant 0 : index
    %c0_5 = arith.constant 0 : index
    %12 = vector.load %arg2[%c0_4, %c0_5] : memref<256x1xf32, #tpu.memory_space<vmem>>, vector<256x1xf32>
    %cst_6 = arith.constant 9.99999974E-6 : f32
    %13 = vector.broadcast %cst_6 : f32 to vector<256x1xf32>
    %14 = arith.addf %11, %13 : vector<256x1xf32>
    %15 = math.rsqrt %14 : vector<256x1xf32>
    %16 = arith.mulf %12, %15 : vector<256x1xf32>
    %17 = vector.broadcast %16 : vector<256x1xf32> to vector<256x784xf32>
    %18 = arith.mulf %6, %17 : vector<256x784xf32>
    %c0_7 = arith.constant 0 : index
    %c0_8 = arith.constant 0 : index
    %19 = vector.load %arg3[%c0_7, %c0_8] : memref<256x1xf32, #tpu.memory_space<vmem>>, vector<256x1xf32>
    %20 = vector.broadcast %19 : vector<256x1xf32> to vector<256x784xf32>
    %21 = arith.addf %18, %20 : vector<256x784xf32>
    %cst_9 = arith.constant 0.000000e+00 : f32
    %22 = vector.broadcast %cst_9 : f32 to vector<256x784xf32>
    %23 = arith.maximumf %21, %22 : vector<256x784xf32>
    %c0_10 = arith.constant 0 : index
    %c0_11 = arith.constant 0 : index
    %24 = vector.load %arg4[%c0_10, %c0_11] : memref<1024x256xbf16, #tpu.memory_space<vmem>>, vector<1024x256xbf16>
    %25 = arith.truncf %23 : vector<256x784xf32> to vector<256x784xbf16>
    %cst_12 = arith.constant dense<0.000000e+00> : vector<1024x784xf32>
    %26 = tpu.matmul %24, %25, %cst_12 {dimension_numbers = #tpu.dot_dimension_numbers<[1], [0], [0], [1], [0, 0, 1, 1], [], []>} : vector<1024x256xbf16>, vector<256x784xbf16>, vector<1024x784xf32> -> vector<1024x784xf32>
    %c0_13 = arith.constant 0 : index
    %c0_14 = arith.constant 0 : index
    %27 = vector.load %arg5[%c0_13, %c0_14] : memref<1024x784xf32, #tpu.memory_space<vmem>>, vector<1024x784xf32>
    tpu.vector_store %arg5[%c0_13, %c0_14], %26 {strides = array<i32>} : memref<1024x784xf32, #tpu.memory_space<vmem>>, vector<1024x784xf32>,
    return
  }
  func.func @transform_0(%arg0: i32) -> (i32, i32) {
    %c0_i32 = arith.constant 0 : i32
    %c0_i32_0 = arith.constant 0 : i32
    %c0_i32_1 = arith.constant 0 : i32
    return %c0_i32, %c0_i32_0 : i32, i32
  }
  func.func @transform_1(%arg0: i32) -> (i32, i32) {
    %c0_i32 = arith.constant 0 : i32
    %c0_i32_0 = arith.constant 0 : i32
    %c0_i32_1 = arith.constant 0 : i32
    return %c0_i32, %c0_i32_0 : i32, i32
  }
  func.func @transform_2(%arg0: i32) -> (i32, i32) {
    %c0_i32 = arith.constant 0 : i32
    %c0_i32_0 = arith.constant 0 : i32
    %c0_i32_1 = arith.constant 0 : i32
    return %c0_i32, %c0_i32_0 : i32, i32
  }
  func.func @transform_3(%arg0: i32) -> (i32, i32) {
    %c0_i32 = arith.constant 0 : i32
    %c0_i32_0 = arith.constant 0 : i32
    return %arg0, %c0_i32 : i32, i32
  }
  func.func @transform_4(%arg0: i32) -> (i32, i32) {
    %c0_i32 = arith.constant 0 : i32
    %c0_i32_0 = arith.constant 0 : i32
    return %arg0, %c0_i32 : i32, i32
  }
}

</mosaic_0001>

<bundles_post_ra>
// kernel: tpu_custom_call.1
= control target key start
LH: loop header
LB: loop body
LE: loop exit
PB: predicated region body
PF: predicated region fallthrough
CT: control target
= control target key end

     0   :  { %9 = vsyncpa [#allocation3], 0  ;;  %s7608_s15 = smov [#allocation2]   ;;  %s14201_s0 = inlined_call_operand.vmem [shape: f32[256,784], index: 0, kind: input, shape index: {}]   ;;  %s14202_s1 = inlined_call_operand.vmem [shape: f32[256,1], index: 1, kind: input, shape index: {}]   ;;  %s14203_s2 = inlined_call_operand.vmem [shape: f32[256,1], index: 2, kind: input, shape index: {}]   ;;  %s14204_s3 = inlined_call_operand.hbm [shape: bf16[1024,256], index: 3, kind: input, shape index: {}]   ;;  %s14205_s4 = inlined_call_operand.vmem [shape: f32[1024,784], index: 4, kind: output, shape index: {}]  }
   0x1   :  { %s21_s16 = sshll.u32 %s7608_s15, 4  ;;  %s7584_s19 = scalar_lea.hbm %s14204_s3, 16384  ;;  %s22_s16 = int_to_ptr.vmem [resolvable:$true] %s21_s16 }
   0x2   :  { %p7585_p0 = scmp.ne.s32.totalorder %s14204_s3, %s7584_s19  ;;  %p7588_p1 = scmp.lt.u32.totalorder %s7584_s19, %s14204_s3 }
   0x4   :  { %p7590_p2 = pnand %p7588_p1, %p7585_p0 }
   0x6   :  { %7593 = shalt.err (!%p7590_p2)
}
   0x7   :  { %s7594_s24 = scalar_lea.vmem %s22_s16, 16384  ;;  %p7599_p4 = scmp.lt.s32.totalorder %s22_s16, %s22_s16 }
   0x8   :  { %p7595_p3 = scmp.ne.s32.totalorder %s22_s16, %s7594_s24  ;;  %p7600_p5 = scmp.lt.s32.totalorder %s7594_s24, %s7594_s24 }
   0xa   :  { %p7601_p6 = por %p7600_p5, %p7599_p4 }
   0xc   :  { %p7602_p7 = pnand %p7601_p6, %p7595_p3 }
   0xe   :  { %7605 = shalt.err (!%p7602_p7)
}
   0xf   :  { %s7609_s25 = smov 128   ;;  %s7610_s26 = smov 8  }
  0x10   :  { %27 = dma.hbm_to_vmem [thread:$0]  %s14204_s3, 16384, %s22_s16, [#allocation3], %s7609_s25, %s7609_s25, %s7610_s26  }
  0x11   :  { %7606 = dma.done.wait [#allocation3], 16384  }
  0x12   :  { %7607 = vsyncadd [#allocation3], 4294950912  ;;  %v14206_v0 = vmov 0   ;;  %v46_v1 = vld [vmem:[%s14201_s0 + $0x70] sm:$0xff]  ;;  %v47_v2 = vld [vmem:[%s14201_s0 + $0x78] sm:$0xff]  ;;  %vm261_vm0 = vcmask 130048  }
  0x13   :  { %6974 = vset.pattern.permute.xlu1 %v14206_v0  ;;  %6975 = vset.pattern.permute.xlu0 %v14206_v0  ;;  %v48_v3 = vld [vmem:[%s14201_s0 + $0x80] sm:$0xff]  ;;  %v275_v4 = vadd.f32 %v47_v2, %v46_v1  ;;  %v49_v5 = vld [vmem:[%s14201_s0 + $0x88] sm:$0xff]  ;;  %v50_v8 = vld [vmem:[%s14201_s0 + $0x90] sm:$0xff] }
  0x14   :  { %v32_v6 = vld [vmem:[%s14201_s0] sm:$0xff]  ;;  %v33_v7 = vld [vmem:[%s14201_s0 + $0x8] sm:$0xff]  ;;  %v34_v10 = vld [vmem:[%s14201_s0 + $0x10] sm:$0xff] }
  0x15   :  { %v276_v9 = vadd.f32 %v275_v4, %v48_v3  ;;  %v256_v11 = vadd.f32 %v33_v7, %v32_v6  ;;  %v51_v12 = vld [vmem:[%s14201_s0 + $0x98] sm:$0xff]  ;;  %v53_v14 = vld [vmem:[%s14201_s0 + $0xa8] sm:$0xff]  ;;  %v52_v15 = vld [vmem:[%s14201_s0 + $0xa0] sm:$0xff] }
  0x16   :  { %v35_v13 = vld [vmem:[%s14201_s0 + $0x18] sm:$0xff]  ;;  %v54_v18 = vld [vmem:[%s14201_s0 + $0xb0] sm:$0xff]  ;;  %v36_v20 = vld [vmem:[%s14201_s0 + $0x20] sm:$0xff]  ;;  %v280_v29 = vsel %vm261_vm0, %v52_v15, 0.0 }
  0x17   :  { %v277_v16 = vadd.f32 %v276_v9, %v49_v5  ;;  %v257_v17 = vadd.f32 %v256_v11, %v34_v10  ;;  %v55_v19 = vld [vmem:[%s14201_s0 + $0xb8] sm:$0xff]  ;;  %v38_v21 = vld [vmem:[%s14201_s0 + $0x30] sm:$0xff]  ;;  %v56_v22 = vld [vmem:[%s14201_s0 + $0xc0] sm:$0xff]  ;;  %v284_v23 = vadd.f32 %v54_v18, %v53_v14 }
  0x18   :  { %v39_v26 = vld [vmem:[%s14201_s0 + $0x38] sm:$0xff]  ;;  %v40_v27 = vld [vmem:[%s14201_s0 + $0x40] sm:$0xff]  ;;  %v41_v28 = vld [vmem:[%s14201_s0 + $0x48] sm:$0xff]  ;;  %v262_v40 = vsel %vm261_vm0, %v38_v21, 0.0 }
  0x19   :  { %v278_v24 = vadd.f32 %v277_v16, %v50_v8  ;;  %v258_v25 = vadd.f32 %v257_v17, %v35_v13  ;;  %v37_v30 = vld [vmem:[%s14201_s0 + $0x28] sm:$0xff]  ;;  %v285_v32 = vadd.f32 %v284_v23, %v55_v19  ;;  %v266_v33 = vadd.f32 %v40_v27, %v39_v26  ;;  %v58_v36 = vld [vmem:[%s14201_s0 + $0xd0] sm:$0xff]  ;;  %v67_v38 = vld [vmem:[%s14201_s0 + $0x118] sm:$0xff] }
  0x1a   :  { %v57_v31 = vld [vmem:[%s14201_s0 + $0xc8] sm:$0xff]  ;;  %v42_v37 = vld [vmem:[%s14201_s0 + $0x50] sm:$0xff]  ;;  %v68_v39 = vld [vmem:[%s14201_s0 + $0x120] sm:$0xff] }
  0x1b   :  { %v279_v34 = vadd.f32 %v278_v24, %v51_v12  ;;  %v259_v35 = vadd.f32 %v258_v25, %v36_v20  ;;  %v59_v41 = vld [vmem:[%s14201_s0 + $0xd8] sm:$0xff]  ;;  %v286_v42 = vadd.f32 %v285_v32, %v56_v22  ;;  %v267_v44 = vadd.f32 %v266_v33, %v41_v28  ;;  %v69_v45 = vld [vmem:[%s14201_s0 + $0x128] sm:$0xff]  ;;  %v44_v49 = vld [vmem:[%s14201_s0 + $0x60] sm:$0xff] }
  0x1c   :  { %v43_v43 = vld [vmem:[%s14201_s0 + $0x58] sm:$0xff]  ;;  %v302_v46 = vadd.f32 %v68_v39, %v67_v38  ;;  %v70_v50 = vld [vmem:[%s14201_s0 + $0x130] sm:$0xff]  ;;  %v60_v51 = vld [vmem:[%s14201_s0 + $0xe0] sm:$0xff]  ;;  %v289_v59 = vsel %vm261_vm0, %v59_v41, 0.0 }
  0x1d   :  { %v281_v47 = vadd.f32 %v280_v29, %v279_v34  ;;  %v260_v48 = vadd.f32 %v259_v35, %v37_v30  ;;  %v287_v52 = vadd.f32 %v286_v42, %v57_v31  ;;  %v45_v53 = vld [vmem:[%s14201_s0 + $0x68] sm:$0xff]  ;;  %v268_v54 = vadd.f32 %v267_v44, %v42_v37  ;;  %v62_v57 = vld [vmem:[%s14201_s0 + $0xf0] sm:$0xff]  ;;  %v71_v60 = vld [vmem:[%s14201_s0 + $0x138] sm:$0xff] }
  0x1e   :  { %v303_v55 = vadd.f32 %v302_v46, %v69_v45  ;;  %v61_v56 = vld [vmem:[%s14201_s0 + $0xe8] sm:$0xff]  ;;  %v63_v62 = vld [vmem:[%s14201_s0 + $0xf8] sm:$0xff]  ;;  %v82_v5 = vld [vmem:[%s14201_s0 + $0x190] sm:$0xff]  ;;  %v271_v7 = vsel %vm261_vm0, %v45_v53, 0.0 }
  0x1f   :  { %282 = vadd.xlane.f32.xlu1 %v281_v47  ;;  %v263_v58 = vadd.f32 %v262_v40, %v260_v48  ;;  %v73_v61 = vld [vmem:[%s14201_s0 + $0x148] sm:$0xff]  ;;  %v293_v63 = vadd.f32 %v61_v56, %v60_v51  ;;  %v288_v1 = vadd.f32 %v287_v52, %v58_v36  ;;  %v269_v2 = vadd.f32 %v268_v54, %v43_v43  ;;  %v83_v6 = vld [vmem:[%s14201_s0 + $0x198] sm:$0xff]  ;;  %v72_v8 = vld [vmem:[%s14201_s0 + $0x140] sm:$0xff] }
  0x20   :  { %v304_v3 = vadd.f32 %v303_v55, %v70_v50  ;;  %v81_v4 = vld [vmem:[%s14201_s0 + $0x188] sm:$0xff]  ;;  %v64_v9 = vld [vmem:[%s14201_s0 + $0x100] sm:$0xff]  ;;  %v74_v17 = vld [vmem:[%s14201_s0 + $0x150] sm:$0xff]  ;;  %v307_v19 = vsel %vm261_vm0, %v73_v61, 0.0 }
  0x21   :  { %264 = vadd.xlane.f32.xlu0 %v263_v58  ;;  %v294_v10 = vadd.f32 %v293_v63, %v62_v57  ;;  %v320_v11 = vadd.f32 %v82_v5, %v81_v4  ;;  %v290_v12 = vadd.f32 %v289_v59, %v288_v1  ;;  %v270_v13 = vadd.f32 %v269_v2, %v44_v49  ;;  %v65_v15 = vld [vmem:[%s14201_s0 + $0x108] sm:$0xff]  ;;  %v84_v16 = vld [vmem:[%s14201_s0 + $0x1a0] sm:$0xff]  ;;  %v75_v18 = vld [vmem:[%s14201_s0 + $0x158] sm:$0xff] }
  0x22   :  { %v305_v14 = vadd.f32 %v304_v3, %v71_v60  ;;  %v66_v20 = vld [vmem:[%s14201_s0 + $0x110] sm:$0xff]  ;;  %v85_v22 = vld [vmem:[%s14201_s0 + $0x1a8] sm:$0xff]  ;;  %v76_v24 = vld [vmem:[%s14201_s0 + $0x160] sm:$0xff]  ;;  %v311_v25 = vadd.f32 %v75_v18, %v74_v17 }
  0x23   :  { %v295_v21 = vadd.f32 %v294_v10, %v63_v62  ;;  %v321_v23 = vadd.f32 %v320_v11, %v83_v6  ;;  %291 = vadd.xlane.f32.xlu1 %v290_v12  ;;  %v272_v26 = vadd.f32 %v271_v7, %v270_v13  ;;  %v86_v28 = vld [vmem:[%s14201_s0 + $0x1b0] sm:$0xff]  ;;  %v77_v29 = vld [vmem:[%s14201_s0 + $0x168] sm:$0xff]  ;;  %v95_v30 = vld [vmem:[%s14201_s0 + $0x1f8] sm:$0xff]  ;;  %v298_v38 = vsel %vm261_vm0, %v66_v20, 0.0 }
  0x24   :  { %v306_v27 = vadd.f32 %v305_v14, %v72_v8  ;;  %v87_v32 = vld [vmem:[%s14201_s0 + $0x1b8] sm:$0xff]  ;;  %v312_v34 = vadd.f32 %v311_v25, %v76_v24  ;;  %v96_v35 = vld [vmem:[%s14201_s0 + $0x200] sm:$0xff]  ;;  %v97_v36 = vld [vmem:[%s14201_s0 + $0x208] sm:$0xff] }
  0x25   :  { %v296_v31 = vadd.f32 %v295_v21, %v64_v9  ;;  %v322_v33 = vadd.f32 %v321_v23, %v84_v16  ;;  %273 = vadd.xlane.f32.xlu0 %v272_v26  ;;  %v78_v39 = vld [vmem:[%s14201_s0 + $0x170] sm:$0xff]  ;;  %v80_v40 = vld [vmem:[%s14201_s0 + $0x180] sm:$0xff]  ;;  %v338_v42 = vadd.f32 %v96_v35, %v95_v30  ;;  %v89_v47 = vld [vmem:[%s14201_s0 + $0x1c8] sm:$0xff]  ;;  %v325_v49 = vsel %vm261_vm0, %v87_v32, 0.0 }
  0x26   :  { %v308_v37 = vadd.f32 %v307_v19, %v306_v27  ;;  %v98_v41 = vld [vmem:[%s14201_s0 + $0x210] sm:$0xff]  ;;  %v313_v45 = vadd.f32 %v312_v34, %v77_v29  ;;  %v88_v46 = vld [vmem:[%s14201_s0 + $0x1c0] sm:$0xff]  ;;  %v79_v50 = vld [vmem:[%s14201_s0 + $0x178] sm:$0xff]  ;;  %v316_v61 = vsel %vm261_vm0, %v80_v40, 0.0 }
  0x27   :  { %v297_v43 = vadd.f32 %v296_v31, %v65_v15  ;;  %v323_v44 = vadd.f32 %v322_v33, %v85_v22  ;;  %v90_v48 = vld [vmem:[%s14201_s0 + $0x1d0] sm:$0xff]  ;;  %v99_v51 = vld [vmem:[%s14201_s0 + $0x218] sm:$0xff]  ;;  %v339_v52 = vadd.f32 %v338_v42, %v97_v36  ;;  %v329_v53 = vadd.f32 %v89_v47, %v88_v46  ;;  %v100_v57 = vld [vmem:[%s14201_s0 + $0x220] sm:$0xff] }
  0x28   :  { %309 = vadd.xlane.f32.xlu1 %v308_v37  ;;  %v314_v56 = vadd.f32 %v313_v45, %v78_v39  ;;  %v91_v58 = vld [vmem:[%s14201_s0 + $0x1d8] sm:$0xff]  ;;  %v109_v59 = vld [vmem:[%s14201_s0 + $0x268] sm:$0xff]  ;;  %v110_v60 = vld [vmem:[%s14201_s0 + $0x270] sm:$0xff] }
  0x29   :  { %v299_v54 = vadd.f32 %v298_v38, %v297_v43  ;;  %v324_v55 = vadd.f32 %v323_v44, %v86_v28  ;;  %v101_v62 = vld [vmem:[%s14201_s0 + $0x228] sm:$0xff]  ;;  %v340_v63 = vadd.f32 %v339_v52, %v98_v41  ;;  %v92_v1 = vld [vmem:[%s14201_s0 + $0x1e0] sm:$0xff]  ;;  %v330_v2 = vadd.f32 %v329_v53, %v90_v48  ;;  %v111_v3 = vld [vmem:[%s14201_s0 + $0x278] sm:$0xff] }
  0x2a   :  { %v356_v4 = vadd.f32 %v110_v60, %v109_v59  ;;  %v315_v6 = vadd.f32 %v314_v56, %v79_v50  ;;  %v93_v7 = vld [vmem:[%s14201_s0 + $0x1e8] sm:$0xff]  ;;  %v112_v8 = vld [vmem:[%s14201_s0 + $0x280] sm:$0xff]  ;;  %v102_v9 = vld [vmem:[%s14201_s0 + $0x230] sm:$0xff]  ;;  %v343_v17 = vsel %vm261_vm0, %v101_v62, 0.0 }
  0x2b   :  { %300 = vadd.xlane.f32.xlu0 %v299_v54  ;;  %v326_v5 = vadd.f32 %v325_v49, %v324_v55  ;;  %v341_v10 = vadd.f32 %v340_v63, %v99_v51  ;;  %v94_v11 = vld [vmem:[%s14201_s0 + $0x1f0] sm:$0xff]  ;;  %v331_v12 = vadd.f32 %v330_v2, %v91_v58  ;;  %v103_v14 = vld [vmem:[%s14201_s0 + $0x238] sm:$0xff]  ;;  %v104_v15 = vld [vmem:[%s14201_s0 + $0x240] sm:$0xff] }
  0x2c   :  { %v357_v13 = vadd.f32 %v356_v4, %v111_v3  ;;  %v317_v16 = vadd.f32 %v316_v61, %v315_v6  ;;  %v113_v18 = vld [vmem:[%s14201_s0 + $0x288] sm:$0xff]  ;;  %v115_v19 = vld [vmem:[%s14201_s0 + $0x298] sm:$0xff]  ;;  %v347_v21 = vadd.f32 %v103_v14, %v102_v9  ;;  %v124_v26 = vld [vmem:[%s14201_s0 + $0x2e0] sm:$0xff]  ;;  %v334_v28 = vsel %vm261_vm0, %v94_v11, 0.0 }
  0x2d   :  { %327 = vadd.xlane.f32.xlu1 %v326_v5  ;;  %v105_v20 = vld [vmem:[%s14201_s0 + $0x248] sm:$0xff]  ;;  %v342_v22 = vadd.f32 %v341_v10, %v100_v57  ;;  %v332_v23 = vadd.f32 %v331_v12, %v92_v1  ;;  %v123_v25 = vld [vmem:[%s14201_s0 + $0x2d8] sm:$0xff]  ;;  %v114_v29 = vld [vmem:[%s14201_s0 + $0x290] sm:$0xff]  ;;  %v361_v40 = vsel %vm261_vm0, %v115_v19, 0.0 }
  0x2e   :  { %v358_v24 = vadd.f32 %v357_v13, %v112_v8  ;;  %v125_v27 = vld [vmem:[%s14201_s0 + $0x2e8] sm:$0xff]  ;;  %v106_v30 = vld [vmem:[%s14201_s0 + $0x250] sm:$0xff]  ;;  %v348_v31 = vadd.f32 %v347_v21, %v104_v15  ;;  %v374_v32 = vadd.f32 %v124_v26, %v123_v25  ;;  %v107_v36 = vld [vmem:[%s14201_s0 + $0x258] sm:$0xff] }
  0x2f   :  { %318 = vadd.xlane.f32.xlu0 %v317_v16  ;;  %v344_v33 = vadd.f32 %v343_v17, %v342_v22  ;;  %v333_v34 = vadd.f32 %v332_v23, %v93_v7  ;;  %v126_v37 = vld [vmem:[%s14201_s0 + $0x2f0] sm:$0xff]  ;;  %v116_v38 = vld [vmem:[%s14201_s0 + $0x2a0] sm:$0xff]  ;;  %v117_v39 = vld [vmem:[%s14201_s0 + $0x2a8] sm:$0xff] }
  0x30   :  { %v359_v35 = vadd.f32 %v358_v24, %v113_v18  ;;  %v108_v41 = vld [vmem:[%s14201_s0 + $0x260] sm:$0xff]  ;;  %v349_v42 = vadd.f32 %v348_v31, %v105_v20  ;;  %v127_v43 = vld [vmem:[%s14201_s0 + $0x2f8] sm:$0xff]  ;;  %v375_v44 = vadd.f32 %v374_v32, %v125_v27  ;;  %v118_v45 = vld [vmem:[%s14201_s0 + $0x2b0] sm:$0xff]  ;;  %v365_v46 = vadd.f32 %v117_v39, %v116_v38 }
  0x31   :  { %345 = vadd.xlane.f32.xlu1 %v344_v33  ;;  %v335_v47 = vadd.f32 %v334_v28, %v333_v34  ;;  %v128_v49 = vld [vmem:[%s14201_s0 + $0x300] sm:$0xff]  ;;  %v119_v50 = vld [vmem:[%s14201_s0 + $0x2b8] sm:$0xff]  ;;  %v137_v51 = vld [vmem:[%s14201_s0 + $0x348] sm:$0xff]  ;;  %v352_v59 = vsel %vm261_vm0, %v108_v41, 0.0 }
  0x32   :  { %v360_v48 = vadd.f32 %v359_v35, %v114_v29  ;;  %v350_v52 = vadd.f32 %v349_v42, %v106_v30  ;;  %v129_v53 = vld [vmem:[%s14201_s0 + $0x308] sm:$0xff]  ;;  %v376_v54 = vadd.f32 %v375_v44, %v126_v37  ;;  %v366_v55 = vadd.f32 %v365_v46, %v118_v45  ;;  %v138_v56 = vld [vmem:[%s14201_s0 + $0x350] sm:$0xff]  ;;  %v139_v57 = vld [vmem:[%s14201_s0 + $0x358] sm:$0xff] }
  0x33   :  { %336 = vadd.xlane.f32.xlu0 %v335_v47  ;;  %v120_v60 = vld [vmem:[%s14201_s0 + $0x2c0] sm:$0xff]  ;;  %v122_v61 = vld [vmem:[%s14201_s0 + $0x2d0] sm:$0xff]  ;;  %v392_v63 = vadd.f32 %v138_v56, %v137_v51  ;;  %v131_v5 = vld [vmem:[%s14201_s0 + $0x318] sm:$0xff]  ;;  %v379_v7 = vsel %vm261_vm0, %v129_v53, 0.0 }
  0x34   :  { %v362_v58 = vadd.f32 %v361_v40, %v360_v48  ;;  %v140_v62 = vld [vmem:[%s14201_s0 + $0x360] sm:$0xff]  ;;  %v351_v1 = vadd.f32 %v350_v52, %v107_v36  ;;  %v377_v2 = vadd.f32 %v376_v54, %v127_v43  ;;  %v367_v3 = vadd.f32 %v366_v55, %v119_v50  ;;  %v130_v4 = vld [vmem:[%s14201_s0 + $0x310] sm:$0xff]  ;;  %v121_v8 = vld [vmem:[%s14201_s0 + $0x2c8] sm:$0xff] }
  0x35   :  { %v132_v6 = vld [vmem:[%s14201_s0 + $0x320] sm:$0xff]  ;;  %v141_v9 = vld [vmem:[%s14201_s0 + $0x368] sm:$0xff]  ;;  %v393_v10 = vadd.f32 %v392_v63, %v139_v57  ;;  %v383_v11 = vadd.f32 %v131_v5, %v130_v4  ;;  %v142_v15 = vld [vmem:[%s14201_s0 + $0x370] sm:$0xff]  ;;  %v370_v19 = vsel %vm261_vm0, %v122_v61, 0.0 }
  0x36   :  { %363 = vadd.xlane.f32.xlu1 %v362_v58  ;;  %v353_v12 = vadd.f32 %v352_v59, %v351_v1  ;;  %v378_v13 = vadd.f32 %v377_v2, %v128_v49  ;;  %v368_v14 = vadd.f32 %v367_v3, %v120_v60  ;;  %v133_v16 = vld [vmem:[%s14201_s0 + $0x328] sm:$0xff]  ;;  %v151_v17 = vld [vmem:[%s14201_s0 + $0x3b8] sm:$0xff]  ;;  %v152_v18 = vld [vmem:[%s14201_s0 + $0x3c0] sm:$0xff] }
  0x37   :  { %v143_v20 = vld [vmem:[%s14201_s0 + $0x378] sm:$0xff]  ;;  %v394_v21 = vadd.f32 %v393_v10, %v140_v62  ;;  %v134_v22 = vld [vmem:[%s14201_s0 + $0x330] sm:$0xff]  ;;  %v384_v23 = vadd.f32 %v383_v11, %v132_v6  ;;  %v153_v24 = vld [vmem:[%s14201_s0 + $0x3c8] sm:$0xff]  ;;  %v410_v25 = vadd.f32 %v152_v18, %v151_v17 }
  0x38   :  { %354 = vadd.xlane.f32.xlu0 %v353_v12  ;;  %v380_v26 = vadd.f32 %v379_v7, %v378_v13  ;;  %v369_v27 = vadd.f32 %v368_v14, %v121_v8  ;;  %v135_v28 = vld [vmem:[%s14201_s0 + $0x338] sm:$0xff]  ;;  %v154_v29 = vld [vmem:[%s14201_s0 + $0x3d0] sm:$0xff]  ;;  %v144_v30 = vld [vmem:[%s14201_s0 + $0x380] sm:$0xff]  ;;  %v397_v38 = vsel %vm261_vm0, %v143_v20, 0.0 }
  0x39   :  { %v395_v31 = vadd.f32 %v394_v21, %v141_v9  ;;  %v136_v32 = vld [vmem:[%s14201_s0 + $0x340] sm:$0xff]  ;;  %v385_v33 = vadd.f32 %v384_v23, %v133_v16  ;;  %v411_v34 = vadd.f32 %v410_v25, %v153_v24  ;;  %v145_v35 = vld [vmem:[%s14201_s0 + $0x388] sm:$0xff]  ;;  %v146_v36 = vld [vmem:[%s14201_s0 + $0x390] sm:$0xff] }
  0x3a   :  { %381 = vadd.xlane.f32.xlu1 %v380_v26  ;;  %v371_v37 = vadd.f32 %v370_v19, %v369_v27  ;;  %v155_v39 = vld [vmem:[%s14201_s0 + $0x3d8] sm:$0xff]  ;;  %v157_v40 = vld [vmem:[%s14201_s0 + $0x3e8] sm:$0xff]  ;;  %v401_v42 = vadd.f32 %v145_v35, %v144_v30  ;;  %v166_v47 = vld [vmem:[%s14201_s0 + $0x430] sm:$0xff]  ;;  %v388_v49 = vsel %vm261_vm0, %v136_v32, 0.0 }
  0x3b   :  { %v147_v41 = vld [vmem:[%s14201_s0 + $0x398] sm:$0xff]  ;;  %v396_v43 = vadd.f32 %v395_v31, %v142_v15  ;;  %v386_v44 = vadd.f32 %v385_v33, %v134_v22  ;;  %v412_v45 = vadd.f32 %v411_v34, %v154_v29  ;;  %v165_v46 = vld [vmem:[%s14201_s0 + $0x428] sm:$0xff]  ;;  %v156_v50 = vld [vmem:[%s14201_s0 + $0x3e0] sm:$0xff]  ;;  %v415_v61 = vsel %vm261_vm0, %v157_v40, 0.0 }
  0x3c   :  { %v167_v48 = vld [vmem:[%s14201_s0 + $0x438] sm:$0xff]  ;;  %372 = vadd.xlane.f32.xlu0 %v371_v37  ;;  %v148_v51 = vld [vmem:[%s14201_s0 + $0x3a0] sm:$0xff]  ;;  %v402_v52 = vadd.f32 %v401_v42, %v146_v36  ;;  %v428_v53 = vadd.f32 %v166_v47, %v165_v46  ;;  %v149_v57 = vld [vmem:[%s14201_s0 + $0x3a8] sm:$0xff] }
  0x3d   :  { %v398_v54 = vadd.f32 %v397_v38, %v396_v43  ;;  %v387_v55 = vadd.f32 %v386_v44, %v135_v28  ;;  %v413_v56 = vadd.f32 %v412_v45, %v155_v39  ;;  %v168_v58 = vld [vmem:[%s14201_s0 + $0x440] sm:$0xff]  ;;  %v158_v59 = vld [vmem:[%s14201_s0 + $0x3f0] sm:$0xff]  ;;  %v159_v60 = vld [vmem:[%s14201_s0 + $0x3f8] sm:$0xff] }
  0x3e   :  { %v150_v62 = vld [vmem:[%s14201_s0 + $0x3b0] sm:$0xff]  ;;  %v403_v63 = vadd.f32 %v402_v52, %v147_v41  ;;  %v169_v1 = vld [vmem:[%s14201_s0 + $0x448] sm:$0xff]  ;;  %v429_v2 = vadd.f32 %v428_v53, %v167_v48  ;;  %v160_v3 = vld [vmem:[%s14201_s0 + $0x400] sm:$0xff]  ;;  %v419_v4 = vadd.f32 %v159_v60, %v158_v59 }
  0x3f   :  { %399 = vadd.xlane.f32.xlu1 %v398_v54  ;;  %v389_v5 = vadd.f32 %v388_v49, %v387_v55  ;;  %v414_v6 = vadd.f32 %v413_v56, %v156_v50  ;;  %v170_v7 = vld [vmem:[%s14201_s0 + $0x450] sm:$0xff]  ;;  %v161_v8 = vld [vmem:[%s14201_s0 + $0x408] sm:$0xff]  ;;  %v179_v9 = vld [vmem:[%s14201_s0 + $0x498] sm:$0xff]  ;;  %v406_v17 = vsel %vm261_vm0, %v150_v62, 0.0 }
  0x40   :  { %v404_v10 = vadd.f32 %v403_v63, %v148_v51  ;;  %v171_v11 = vld [vmem:[%s14201_s0 + $0x458] sm:$0xff]  ;;  %v430_v12 = vadd.f32 %v429_v2, %v168_v58  ;;  %v420_v13 = vadd.f32 %v419_v4, %v160_v3  ;;  %v180_v14 = vld [vmem:[%s14201_s0 + $0x4a0] sm:$0xff]  ;;  %v181_v15 = vld [vmem:[%s14201_s0 + $0x4a8] sm:$0xff] }
  0x41   :  { %390 = vadd.xlane.f32.xlu0 %v389_v5  ;;  %v416_v16 = vadd.f32 %v415_v61, %v414_v6  ;;  %v162_v18 = vld [vmem:[%s14201_s0 + $0x410] sm:$0xff]  ;;  %v164_v19 = vld [vmem:[%s14201_s0 + $0x420] sm:$0xff]  ;;  %v446_v21 = vadd.f32 %v180_v14, %v179_v9  ;;  %v173_v26 = vld [vmem:[%s14201_s0 + $0x468] sm:$0xff]  ;;  %v433_v28 = vsel %vm261_vm0, %v171_v11, 0.0 }
  0x42   :  { %v182_v20 = vld [vmem:[%s14201_s0 + $0x4b0] sm:$0xff]  ;;  %v405_v22 = vadd.f32 %v404_v10, %v149_v57  ;;  %v431_v23 = vadd.f32 %v430_v12, %v169_v1  ;;  %v421_v24 = vadd.f32 %v420_v13, %v161_v8  ;;  %v172_v25 = vld [vmem:[%s14201_s0 + $0x460] sm:$0xff]  ;;  %v163_v29 = vld [vmem:[%s14201_s0 + $0x418] sm:$0xff]  ;;  %v424_v40 = vsel %vm261_vm0, %v164_v19, 0.0 }
  0x43   :  { %v174_v27 = vld [vmem:[%s14201_s0 + $0x470] sm:$0xff]  ;;  %417 = vadd.xlane.f32.xlu1 %v416_v16  ;;  %v183_v30 = vld [vmem:[%s14201_s0 + $0x4b8] sm:$0xff]  ;;  %v447_v31 = vadd.f32 %v446_v21, %v181_v15  ;;  %v437_v32 = vadd.f32 %v173_v26, %v172_v25  ;;  %v184_v36 = vld [vmem:[%s14201_s0 + $0x4c0] sm:$0xff] }
  0x44   :  { %v407_v33 = vadd.f32 %v406_v17, %v405_v22  ;;  %v432_v34 = vadd.f32 %v431_v23, %v170_v7  ;;  %v422_v35 = vadd.f32 %v421_v24, %v162_v18  ;;  %v175_v37 = vld [vmem:[%s14201_s0 + $0x478] sm:$0xff]  ;;  %v193_v38 = vld [vmem:[%s14201_s0 + $0x508] sm:$0xff]  ;;  %v194_v39 = vld [vmem:[%s14201_s0 + $0x510] sm:$0xff] }
  0x45   :  { %v185_v41 = vld [vmem:[%s14201_s0 + $0x4c8] sm:$0xff]  ;;  %v448_v42 = vadd.f32 %v447_v31, %v182_v20  ;;  %v176_v43 = vld [vmem:[%s14201_s0 + $0x480] sm:$0xff]  ;;  %v438_v44 = vadd.f32 %v437_v32, %v174_v27  ;;  %v195_v45 = vld [vmem:[%s14201_s0 + $0x518] sm:$0xff]  ;;  %v464_v46 = vadd.f32 %v194_v39, %v193_v38 }
  0x46   :  { %408 = vadd.xlane.f32.xlu0 %v407_v33  ;;  %v434_v47 = vadd.f32 %v433_v28, %v432_v34  ;;  %v423_v48 = vadd.f32 %v422_v35, %v163_v29  ;;  %v177_v49 = vld [vmem:[%s14201_s0 + $0x488] sm:$0xff]  ;;  %v196_v50 = vld [vmem:[%s14201_s0 + $0x520] sm:$0xff]  ;;  %v186_v51 = vld [vmem:[%s14201_s0 + $0x4d0] sm:$0xff]  ;;  %v451_v59 = vsel %vm261_vm0, %v185_v41, 0.0 }
  0x47   :  { %v449_v52 = vadd.f32 %v448_v42, %v183_v30  ;;  %v178_v53 = vld [vmem:[%s14201_s0 + $0x490] sm:$0xff]  ;;  %v439_v54 = vadd.f32 %v438_v44, %v175_v37  ;;  %v465_v55 = vadd.f32 %v464_v46, %v195_v45  ;;  %v187_v56 = vld [vmem:[%s14201_s0 + $0x4d8] sm:$0xff]  ;;  %v188_v57 = vld [vmem:[%s14201_s0 + $0x4e0] sm:$0xff] }
  0x48   :  { %435 = vadd.xlane.f32.xlu1 %v434_v47  ;;  %v425_v58 = vadd.f32 %v424_v40, %v423_v48  ;;  %v197_v60 = vld [vmem:[%s14201_s0 + $0x528] sm:$0xff]  ;;  %v199_v61 = vld [vmem:[%s14201_s0 + $0x538] sm:$0xff]  ;;  %v455_v63 = vadd.f32 %v187_v56, %v186_v51  ;;  %v208_v5 = vld [vmem:[%s14201_s0 + $0x580] sm:$0xff]  ;;  %v442_v7 = vsel %vm261_vm0, %v178_v53, 0.0 }
  0x49   :  { %v189_v62 = vld [vmem:[%s14201_s0 + $0x4e8] sm:$0xff]  ;;  %v450_v1 = vadd.f32 %v449_v52, %v184_v36  ;;  %v440_v2 = vadd.f32 %v439_v54, %v176_v43  ;;  %v466_v3 = vadd.f32 %v465_v55, %v196_v50  ;;  %v207_v4 = vld [vmem:[%s14201_s0 + $0x578] sm:$0xff]  ;;  %v198_v8 = vld [vmem:[%s14201_s0 + $0x530] sm:$0xff]  ;;  %v469_v19 = vsel %vm261_vm0, %v199_v61, 0.0 }
  0x4a   :  { %v209_v6 = vld [vmem:[%s14201_s0 + $0x588] sm:$0xff]  ;;  %426 = vadd.xlane.f32.xlu0 %v425_v58  ;;  %v190_v9 = vld [vmem:[%s14201_s0 + $0x4f0] sm:$0xff]  ;;  %v456_v10 = vadd.f32 %v455_v63, %v188_v57  ;;  %v482_v11 = vadd.f32 %v208_v5, %v207_v4  ;;  %v191_v15 = vld [vmem:[%s14201_s0 + $0x4f8] sm:$0xff] }
  0x4b   :  { %v452_v12 = vadd.f32 %v451_v59, %v450_v1  ;;  %v441_v13 = vadd.f32 %v440_v2, %v177_v49  ;;  %v467_v14 = vadd.f32 %v466_v3, %v197_v60  ;;  %v210_v16 = vld [vmem:[%s14201_s0 + $0x590] sm:$0xff]  ;;  %v200_v17 = vld [vmem:[%s14201_s0 + $0x540] sm:$0xff]  ;;  %v201_v18 = vld [vmem:[%s14201_s0 + $0x548] sm:$0xff] }
  0x4c   :  { %v192_v20 = vld [vmem:[%s14201_s0 + $0x500] sm:$0xff]  ;;  %v457_v21 = vadd.f32 %v456_v10, %v189_v62  ;;  %v211_v22 = vld [vmem:[%s14201_s0 + $0x598] sm:$0xff]  ;;  %v483_v23 = vadd.f32 %v482_v11, %v209_v6  ;;  %v202_v24 = vld [vmem:[%s14201_s0 + $0x550] sm:$0xff]  ;;  %v473_v25 = vadd.f32 %v201_v18, %v200_v17 }
  0x4d   :  { %453 = vadd.xlane.f32.xlu1 %v452_v12  ;;  %v443_v26 = vadd.f32 %v442_v7, %v441_v13  ;;  %v468_v27 = vadd.f32 %v467_v14, %v198_v8  ;;  %v212_v28 = vld [vmem:[%s14201_s0 + $0x5a0] sm:$0xff]  ;;  %v203_v29 = vld [vmem:[%s14201_s0 + $0x558] sm:$0xff]  ;;  %v221_v30 = vld [vmem:[%s14201_s0 + $0x5e8] sm:$0xff]  ;;  %v460_v38 = vsel %vm261_vm0, %v192_v20, 0.0 }
  0x4e   :  { %v458_v31 = vadd.f32 %v457_v21, %v190_v9  ;;  %v213_v32 = vld [vmem:[%s14201_s0 + $0x5a8] sm:$0xff]  ;;  %v484_v33 = vadd.f32 %v483_v23, %v210_v16  ;;  %v474_v34 = vadd.f32 %v473_v25, %v202_v24  ;;  %v222_v35 = vld [vmem:[%s14201_s0 + $0x5f0] sm:$0xff]  ;;  %v223_v36 = vld [vmem:[%s14201_s0 + $0x5f8] sm:$0xff] }
  0x4f   :  { %444 = vadd.xlane.f32.xlu0 %v443_v26  ;;  %v470_v37 = vadd.f32 %v469_v19, %v468_v27  ;;  %v204_v39 = vld [vmem:[%s14201_s0 + $0x560] sm:$0xff]  ;;  %v206_v40 = vld [vmem:[%s14201_s0 + $0x570] sm:$0xff]  ;;  %v500_v42 = vadd.f32 %v222_v35, %v221_v30  ;;  %v215_v47 = vld [vmem:[%s14201_s0 + $0x5b8] sm:$0xff]  ;;  %v487_v49 = vsel %vm261_vm0, %v213_v32, 0.0 }
  0x50   :  { %v224_v41 = vld [vmem:[%s14201_s0 + $0x600] sm:$0xff]  ;;  %v459_v43 = vadd.f32 %v458_v31, %v191_v15  ;;  %v485_v44 = vadd.f32 %v484_v33, %v211_v22  ;;  %v475_v45 = vadd.f32 %v474_v34, %v203_v29  ;;  %v214_v46 = vld [vmem:[%s14201_s0 + $0x5b0] sm:$0xff]  ;;  %v205_v50 = vld [vmem:[%s14201_s0 + $0x568] sm:$0xff]  ;;  %v478_v61 = vsel %vm261_vm0, %v206_v40, 0.0 }
  0x51   :  { %v216_v48 = vld [vmem:[%s14201_s0 + $0x5c0] sm:$0xff]  ;;  %471 = vadd.xlane.f32.xlu1 %v470_v37  ;;  %v225_v51 = vld [vmem:[%s14201_s0 + $0x608] sm:$0xff]  ;;  %v501_v52 = vadd.f32 %v500_v42, %v223_v36  ;;  %v491_v53 = vadd.f32 %v215_v47, %v214_v46  ;;  %v226_v57 = vld [vmem:[%s14201_s0 + $0x610] sm:$0xff] }
  0x52   :  { %v461_v54 = vadd.f32 %v460_v38, %v459_v43  ;;  %v486_v55 = vadd.f32 %v485_v44, %v212_v28  ;;  %v476_v56 = vadd.f32 %v475_v45, %v204_v39  ;;  %v217_v58 = vld [vmem:[%s14201_s0 + $0x5c8] sm:$0xff]  ;;  %v235_v59 = vld [vmem:[%s14201_s0 + $0x658] sm:$0xff]  ;;  %v236_v60 = vld [vmem:[%s14201_s0 + $0x660] sm:$0xff] }
  0x53   :  { %v227_v62 = vld [vmem:[%s14201_s0 + $0x618] sm:$0xff]  ;;  %v502_v63 = vadd.f32 %v501_v52, %v224_v41  ;;  %v218_v1 = vld [vmem:[%s14201_s0 + $0x5d0] sm:$0xff]  ;;  %v492_v2 = vadd.f32 %v491_v53, %v216_v48  ;;  %v237_v3 = vld [vmem:[%s14201_s0 + $0x668] sm:$0xff]  ;;  %v518_v4 = vadd.f32 %v236_v60, %v235_v59 }
  0x54   :  { %462 = vadd.xlane.f32.xlu0 %v461_v54  ;;  %v488_v5 = vadd.f32 %v487_v49, %v486_v55  ;;  %v477_v6 = vadd.f32 %v476_v56, %v205_v50  ;;  %v219_v7 = vld [vmem:[%s14201_s0 + $0x5d8] sm:$0xff]  ;;  %v238_v8 = vld [vmem:[%s14201_s0 + $0x670] sm:$0xff]  ;;  %v228_v9 = vld [vmem:[%s14201_s0 + $0x620] sm:$0xff]  ;;  %v505_v17 = vsel %vm261_vm0, %v227_v62, 0.0 }
  0x55   :  { %v503_v10 = vadd.f32 %v502_v63, %v225_v51  ;;  %v220_v11 = vld [vmem:[%s14201_s0 + $0x5e0] sm:$0xff]  ;;  %v493_v12 = vadd.f32 %v492_v2, %v217_v58  ;;  %v519_v13 = vadd.f32 %v518_v4, %v237_v3  ;;  %v229_v14 = vld [vmem:[%s14201_s0 + $0x628] sm:$0xff]  ;;  %v230_v15 = vld [vmem:[%s14201_s0 + $0x630] sm:$0xff] }
  0x56   :  { %489 = vadd.xlane.f32.xlu1 %v488_v5  ;;  %v479_v16 = vadd.f32 %v478_v61, %v477_v6  ;;  %v239_v18 = vld [vmem:[%s14201_s0 + $0x678] sm:$0xff]  ;;  %v241_v19 = vld [vmem:[%s14201_s0 + $0x688] sm:$0xff]  ;;  %v509_v21 = vadd.f32 %v229_v14, %v228_v9  ;;  %v250_v26 = vld [vmem:[%s14201_s0 + $0x6d0] sm:$0xff]  ;;  %v496_v28 = vsel %vm261_vm0, %v220_v11, 0.0 }
  0x57   :  { %v231_v20 = vld [vmem:[%s14201_s0 + $0x638] sm:$0xff]  ;;  %v504_v22 = vadd.f32 %v503_v10, %v226_v57  ;;  %v494_v23 = vadd.f32 %v493_v12, %v218_v1  ;;  %v520_v24 = vadd.f32 %v519_v13, %v238_v8  ;;  %v249_v25 = vld [vmem:[%s14201_s0 + $0x6c8] sm:$0xff]  ;;  %v240_v29 = vld [vmem:[%s14201_s0 + $0x680] sm:$0xff]  ;;  %v523_v39 = vsel %vm261_vm0, %v241_v19, 0.0 }
  0x58   :  { %v251_v27 = vld [vmem:[%s14201_s0 + $0x6d8] sm:$0xff]  ;;  %480 = vadd.xlane.f32.xlu0 %v479_v16  ;;  %v232_v30 = vld [vmem:[%s14201_s0 + $0x640] sm:$0xff]  ;;  %v510_v31 = vadd.f32 %v509_v21, %v230_v15  ;;  %v536_v32 = vadd.f32 %v250_v26, %v249_v25  ;;  %v242_v37 = vld [vmem:[%s14201_s0 + $0x690] sm:$0xff] }
  0x59   :  { %v506_v33 = vadd.f32 %v505_v17, %v504_v22  ;;  %v495_v34 = vadd.f32 %v494_v23, %v219_v7  ;;  %v521_v35 = vadd.f32 %v520_v24, %v239_v18  ;;  %v252_v36 = vld [vmem:[%s14201_s0 + $0x6e0] sm:$0xff]  ;;  %v243_v38 = vld [vmem:[%s14201_s0 + $0x698] sm:$0xff]  ;;  %v234_v40 = vld [vmem:[%s14201_s0 + $0x650] sm:$0xff] }
  0x5a   :  { %v511_v41 = vadd.f32 %v510_v31, %v231_v20  ;;  %v537_v42 = vadd.f32 %v536_v32, %v251_v27  ;;  %v244_v43 = vld [vmem:[%s14201_s0 + $0x6a0] sm:$0xff]  ;;  %v527_v44 = vadd.f32 %v243_v38, %v242_v37  ;;  %v233_v47 = vld [vmem:[%s14201_s0 + $0x648] sm:$0xff]  ;;  %v255_v51 = vld [vmem:[%s14201_s0 + $0x6f8] sm:$0xff]  ;;  %v514_v55 = vsel %vm261_vm0, %v234_v40, 0.0 }
  0x5b   :  { %507 = vadd.xlane.f32.xlu1 %v506_v33  ;;  %v497_v45 = vadd.f32 %v496_v28, %v495_v34  ;;  %v522_v46 = vadd.f32 %v521_v35, %v240_v29  ;;  %v253_v48 = vld [vmem:[%s14201_s0 + $0x6e8] sm:$0xff]  ;;  %v254_v56 = vld [vmem:[%s14201_s0 + $0x6f0] sm:$0xff]  ;;  %v248_v60 = vld [vmem:[%s14201_s0 + $0x6c0] sm:$0xff]  ;;  %v541_v62 = vsel %vm261_vm0, %v255_v51, 0.0 }
  0x5c   :  { %v245_v49 = vld [vmem:[%s14201_s0 + $0x6a8] sm:$0xff]  ;;  %v512_v50 = vadd.f32 %v511_v41, %v232_v30  ;;  %v538_v52 = vadd.f32 %v537_v42, %v252_v36  ;;  %v528_v53 = vadd.f32 %v527_v44, %v244_v43  ;;  %v246_v57 = vld [vmem:[%s14201_s0 + $0x6b0] sm:$0xff]  ;;  %v247_v63 = vld [vmem:[%s14201_s0 + $0x6b8] sm:$0xff]  ;;  %v532_v4 = vsel %vm261_vm0, %v248_v60, 0.0 }
  0x5d   :  { %498 = vadd.xlane.f32.xlu0 %v497_v45  ;;  %v524_v54 = vadd.f32 %v523_v39, %v522_v46  ;;  %v1857_v8 = vld [vmem:[%s14203_s2] sm:$0xff]  ;;  %v1858_v9 = vld [vmem:[%s14203_s2 + $0x8] sm:$0xff]  ;;  %v1859_v11 = vld [vmem:[%s14203_s2 + $0x10] sm:$0xff] }
  0x5e   :  { %v513_v58 = vadd.f32 %v512_v50, %v233_v47  ;;  %v539_v59 = vadd.f32 %v538_v52, %v253_v48  ;;  %v529_v61 = vadd.f32 %v528_v53, %v245_v49  ;;  %v1862_v10 = vld [vmem:[%s14203_s2 + $0x28] sm:$0xff]  ;;  %v1864_v12 = vld [vmem:[%s14203_s2 + $0x38] sm:$0xff]  ;;  %v1861_v15 = vld [vmem:[%s14203_s2 + $0x20] sm:$0xff] }
  0x5f   :  { %525 = vadd.xlane.f32.xlu1 %v524_v54  ;;  %v1860_v13 = vld [vmem:[%s14203_s2 + $0x18] sm:$0xff]  ;;  %v1866_v14 = vld [vmem:[%s14203_s2 + $0x48] sm:$0xff]  ;;  %v1863_v17 = vld [vmem:[%s14203_s2 + $0x30] sm:$0xff] }
  0x60   :  { %v515_v1 = vadd.f32 %v514_v55, %v513_v58  ;;  %v540_v2 = vadd.f32 %v539_v59, %v254_v56  ;;  %v530_v3 = vadd.f32 %v529_v61, %v246_v57  ;;  %v1868_v16 = vld [vmem:[%s14203_s2 + $0x58] sm:$0xff]  ;;  %v1870_v18 = vld [vmem:[%s14203_s2 + $0x68] sm:$0xff]  ;;  %v1865_v19 = vld [vmem:[%s14203_s2 + $0x40] sm:$0xff] }
  0x61   :  { %v1872_v20 = vld [vmem:[%s14203_s2 + $0x78] sm:$0xff]  ;;  %v1867_v21 = vld [vmem:[%s14203_s2 + $0x50] sm:$0xff]  ;;  %v1874_v22 = vld [vmem:[%s14203_s2 + $0x88] sm:$0xff] }
  0x62   :  { %516 = vadd.xlane.f32.xlu0 %v515_v1  ;;  %v542_v5 = vadd.f32 %v541_v62, %v540_v2  ;;  %v531_v6 = vadd.f32 %v530_v3, %v247_v63  ;;  %v1869_v23 = vld [vmem:[%s14203_s2 + $0x60] sm:$0xff]  ;;  %v1876_v24 = vld [vmem:[%s14203_s2 + $0x98] sm:$0xff]  ;;  %v1871_v25 = vld [vmem:[%s14203_s2 + $0x70] sm:$0xff] }
  0x63   :  { %v1878_v26 = vld [vmem:[%s14203_s2 + $0xa8] sm:$0xff]  ;;  %v1873_v27 = vld [vmem:[%s14203_s2 + $0x80] sm:$0xff]  ;;  %v1880_v28 = vld [vmem:[%s14203_s2 + $0xb8] sm:$0xff] }
  0x64   :  { %543 = vadd.xlane.f32.xlu1 %v542_v5  ;;  %v533_v7 = vadd.f32 %v532_v4, %v531_v6  ;;  %v1875_v29 = vld [vmem:[%s14203_s2 + $0x90] sm:$0xff]  ;;  %v1877_v30 = vld [vmem:[%s14203_s2 + $0xa0] sm:$0xff]  ;;  %v7233_v38 = vld [vmem:[%s14201_s0 + $0x78] sm:$0xff] }
  0x65   :  { %v1879_v31 = vld [vmem:[%s14203_s2 + $0xb0] sm:$0xff]  ;;  %v7234_v41 = vld [vmem:[%s14201_s0] sm:$0xff]  ;;  %v7235_v43 = vld [vmem:[%s14201_s0 + $0x8] sm:$0xff] }
  0x66   :  { %534 = vadd.xlane.f32.xlu0 %v533_v7  ;;  %v7232_v36 = vld [vmem:[%s14201_s0 + $0x70] sm:$0xff]  ;;  %v7237_v47 = vld [vmem:[%s14201_s0 + $0x80] sm:$0xff]  ;;  %v7238_v49 = vld [vmem:[%s14201_s0 + $0x18] sm:$0xff] }
  0x67   :  { %v7236_v45 = vld [vmem:[%s14201_s0 + $0x10] sm:$0xff]  ;;  %v7239_v51 = vld [vmem:[%s14201_s0 + $0x20] sm:$0xff]  ;;  %v7240_v53 = vld [vmem:[%s14201_s0 + $0x28] sm:$0xff] }
  0x68   :  { %v7241_v55 = vld [vmem:[%s14201_s0 + $0x30] sm:$0xff]  ;;  %v7242_v61 = vld [vmem:[%s14201_s0 + $0x88] sm:$0xff]  ;;  %v7244_v4 = vld [vmem:[%s14201_s0 + $0x98] sm:$0xff] }
  0x69   :  { %v7243_v2 = vld [vmem:[%s14201_s0 + $0x90] sm:$0xff] }
  0x75   :  { %1891 = vperm.xlu1 %6974, %v1857_v8   ;;  %v7245_v8 = vld [vmem:[%s14201_s0 + $0xa0] sm:$0xff] }
  0x79   :  { %1896 = vperm.xlu1 %6974, %v1858_v9  }
  0x7c   :  { %1916 = vperm.xlu0 %6975, %v1862_v10  }
  0x7d   :  { %1901 = vperm.xlu1 %6974, %v1859_v11  }
  0x80   :  { %1926 = vperm.xlu0 %6975, %v1864_v12  }
  0x81   :  { %1906 = vperm.xlu1 %6974, %v1860_v13  }
  0x84   :  { %1936 = vperm.xlu0 %6975, %v1866_v14  }
  0x85   :  { %1911 = vperm.xlu1 %6974, %v1861_v15  }
  0x88   :  { %1946 = vperm.xlu0 %6975, %v1868_v16  }
  0x89   :  { %1921 = vperm.xlu1 %6974, %v1863_v17  }
  0x8c   :  { %1956 = vperm.xlu0 %6975, %v1870_v18  }
  0x8d   :  { %1931 = vperm.xlu1 %6974, %v1865_v19  }
  0x90   :  { %1966 = vperm.xlu0 %6975, %v1872_v20  }
  0x91   :  { %1941 = vperm.xlu1 %6974, %v1867_v21  }
  0x94   :  { %1976 = vperm.xlu0 %6975, %v1874_v22   ;;  %v7246_v22 = vld [vmem:[%s14201_s0 + $0x38] sm:$0xff] }
  0x95   :  { %1951 = vperm.xlu1 %6974, %v1869_v23  }
  0x98   :  { %1986 = vperm.xlu0 %6975, %v1876_v24   ;;  %v7247_v24 = vld [vmem:[%s14201_s0 + $0x40] sm:$0xff] }
  0x99   :  { %1961 = vperm.xlu1 %6974, %v1871_v25  }
  0x9c   :  { %1996 = vperm.xlu0 %6975, %v1878_v26   ;;  %v7248_v26 = vld [vmem:[%s14201_s0 + $0x48] sm:$0xff] }
  0x9d   :  { %1971 = vperm.xlu1 %6974, %v1873_v27  }
  0xa0   :  { %2006 = vperm.xlu0 %6975, %v1880_v28  }
  0xa1   :  { %1981 = vperm.xlu1 %6974, %v1875_v29  }
  0xa5   :  { %1991 = vperm.xlu1 %6974, %v1877_v30  }
  0xa9   :  { %2001 = vperm.xlu1 %6974, %v1879_v31  }
  0xac   :  { %v283_v32 = vpop.xlane.xlu1 %282 }
  0xad   :  { %v547_v33 = vmul.f32 0.0012755102, %v283_v32 }
  0xae   :  { %v265_v34 = vpop.xlane.xlu0 %264 }
  0xaf   :  { %v545_v35 = vmul.f32 0.0012755102, %v265_v34  ;;  %v8430_v37 = vsub.f32 %v7232_v36, %v547_v33  ;;  %v8435_v39 = vsub.f32 %v7233_v38, %v547_v33  ;;  %v8455_v48 = vsub.f32 %v7237_v47, %v547_v33 }
  0xb0   :  { %v292_v40 = vpop.xlane.xlu1 %291  ;;  %v8486_v62 = vsub.f32 %v7242_v61, %v547_v33  ;;  %v8493_v3 = vsub.f32 %v7243_v2, %v547_v33  ;;  %v8498_v5 = vsub.f32 %v7244_v4, %v547_v33  ;;  %v8503_v9 = vsub.f32 %v7245_v8, %v547_v33 }
  0xb1   :  { %v8440_v42 = vsub.f32 %v7234_v41, %v545_v35  ;;  %v8445_v44 = vsub.f32 %v7235_v43, %v545_v35  ;;  %v8450_v46 = vsub.f32 %v7236_v45, %v545_v35  ;;  %v8460_v50 = vsub.f32 %v7238_v49, %v545_v35  ;;  %v7249_v41 = vld [vmem:[%s14201_s0 + $0x68] sm:$0xff]  ;;  %v7250_v49 = vld [vmem:[%s14201_s0 + $0x50] sm:$0xff] }
  0xb2   :  { %v8465_v52 = vsub.f32 %v7239_v51, %v545_v35  ;;  %v8470_v54 = vsub.f32 %v7240_v53, %v545_v35  ;;  %v8475_v56 = vsub.f32 %v7241_v55, %v545_v35  ;;  %v274_v57 = vpop.xlane.xlu0 %273  ;;  %14460 = vst [vmem:[#allocation5_spill] sm:$0xff] %v8493_v3  ;;  %14461 = vst [vmem:[#allocation6_spill] sm:$0xff] %v8498_v5  ;;  %v8509_v12 = vmul.f32 0.0012755102, %v292_v40  ;;  %v7251_v53 = vld [vmem:[%s14201_s0 + $0x58] sm:$0xff] }
  0xb3   :  { %v801_v58 = vmul.f32 %v8440_v42, %v8440_v42  ;;  %v802_v59 = vmul.f32 %v8445_v44, %v8445_v44  ;;  %v803_v60 = vmul.f32 %v8450_v46, %v8450_v46  ;;  %v546_v63 = vmul.f32 0.0012755102, %v274_v57  ;;  %14462 = vst [vmem:[#allocation7_spill] sm:$0xff] %v8503_v9  ;;  %v7252_v57 = vld [vmem:[%s14201_s0 + $0x60] sm:$0xff] }
  0xb4   :  { %v807_v1 = vmul.f32 %v8475_v56, %v8475_v56  ;;  %v815_v10 = vmul.f32 %v8430_v37, %v8430_v37  ;;  %v816_v11 = vmul.f32 %v8435_v39, %v8435_v39  ;;  %v804_v13 = vmul.f32 %v8460_v50, %v8460_v50 }
  0xb5   :  { %v310_v6 = vpop.xlane.xlu1 %309  ;;  %v1025_v7 = vadd.f32 %v802_v59, %v801_v58  ;;  %v805_v14 = vmul.f32 %v8465_v52, %v8465_v52  ;;  %v806_v15 = vmul.f32 %v8470_v54, %v8470_v54  ;;  %v817_v18 = vmul.f32 %v8455_v48, %v8455_v48 }
  0xb6   :  { %v8517_v16 = vmul.f32 0.0012755102, %v310_v6  ;;  %v1043_v19 = vadd.f32 %v816_v11, %v815_v10  ;;  %v1030_v21 = vsel %vm261_vm0, %v807_v1, 0.0  ;;  %v8525_v23 = vsub.f32 %v7246_v22, %v546_v63  ;;  %v7253_v6 = vld [vmem:[%s14201_s0 + $0xe0] sm:$0xff]  ;;  %v7255_v10 = vld [vmem:[%s14201_s0 + $0xf0] sm:$0xff] }
  0xb7   :  { %v1026_v17 = vadd.f32 %v1025_v7, %v803_v60  ;;  %v8530_v25 = vsub.f32 %v7247_v24, %v546_v63  ;;  %v8535_v27 = vsub.f32 %v7248_v26, %v546_v63  ;;  %v818_v29 = vmul.f32 %v8486_v62, %v8486_v62 }
  0xb8   :  { %v301_v20 = vpop.xlane.xlu0 %300  ;;  %v821_v30 = vmul.f32 %v8503_v9, %v8503_v9  ;;  %v1044_v31 = vadd.f32 %v1043_v19, %v817_v18  ;;  %v819_v34 = vmul.f32 %v8493_v3, %v8493_v3  ;;  %v820_v35 = vmul.f32 %v8498_v5, %v8498_v5  ;;  %v7256_v18 = vld [vmem:[%s14201_s0 + $0xf8] sm:$0xff]  ;;  %v7279_v9 = vld [vmem:[%s14201_s0 + $0x148] sm:$0xff] }
  0xb9   :  { %v1027_v28 = vadd.f32 %v1026_v17, %v804_v13  ;;  %v549_v32 = vmul.f32 0.0012755102, %v301_v20  ;;  %v808_v36 = vmul.f32 %v8525_v23, %v8525_v23  ;;  %v8550_v43 = vsub.f32 %v7249_v41, %v546_v63 }
  0xba   :  { %v328_v33 = vpop.xlane.xlu1 %327  ;;  %v1045_v40 = vadd.f32 %v1044_v31, %v818_v29  ;;  %v809_v45 = vmul.f32 %v8530_v25, %v8530_v25  ;;  %v8557_v51 = vsub.f32 %v7250_v49, %v546_v63  ;;  %v8562_v55 = vsub.f32 %v7251_v53, %v546_v63 }
  0xbb   :  { %v1028_v38 = vadd.f32 %v1027_v28, %v805_v14  ;;  %14463 = vst [vmem:[#allocation8_spill] sm:$0xff] %v8550_v43  ;;  %v8567_v58 = vsub.f32 %v7252_v57, %v546_v63  ;;  %v810_v59 = vmul.f32 %v8535_v27, %v8535_v27  ;;  %v8571_v60 = vmul.f32 0.0012755102, %v328_v33  ;;  %v7254_v63 = vld [vmem:[%s14201_s0 + $0xe8] sm:$0xff]  ;;  %v7257_v28 = vld [vmem:[%s14201_s0 + $0x100] sm:$0xff] }
  0xbc   :  { %v319_v47 = vpop.xlane.xlu0 %318  ;;  %14464 = vst [vmem:[#allocation9_spill] sm:$0xff] %v8562_v55  ;;  %v1046_v1 = vadd.f32 %v1045_v40, %v819_v34  ;;  %v1048_v2 = vsel %vm261_vm0, %v821_v30, 0.0  ;;  %v1034_v4 = vadd.f32 %v809_v45, %v808_v36  ;;  %v8577_v7 = vsub.f32 %v7253_v6, %v549_v32  ;;  %v7258_v30 = vld [vmem:[%s14201_s0 + $0x110] sm:$0xff] }
  0xbd   :  { %14465 = vst [vmem:[#allocation10_spill] sm:$0xff] %v8567_v58  ;;  %v1029_v61 = vadd.f32 %v1028_v38, %v806_v15  ;;  %v8582_v8 = vsub.f32 %v7254_v63, %v549_v32  ;;  %v8587_v11 = vsub.f32 %v7255_v10, %v549_v32  ;;  %v814_v17 = vmul.f32 %v8550_v43, %v8550_v43  ;;  %v7259_v38 = vld [vmem:[%s14201_s0 + $0x108] sm:$0xff] }
  0xbe   :  { %14466 = vst [vmem:[#allocation11_spill] sm:$0xff] %v8577_v7  ;;  %v346_v13 = vpop.xlane.xlu1 %345  ;;  %v1047_v15 = vadd.f32 %v1046_v1, %v820_v35  ;;  %v8594_v19 = vsub.f32 %v7256_v18, %v549_v32  ;;  %v811_v20 = vmul.f32 %v8557_v51, %v8557_v51  ;;  %v812_v22 = vmul.f32 %v8562_v55, %v8562_v55 }
  0xbf   :  { %14467 = vst [vmem:[#allocation12_spill] sm:$0xff] %v8587_v11  ;;  %v1031_v14 = vadd.f32 %v1030_v21, %v1029_v61  ;;  %v813_v24 = vmul.f32 %v8567_v58, %v8567_v58  ;;  %v1035_v21 = vadd.f32 %v1034_v4, %v810_v59  ;;  %v8605_v29 = vsub.f32 %v7257_v28, %v549_v32 }
  0xc0   :  { %14468 = vst [vmem:[#allocation13_spill] sm:$0xff] %v8594_v19  ;;  %v337_v26 = vpop.xlane.xlu0 %336  ;;  %v8610_v31 = vsub.f32 %v7258_v30, %v549_v32  ;;  %v829_v33 = vmul.f32 %v8577_v7, %v8577_v7  ;;  %v830_v34 = vmul.f32 %v8582_v8, %v8582_v8  ;;  %v8616_v35 = vmul.f32 0.0012755102, %v319_v47  ;;  %v7264_v30 = vld [vmem:[%s14201_s0 + $0xc8] sm:$0xff] }
  0xc1   :  { %1032 = vadd.xlane.f32.xlu0 %v1031_v14  ;;  %14469 = vst [vmem:[#allocation14_spill] sm:$0xff] %v8605_v29  ;;  %v1036_v36 = vadd.f32 %v1035_v21, %v811_v20  ;;  %v8621_v40 = vsub.f32 %v7259_v38, %v549_v32  ;;  %v831_v41 = vmul.f32 %v8587_v11, %v8587_v11  ;;  %v1039_v53 = vsel %vm261_vm0, %v814_v17, 0.0  ;;  %v7260_v32 = vld [vmem:[%s14201_s0 + $0xa8] sm:$0xff]  ;;  %v7262_v14 = vld [vmem:[%s14201_s0 + $0xb8] sm:$0xff]  ;;  %v7265_v38 = vld [vmem:[%s14201_s0 + $0xd0] sm:$0xff] }
  0xc2   :  { %14470 = vst [vmem:[#allocation15_spill] sm:$0xff] %v8610_v31  ;;  %v1049_v49 = vadd.f32 %v1048_v2, %v1047_v15  ;;  %v832_v57 = vmul.f32 %v8594_v19, %v8594_v19  ;;  %v1061_v59 = vadd.f32 %v830_v34, %v829_v33  ;;  %v835_v61 = vmul.f32 %v8610_v31, %v8610_v31  ;;  %v7261_v2 = vld [vmem:[%s14201_s0 + $0xb0] sm:$0xff] }
  0xc3   :  { %14471 = vst [vmem:[#allocation16_spill] sm:$0xff] %v8621_v40  ;;  %v364_v45 = vpop.xlane.xlu1 %363  ;;  %v1037_v47 = vadd.f32 %v1036_v36, %v812_v22  ;;  %v8634_v1 = vsub.f32 %v7260_v32, %v8509_v12  ;;  %v8640_v4 = vsub.f32 %v7261_v2, %v8509_v12  ;;  %v8642_v6 = vmul.f32 0.0012755102, %v346_v13  ;;  %v7263_v22 = vld [vmem:[%s14201_s0 + $0xc0] sm:$0xff] }
  0xc4   :  { %v833_v63 = vmul.f32 %v8605_v29, %v8605_v29  ;;  %v1062_v10 = vadd.f32 %v1061_v59, %v831_v41  ;;  %v8650_v15 = vsub.f32 %v7262_v14, %v8509_v12  ;;  %v8652_v17 = vmul.f32 0.0012755102, %v337_v26 }
  0xc5   :  { %1050 = vadd.xlane.f32.xlu0 %v1049_v49  ;;  %v355_v18 = vpop.xlane.xlu0 %354  ;;  %v1038_v20 = vadd.f32 %v1037_v47, %v813_v24  ;;  %v834_v13 = vmul.f32 %v8621_v40, %v8621_v40  ;;  %v8660_v21 = vsub.f32 %v7263_v22, %v8509_v12  ;;  %v8666_v26 = vsub.f32 %v7264_v30, %v8509_v12  ;;  %v7266_v49 = vld [vmem:[%s14201_s0 + $0xd8] sm:$0xff] }
  0xc6   :  { %v1063_v28 = vadd.f32 %v1062_v10, %v832_v57  ;;  %v822_v24 = vmul.f32 %v8634_v1, %v8634_v1  ;;  %v823_v33 = vmul.f32 %v8640_v4, %v8640_v4  ;;  %v8672_v34 = vmul.f32 0.0012755102, %v364_v45  ;;  %v7267_v10 = vld [vmem:[%s14201_s0 + $0x150] sm:$0xff] }
  0xc7   :  { %14472 = vst [vmem:[#allocation17_spill] sm:$0xff] %v8666_v26  ;;  %v1066_v36 = vsel %vm261_vm0, %v835_v61, 0.0  ;;  %v8679_v41 = vsub.f32 %v7265_v38, %v8509_v12  ;;  %v8685_v57 = vsub.f32 %v7266_v49, %v8509_v12  ;;  %v8687_v59 = vmul.f32 0.0012755102, %v355_v18  ;;  %v382_v45 = vpop.xlane.xlu1 %381  ;;  %v7268_v12 = vld [vmem:[%s14201_s0 + $0x158] sm:$0xff] }
  0xc8   :  { %v1040_v47 = vadd.f32 %v1039_v53, %v1038_v20  ;;  %v1064_v32 = vadd.f32 %v1063_v28, %v833_v63  ;;  %v824_v61 = vmul.f32 %v8650_v15, %v8650_v15  ;;  %v1052_v2 = vadd.f32 %v823_v33, %v822_v24  ;;  %v7269_v53 = vld [vmem:[%s14201_s0 + $0x160] sm:$0xff]  ;;  %v7270_v24 = vld [vmem:[%s14201_s0 + $0x168] sm:$0xff] }
  0xc9   :  { %14473 = vst [vmem:[#allocation18_spill] sm:$0xff] %v8679_v41  ;;  %14474 = vst [vmem:[#allocation19_spill] sm:$0xff] %v8685_v57  ;;  %v8695_v14 = vsub.f32 %v7267_v10, %v8616_v35  ;;  %v8701_v18 = vsub.f32 %v7268_v12, %v8616_v35  ;;  %v8707_v63 = vsub.f32 %v7269_v53, %v8616_v35  ;;  %v373_v20 = vpop.xlane.xlu0 %372  ;;  %v7272_v10 = vld [vmem:[%s14201_s0 + $0x180] sm:$0xff]  ;;  %v8739_v0 = vmul.f32 0.0012755102, %v382_v45 }
  0xca   :  { %v1065_v22 = vadd.f32 %v1064_v32, %v834_v13  ;;  %v825_v28 = vmul.f32 %v8660_v21, %v8660_v21  ;;  %v826_v30 = vmul.f32 %v8666_v26, %v8666_v26  ;;  %v8717_v33 = vsub.f32 %v7270_v24, %v8616_v35  ;;  %v7271_v13 = vld [vmem:[%s14201_s0 + $0x170] sm:$0xff] }
  0xcb   :  { %14475 = vst [vmem:[#allocation20_spill] sm:$0xff] %v8695_v14  ;;  %14476 = vst [vmem:[#allocation21_spill] sm:$0xff] %v8701_v18  ;;  %v828_v38 = vmul.f32 %v8685_v57, %v8685_v57  ;;  %v1053_v49 = vadd.f32 %v1052_v2, %v824_v61  ;;  %v8725_v32 = vsub.f32 %v7271_v13, %v8616_v35 }
  0xcc   :  { %14477 = vst [vmem:[#allocation22_spill] sm:$0xff] %v8707_v63  ;;  %14478 = vst [vmem:[#allocation23_spill] sm:$0xff] %v8717_v33  ;;  %v8731_v12 = vsub.f32 %v7272_v10, %v8616_v35  ;;  %v1067_v53 = vadd.f32 %v1066_v36, %v1065_v22  ;;  %v843_v24 = vmul.f32 %v8695_v14, %v8695_v14  ;;  %v7273_v36 = vld [vmem:[%s14201_s0 + $0x178] sm:$0xff]  ;;  %v8749_v10 = vmul.f32 0.0012755102, %v373_v20  ;;  %v400_v29 = vpop.xlane.xlu1 %399  ;;  %v7275_v20 = vld [vmem:[%s14201_s0 + $0x120] sm:$0xff] }
  0xcd   :  { %14479 = vst [vmem:[#allocation24_spill] sm:$0xff] %v8725_v32  ;;  %v844_v61 = vmul.f32 %v8701_v18, %v8701_v18  ;;  %v845_v2 = vmul.f32 %v8707_v63, %v8707_v63  ;;  %1041 = vadd.xlane.f32.xlu1 %v1040_v47  ;;  %v827_v13 = vmul.f32 %v8679_v41, %v8679_v41  ;;  %v7274_v47 = vld [vmem:[%s14201_s0 + $0x118] sm:$0xff]  ;;  %v1057_v57 = vsel %vm261_vm0, %v828_v38, 0.0  ;;  %v7277_v38 = vld [vmem:[%s14201_s0 + $0x130] sm:$0xff] }
  0xce   :  { %14480 = vst [vmem:[#allocation25_spill] sm:$0xff] %v8731_v12  ;;  %v1054_v31 = vadd.f32 %v1053_v49, %v825_v28  ;;  %v8747_v22 = vsub.f32 %v7273_v36, %v8616_v35  ;;  %1068 = vadd.xlane.f32.xlu0 %v1067_v53  ;;  %v846_v45 = vmul.f32 %v8717_v33, %v8717_v33 }
  0xcf   :  { %v1079_v40 = vadd.f32 %v844_v61, %v843_v24  ;;  %v8757_v28 = vsub.f32 %v7274_v47, %v8517_v16  ;;  %v849_v35 = vmul.f32 %v8731_v12, %v8731_v12  ;;  %v8766_v53 = vsub.f32 %v7275_v20, %v8517_v16  ;;  %v391_v24 = vpop.xlane.xlu0 %390 }
  0xd0   :  { %14481 = vst [vmem:[#allocation26_spill] sm:$0xff] %v8747_v22  ;;  %v1055_v49 = vadd.f32 %v1054_v31, %v826_v30  ;;  %v847_v61 = vmul.f32 %v8725_v32, %v8725_v32  ;;  %v7276_v31 = vld [vmem:[%s14201_s0 + $0x128] sm:$0xff]  ;;  %v8780_v47 = vsub.f32 %v7277_v38, %v8517_v16  ;;  %v8782_v20 = vmul.f32 0.0012755102, %v400_v29 }
  0xd1   :  { %v1080_v36 = vadd.f32 %v1079_v40, %v845_v2  ;;  %v8774_v30 = vsub.f32 %v7276_v31, %v8517_v16  ;;  %v848_v40 = vmul.f32 %v8747_v22, %v8747_v22  ;;  %v7278_v2 = vld [vmem:[%s14201_s0 + $0x138] sm:$0xff]  ;;  %v8796_v38 = vsub.f32 %v7279_v9, %v8517_v16 }
  0xd2   :  { %v1056_v12 = vadd.f32 %v1055_v49, %v827_v13  ;;  %v8790_v31 = vsub.f32 %v7278_v2, %v8517_v16  ;;  %v836_v29 = vmul.f32 %v8757_v28, %v8757_v28  ;;  %v837_v13 = vmul.f32 %v8766_v53, %v8766_v53 }
  0xd3   :  { %v1081_v32 = vadd.f32 %v1080_v36, %v846_v45  ;;  %14483 = vst [vmem:[#allocation28_spill] sm:$0xff] %v8796_v38  ;;  %v8802_v22 = vmul.f32 0.0012755102, %v391_v24  ;;  %v1084_v2 = vsel %vm261_vm0, %v849_v35, 0.0  ;;  %v7280_v45 = vld [vmem:[%s14201_s0 + $0x140] sm:$0xff]  ;;  %v838_v26 = vmul.f32 %v8774_v30, %v8774_v30  ;;  %v7283_v35 = vld [vmem:[%s14201_s0 + $0x1d0] sm:$0xff] }
  0xd4   :  { %14482 = vst [vmem:[#allocation27_spill] sm:$0xff] %v8790_v31  ;;  %v1058_v49 = vadd.f32 %v1057_v57, %v1056_v12  ;;  %v8809_v36 = vsub.f32 %v7280_v45, %v8517_v16  ;;  %v839_v3 = vmul.f32 %v8780_v47, %v8780_v47  ;;  %v1070_v41 = vadd.f32 %v837_v13, %v836_v29  ;;  %v7281_v57 = vld [vmem:[%s14201_s0 + $0x1c0] sm:$0xff]  ;;  %v7282_v16 = vld [vmem:[%s14201_s0 + $0x1c8] sm:$0xff] }
  0xd5   :  { %v1082_v9 = vadd.f32 %v1081_v32, %v847_v61  ;;  %v8819_v12 = vsub.f32 %v7281_v57, %v8652_v17  ;;  %v8825_v32 = vsub.f32 %v7282_v16, %v8652_v17  ;;  %v8831_v24 = vsub.f32 %v7283_v35, %v8652_v17  ;;  %v7284_v61 = vld [vmem:[%s14201_s0 + $0x1d8] sm:$0xff]  ;;  %v7285_v35 = vld [vmem:[%s14201_s0 + $0x1e0] sm:$0xff] }
  0xd6   :  { %14484 = vst [vmem:[#allocation29_spill] sm:$0xff] %v8809_v36  ;;  %1059 = vadd.xlane.f32.xlu1 %v1058_v49  ;;  %v8837_v29 = vsub.f32 %v7284_v61, %v8652_v17  ;;  %v418_v49 = vpop.xlane.xlu1 %417  ;;  %v840_v45 = vmul.f32 %v8790_v31, %v8790_v31  ;;  %v842_v57 = vmul.f32 %v8796_v38, %v8796_v38  ;;  %v7286_v61 = vld [vmem:[%s14201_s0 + $0x1f0] sm:$0xff] }
  0xd7   :  { %14485 = vst [vmem:[#allocation30_spill] sm:$0xff] %v8819_v12  ;;  %14486 = vst [vmem:[#allocation31_spill] sm:$0xff] %v8825_v32  ;;  %v1083_v13 = vadd.f32 %v1082_v9, %v848_v40  ;;  %v1071_v16 = vadd.f32 %v1070_v41, %v838_v26  ;;  %v8847_v5 = vsub.f32 %v7285_v35, %v8652_v17  ;;  %v7287_v35 = vld [vmem:[%s14201_s0 + $0x1e8] sm:$0xff] }
  0xd8   :  { %14487 = vst [vmem:[#allocation32_spill] sm:$0xff] %v8831_v24  ;;  %14488 = vst [vmem:[#allocation33_spill] sm:$0xff] %v8837_v29  ;;  %v8853_v40 = vsub.f32 %v7286_v61, %v8652_v17  ;;  %v857_v9 = vmul.f32 %v8819_v12, %v8819_v12  ;;  %v858_v26 = vmul.f32 %v8825_v32, %v8825_v32  ;;  %v8867_v61 = vmul.f32 0.0012755102, %v418_v49  ;;  %v7289_v49 = vld [vmem:[%s14201_s0 + $0x190] sm:$0xff] }
  0xd9   :  { %14489 = vst [vmem:[#allocation34_spill] sm:$0xff] %v8847_v5  ;;  %v1085_v41 = vadd.f32 %v1084_v2, %v1083_v13  ;;  %v1072_v38 = vadd.f32 %v1071_v16, %v839_v3  ;;  %v8863_v31 = vsub.f32 %v7287_v35, %v8652_v17  ;;  %v859_v43 = vmul.f32 %v8831_v24, %v8831_v24  ;;  %v7288_v17 = vld [vmem:[%s14201_s0 + $0x188] sm:$0xff]  ;;  %v7293_v24 = vld [vmem:[%s14201_s0 + $0x1b8] sm:$0xff] }
  0xda   :  { %14490 = vst [vmem:[#allocation35_spill] sm:$0xff] %v8853_v40  ;;  %v841_v55 = vmul.f32 %v8809_v36, %v8809_v36  ;;  %v860_v58 = vmul.f32 %v8837_v29, %v8837_v29  ;;  %v1097_v2 = vadd.f32 %v858_v26, %v857_v9  ;;  %v863_v13 = vmul.f32 %v8853_v40, %v8853_v40  ;;  %v409_v9 = vpop.xlane.xlu0 %408  ;;  %v7290_v26 = vld [vmem:[%s14201_s0 + $0x198] sm:$0xff] }
  0xdb   :  { %14491 = vst [vmem:[#allocation36_spill] sm:$0xff] %v8863_v31  ;;  %1086 = vadd.xlane.f32.xlu0 %v1085_v41  ;;  %v1073_v3 = vadd.f32 %v1072_v38, %v840_v45  ;;  %v8879_v16 = vsub.f32 %v7288_v17, %v8571_v60  ;;  %v8885_v35 = vsub.f32 %v7289_v49, %v8571_v60  ;;  %v7291_v17 = vld [vmem:[%s14201_s0 + $0x1a0] sm:$0xff]  ;;  %v1075_v36 = vsel %vm261_vm0, %v842_v57, 0.0 }
  0xdc   :  { %v861_v38 = vmul.f32 %v8847_v5, %v8847_v5  ;;  %v1098_v45 = vadd.f32 %v1097_v2, %v859_v43  ;;  %v8893_v41 = vsub.f32 %v7290_v26, %v8571_v60  ;;  %v8899_v40 = vsub.f32 %v7291_v17, %v8571_v60  ;;  %v7292_v2 = vld [vmem:[%s14201_s0 + $0x1a8] sm:$0xff] }
  0xdd   :  { %v1074_v49 = vadd.f32 %v1073_v3, %v841_v55  ;;  %v862_v43 = vmul.f32 %v8863_v31, %v8863_v31  ;;  %v8908_v26 = vsub.f32 %v7292_v2, %v8571_v60  ;;  %v8914_v17 = vsub.f32 %v7293_v24, %v8571_v60 }
  0xde   :  { %14492 = vst [vmem:[#allocation37_spill] sm:$0xff] %v8893_v41  ;;  %v1099_v5 = vadd.f32 %v1098_v45, %v860_v58  ;;  %v850_v55 = vmul.f32 %v8879_v16, %v8879_v16  ;;  %v851_v57 = vmul.f32 %v8885_v35, %v8885_v35  ;;  %v8920_v31 = vmul.f32 0.0012755102, %v409_v9  ;;  %v7294_v58 = vld [vmem:[%s14201_s0 + $0x1b0] sm:$0xff]  ;;  %v7297_v9 = vld [vmem:[%s14201_s0 + $0x240] sm:$0xff] }
  0xdf   :  { %14493 = vst [vmem:[#allocation38_spill] sm:$0xff] %v8908_v26  ;;  %14494 = vst [vmem:[#allocation39_spill] sm:$0xff] %v8914_v17  ;;  %v1076_v3 = vadd.f32 %v1075_v36, %v1074_v49  ;;  %v1102_v2 = vsel %vm261_vm0, %v863_v13, 0.0  ;;  %v8927_v45 = vsub.f32 %v7294_v58, %v8571_v60  ;;  %v852_v12 = vmul.f32 %v8893_v41, %v8893_v41  ;;  %v7295_v36 = vld [vmem:[%s14201_s0 + $0x230] sm:$0xff]  ;;  %v7296_v60 = vld [vmem:[%s14201_s0 + $0x238] sm:$0xff] }
  0xe0   :  { %v1100_v24 = vadd.f32 %v1099_v5, %v861_v38  ;;  %v853_v29 = vmul.f32 %v8899_v40, %v8899_v40  ;;  %v1088_v32 = vadd.f32 %v851_v57, %v850_v55  ;;  %v8937_v13 = vsub.f32 %v7295_v36, %v8687_v59  ;;  %v7298_v49 = vld [vmem:[%s14201_s0 + $0x248] sm:$0xff] }
  0xe1   :  { %14495 = vst [vmem:[#allocation40_spill] sm:$0xff] %v8927_v45  ;;  %1077 = vadd.xlane.f32.xlu1 %v1076_v3  ;;  %v8943_v5 = vsub.f32 %v7296_v60, %v8687_v59  ;;  %v8949_v38 = vsub.f32 %v7297_v9, %v8687_v59  ;;  %v8955_v55 = vsub.f32 %v7298_v49, %v8687_v59  ;;  %v436_v3 = vpop.xlane.xlu1 %435  ;;  %v7299_v9 = vld [vmem:[%s14201_s0 + $0x250] sm:$0xff]  ;;  %v7300_v49 = vld [vmem:[%s14201_s0 + $0x260] sm:$0xff] }
  0xe2   :  { %14496 = vst [vmem:[#allocation41_spill] sm:$0xff] %v8937_v13  ;;  %v1101_v57 = vadd.f32 %v1100_v24, %v862_v43  ;;  %v854_v58 = vmul.f32 %v8908_v26, %v8908_v26  ;;  %v856_v36 = vmul.f32 %v8914_v17, %v8914_v17  ;;  %v1089_v60 = vadd.f32 %v1088_v32, %v852_v12 }
  0xe3   :  { %14497 = vst [vmem:[#allocation42_spill] sm:$0xff] %v8943_v5  ;;  %14498 = vst [vmem:[#allocation43_spill] sm:$0xff] %v8949_v38  ;;  %v8965_v41 = vsub.f32 %v7299_v9, %v8687_v59  ;;  %v8971_v43 = vsub.f32 %v7300_v49, %v8687_v59  ;;  %v871_v24 = vmul.f32 %v8937_v13, %v8937_v13  ;;  %v7301_v9 = vld [vmem:[%s14201_s0 + $0x258] sm:$0xff]  ;;  %v8985_v49 = vmul.f32 0.0012755102, %v436_v3  ;;  %v7303_v3 = vld [vmem:[%s14201_s0 + $0x200] sm:$0xff] }
  0xe4   :  { %14499 = vst [vmem:[#allocation44_spill] sm:$0xff] %v8955_v55  ;;  %v872_v12 = vmul.f32 %v8943_v5, %v8943_v5  ;;  %v1103_v32 = vadd.f32 %v1102_v2, %v1101_v57  ;;  %v1090_v17 = vadd.f32 %v1089_v60, %v853_v29  ;;  %v8981_v26 = vsub.f32 %v7301_v9, %v8687_v59  ;;  %v7302_v59 = vld [vmem:[%s14201_s0 + $0x1f8] sm:$0xff] }
  0xe5   :  { %14500 = vst [vmem:[#allocation45_spill] sm:$0xff] %v8965_v41  ;;  %14501 = vst [vmem:[#allocation46_spill] sm:$0xff] %v8971_v43  ;;  %v873_v63 = vmul.f32 %v8949_v38, %v8949_v38  ;;  %v855_v13 = vmul.f32 %v8927_v45, %v8927_v45  ;;  %v874_v5 = vmul.f32 %v8955_v55, %v8955_v55  ;;  %v1093_v45 = vsel %vm261_vm0, %v856_v36, 0.0  ;;  %v7307_v38 = vld [vmem:[%s14201_s0 + $0x228] sm:$0xff] }
  0xe6   :  { %14502 = vst [vmem:[#allocation47_spill] sm:$0xff] %v8981_v26  ;;  %v1115_v2 = vadd.f32 %v872_v12, %v871_v24  ;;  %1104 = vadd.xlane.f32.xlu0 %v1103_v32  ;;  %v1091_v29 = vadd.f32 %v1090_v17, %v854_v58  ;;  %v877_v57 = vmul.f32 %v8971_v43, %v8971_v43  ;;  %v427_v24 = vpop.xlane.xlu0 %426  ;;  %v7304_v12 = vld [vmem:[%s14201_s0 + $0x208] sm:$0xff] }
  0xe7   :  { %v8997_v60 = vsub.f32 %v7302_v59, %v8642_v6  ;;  %v9003_v9 = vsub.f32 %v7303_v3, %v8642_v6  ;;  %v875_v17 = vmul.f32 %v8965_v41, %v8965_v41  ;;  %v9011_v32 = vsub.f32 %v7304_v12, %v8642_v6  ;;  %v7305_v59 = vld [vmem:[%s14201_s0 + $0x210] sm:$0xff] }
  0xe8   :  { %v1116_v58 = vadd.f32 %v1115_v2, %v873_v63  ;;  %v9017_v43 = vsub.f32 %v7305_v59, %v8642_v6  ;;  %v1092_v3 = vadd.f32 %v1091_v29, %v855_v13  ;;  %v876_v63 = vmul.f32 %v8981_v26, %v8981_v26  ;;  %v7306_v2 = vld [vmem:[%s14201_s0 + $0x218] sm:$0xff] }
  0xe9   :  { %14503 = vst [vmem:[#allocation48_spill] sm:$0xff] %v8997_v60  ;;  %14504 = vst [vmem:[#allocation49_spill] sm:$0xff] %v9003_v9  ;;  %v9026_v12 = vsub.f32 %v7306_v2, %v8642_v6  ;;  %v9032_v59 = vsub.f32 %v7307_v38, %v8642_v6  ;;  %v864_v13 = vmul.f32 %v8997_v60, %v8997_v60  ;;  %v9038_v26 = vmul.f32 0.0012755102, %v427_v24 }
  0xea   :  { %14505 = vst [vmem:[#allocation50_spill] sm:$0xff] %v9011_v32  ;;  %14506 = vst [vmem:[#allocation51_spill] sm:$0xff] %v9017_v43  ;;  %v1117_v41 = vadd.f32 %v1116_v58, %v874_v5  ;;  %v865_v36 = vmul.f32 %v9003_v9, %v9003_v9  ;;  %v1094_v29 = vadd.f32 %v1093_v45, %v1092_v3  ;;  %v1120_v2 = vsel %vm261_vm0, %v877_v57, 0.0  ;;  %v7308_v5 = vld [vmem:[%s14201_s0 + $0x220] sm:$0xff]  ;;  %v454_v45 = vpop.xlane.xlu1 %453 }
  0xeb   :  { %14507 = vst [vmem:[#allocation52_spill] sm:$0xff] %v9026_v12  ;;  %14508 = vst [vmem:[#allocation53_spill] sm:$0xff] %v9032_v59  ;;  %v9045_v58 = vsub.f32 %v7308_v5, %v8642_v6  ;;  %v866_v55 = vmul.f32 %v9011_v32, %v9011_v32  ;;  %v867_v60 = vmul.f32 %v9017_v43, %v9017_v43  ;;  %v7309_v57 = vld [vmem:[%s14201_s0 + $0x2a0] sm:$0xff]  ;;  %v7310_v6 = vld [vmem:[%s14201_s0 + $0x2a8] sm:$0xff] }
  0xec   :  { %v1118_v38 = vadd.f32 %v1117_v41, %v875_v17  ;;  %v1106_v9 = vadd.f32 %v865_v36, %v864_v13  ;;  %1095 = vadd.xlane.f32.xlu1 %v1094_v29  ;;  %v9055_v24 = vsub.f32 %v7309_v57, %v8749_v10  ;;  %v9061_v41 = vsub.f32 %v7310_v6, %v8749_v10  ;;  %v7311_v17 = vld [vmem:[%s14201_s0 + $0x2b0] sm:$0xff]  ;;  %v7312_v13 = vld [vmem:[%s14201_s0 + $0x2b8] sm:$0xff] }
  0xed   :  { %14509 = vst [vmem:[#allocation54_spill] sm:$0xff] %v9045_v58  ;;  %v9067_v3 = vsub.f32 %v7311_v17, %v8749_v10  ;;  %v9073_v36 = vsub.f32 %v7312_v13, %v8749_v10  ;;  %v868_v5 = vmul.f32 %v9026_v12, %v9026_v12  ;;  %v870_v57 = vmul.f32 %v9032_v59, %v9032_v59  ;;  %v7313_v17 = vld [vmem:[%s14201_s0 + $0x2c0] sm:$0xff]  ;;  %v7314_v13 = vld [vmem:[%s14201_s0 + $0x2d0] sm:$0xff] }
  0xee   :  { %14510 = vst [vmem:[#allocation55_spill] sm:$0xff] %v9055_v24  ;;  %14511 = vst [vmem:[#allocation56_spill] sm:$0xff] %v9061_v41  ;;  %v1119_v29 = vadd.f32 %v1118_v38, %v876_v63  ;;  %v1107_v6 = vadd.f32 %v1106_v9, %v866_v55  ;;  %v9083_v32 = vsub.f32 %v7313_v17, %v8749_v10  ;;  %v7315_v17 = vld [vmem:[%s14201_s0 + $0x2c8] sm:$0xff] }
  0xef   :  { %14512 = vst [vmem:[#allocation57_spill] sm:$0xff] %v9067_v3  ;;  %14513 = vst [vmem:[#allocation58_spill] sm:$0xff] %v9073_v36  ;;  %v9089_v63 = vsub.f32 %v7314_v13, %v8749_v10  ;;  %v885_v38 = vmul.f32 %v9055_v24, %v9055_v24  ;;  %v886_v55 = vmul.f32 %v9061_v41, %v9061_v41  ;;  %v9103_v13 = vmul.f32 0.0012755102, %v454_v45  ;;  %v7317_v45 = vld [vmem:[%s14201_s0 + $0x270] sm:$0xff] }
  0xf0   :  { %14514 = vst [vmem:[#allocation59_spill] sm:$0xff] %v9083_v32  ;;  %v1121_v9 = vadd.f32 %v1120_v2, %v1119_v29  ;;  %v1108_v59 = vadd.f32 %v1107_v6, %v867_v60  ;;  %v9099_v12 = vsub.f32 %v7315_v17, %v8749_v10  ;;  %v887_v43 = vmul.f32 %v9067_v3, %v9067_v3  ;;  %v7316_v10 = vld [vmem:[%s14201_s0 + $0x268] sm:$0xff] }
  0xf1   :  { %14515 = vst [vmem:[#allocation60_spill] sm:$0xff] %v9089_v63  ;;  %v869_v24 = vmul.f32 %v9045_v58, %v9045_v58  ;;  %v888_v41 = vmul.f32 %v9073_v36, %v9073_v36  ;;  %v1133_v2 = vadd.f32 %v886_v55, %v885_v38  ;;  %v891_v29 = vmul.f32 %v9089_v63, %v9089_v63  ;;  %v445_v38 = vpop.xlane.xlu0 %444  ;;  %v472_v55 = vpop.xlane.xlu1 %471  ;;  %v7319_v63 = vld [vmem:[%s14201_s0 + $0x280] sm:$0xff]  ;;  %v7321_v36 = vld [vmem:[%s14201_s0 + $0x298] sm:$0xff] }
  0xf2   :  { %14516 = vst [vmem:[#allocation61_spill] sm:$0xff] %v9099_v12  ;;  %1122 = vadd.xlane.f32.xlu0 %v1121_v9  ;;  %v1109_v60 = vadd.f32 %v1108_v59, %v868_v5  ;;  %v9115_v6 = vsub.f32 %v7316_v10, %v8672_v34  ;;  %v9121_v17 = vsub.f32 %v7317_v45, %v8672_v34  ;;  %v7318_v9 = vld [vmem:[%s14201_s0 + $0x278] sm:$0xff]  ;;  %v1111_v3 = vsel %vm261_vm0, %v870_v57, 0.0 }
  0xf3   :  { %v889_v59 = vmul.f32 %v9083_v32, %v9083_v32  ;;  %v1134_v5 = vadd.f32 %v1133_v2, %v887_v43  ;;  %v9129_v10 = vsub.f32 %v7318_v9, %v8672_v34  ;;  %v9135_v45 = vsub.f32 %v7319_v63, %v8672_v34  ;;  %v7320_v2 = vld [vmem:[%s14201_s0 + $0x288] sm:$0xff] }
  0xf4   :  { %14517 = vst [vmem:[#allocation62_spill] sm:$0xff] %v9115_v6  ;;  %14518 = vst [vmem:[#allocation63_spill] sm:$0xff] %v9121_v17  ;;  %v1110_v58 = vadd.f32 %v1109_v60, %v869_v24  ;;  %v890_v43 = vmul.f32 %v9099_v12, %v9099_v12  ;;  %v9144_v9 = vsub.f32 %v7320_v2, %v8672_v34  ;;  %v9156_v12 = vmul.f32 0.0012755102, %v445_v38 }
  0xf5   :  { %14519 = vst [vmem:[#allocation64_spill] sm:$0xff] %v9129_v10  ;;  %14520 = vst [vmem:[#allocation65_spill] sm:$0xff] %v9135_v45  ;;  %v1135_v32 = vadd.f32 %v1134_v5, %v888_v41  ;;  %v9150_v63 = vsub.f32 %v7321_v36, %v8672_v34  ;;  %v878_v24 = vmul.f32 %v9115_v6, %v9115_v6  ;;  %v1138_v2 = vsel %vm261_vm0, %v891_v29, 0.0  ;;  %v7322_v41 = vld [vmem:[%s14201_s0 + $0x290] sm:$0xff]  ;;  %v7325_v29 = vld [vmem:[%s14201_s0 + $0x320] sm:$0xff] }
  0xf6   :  { %14521 = vst [vmem:[#allocation66_spill] sm:$0xff] %v9144_v9  ;;  %v879_v57 = vmul.f32 %v9121_v17, %v9121_v17  ;;  %v1112_v60 = vadd.f32 %v1111_v3, %v1110_v58  ;;  %v9163_v5 = vsub.f32 %v7322_v41, %v8672_v34  ;;  %v880_v14 = vmul.f32 %v9129_v10, %v9129_v10  ;;  %v7323_v58 = vld [vmem:[%s14201_s0 + $0x310] sm:$0xff]  ;;  %v7324_v34 = vld [vmem:[%s14201_s0 + $0x318] sm:$0xff] }
  0xf7   :  { %14522 = vst [vmem:[#allocation67_spill] sm:$0xff] %v9150_v63  ;;  %v1136_v36 = vadd.f32 %v1135_v32, %v889_v59  ;;  %v881_v6 = vmul.f32 %v9135_v45, %v9135_v45  ;;  %v9173_v3 = vsub.f32 %v7323_v58, %v8802_v22  ;;  %v9179_v32 = vsub.f32 %v7324_v34, %v8802_v22  ;;  %v7326_v59 = vld [vmem:[%s14201_s0 + $0x328] sm:$0xff]  ;;  %v9197_v34 = vpop.xlane.xlu1 %489 }
  0xf8   :  { %14523 = vst [vmem:[#allocation68_spill] sm:$0xff] %v9163_v5  ;;  %v1124_v17 = vadd.f32 %v879_v57, %v878_v24  ;;  %1113 = vadd.xlane.f32.xlu1 %v1112_v60  ;;  %v9185_v38 = vsub.f32 %v7325_v29, %v8802_v22  ;;  %v9191_v24 = vsub.f32 %v7326_v59, %v8802_v22  ;;  %v7327_v29 = vld [vmem:[%s14201_s0 + $0x330] sm:$0xff] }
  0xf9   :  { %14524 = vst [vmem:[#allocation69_spill] sm:$0xff] %v9173_v3  ;;  %14525 = vst [vmem:[#allocation70_spill] sm:$0xff] %v9179_v32  ;;  %v1137_v57 = vadd.f32 %v1136_v36, %v890_v43  ;;  %v882_v60 = vmul.f32 %v9144_v9, %v9144_v9  ;;  %v884_v41 = vmul.f32 %v9150_v63, %v9150_v63  ;;  %v7328_v43 = vld [vmem:[%s14201_s0 + $0x340] sm:$0xff] }
  0xfa   :  { %14526 = vst [vmem:[#allocation71_spill] sm:$0xff] %v9185_v38  ;;  %14527 = vst [vmem:[#allocation72_spill] sm:$0xff] %v9191_v24  ;;  %v1125_v58 = vadd.f32 %v1124_v17, %v880_v14  ;;  %v9203_v10 = vsub.f32 %v7327_v29, %v8802_v22  ;;  %v9209_v36 = vsub.f32 %v7328_v43, %v8802_v22  ;;  %v7329_v29 = vld [vmem:[%s14201_s0 + $0x338] sm:$0xff]  ;;  %v9223_v43 = vmul.f32 0.0012755102, %v472_v55  ;;  %v7331_v55 = vld [vmem:[%s14201_s0 + $0x2e0] sm:$0xff] }
  0xfb   :  { %v899_v59 = vmul.f32 %v9173_v3, %v9173_v3  ;;  %v900_v14 = vmul.f32 %v9179_v32, %v9179_v32  ;;  %v1139_v17 = vadd.f32 %v1138_v2, %v1137_v57  ;;  %v9219_v9 = vsub.f32 %v7329_v29, %v8802_v22  ;;  %v7330_v22 = vld [vmem:[%s14201_s0 + $0x2d8] sm:$0xff] }
  0xfc   :  { %14528 = vst [vmem:[#allocation73_spill] sm:$0xff] %v9203_v10  ;;  %14529 = vst [vmem:[#allocation74_spill] sm:$0xff] %v9209_v36  ;;  %v1126_v63 = vadd.f32 %v1125_v58, %v881_v6  ;;  %v901_v45 = vmul.f32 %v9185_v38, %v9185_v38  ;;  %v883_v3 = vmul.f32 %v9163_v5, %v9163_v5  ;;  %v1129_v5 = vsel %vm261_vm0, %v884_v41, 0.0 }
  0xfd   :  { %14530 = vst [vmem:[#allocation75_spill] sm:$0xff] %v9219_v9  ;;  %v902_v32 = vmul.f32 %v9191_v24, %v9191_v24  ;;  %v1151_v2 = vadd.f32 %v900_v14, %v899_v59  ;;  %1140 = vadd.xlane.f32.xlu0 %v1139_v17  ;;  %v905_v57 = vmul.f32 %v9209_v36, %v9209_v36  ;;  %v463_v59 = vpop.xlane.xlu0 %462  ;;  %v7332_v14 = vld [vmem:[%s14201_s0 + $0x2e8] sm:$0xff] }
  0xfe   :  { %v1127_v6 = vadd.f32 %v1126_v63, %v882_v60  ;;  %v9235_v58 = vsub.f32 %v7330_v22, %v8739_v0  ;;  %v9241_v29 = vsub.f32 %v7331_v55, %v8739_v0  ;;  %v903_v63 = vmul.f32 %v9203_v10, %v9203_v10  ;;  %v7333_v22 = vld [vmem:[%s14201_s0 + $0x2f0] sm:$0xff]  ;;  %v9266_v10 = vpop.xlane.xlu1 %507 }
  0xff   :  { %v1152_v60 = vadd.f32 %v1151_v2, %v901_v45  ;;  %v9249_v17 = vsub.f32 %v7332_v14, %v8739_v0  ;;  %v9255_v36 = vsub.f32 %v7333_v22, %v8739_v0  ;;  %v904_v45 = vmul.f32 %v9219_v9, %v9219_v9  ;;  %v7334_v2 = vld [vmem:[%s14201_s0 + $0x2f8] sm:$0xff]  ;;  %v7335_v22 = vld [vmem:[%s14201_s0 + $0x308] sm:$0xff] }
 0x100   :  { %14531 = vst [vmem:[#allocation76_spill] sm:$0xff] %v9235_v58  ;;  %14532 = vst [vmem:[#allocation77_spill] sm:$0xff] %v9241_v29  ;;  %v1128_v55 = vadd.f32 %v1127_v6, %v883_v3  ;;  %v9264_v14 = vsub.f32 %v7334_v2, %v8739_v0  ;;  %v9272_v3 = vsub.f32 %v7335_v22, %v8739_v0  ;;  %v9278_v24 = vmul.f32 0.0012755102, %v463_v59  ;;  %v7339_v59 = vld [vmem:[%s14201_s0 + $0x390] sm:$0xff] }
 0x101   :  { %14533 = vst [vmem:[#allocation78_spill] sm:$0xff] %v9249_v17  ;;  %14534 = vst [vmem:[#allocation79_spill] sm:$0xff] %v9255_v36  ;;  %v1153_v38 = vadd.f32 %v1152_v60, %v902_v32  ;;  %v892_v41 = vmul.f32 %v9235_v58, %v9235_v58  ;;  %v893_v6 = vmul.f32 %v9241_v29, %v9241_v29  ;;  %v1156_v2 = vsel %vm261_vm0, %v905_v57, 0.0  ;;  %v7336_v32 = vld [vmem:[%s14201_s0 + $0x300] sm:$0xff] }
 0x102   :  { %14535 = vst [vmem:[#allocation80_spill] sm:$0xff] %v9264_v14  ;;  %14536 = vst [vmem:[#allocation81_spill] sm:$0xff] %v9272_v3  ;;  %v1130_v9 = vadd.f32 %v1129_v5, %v1128_v55  ;;  %v9285_v60 = vsub.f32 %v7336_v32, %v8739_v0  ;;  %v894_v33 = vmul.f32 %v9249_v17, %v9249_v17  ;;  %v7337_v5 = vld [vmem:[%s14201_s0 + $0x380] sm:$0xff]  ;;  %v7338_v0 = vld [vmem:[%s14201_s0 + $0x388] sm:$0xff] }
 0x103   :  { %v1154_v22 = vadd.f32 %v1153_v38, %v903_v63  ;;  %v895_v58 = vmul.f32 %v9255_v36, %v9255_v36  ;;  %v1142_v29 = vadd.f32 %v893_v6, %v892_v41  ;;  %v9295_v57 = vsub.f32 %v7337_v5, %v8920_v31  ;;  %v7340_v63 = vld [vmem:[%s14201_s0 + $0x398] sm:$0xff] }
 0x104   :  { %14537 = vst [vmem:[#allocation82_spill] sm:$0xff] %v9285_v60  ;;  %1131 = vadd.xlane.f32.xlu1 %v1130_v9  ;;  %v9301_v38 = vsub.f32 %v7338_v0, %v8920_v31  ;;  %v9307_v9 = vsub.f32 %v7339_v59, %v8920_v31  ;;  %v9313_v55 = vsub.f32 %v7340_v63, %v8920_v31  ;;  %v7341_v0 = vld [vmem:[%s14201_s0 + $0x3a0] sm:$0xff]  ;;  %v7342_v63 = vld [vmem:[%s14201_s0 + $0x3b0] sm:$0xff]  ;;  %v9346_v36 = vmul.f32 0.0012755102, %v9197_v34 }
 0x105   :  { %14538 = vst [vmem:[#allocation83_spill] sm:$0xff] %v9295_v57  ;;  %v1155_v41 = vadd.f32 %v1154_v22, %v904_v45  ;;  %v896_v6 = vmul.f32 %v9264_v14, %v9264_v14  ;;  %v898_v32 = vmul.f32 %v9272_v3, %v9272_v3  ;;  %v1143_v5 = vadd.f32 %v1142_v29, %v894_v33  ;;  %v9335_v29 = vpop.xlane.xlu1 %525  ;;  %v7345_v34 = vld [vmem:[%s14201_s0 + $0x350] sm:$0xff] }
 0x106   :  { %14539 = vst [vmem:[#allocation84_spill] sm:$0xff] %v9301_v38  ;;  %14540 = vst [vmem:[#allocation85_spill] sm:$0xff] %v9307_v9  ;;  %v9323_v59 = vsub.f32 %v7341_v0, %v8920_v31  ;;  %v9329_v45 = vsub.f32 %v7342_v63, %v8920_v31  ;;  %v913_v22 = vmul.f32 %v9295_v57, %v9295_v57  ;;  %v7343_v0 = vld [vmem:[%s14201_s0 + $0x3a8] sm:$0xff]  ;;  %v9590_v11 = vmul.f32 0.0012755102, %v9335_v29 }
 0x107   :  { %14541 = vst [vmem:[#allocation86_spill] sm:$0xff] %v9313_v55  ;;  %v914_v33 = vmul.f32 %v9301_v38, %v9301_v38  ;;  %v1157_v3 = vadd.f32 %v1156_v2, %v1155_v41  ;;  %v1144_v14 = vadd.f32 %v1143_v5, %v895_v58  ;;  %v9341_v17 = vsub.f32 %v7343_v0, %v8920_v31  ;;  %v7344_v31 = vld [vmem:[%s14201_s0 + $0x348] sm:$0xff] }
 0x108   :  { %14542 = vst [vmem:[#allocation87_spill] sm:$0xff] %v9323_v59  ;;  %14543 = vst [vmem:[#allocation88_spill] sm:$0xff] %v9329_v45  ;;  %v915_v63 = vmul.f32 %v9307_v9, %v9307_v9  ;;  %v897_v57 = vmul.f32 %v9285_v60, %v9285_v60  ;;  %v916_v2 = vmul.f32 %v9313_v55, %v9313_v55  ;;  %v1147_v9 = vsel %vm261_vm0, %v898_v32, 0.0  ;;  %v7349_v55 = vld [vmem:[%s14201_s0 + $0x378] sm:$0xff] }
 0x109   :  { %14544 = vst [vmem:[#allocation89_spill] sm:$0xff] %v9341_v17  ;;  %v1169_v58 = vadd.f32 %v914_v33, %v913_v22  ;;  %1158 = vadd.xlane.f32.xlu0 %v1157_v3  ;;  %v1145_v41 = vadd.f32 %v1144_v14, %v896_v6  ;;  %v919_v5 = vmul.f32 %v9329_v45, %v9329_v45  ;;  %v481_v22 = vpop.xlane.xlu0 %480  ;;  %v7346_v6 = vld [vmem:[%s14201_s0 + $0x358] sm:$0xff] }
 0x10a   :  { %v9358_v0 = vsub.f32 %v7344_v31, %v8782_v20  ;;  %v9364_v60 = vsub.f32 %v7345_v34, %v8782_v20  ;;  %v917_v14 = vmul.f32 %v9323_v59, %v9323_v59  ;;  %v9372_v33 = vsub.f32 %v7346_v6, %v8782_v20  ;;  %v7347_v31 = vld [vmem:[%s14201_s0 + $0x360] sm:$0xff] }
 0x10b   :  { %v1170_v3 = vadd.f32 %v1169_v58, %v915_v63  ;;  %v9378_v45 = vsub.f32 %v7347_v31, %v8782_v20  ;;  %v1146_v34 = vadd.f32 %v1145_v41, %v897_v57  ;;  %v918_v63 = vmul.f32 %v9341_v17, %v9341_v17  ;;  %v7348_v58 = vld [vmem:[%s14201_s0 + $0x368] sm:$0xff]  ;;  %v9399_v41 = vpop.xlane.xlu1 %543 }
 0x10c   :  { %14545 = vst [vmem:[#allocation90_spill] sm:$0xff] %v9358_v0  ;;  %14546 = vst [vmem:[#allocation91_spill] sm:$0xff] %v9364_v60  ;;  %v9387_v6 = vsub.f32 %v7348_v58, %v8782_v20  ;;  %v9393_v31 = vsub.f32 %v7349_v55, %v8782_v20  ;;  %v906_v57 = vmul.f32 %v9358_v0, %v9358_v0  ;;  %v9401_v38 = vmul.f32 0.0012755102, %v481_v22  ;;  %v7353_v22 = vld [vmem:[%s14201_s0 + $0x400] sm:$0xff] }
 0x10d   :  { %14547 = vst [vmem:[#allocation92_spill] sm:$0xff] %v9372_v33  ;;  %14548 = vst [vmem:[#allocation93_spill] sm:$0xff] %v9378_v45  ;;  %v1171_v59 = vadd.f32 %v1170_v3, %v916_v2  ;;  %v907_v32 = vmul.f32 %v9364_v60, %v9364_v60  ;;  %v1148_v17 = vadd.f32 %v1147_v9, %v1146_v34  ;;  %v1174_v2 = vsel %vm261_vm0, %v919_v5, 0.0  ;;  %v7350_v3 = vld [vmem:[%s14201_s0 + $0x370] sm:$0xff] }
 0x10e   :  { %14549 = vst [vmem:[#allocation94_spill] sm:$0xff] %v9387_v6  ;;  %14550 = vst [vmem:[#allocation95_spill] sm:$0xff] %v9393_v31  ;;  %v9408_v55 = vsub.f32 %v7350_v3, %v8782_v20  ;;  %v908_v0 = vmul.f32 %v9372_v33, %v9372_v33  ;;  %v909_v60 = vmul.f32 %v9378_v45, %v9378_v45  ;;  %v7351_v9 = vld [vmem:[%s14201_s0 + $0x3f0] sm:$0xff]  ;;  %v7352_v20 = vld [vmem:[%s14201_s0 + $0x3f8] sm:$0xff]  ;;  %v9469_v45 = vmul.f32 0.0012755102, %v9266_v10 }
 0x10f   :  { %v1172_v58 = vadd.f32 %v1171_v59, %v917_v14  ;;  %v1160_v18 = vadd.f32 %v907_v32, %v906_v57  ;;  %1149 = vadd.xlane.f32.xlu1 %v1148_v17  ;;  %v9418_v5 = vsub.f32 %v7351_v9, %v9038_v26  ;;  %v9424_v59 = vsub.f32 %v7352_v20, %v9038_v26  ;;  %v7354_v14 = vld [vmem:[%s14201_s0 + $0x408] sm:$0xff]  ;;  %v7355_v20 = vld [vmem:[%s14201_s0 + $0x410] sm:$0xff]  ;;  %v7359_v10 = vld [vmem:[%s14201_s0 + $0x3c0] sm:$0xff] }
 0x110   :  { %14551 = vst [vmem:[#allocation96_spill] sm:$0xff] %v9408_v55  ;;  %v9430_v17 = vsub.f32 %v7353_v22, %v9038_v26  ;;  %v9436_v34 = vsub.f32 %v7354_v14, %v9038_v26  ;;  %v910_v32 = vmul.f32 %v9387_v6, %v9387_v6  ;;  %v912_v3 = vmul.f32 %v9393_v31, %v9393_v31  ;;  %v7356_v14 = vld [vmem:[%s14201_s0 + $0x420] sm:$0xff] }
 0x111   :  { %14552 = vst [vmem:[#allocation97_spill] sm:$0xff] %v9418_v5  ;;  %14553 = vst [vmem:[#allocation98_spill] sm:$0xff] %v9424_v59  ;;  %v1173_v57 = vadd.f32 %v1172_v58, %v918_v63  ;;  %v1161_v9 = vadd.f32 %v1160_v18, %v908_v0  ;;  %v9446_v22 = vsub.f32 %v7355_v20, %v9038_v26  ;;  %v7357_v20 = vld [vmem:[%s14201_s0 + $0x418] sm:$0xff] }
 0x112   :  { %14554 = vst [vmem:[#allocation99_spill] sm:$0xff] %v9430_v17  ;;  %14555 = vst [vmem:[#allocation100_spill] sm:$0xff] %v9436_v34  ;;  %v9452_v63 = vsub.f32 %v7356_v14, %v9038_v26  ;;  %v927_v58 = vmul.f32 %v9418_v5, %v9418_v5  ;;  %v928_v18 = vmul.f32 %v9424_v59, %v9424_v59  ;;  %v9466_v14 = vpop.permute.xlu1 %1891 }
 0x113   :  { %14556 = vst [vmem:[#allocation101_spill] sm:$0xff] %v9446_v22  ;;  %v1175_v0 = vadd.f32 %v1174_v2, %v1173_v57  ;;  %v1162_v31 = vadd.f32 %v1161_v9, %v909_v60  ;;  %v9462_v6 = vsub.f32 %v7357_v20, %v9038_v26  ;;  %v929_v33 = vmul.f32 %v9430_v17, %v9430_v17  ;;  %v7358_v9 = vld [vmem:[%s14201_s0 + $0x3b8] sm:$0xff] }
 0x114   :  { %14557 = vst [vmem:[#allocation102_spill] sm:$0xff] %v9452_v63  ;;  %v911_v5 = vmul.f32 %v9408_v55, %v9408_v55  ;;  %v930_v60 = vmul.f32 %v9436_v34, %v9436_v34  ;;  %v1187_v2 = vadd.f32 %v928_v18, %v927_v58  ;;  %v933_v26 = vmul.f32 %v9452_v63, %v9452_v63  ;;  %v499_v58 = vpop.xlane.xlu0 %498  ;;  %v7360_v18 = vld [vmem:[%s14201_s0 + $0x3c8] sm:$0xff] }
 0x115   :  { %14558 = vst [vmem:[#allocation103_spill] sm:$0xff] %v9462_v6  ;;  %1176 = vadd.xlane.f32.xlu0 %v1175_v0  ;;  %v1163_v57 = vadd.f32 %v1162_v31, %v910_v32  ;;  %v9481_v20 = vsub.f32 %v7358_v9, %v8867_v61  ;;  %v9487_v55 = vsub.f32 %v7359_v10, %v8867_v61  ;;  %v7361_v9 = vld [vmem:[%s14201_s0 + $0x3d0] sm:$0xff]  ;;  %v1165_v17 = vsel %vm261_vm0, %v912_v3, 0.0  ;;  %v7363_v34 = vld [vmem:[%s14201_s0 + $0x3e8] sm:$0xff] }
 0x116   :  { %v931_v31 = vmul.f32 %v9446_v22, %v9446_v22  ;;  %v1188_v32 = vadd.f32 %v1187_v2, %v929_v33  ;;  %v9495_v0 = vsub.f32 %v7360_v18, %v8867_v61  ;;  %v9501_v63 = vsub.f32 %v7361_v9, %v8867_v61  ;;  %v7362_v2 = vld [vmem:[%s14201_s0 + $0x3d8] sm:$0xff] }
 0x117   :  { %14559 = vst [vmem:[#allocation104_spill] sm:$0xff] %v9481_v20  ;;  %14560 = vst [vmem:[#allocation105_spill] sm:$0xff] %v9487_v55  ;;  %v1164_v10 = vadd.f32 %v1163_v57, %v911_v5  ;;  %v932_v33 = vmul.f32 %v9462_v6, %v9462_v6  ;;  %v9510_v18 = vsub.f32 %v7362_v2, %v8867_v61  ;;  %v9522_v6 = vmul.f32 0.0012755102, %v499_v58 }
 0x118   :  { %14561 = vst [vmem:[#allocation106_spill] sm:$0xff] %v9495_v0  ;;  %14562 = vst [vmem:[#allocation107_spill] sm:$0xff] %v9501_v63  ;;  %v1189_v22 = vadd.f32 %v1188_v32, %v930_v60  ;;  %v9516_v9 = vsub.f32 %v7363_v34, %v8867_v61  ;;  %v920_v5 = vmul.f32 %v9481_v20, %v9481_v20  ;;  %v1192_v2 = vsel %vm261_vm0, %v933_v26, 0.0  ;;  %v7364_v60 = vld [vmem:[%s14201_s0 + $0x3e0] sm:$0xff]  ;;  %v9531_v34 = vpop.permute.xlu1 %1896 }
 0x119   :  { %14563 = vst [vmem:[#allocation108_spill] sm:$0xff] %v9510_v18  ;;  %v921_v3 = vmul.f32 %v9487_v55, %v9487_v55  ;;  %v1166_v57 = vadd.f32 %v1165_v17, %v1164_v10  ;;  %v9529_v32 = vsub.f32 %v7364_v60, %v8867_v61  ;;  %v922_v20 = vmul.f32 %v9495_v0, %v9495_v0  ;;  %v7365_v26 = vld [vmem:[%s14201_s0 + $0x460] sm:$0xff]  ;;  %v7366_v61 = vld [vmem:[%s14201_s0 + $0x468] sm:$0xff] }
 0x11a   :  { %14564 = vst [vmem:[#allocation109_spill] sm:$0xff] %v9516_v9  ;;  %v1190_v59 = vadd.f32 %v1189_v22, %v931_v31  ;;  %v923_v17 = vmul.f32 %v9501_v63, %v9501_v63  ;;  %v9541_v10 = vsub.f32 %v7365_v26, %v9156_v12  ;;  %v9547_v22 = vsub.f32 %v7366_v61, %v9156_v12  ;;  %v7367_v31 = vld [vmem:[%s14201_s0 + $0x470] sm:$0xff] }
 0x11b   :  { %14565 = vst [vmem:[#allocation110_spill] sm:$0xff] %v9529_v32  ;;  %v1178_v58 = vadd.f32 %v921_v3, %v920_v5  ;;  %1167 = vadd.xlane.f32.xlu1 %v1166_v57  ;;  %v9553_v5 = vsub.f32 %v7367_v31, %v9156_v12  ;;  %v7368_v3 = vld [vmem:[%s14201_s0 + $0x478] sm:$0xff]  ;;  %v924_v26 = vmul.f32 %v9510_v18, %v9510_v18  ;;  %v7369_v31 = vld [vmem:[%s14201_s0 + $0x480] sm:$0xff]  ;;  %v517_v18 = vpop.xlane.xlu0 %516 }
 0x11c   :  { %14566 = vst [vmem:[#allocation111_spill] sm:$0xff] %v9541_v10  ;;  %14567 = vst [vmem:[#allocation112_spill] sm:$0xff] %v9547_v22  ;;  %v9559_v57 = vsub.f32 %v7368_v3, %v9156_v12  ;;  %v1191_v60 = vadd.f32 %v1190_v59, %v932_v33  ;;  %v926_v61 = vmul.f32 %v9516_v9, %v9516_v9  ;;  %v7370_v3 = vld [vmem:[%s14201_s0 + $0x490] sm:$0xff] }
 0x11d   :  { %14568 = vst [vmem:[#allocation113_spill] sm:$0xff] %v9553_v5  ;;  %v1179_v0 = vadd.f32 %v1178_v58, %v922_v20  ;;  %v9569_v63 = vsub.f32 %v7369_v31, %v9156_v12  ;;  %v9575_v59 = vsub.f32 %v7370_v3, %v9156_v12  ;;  %v941_v33 = vmul.f32 %v9541_v10, %v9541_v10  ;;  %v7371_v31 = vld [vmem:[%s14201_s0 + $0x488] sm:$0xff] }
 0x11e   :  { %14569 = vst [vmem:[#allocation114_spill] sm:$0xff] %v9559_v57  ;;  %v942_v20 = vmul.f32 %v9547_v22, %v9547_v22  ;;  %v1193_v58 = vadd.f32 %v1192_v2, %v1191_v60  ;;  %v9585_v55 = vsub.f32 %v7371_v31, %v9156_v12  ;;  %v943_v3 = vmul.f32 %v9553_v5, %v9553_v5  ;;  %v7372_v31 = vld [vmem:[%s14201_s0 + $0x428] sm:$0xff] }
 0x11f   :  { %14570 = vst [vmem:[#allocation115_spill] sm:$0xff] %v9569_v63  ;;  %14571 = vst [vmem:[#allocation116_spill] sm:$0xff] %v9575_v59  ;;  %v1180_v9 = vadd.f32 %v1179_v0, %v923_v17  ;;  %v925_v10 = vmul.f32 %v9529_v32, %v9529_v32  ;;  %v944_v0 = vmul.f32 %v9559_v57, %v9559_v57  ;;  %v9596_v17 = vpop.permute.xlu1 %1901  ;;  %v7373_v32 = vld [vmem:[%s14201_s0 + $0x430] sm:$0xff]  ;;  %v1183_v5 = vsel %vm261_vm0, %v926_v61, 0.0  ;;  %v7377_v57 = vld [vmem:[%s14201_s0 + $0x458] sm:$0xff] }
 0x120   :  { %14572 = vst [vmem:[#allocation117_spill] sm:$0xff] %v9585_v55  ;;  %v1205_v2 = vadd.f32 %v942_v20, %v941_v33  ;;  %1194 = vadd.xlane.f32.xlu0 %v1193_v58  ;;  %v947_v12 = vmul.f32 %v9575_v59, %v9575_v59  ;;  %v9604_v29 = vsub.f32 %v7372_v31, %v8985_v49  ;;  %v7374_v20 = vld [vmem:[%s14201_s0 + $0x438] sm:$0xff]  ;;  %v7375_v31 = vld [vmem:[%s14201_s0 + $0x440] sm:$0xff] }
 0x121   :  { %v1181_v60 = vadd.f32 %v1180_v9, %v924_v26  ;;  %v9610_v33 = vsub.f32 %v7373_v32, %v8985_v49  ;;  %v945_v9 = vmul.f32 %v9569_v63, %v9569_v63  ;;  %v9618_v58 = vsub.f32 %v7374_v20, %v8985_v49 }
 0x122   :  { %14573 = vst [vmem:[#allocation118_spill] sm:$0xff] %v9604_v29  ;;  %v1206_v26 = vadd.f32 %v1205_v2, %v943_v3  ;;  %v9624_v59 = vsub.f32 %v7375_v31, %v8985_v49  ;;  %v946_v3 = vmul.f32 %v9585_v55, %v9585_v55  ;;  %v7376_v2 = vld [vmem:[%s14201_s0 + $0x448] sm:$0xff]  ;;  %v9639_v31 = vsub.f32 %v7377_v57, %v8985_v49  ;;  %v9654_v57 = vpop.xlane.xlu0 %534 }
 0x123   :  { %14574 = vst [vmem:[#allocation119_spill] sm:$0xff] %v9610_v33  ;;  %14575 = vst [vmem:[#allocation120_spill] sm:$0xff] %v9618_v58  ;;  %v1182_v32 = vadd.f32 %v1181_v60, %v925_v10  ;;  %v9633_v20 = vsub.f32 %v7376_v2, %v8985_v49  ;;  %v934_v10 = vmul.f32 %v9604_v29, %v9604_v29  ;;  %v9645_v55 = vmul.f32 0.0012755102, %v517_v18 }
 0x124   :  { %14576 = vst [vmem:[#allocation121_spill] sm:$0xff] %v9624_v59  ;;  %v1207_v63 = vadd.f32 %v1206_v26, %v944_v0  ;;  %14578 = vst [vmem:[#allocation123_spill] sm:$0xff] %v9639_v31  ;;  %v935_v61 = vmul.f32 %v9610_v33, %v9610_v33  ;;  %v1210_v2 = vsel %vm261_vm0, %v947_v12, 0.0  ;;  %v7378_v0 = vld [vmem:[%s14201_s0 + $0x450] sm:$0xff]  ;;  %v936_v29 = vmul.f32 %v9618_v58, %v9618_v58 }
 0x125   :  { %14577 = vst [vmem:[#allocation122_spill] sm:$0xff] %v9633_v20  ;;  %v1184_v60 = vadd.f32 %v1183_v5, %v1182_v32  ;;  %v9652_v26 = vsub.f32 %v7378_v0, %v8985_v49  ;;  %v937_v5 = vmul.f32 %v9624_v59, %v9624_v59  ;;  %v9660_v32 = vpop.permute.xlu1 %1906  ;;  %v7379_v12 = vld [vmem:[%s14201_s0 + $0x4d0] sm:$0xff]  ;;  %v938_v58 = vmul.f32 %v9633_v20, %v9633_v20 }
 0x126   :  { %v1208_v22 = vadd.f32 %v1207_v63, %v945_v9  ;;  %v1196_v18 = vadd.f32 %v935_v61, %v934_v10  ;;  %v9666_v49 = vsub.f32 %v7379_v12, %v9278_v24  ;;  %v7380_v63 = vld [vmem:[%s14201_s0 + $0x4d8] sm:$0xff]  ;;  %v7381_v10 = vld [vmem:[%s14201_s0 + $0x4e0] sm:$0xff] }
 0x127   :  { %14579 = vst [vmem:[#allocation124_spill] sm:$0xff] %v9652_v26  ;;  %1185 = vadd.xlane.f32.xlu1 %v1184_v60  ;;  %v9672_v9 = vsub.f32 %v7380_v63, %v9278_v24  ;;  %v9678_v61 = vsub.f32 %v7381_v10, %v9278_v24  ;;  %v7382_v60 = vld [vmem:[%s14201_s0 + $0x4e8] sm:$0xff]  ;;  %v940_v63 = vmul.f32 %v9639_v31, %v9639_v31  ;;  %v7383_v10 = vld [vmem:[%s14201_s0 + $0x4f0] sm:$0xff] }
 0x128   :  { %14580 = vst [vmem:[#allocation125_spill] sm:$0xff] %v9666_v49  ;;  %v9684_v0 = vsub.f32 %v7382_v60, %v9278_v24  ;;  %v1209_v12 = vadd.f32 %v1208_v22, %v946_v3  ;;  %v1197_v59 = vadd.f32 %v1196_v18, %v936_v29  ;;  %v9694_v33 = vsub.f32 %v7383_v10, %v9278_v24  ;;  %v7384_v60 = vld [vmem:[%s14201_s0 + $0x500] sm:$0xff]  ;;  %v9706_v18 = vpop.permute.xlu0 %1916 }
 0x129   :  { %14581 = vst [vmem:[#allocation126_spill] sm:$0xff] %v9672_v9  ;;  %14582 = vst [vmem:[#allocation127_spill] sm:$0xff] %v9678_v61  ;;  %v9700_v22 = vsub.f32 %v7384_v60, %v9278_v24  ;;  %v955_v3 = vmul.f32 %v9666_v49, %v9666_v49  ;;  %v956_v29 = vmul.f32 %v9672_v9, %v9672_v9  ;;  %v7385_v60 = vld [vmem:[%s14201_s0 + $0x4f8] sm:$0xff] }
 0x12a   :  { %14583 = vst [vmem:[#allocation128_spill] sm:$0xff] %v9684_v0  ;;  %14584 = vst [vmem:[#allocation129_spill] sm:$0xff] %v9694_v33  ;;  %v1211_v31 = vadd.f32 %v1210_v2, %v1209_v12  ;;  %v939_v10 = vmul.f32 %v9652_v26, %v9652_v26  ;;  %v1198_v20 = vadd.f32 %v1197_v59, %v937_v5  ;;  %v7386_v59 = vld [vmem:[%s14201_s0 + $0x498] sm:$0xff] }
 0x12b   :  { %14585 = vst [vmem:[#allocation130_spill] sm:$0xff] %v9700_v22  ;;  %v957_v7 = vmul.f32 %v9678_v61, %v9678_v61  ;;  %v9716_v19 = vsub.f32 %v7385_v60, %v9278_v24  ;;  %v958_v49 = vmul.f32 %v9684_v0, %v9684_v0  ;;  %v961_v2 = vmul.f32 %v9700_v22, %v9700_v22  ;;  %v7387_v24 = vld [vmem:[%s14201_s0 + $0x4a0] sm:$0xff] }
 0x12c   :  { %v1223_v12 = vadd.f32 %v956_v29, %v955_v3  ;;  %1212 = vadd.xlane.f32.xlu0 %v1211_v31  ;;  %v1199_v26 = vadd.f32 %v1198_v20, %v938_v58  ;;  %v9726_v5 = vsub.f32 %v7386_v59, %v9103_v13  ;;  %v9732_v60 = vsub.f32 %v7387_v24, %v9103_v13  ;;  %v7388_v3 = vld [vmem:[%s14201_s0 + $0x4a8] sm:$0xff]  ;;  %v9740_v20 = vpop.permute.xlu1 %1911  ;;  %v7389_v24 = vld [vmem:[%s14201_s0 + $0x4b0] sm:$0xff] }
 0x12d   :  { %14586 = vst [vmem:[#allocation131_spill] sm:$0xff] %v9716_v19  ;;  %v9738_v58 = vsub.f32 %v7388_v3, %v9103_v13  ;;  %14590 = vst [vmem:[#allocation135_spill] sm:$0xff] %v9740_v20  ;;  %v1201_v31 = vsel %vm261_vm0, %v940_v63, 0.0  ;;  %v959_v29 = vmul.f32 %v9694_v33, %v9694_v33  ;;  %v9749_v22 = vsub.f32 %v7389_v24, %v9103_v13  ;;  %v7390_v3 = vld [vmem:[%s14201_s0 + $0x4b8] sm:$0xff]  ;;  %v7391_v63 = vld [vmem:[%s14201_s0 + $0x4c8] sm:$0xff]  ;;  %v9770_v33 = vpop.permute.xlu0 %1926 }
 0x12e   :  { %14587 = vst [vmem:[#allocation132_spill] sm:$0xff] %v9726_v5  ;;  %14588 = vst [vmem:[#allocation133_spill] sm:$0xff] %v9732_v60  ;;  %v1224_v59 = vadd.f32 %v1223_v12, %v957_v7  ;;  %v1200_v61 = vadd.f32 %v1199_v26, %v939_v10  ;;  %v9755_v0 = vsub.f32 %v7390_v3, %v9103_v13  ;;  %v1228_v24 = vsel %vm261_vm0, %v961_v2, 0.0 }
 0x12f   :  { %14589 = vst [vmem:[#allocation134_spill] sm:$0xff] %v9738_v58  ;;  %14591 = vst [vmem:[#allocation136_spill] sm:$0xff] %v9749_v22  ;;  %v9761_v7 = vsub.f32 %v7391_v63, %v9103_v13  ;;  %v948_v12 = vmul.f32 %v9726_v5, %v9726_v5  ;;  %v960_v26 = vmul.f32 %v9716_v19, %v9716_v19  ;;  %v7392_v63 = vld [vmem:[%s14201_s0 + $0x4c0] sm:$0xff] }
 0x130   :  { %14592 = vst [vmem:[#allocation137_spill] sm:$0xff] %v9755_v0  ;;  %v1225_v10 = vadd.f32 %v1224_v59, %v958_v49  ;;  %v949_v3 = vmul.f32 %v9732_v60, %v9732_v60  ;;  %14594 = vst [vmem:[#allocation139_spill] sm:$0xff] %v9770_v33  ;;  %v1202_v9 = vadd.f32 %v1201_v31, %v1200_v61  ;;  %v7393_v19 = vld [vmem:[%s14201_s0 + $0x540] sm:$0xff] }
 0x131   :  { %14593 = vst [vmem:[#allocation138_spill] sm:$0xff] %v9761_v7  ;;  %v9776_v20 = vsub.f32 %v7392_v63, %v9103_v13  ;;  %v950_v5 = vmul.f32 %v9738_v58, %v9738_v58  ;;  %v951_v49 = vmul.f32 %v9749_v22, %v9749_v22  ;;  %v9786_v61 = vsub.f32 %v7393_v19, %v9401_v38  ;;  %v7394_v13 = vld [vmem:[%s14201_s0 + $0x548] sm:$0xff]  ;;  %v9840_v33 = vpop.permute.xlu0 %1936 }
 0x132   :  { %v1226_v2 = vadd.f32 %v1225_v10, %v959_v29  ;;  %v1214_v59 = vadd.f32 %v949_v3, %v948_v12  ;;  %v9792_v31 = vsub.f32 %v7394_v13, %v9401_v38  ;;  %1203 = vadd.xlane.f32.xlu1 %v1202_v9  ;;  %v952_v63 = vmul.f32 %v9755_v0, %v9755_v0  ;;  %v7395_v12 = vld [vmem:[%s14201_s0 + $0x550] sm:$0xff]  ;;  %v7396_v10 = vld [vmem:[%s14201_s0 + $0x558] sm:$0xff]  ;;  %v9810_v9 = vpop.permute.xlu1 %1921 }
 0x133   :  { %14595 = vst [vmem:[#allocation140_spill] sm:$0xff] %v9776_v20  ;;  %14596 = vst [vmem:[#allocation141_spill] sm:$0xff] %v9786_v61  ;;  %v954_v29 = vmul.f32 %v9761_v7, %v9761_v7  ;;  %v9802_v19 = vsub.f32 %v7395_v12, %v9401_v38  ;;  %v9808_v3 = vsub.f32 %v7396_v10, %v9401_v38  ;;  %v7397_v7 = vld [vmem:[%s14201_s0 + $0x560] sm:$0xff]  ;;  %v7398_v12 = vld [vmem:[%s14201_s0 + $0x570] sm:$0xff] }
 0x134   :  { %14597 = vst [vmem:[#allocation142_spill] sm:$0xff] %v9792_v31  ;;  %14600 = vst [vmem:[#allocation145_spill] sm:$0xff] %v9810_v9  ;;  %v1227_v13 = vadd.f32 %v1226_v2, %v960_v26  ;;  %v1215_v0 = vadd.f32 %v1214_v59, %v950_v5  ;;  %v9816_v58 = vsub.f32 %v7397_v7, %v9401_v38  ;;  %v7399_v10 = vld [vmem:[%s14201_s0 + $0x568] sm:$0xff] }
 0x135   :  { %14598 = vst [vmem:[#allocation143_spill] sm:$0xff] %v9802_v19  ;;  %14599 = vst [vmem:[#allocation144_spill] sm:$0xff] %v9808_v3  ;;  %v9822_v22 = vsub.f32 %v7398_v12, %v9401_v38  ;;  %v9828_v5 = vsub.f32 %v7399_v10, %v9401_v38  ;;  %v969_v26 = vmul.f32 %v9786_v61, %v9786_v61  ;;  %v7400_v61 = vld [vmem:[%s14201_s0 + $0x508] sm:$0xff] }
 0x136   :  { %14601 = vst [vmem:[#allocation146_spill] sm:$0xff] %v9816_v58  ;;  %v970_v7 = vmul.f32 %v9792_v31, %v9792_v31  ;;  %v971_v2 = vmul.f32 %v9802_v19, %v9802_v19  ;;  %v1229_v59 = vadd.f32 %v1228_v24, %v1227_v13  ;;  %v953_v12 = vmul.f32 %v9776_v20, %v9776_v20 }
 0x137   :  { %14602 = vst [vmem:[#allocation147_spill] sm:$0xff] %v9822_v22  ;;  %14603 = vst [vmem:[#allocation148_spill] sm:$0xff] %v9828_v5  ;;  %v1216_v60 = vadd.f32 %v1215_v0, %v951_v49  ;;  %v972_v9 = vmul.f32 %v9808_v3, %v9808_v3  ;;  %v975_v38 = vmul.f32 %v9822_v22, %v9822_v22  ;;  %v7401_v0 = vld [vmem:[%s14201_s0 + $0x510] sm:$0xff]  ;;  %v1219_v13 = vsel %vm261_vm0, %v954_v29, 0.0  ;;  %v7404_v29 = vld [vmem:[%s14201_s0 + $0x528] sm:$0xff] }
 0x138   :  { %v1241_v10 = vadd.f32 %v970_v7, %v969_v26  ;;  %v9848_v19 = vsub.f32 %v7400_v61, %v9223_v43  ;;  %v9854_v24 = vsub.f32 %v7401_v0, %v9223_v43  ;;  %1230 = vadd.xlane.f32.xlu0 %v1229_v59  ;;  %v7402_v26 = vld [vmem:[%s14201_s0 + $0x518] sm:$0xff]  ;;  %v7403_v61 = vld [vmem:[%s14201_s0 + $0x520] sm:$0xff]  ;;  %v973_v59 = vmul.f32 %v9816_v58, %v9816_v58 }
 0x139   :  { %v1217_v49 = vadd.f32 %v1216_v60, %v952_v63  ;;  %v9861_v7 = vsub.f32 %v7402_v26, %v9223_v43  ;;  %v9867_v22 = vsub.f32 %v7403_v61, %v9223_v43  ;;  %v974_v60 = vmul.f32 %v9828_v5, %v9828_v5  ;;  %v9879_v26 = vpop.permute.xlu1 %1931  ;;  %v7405_v61 = vld [vmem:[%s14201_s0 + $0x538] sm:$0xff] }
 0x13a   :  { %14604 = vst [vmem:[#allocation149_spill] sm:$0xff] %v9848_v19  ;;  %14605 = vst [vmem:[#allocation150_spill] sm:$0xff] %v9854_v24  ;;  %v1242_v63 = vadd.f32 %v1241_v10, %v971_v2  ;;  %v9877_v0 = vsub.f32 %v7404_v29, %v9223_v43  ;;  %v9885_v58 = vsub.f32 %v7405_v61, %v9223_v43  ;;  %v1246_v29 = vsel %vm261_vm0, %v975_v38, 0.0 }
 0x13b   :  { %14606 = vst [vmem:[#allocation151_spill] sm:$0xff] %v9861_v7  ;;  %14607 = vst [vmem:[#allocation152_spill] sm:$0xff] %v9867_v22  ;;  %v1218_v20 = vadd.f32 %v1217_v49, %v953_v12  ;;  %v962_v2 = vmul.f32 %v9848_v19, %v9848_v19  ;;  %v963_v10 = vmul.f32 %v9854_v24, %v9854_v24  ;;  %v7406_v12 = vld [vmem:[%s14201_s0 + $0x530] sm:$0xff] }
 0x13c   :  { %14608 = vst [vmem:[#allocation153_spill] sm:$0xff] %v9877_v0  ;;  %14609 = vst [vmem:[#allocation154_spill] sm:$0xff] %v9885_v58  ;;  %v1243_v5 = vadd.f32 %v1242_v63, %v972_v9  ;;  %v9896_v49 = vsub.f32 %v7406_v12, %v9223_v43  ;;  %v964_v61 = vmul.f32 %v9861_v7, %v9861_v7  ;;  %v7407_v9 = vld [vmem:[%s14201_s0 + $0x5b0] sm:$0xff]  ;;  %v9908_v63 = vpop.permute.xlu0 %1946  ;;  %v7408_v43 = vld [vmem:[%s14201_s0 + $0x5b8] sm:$0xff] }
 0x13d   :  { %v1220_v3 = vadd.f32 %v1219_v13, %v1218_v20  ;;  %v965_v31 = vmul.f32 %v9867_v22, %v9867_v22  ;;  %v1232_v19 = vadd.f32 %v963_v10, %v962_v2  ;;  %v9906_v38 = vsub.f32 %v7407_v9, %v9522_v6  ;;  %14612 = vst [vmem:[#allocation157_spill] sm:$0xff] %v9908_v63  ;;  %v7409_v13 = vld [vmem:[%s14201_s0 + $0x5c0] sm:$0xff]  ;;  %v7410_v10 = vld [vmem:[%s14201_s0 + $0x5c8] sm:$0xff] }
 0x13e   :  { %14610 = vst [vmem:[#allocation155_spill] sm:$0xff] %v9896_v49  ;;  %v1244_v24 = vadd.f32 %v1243_v5, %v973_v59  ;;  %v9914_v20 = vsub.f32 %v7408_v43, %v9522_v6  ;;  %v9920_v2 = vsub.f32 %v7409_v13, %v9522_v6  ;;  %v9926_v5 = vsub.f32 %v7410_v10, %v9522_v6  ;;  %v7411_v43 = vld [vmem:[%s14201_s0 + $0x5d0] sm:$0xff]  ;;  %v7412_v10 = vld [vmem:[%s14201_s0 + $0x5e0] sm:$0xff] }
 0x13f   :  { %14611 = vst [vmem:[#allocation156_spill] sm:$0xff] %v9906_v38  ;;  %1221 = vadd.xlane.f32.xlu1 %v1220_v3  ;;  %v966_v59 = vmul.f32 %v9877_v0, %v9877_v0  ;;  %v968_v12 = vmul.f32 %v9885_v58, %v9885_v58  ;;  %v1233_v9 = vadd.f32 %v1232_v19, %v964_v61  ;;  %v9948_v61 = vpop.permute.xlu1 %1941 }
 0x140   :  { %14613 = vst [vmem:[#allocation158_spill] sm:$0xff] %v9914_v20  ;;  %14614 = vst [vmem:[#allocation159_spill] sm:$0xff] %v9920_v2  ;;  %v9936_v13 = vsub.f32 %v7411_v43, %v9522_v6  ;;  %v1245_v7 = vadd.f32 %v1244_v24, %v974_v60  ;;  %v9942_v3 = vsub.f32 %v7412_v10, %v9522_v6  ;;  %v7413_v24 = vld [vmem:[%s14201_s0 + $0x5d8] sm:$0xff] }
 0x141   :  { %14615 = vst [vmem:[#allocation160_spill] sm:$0xff] %v9926_v5  ;;  %v983_v0 = vmul.f32 %v9906_v38, %v9906_v38  ;;  %v984_v19 = vmul.f32 %v9914_v20, %v9914_v20  ;;  %14618 = vst [vmem:[#allocation163_spill] sm:$0xff] %v9948_v61  ;;  %v967_v43 = vmul.f32 %v9896_v49, %v9896_v49 }
 0x142   :  { %14616 = vst [vmem:[#allocation161_spill] sm:$0xff] %v9936_v13  ;;  %14617 = vst [vmem:[#allocation162_spill] sm:$0xff] %v9942_v3  ;;  %v1234_v58 = vadd.f32 %v1233_v9, %v965_v31  ;;  %v9956_v60 = vsub.f32 %v7413_v24, %v9522_v6  ;;  %v985_v10 = vmul.f32 %v9920_v2, %v9920_v2  ;;  %v7414_v31 = vld [vmem:[%s14201_s0 + $0x578] sm:$0xff]  ;;  %v7415_v6 = vld [vmem:[%s14201_s0 + $0x580] sm:$0xff] }
 0x143   :  { %v1247_v38 = vadd.f32 %v1246_v29, %v1245_v7  ;;  %v986_v20 = vmul.f32 %v9926_v5, %v9926_v5  ;;  %v989_v22 = vmul.f32 %v9942_v3, %v9942_v3  ;;  %v1259_v63 = vadd.f32 %v984_v19, %v983_v0  ;;  %v7416_v29 = vld [vmem:[%s14201_s0 + $0x588] sm:$0xff]  ;;  %v9982_v0 = vpop.permute.xlu0 %1956  ;;  %v7417_v3 = vld [vmem:[%s14201_s0 + $0x590] sm:$0xff] }
 0x144   :  { %14619 = vst [vmem:[#allocation164_spill] sm:$0xff] %v9956_v60  ;;  %v1235_v49 = vadd.f32 %v1234_v58, %v966_v59  ;;  %v9968_v9 = vsub.f32 %v7414_v31, %v9346_v36  ;;  %v9974_v7 = vsub.f32 %v7415_v6, %v9346_v36  ;;  %v9980_v58 = vsub.f32 %v7416_v29, %v9346_v36 }
 0x145   :  { %14623 = vst [vmem:[#allocation168_spill] sm:$0xff] %v9982_v0  ;;  %v9985_v59 = vmul.f32 0.0012755102, %v9654_v57  ;;  %1248 = vadd.xlane.f32.xlu0 %v1247_v38  ;;  %v1237_v19 = vsel %vm261_vm0, %v968_v12, 0.0  ;;  %v987_v24 = vmul.f32 %v9936_v13, %v9936_v13  ;;  %v1260_v31 = vadd.f32 %v1259_v63, %v985_v10  ;;  %v7418_v57 = vld [vmem:[%s14201_s0 + $0x598] sm:$0xff]  ;;  %v10014_v13 = vpop.permute.xlu1 %1951 }
 0x146   :  { %14620 = vst [vmem:[#allocation165_spill] sm:$0xff] %v9968_v9  ;;  %14621 = vst [vmem:[#allocation166_spill] sm:$0xff] %v9974_v7  ;;  %v1236_v6 = vadd.f32 %v1235_v49, %v967_v43  ;;  %v9994_v29 = vsub.f32 %v7417_v3, %v9346_v36  ;;  %v10000_v38 = vsub.f32 %v7418_v57, %v9346_v36  ;;  %v7419_v43 = vld [vmem:[%s14201_s0 + $0x5a8] sm:$0xff]  ;;  %v1264_v2 = vsel %vm261_vm0, %v989_v22, 0.0 }
 0x147   :  { %14622 = vst [vmem:[#allocation167_spill] sm:$0xff] %v9980_v58  ;;  %v976_v12 = vmul.f32 %v9968_v9, %v9968_v9  ;;  %v988_v49 = vmul.f32 %v9956_v60, %v9956_v60  ;;  %v1261_v63 = vadd.f32 %v1260_v31, %v986_v20  ;;  %v10010_v3 = vsub.f32 %v7419_v43, %v9346_v36  ;;  %v7420_v60 = vld [vmem:[%s14201_s0 + $0x5a0] sm:$0xff]  ;;  %v7422_v22 = vld [vmem:[%s14201_s0 + $0x628] sm:$0xff] }
 0x148   :  { %14624 = vst [vmem:[#allocation169_spill] sm:$0xff] %v9994_v29  ;;  %14625 = vst [vmem:[#allocation170_spill] sm:$0xff] %v10000_v38  ;;  %v977_v10 = vmul.f32 %v9974_v7, %v9974_v7  ;;  %v1238_v57 = vadd.f32 %v1237_v19, %v1236_v6  ;;  %v10021_v20 = vsub.f32 %v7420_v60, %v9346_v36  ;;  %v7421_v9 = vld [vmem:[%s14201_s0 + $0x620] sm:$0xff] }
 0x149   :  { %14626 = vst [vmem:[#allocation171_spill] sm:$0xff] %v10010_v3  ;;  %14627 = vst [vmem:[#allocation172_spill] sm:$0xff] %v10014_v13  ;;  %v978_v31 = vmul.f32 %v9980_v58, %v9980_v58  ;;  %v1262_v43 = vadd.f32 %v1261_v63, %v987_v24  ;;  %v10029_v19 = vsub.f32 %v7421_v9, %v9645_v55  ;;  %v7423_v24 = vld [vmem:[%s14201_s0 + $0x630] sm:$0xff] }
 0x14a   :  { %14628 = vst [vmem:[#allocation173_spill] sm:$0xff] %v10021_v20  ;;  %v1250_v5 = vadd.f32 %v977_v10, %v976_v12  ;;  %v10035_v6 = vsub.f32 %v7422_v22, %v9645_v55  ;;  %1239 = vadd.xlane.f32.xlu1 %v1238_v57  ;;  %v979_v36 = vmul.f32 %v9994_v29, %v9994_v29  ;;  %v7424_v12 = vld [vmem:[%s14201_s0 + $0x638] sm:$0xff]  ;;  %v10053_v10 = vpop.permute.xlu0 %1966  ;;  %v7425_v58 = vld [vmem:[%s14201_s0 + $0x650] sm:$0xff]  ;;  %v7426_v29 = vld [vmem:[%s14201_s0 + $0x640] sm:$0xff] }
 0x14b   :  { %14629 = vst [vmem:[#allocation174_spill] sm:$0xff] %v10029_v19  ;;  %v980_v60 = vmul.f32 %v10000_v38, %v10000_v38  ;;  %v10045_v9 = vsub.f32 %v7423_v24, %v9645_v55  ;;  %v10051_v63 = vsub.f32 %v7424_v12, %v9645_v55  ;;  %14633 = vst [vmem:[#allocation178_spill] sm:$0xff] %v10053_v10  ;;  %v10083_v10 = vpop.permute.xlu1 %1961 }
 0x14c   :  { %14630 = vst [vmem:[#allocation175_spill] sm:$0xff] %v10035_v6  ;;  %v1263_v57 = vadd.f32 %v1262_v43, %v988_v49  ;;  %v982_v22 = vmul.f32 %v10010_v3, %v10010_v3  ;;  %v1251_v38 = vadd.f32 %v1250_v5, %v978_v31  ;;  %v10061_v24 = vsub.f32 %v7425_v58, %v9645_v55  ;;  %v7427_v58 = vld [vmem:[%s14201_s0 + $0x648] sm:$0xff] }
 0x14d   :  { %14631 = vst [vmem:[#allocation176_spill] sm:$0xff] %v10045_v9  ;;  %14632 = vst [vmem:[#allocation177_spill] sm:$0xff] %v10051_v63  ;;  %v10067_v12 = vsub.f32 %v7426_v29, %v9645_v55  ;;  %v997_v49 = vmul.f32 %v10029_v19, %v10029_v19  ;;  %v998_v5 = vmul.f32 %v10035_v6, %v10035_v6 }
 0x14e   :  { %14634 = vst [vmem:[#allocation179_spill] sm:$0xff] %v10061_v24  ;;  %v999_v31 = vmul.f32 %v10045_v9, %v10045_v9  ;;  %v1265_v43 = vadd.f32 %v1264_v2, %v1263_v57  ;;  %v1252_v3 = vadd.f32 %v1251_v38, %v979_v36  ;;  %v10079_v7 = vsub.f32 %v7427_v58, %v9645_v55  ;;  %v7428_v2 = vld [vmem:[%s14201_s0 + $0x5e8] sm:$0xff]  ;;  %v7429_v55 = vld [vmem:[%s14201_s0 + $0x5f0] sm:$0xff] }
 0x14f   :  { %14635 = vst [vmem:[#allocation180_spill] sm:$0xff] %v10067_v12  ;;  %v1000_v29 = vmul.f32 %v10051_v63, %v10051_v63  ;;  %14637 = vst [vmem:[#allocation182_spill] sm:$0xff] %v10083_v10  ;;  %v1003_v19 = vmul.f32 %v10061_v24, %v10061_v24  ;;  %v1277_v6 = vadd.f32 %v998_v5, %v997_v49  ;;  %v1255_v49 = vsel %vm261_vm0, %v982_v22, 0.0  ;;  %v7430_v5 = vld [vmem:[%s14201_s0 + $0x5f8] sm:$0xff]  ;;  %v10122_v22 = vpop.permute.xlu0 %1976 }
 0x150   :  { %14636 = vst [vmem:[#allocation181_spill] sm:$0xff] %v10079_v7  ;;  %v10091_v38 = vsub.f32 %v7428_v2, %v9469_v45  ;;  %v10097_v36 = vsub.f32 %v7429_v55, %v9469_v45  ;;  %1266 = vadd.xlane.f32.xlu0 %v1265_v43  ;;  %v981_v57 = vmul.f32 %v10021_v20, %v10021_v20  ;;  %v7431_v43 = vld [vmem:[%s14201_s0 + $0x600] sm:$0xff]  ;;  %14643 = vst [vmem:[#allocation188_spill] sm:$0xff] %v10122_v22 }
 0x151   :  { %v1253_v58 = vadd.f32 %v1252_v3, %v980_v60  ;;  %v10106_v2 = vsub.f32 %v7430_v5, %v9469_v45  ;;  %v1001_v24 = vmul.f32 %v10067_v12, %v10067_v12  ;;  %v1278_v9 = vadd.f32 %v1277_v6, %v999_v31  ;;  %v7432_v3 = vld [vmem:[%s14201_s0 + $0x608] sm:$0xff]  ;;  %v7433_v6 = vld [vmem:[%s14201_s0 + $0x610] sm:$0xff] }
 0x152   :  { %14638 = vst [vmem:[#allocation183_spill] sm:$0xff] %v10091_v38  ;;  %14639 = vst [vmem:[#allocation184_spill] sm:$0xff] %v10097_v36  ;;  %v10114_v55 = vsub.f32 %v7431_v43, %v9469_v45  ;;  %v10120_v60 = vsub.f32 %v7432_v3, %v9469_v45  ;;  %v10128_v31 = vsub.f32 %v7433_v6, %v9469_v45  ;;  %v1282_v63 = vsel %vm261_vm0, %v1003_v19, 0.0  ;;  %v10151_v19 = vpop.permute.xlu1 %1971 }
 0x153   :  { %14640 = vst [vmem:[#allocation185_spill] sm:$0xff] %v10106_v2  ;;  %v1254_v5 = vadd.f32 %v1253_v58, %v981_v57  ;;  %v990_v43 = vmul.f32 %v10091_v38, %v10091_v38  ;;  %v991_v12 = vmul.f32 %v10097_v36, %v10097_v36  ;;  %v1002_v3 = vmul.f32 %v10079_v7, %v10079_v7  ;;  %v7434_v57 = vld [vmem:[%s14201_s0 + $0x618] sm:$0xff]  ;;  %v7435_v36 = vld [vmem:[%s14201_s0 + $0x690] sm:$0xff] }
 0x154   :  { %14641 = vst [vmem:[#allocation186_spill] sm:$0xff] %v10114_v55  ;;  %14642 = vst [vmem:[#allocation187_spill] sm:$0xff] %v10120_v60  ;;  %v1279_v20 = vadd.f32 %v1278_v9, %v1000_v29  ;;  %v10141_v58 = vsub.f32 %v7434_v57, %v9469_v45  ;;  %v992_v38 = vmul.f32 %v10106_v2, %v10106_v2  ;;  %v7436_v45 = vld [vmem:[%s14201_s0 + $0x698] sm:$0xff]  ;;  %v7439_v7 = vld [vmem:[%s14201_s0 + $0x6b0] sm:$0xff] }
 0x155   :  { %14644 = vst [vmem:[#allocation189_spill] sm:$0xff] %v10128_v31  ;;  %v1256_v6 = vadd.f32 %v1255_v49, %v1254_v5  ;;  %v1268_v22 = vadd.f32 %v991_v12, %v990_v43  ;;  %v10149_v9 = vsub.f32 %v7435_v36, %v9985_v59  ;;  %14647 = vst [vmem:[#allocation192_spill] sm:$0xff] %v10151_v19  ;;  %v7437_v12 = vld [vmem:[%s14201_s0 + $0x6a0] sm:$0xff]  ;;  %v7438_v36 = vld [vmem:[%s14201_s0 + $0x6a8] sm:$0xff] }
 0x156   :  { %14645 = vst [vmem:[#allocation190_spill] sm:$0xff] %v10141_v58  ;;  %v1280_v29 = vadd.f32 %v1279_v20, %v1001_v24  ;;  %v10157_v49 = vsub.f32 %v7436_v45, %v9985_v59  ;;  %v10163_v5 = vsub.f32 %v7437_v12, %v9985_v59  ;;  %v10169_v20 = vsub.f32 %v7438_v36, %v9985_v59 }
 0x157   :  { %14646 = vst [vmem:[#allocation191_spill] sm:$0xff] %v10149_v9  ;;  %1257 = vadd.xlane.f32.xlu1 %v1256_v6  ;;  %v993_v24 = vmul.f32 %v10114_v55, %v10114_v55  ;;  %v994_v43 = vmul.f32 %v10120_v60, %v10120_v60  ;;  %v995_v57 = vmul.f32 %v10128_v31, %v10128_v31  ;;  %v10187_v55 = vpop.permute.xlu0 %1986  ;;  %v7441_v31 = vld [vmem:[%s14201_s0 + $0x6b8] sm:$0xff] }
 0x158   :  { %14648 = vst [vmem:[#allocation193_spill] sm:$0xff] %v10157_v49  ;;  %14649 = vst [vmem:[#allocation194_spill] sm:$0xff] %v10163_v5  ;;  %v1269_v45 = vadd.f32 %v1268_v22, %v992_v38  ;;  %v1281_v12 = vadd.f32 %v1280_v29, %v1002_v3  ;;  %v10181_v2 = vsub.f32 %v7439_v7, %v9985_v59  ;;  %v7440_v22 = vld [vmem:[%s14201_s0 + $0x6c0] sm:$0xff] }
 0x159   :  { %14650 = vst [vmem:[#allocation195_spill] sm:$0xff] %v10169_v20  ;;  %v1011_v6 = vmul.f32 %v10149_v9, %v10149_v9  ;;  %v1012_v36 = vmul.f32 %v10157_v49, %v10157_v49  ;;  %14652 = vst [vmem:[#allocation197_spill] sm:$0xff] %v10187_v55  ;;  %v996_v60 = vmul.f32 %v10141_v58, %v10141_v58 }
 0x15a   :  { %14651 = vst [vmem:[#allocation196_spill] sm:$0xff] %v10181_v2  ;;  %v1270_v38 = vadd.f32 %v1269_v45, %v993_v24  ;;  %v10195_v3 = vsub.f32 %v7440_v22, %v9985_v59  ;;  %v1013_v7 = vmul.f32 %v10163_v5, %v10163_v5  ;;  %v1283_v29 = vadd.f32 %v1282_v63, %v1281_v12  ;;  %v7442_v22 = vld [vmem:[%s14201_s0 + $0x658] sm:$0xff]  ;;  %v7443_v63 = vld [vmem:[%s14201_s0 + $0x660] sm:$0xff] }
 0x15b   :  { %v10203_v9 = vsub.f32 %v7441_v31, %v9985_v59  ;;  %v1014_v24 = vmul.f32 %v10169_v20, %v10169_v20  ;;  %v1295_v45 = vadd.f32 %v1012_v36, %v1011_v6  ;;  %v10211_v49 = vsub.f32 %v7442_v22, %v9590_v11  ;;  %v7444_v59 = vld [vmem:[%s14201_s0 + $0x668] sm:$0xff] }
 0x15c   :  { %14653 = vst [vmem:[#allocation198_spill] sm:$0xff] %v10195_v3  ;;  %v1271_v58 = vadd.f32 %v1270_v38, %v994_v43  ;;  %v10217_v12 = vsub.f32 %v7443_v63, %v9590_v11  ;;  %v10223_v31 = vsub.f32 %v7444_v59, %v9590_v11  ;;  %v10225_v43 = vpop.permute.xlu1 %1981  ;;  %v576_v6 = vmul.f32 0.0012755102, %v9399_v41  ;;  %1284 = vadd.xlane.f32.xlu0 %v1283_v29  ;;  %v7445_v41 = vld [vmem:[%s14201_s0 + $0x670] sm:$0xff] }
 0x15d   :  { %14654 = vst [vmem:[#allocation199_spill] sm:$0xff] %v10203_v9  ;;  %14655 = vst [vmem:[#allocation200_spill] sm:$0xff] %v10211_v49  ;;  %v1015_v36 = vmul.f32 %v10181_v2, %v10181_v2  ;;  %v1296_v38 = vadd.f32 %v1295_v45, %v1013_v7  ;;  %v1273_v63 = vsel %vm261_vm0, %v996_v60, 0.0  ;;  %v1017_v5 = vmul.f32 %v10195_v3, %v10195_v3  ;;  %v7446_v7 = vld [vmem:[%s14201_s0 + $0x678] sm:$0xff] }
 0x15e   :  { %14656 = vst [vmem:[#allocation201_spill] sm:$0xff] %v10217_v12  ;;  %14657 = vst [vmem:[#allocation202_spill] sm:$0xff] %v10223_v31  ;;  %v1272_v22 = vadd.f32 %v1271_v58, %v995_v57  ;;  %v1004_v20 = vmul.f32 %v10211_v49, %v10211_v49  ;;  %v1016_v59 = vmul.f32 %v10203_v9, %v10203_v9  ;;  %v10245_v58 = vpop.permute.xlu0 %1996 }
 0x15f   :  { %14658 = vst [vmem:[#allocation203_spill] sm:$0xff] %v10225_v43  ;;  %v1297_v55 = vadd.f32 %v1296_v38, %v1014_v24  ;;  %v10241_v29 = vsub.f32 %v7445_v41, %v9590_v11  ;;  %v1005_v60 = vmul.f32 %v10217_v12, %v10217_v12  ;;  %14660 = vst [vmem:[#allocation205_spill] sm:$0xff] %v10245_v58  ;;  %v7447_v41 = vld [vmem:[%s14201_s0 + $0x6c8] sm:$0xff] }
 0x160   :  { %v1274_v57 = vadd.f32 %v1273_v63, %v1272_v22  ;;  %v10251_v45 = vsub.f32 %v7446_v7, %v9590_v11  ;;  %v1006_v24 = vmul.f32 %v10223_v31, %v10223_v31  ;;  %v10258_v2 = vsub.f32 %v7447_v41, %v576_v6  ;;  %v7448_v22 = vld [vmem:[%s14201_s0 + $0x6d0] sm:$0xff]  ;;  %v10277_v41 = vpop.permute.xlu1 %1991  ;;  %v7452_v31 = vld [vmem:[%s14201_s0 + $0x6e0] sm:$0xff] }
 0x161   :  { %14659 = vst [vmem:[#allocation204_spill] sm:$0xff] %v10241_v29  ;;  %v1298_v38 = vadd.f32 %v1297_v55, %v1015_v36  ;;  %v1286_v3 = vadd.f32 %v1005_v60, %v1004_v20  ;;  %v10263_v63 = vsub.f32 %v7448_v22, %v576_v6  ;;  %v1300_v7 = vsel %vm261_vm0, %v1017_v5, 0.0  ;;  %v7449_v55 = vld [vmem:[%s14201_s0 + $0x688] sm:$0xff]  ;;  %v7450_v36 = vld [vmem:[%s14201_s0 + $0x6d8] sm:$0xff]  ;;  %14666 = vst [vmem:[#allocation211_spill] sm:$0xff] %v10277_v41 }
 0x162   :  { %14661 = vst [vmem:[#allocation206_spill] sm:$0xff] %v10251_v45  ;;  %14662 = vst [vmem:[#allocation207_spill] sm:$0xff] %v10258_v2  ;;  %1275 = vadd.xlane.f32.xlu1 %v1274_v57  ;;  %v10270_v20 = vsub.f32 %v7449_v55, %v9590_v11  ;;  %v10275_v60 = vsub.f32 %v7450_v36, %v576_v6  ;;  %v7451_v5 = vld [vmem:[%s14201_s0 + $0x680] sm:$0xff]  ;;  %v1007_v55 = vmul.f32 %v10241_v29, %v10241_v29  ;;  %v10298_v12 = vpop.permute.xlu0 %2006 }
 0x163   :  { %14663 = vst [vmem:[#allocation208_spill] sm:$0xff] %v10263_v63  ;;  %v1299_v22 = vadd.f32 %v1298_v38, %v1016_v59  ;;  %v10283_v57 = vsub.f32 %v7451_v5, %v9590_v11  ;;  %v1287_v9 = vadd.f32 %v1286_v3, %v1006_v24  ;;  %v10290_v36 = vsub.f32 %v7452_v31, %v576_v6  ;;  %v7453_v31 = vld [vmem:[%s14201_s0 + $0x6e8] sm:$0xff] }
 0x164   :  { %14664 = vst [vmem:[#allocation209_spill] sm:$0xff] %v10270_v20  ;;  %14665 = vst [vmem:[#allocation210_spill] sm:$0xff] %v10275_v60  ;;  %v1018_v59 = vmul.f32 %v10258_v2, %v10258_v2  ;;  %v1019_v38 = vmul.f32 %v10263_v63, %v10263_v63  ;;  %v1008_v11 = vmul.f32 %v10251_v45, %v10251_v45 }
 0x165   :  { %14667 = vst [vmem:[#allocation212_spill] sm:$0xff] %v10283_v57  ;;  %14668 = vst [vmem:[#allocation213_spill] sm:$0xff] %v10290_v36  ;;  %v1301_v49 = vadd.f32 %v1300_v7, %v1299_v22  ;;  %v1288_v5 = vadd.f32 %v1287_v9, %v1007_v55  ;;  %v1010_v3 = vmul.f32 %v10270_v20, %v10270_v20  ;;  %v7454_v22 = vld [vmem:[%s14201_s0 + $0x6f8] sm:$0xff] }
 0x166   :  { %14669 = vst [vmem:[#allocation214_spill] sm:$0xff] %v10298_v12  ;;  %v10305_v24 = vsub.f32 %v7453_v31, %v576_v6  ;;  %v1020_v2 = vmul.f32 %v10275_v60, %v10275_v60  ;;  %v1304_v63 = vadd.f32 %v1019_v38, %v1018_v59  ;;  %v1009_v7 = vmul.f32 %v10283_v57, %v10283_v57  ;;  %v7455_v31 = vld [vmem:[%s14201_s0 + $0x6f0] sm:$0xff]  ;;  %v10323_v38 = vpop.permute.xlu1 %2001 }
 0x167   :  { %1302 = vadd.xlane.f32.xlu0 %v1301_v49  ;;  %v1289_v9 = vadd.f32 %v1288_v5, %v1008_v11  ;;  %v10314_v55 = vsub.f32 %v7454_v22, %v576_v6  ;;  %v10319_v20 = vsub.f32 %v7455_v31, %v576_v6  ;;  %v1021_v59 = vmul.f32 %v10290_v36, %v10290_v36  ;;  %v1033_v11 = vpop.xlane.xlu0 %1032 }
 0x168   :  { %14670 = vst [vmem:[#allocation215_spill] sm:$0xff] %v10305_v24  ;;  %v1305_v49 = vadd.f32 %v1304_v63, %v1020_v2  ;;  %14673 = vst [vmem:[#allocation218_spill] sm:$0xff] %v10323_v38  ;;  %v1291_v5 = vsel %vm261_vm0, %v1010_v3, 0.0  ;;  %v1022_v22 = vmul.f32 %v10305_v24, %v10305_v24  ;;  %v1313_v36 = vmul.f32 0.0012755102, %v1033_v11 }
 0x169   :  { %14671 = vst [vmem:[#allocation216_spill] sm:$0xff] %v10314_v55  ;;  %14672 = vst [vmem:[#allocation217_spill] sm:$0xff] %v10319_v20  ;;  %v1290_v45 = vadd.f32 %v1289_v9, %v1009_v7  ;;  %v1024_v29 = vmul.f32 %v10314_v55, %v10314_v55  ;;  %v1023_v6 = vmul.f32 %v10319_v20, %v10319_v20  ;;  %v1882_v20 = vld [vmem:[%s14203_s2 + $0xc8] sm:$0xff] }
 0x16a   :  { %v1306_v57 = vadd.f32 %v1305_v49, %v1021_v59  ;;  %v1042_v2 = vpop.xlane.xlu1 %1041  ;;  %v1377_v3 = vadd.f32 1e-05, %v1313_v36  ;;  %v1884_v36 = vld [vmem:[%s14203_s2 + $0xd8] sm:$0xff] }
 0x16b   :  { %v1292_v60 = vadd.f32 %v1291_v5, %v1290_v45  ;;  %v1309_v7 = vsel %vm261_vm0, %v1024_v29, 0.0  ;;  %v1051_v59 = vpop.xlane.xlu0 %1050  ;;  %v1314_v45 = vmul.f32 0.0012755102, %v1042_v2  ;;  %v1881_v2 = vld [vmem:[%s14203_s2 + $0xc0] sm:$0xff] }
 0x16c   :  { %v1307_v31 = vadd.f32 %v1306_v57, %v1022_v22  ;;  %7168 = vrsqrt.f32 %v1377_v3 }
 0x16d   :  { %1293 = vadd.xlane.f32.xlu1 %v1292_v60  ;;  %v1378_v57 = vadd.f32 1e-05, %v1314_v45  ;;  %v1315_v60 = vmul.f32 0.0012755102, %v1051_v59  ;;  %v1883_v59 = vld [vmem:[%s14203_s2 + $0xd0] sm:$0xff] }
 0x16e   :  { %v1308_v63 = vadd.f32 %v1307_v31, %v1023_v6  ;;  %v1060_v12 = vpop.xlane.xlu1 %1059  ;;  %v1345_v6 = vld [vmem:[%s14202_s1] sm:$0xff] }
 0x16f   :  { %v1069_v11 = vpop.xlane.xlu0 %1068  ;;  %v1316_v31 = vmul.f32 0.0012755102, %v1060_v12 }
 0x170   :  { %v1310_v9 = vadd.f32 %v1309_v7, %v1308_v63  ;;  %v1379_v63 = vadd.f32 1e-05, %v1315_v60  ;;  %v1317_v45 = vmul.f32 0.0012755102, %v1069_v11  ;;  %v1885_v11 = vld [vmem:[%s14203_s2 + $0xe0] sm:$0xff] }
 0x172   :  { %1311 = vadd.xlane.f32.xlu1 %v1310_v9  ;;  %v1078_v49 = vpop.xlane.xlu1 %1077  ;;  %v1380_v9 = vadd.f32 1e-05, %v1316_v31  ;;  %v1346_v31 = vld [vmem:[%s14202_s1 + $0x8] sm:$0xff] }
 0x173   :  { %v1318_v5 = vmul.f32 0.0012755102, %v1078_v49  ;;  %v1087_v7 = vpop.xlane.xlu0 %1086 }
 0x175   :  { %v1382_v22 = vadd.f32 1e-05, %v1318_v5  ;;  %v1886_v5 = vld [vmem:[%s14203_s2 + $0xe8] sm:$0xff] }
 0x176   :  { %v7169_v29 = vpop.eup %7168 }
 0x177   :  { %7170 = vrsqrt.f32 %v1382_v22  ;;  %v1105_v60 = vpop.xlane.xlu0 %1104 }
 0x178   :  { %7172 = vrsqrt.f32 %v1378_v57  ;;  %v1350_v57 = vld [vmem:[%s14202_s1 + $0x28] sm:$0xff] }
 0x179   :  { %v1096_v3 = vpop.xlane.xlu1 %1095  ;;  %7174 = vrsqrt.f32 %v1379_v63 }
 0x17a   :  { %v1320_v49 = vmul.f32 0.0012755102, %v1096_v3  ;;  %7176 = vrsqrt.f32 %v1380_v9  ;;  %v1321_v9 = vmul.f32 0.0012755102, %v1105_v60 }
 0x17c   :  { %v1384_v12 = vadd.f32 1e-05, %v1320_v49 }
 0x17d   :  { %2016 = vperm.xlu0 %6975, %v1882_v20   ;;  %v1441_v20 = vmul.f32 %v7169_v29, %v1345_v6  ;;  %v1319_v6 = vmul.f32 0.0012755102, %v1087_v7  ;;  %v1347_v7 = vld [vmem:[%s14202_s1 + $0x10] sm:$0xff] }
 0x17e   :  { %7178 = vrsqrt.f32 %v1384_v12  ;;  %v1385_v12 = vadd.f32 1e-05, %v1321_v9  ;;  %v1349_v9 = vld [vmem:[%s14202_s1 + $0x20] sm:$0xff] }
 0x17f   :  { %v1123_v3 = vpop.xlane.xlu0 %1122 }
 0x180   :  { %v1323_v55 = vmul.f32 0.0012755102, %v1123_v3 }
 0x181   :  { %2026 = vperm.xlu0 %6975, %v1884_v36   ;;  %v7171_v22 = vpop.eup %7170  ;;  %v1381_v36 = vadd.f32 1e-05, %v1317_v45 }
 0x182   :  { %v7173_v29 = vpop.eup %7172 }
 0x183   :  { %2011 = vperm.xlu1 %6974, %v1881_v2   ;;  %v1446_v2 = vmul.f32 %v7171_v22, %v1350_v57  ;;  %v1442_v63 = vmul.f32 %v7173_v29, %v1346_v31  ;;  %7180 = vrsqrt.f32 %v1381_v36  ;;  %v1387_v31 = vadd.f32 1e-05, %v1323_v55  ;;  %v1354_v55 = vld [vmem:[%s14202_s1 + $0x48] sm:$0xff] }
 0x185   :  { %1475 = vperm.xlu0 %6975, %v1441_v20   ;;  %v1383_v20 = vadd.f32 1e-05, %v1319_v6  ;;  %v1114_v49 = vpop.xlane.xlu1 %1113 }
 0x186   :  { %v1322_v45 = vmul.f32 0.0012755102, %v1114_v49 }
 0x187   :  { %2021 = vperm.xlu1 %6974, %v1883_v59   ;;  %v7175_v59 = vpop.eup %7174  ;;  %7182 = vrsqrt.f32 %v1383_v20 }
 0x188   :  { %v7177_v57 = vpop.eup %7176  ;;  %v1386_v22 = vadd.f32 1e-05, %v1322_v45  ;;  %v1443_v60 = vmul.f32 %v7175_v59, %v1347_v7 }
 0x189   :  { %2036 = vperm.xlu0 %6975, %v1886_v5   ;;  %v1352_v5 = vld [vmem:[%s14202_s1 + $0x38] sm:$0xff]  ;;  %v7179_v29 = vpop.eup %7178 }
 0x18a   :  { %7184 = vrsqrt.f32 %v1386_v22  ;;  %v1141_v36 = vpop.xlane.xlu0 %1140  ;;  %v1448_v6 = vmul.f32 %v7179_v29, %v1352_v5 }
 0x18b   :  { %2031 = vperm.xlu1 %6974, %v1885_v11   ;;  %v1348_v11 = vld [vmem:[%s14202_s1 + $0x18] sm:$0xff]  ;;  %7186 = vrsqrt.f32 %v1385_v12  ;;  %v1351_v12 = vld [vmem:[%s14202_s1 + $0x30] sm:$0xff] }
 0x18c   :  { %7188 = vrsqrt.f32 %v1387_v31 }
 0x18d   :  { %1500 = vperm.xlu0 %6975, %v1446_v2   ;;  %v1325_v2 = vmul.f32 0.0012755102, %v1141_v36  ;;  %v7181_v20 = vpop.eup %7180  ;;  %v1353_v36 = vld [vmem:[%s14202_s1 + $0x40] sm:$0xff] }
 0x18e   :  { %v1445_v49 = vmul.f32 %v7181_v20, %v1349_v9  ;;  %v1355_v20 = vld [vmem:[%s14202_s1 + $0x50] sm:$0xff] }
 0x18f   :  { %1480 = vperm.xlu1 %6974, %v1442_v63   ;;  %v1444_v63 = vmul.f32 %v7177_v57, %v1348_v11  ;;  %v1389_v3 = vadd.f32 1e-05, %v1325_v2 }
 0x191   :  { %1510 = vperm.xlu0 %6975, %v1448_v6   ;;  %v1132_v59 = vpop.xlane.xlu1 %1131  ;;  %v7183_v7 = vpop.eup %7182  ;;  %7190 = vrsqrt.f32 %v1389_v3 }
 0x192   :  { %v1324_v45 = vmul.f32 0.0012755102, %v1132_v59  ;;  %v1447_v22 = vmul.f32 %v7183_v7, %v1351_v12  ;;  %v1356_v7 = vld [vmem:[%s14202_s1 + $0x58] sm:$0xff] }
 0x193   :  { %1485 = vperm.xlu1 %6974, %v1443_v60  }
 0x194   :  { %v1388_v5 = vadd.f32 1e-05, %v1324_v45  ;;  %v7185_v57 = vpop.eup %7184  ;;  %v1357_v45 = vld [vmem:[%s14202_s1 + $0x60] sm:$0xff] }
 0x195   :  { %v7187_v60 = vpop.eup %7186  ;;  %v1450_v11 = vmul.f32 %v7185_v57, %v1354_v55 }
 0x196   :  { %7192 = vrsqrt.f32 %v1388_v5  ;;  %v1159_v29 = vpop.xlane.xlu0 %1158  ;;  %v1449_v2 = vmul.f32 %v7187_v60, %v1353_v36 }
 0x197   :  { %1490 = vperm.xlu1 %6974, %v1444_v63   ;;  %v1327_v6 = vmul.f32 0.0012755102, %v1159_v29  ;;  %1520 = vperm.xlu0 %6975, %v1450_v11   ;;  %v7189_v63 = vpop.eup %7188  ;;  %v1359_v29 = vld [vmem:[%s14202_s1 + $0x70] sm:$0xff] }
 0x198   :  { %v1451_v59 = vmul.f32 %v7189_v63, %v1355_v20  ;;  %v1358_v63 = vld [vmem:[%s14202_s1 + $0x68] sm:$0xff] }
 0x199   :  { %v1391_v31 = vadd.f32 1e-05, %v1327_v6 }
 0x19b   :  { %1495 = vperm.xlu1 %6974, %v1445_v49   ;;  %7194 = vrsqrt.f32 %v1391_v31  ;;  %v7191_v49 = vpop.eup %7190 }
 0x19c   :  { %v1150_v9 = vpop.xlane.xlu1 %1149 }
 0x19d   :  { %v1326_v3 = vmul.f32 0.0012755102, %v1150_v9 }
 0x19f   :  { %1505 = vperm.xlu1 %6974, %v1447_v22   ;;  %v1390_v12 = vadd.f32 1e-05, %v1326_v3  ;;  %v1453_v22 = vmul.f32 %v7191_v49, %v1357_v45 }
 0x1a0   :  { %v7193_v55 = vpop.eup %7192 }
 0x1a1   :  { %7196 = vrsqrt.f32 %v1390_v12  ;;  %v1452_v57 = vmul.f32 %v7193_v55, %v1356_v7  ;;  %v1361_v7 = vld [vmem:[%s14202_s1 + $0x80] sm:$0xff] }
 0x1a2   :  { %v1177_v5 = vpop.xlane.xlu0 %1176 }
 0x1a3   :  { %1515 = vperm.xlu1 %6974, %v1449_v2   ;;  %v1329_v60 = vmul.f32 0.0012755102, %v1177_v5  ;;  %1530 = vperm.xlu0 %6975, %v1452_v57  }
 0x1a5   :  { %v1393_v11 = vadd.f32 1e-05, %v1329_v60  ;;  %v7195_v36 = vpop.eup %7194 }
 0x1a6   :  { %v1455_v6 = vmul.f32 %v7195_v36, %v1359_v29 }
 0x1a7   :  { %1525 = vperm.xlu1 %6974, %v1451_v59   ;;  %7198 = vrsqrt.f32 %v1393_v11 }
 0x1a8   :  { %v1168_v31 = vpop.xlane.xlu1 %1167 }
 0x1a9   :  { %v1328_v2 = vmul.f32 0.0012755102, %v1168_v31  ;;  %v1363_v31 = vld [vmem:[%s14202_s1 + $0x90] sm:$0xff] }
 0x1ab   :  { %1535 = vperm.xlu1 %6974, %v1453_v22   ;;  %v1392_v20 = vadd.f32 1e-05, %v1328_v2  ;;  %v7197_v9 = vpop.eup %7196  ;;  %v1360_v22 = vld [vmem:[%s14202_s1 + $0x78] sm:$0xff] }
 0x1ac   :  { %v1454_v59 = vmul.f32 %v7197_v9, %v1358_v63 }
 0x1ad   :  { %7200 = vrsqrt.f32 %v1392_v20  ;;  %v1195_v3 = vpop.xlane.xlu0 %1194 }
 0x1ae   :  { %v1331_v49 = vmul.f32 0.0012755102, %v1195_v3  ;;  %1540 = vperm.xlu0 %6975, %v1454_v59   ;;  %v1362_v59 = vld [vmem:[%s14202_s1 + $0x88] sm:$0xff] }
 0x1af   :  { %1545 = vperm.xlu1 %6974, %v1455_v6  }
 0x1b0   :  { %v1395_v45 = vadd.f32 1e-05, %v1331_v49 }
 0x1b1   :  { %v7199_v12 = vpop.eup %7198 }
 0x1b2   :  { %7202 = vrsqrt.f32 %v1395_v45  ;;  %v1457_v55 = vmul.f32 %v7199_v12, %v1361_v7 }
 0x1b4   :  { %v1186_v5 = vpop.xlane.xlu1 %1185  ;;  %1555 = vperm.xlu1 %6974, %v1457_v55  }
 0x1b5   :  { %v1330_v57 = vmul.f32 0.0012755102, %v1186_v5  ;;  %v1365_v5 = vld [vmem:[%s14202_s1 + $0xa0] sm:$0xff] }
 0x1b7   :  { %v1394_v60 = vadd.f32 1e-05, %v1330_v57  ;;  %v7201_v29 = vpop.eup %7200 }
 0x1b8   :  { %v1456_v36 = vmul.f32 %v7201_v29, %v1360_v22 }
 0x1b9   :  { %7204 = vrsqrt.f32 %v1394_v60  ;;  %v1213_v11 = vpop.xlane.xlu0 %1212 }
 0x1ba   :  { %v1333_v6 = vmul.f32 0.0012755102, %v1213_v11  ;;  %1550 = vperm.xlu0 %6975, %v1456_v36   ;;  %v1364_v36 = vld [vmem:[%s14202_s1 + $0x98] sm:$0xff] }
 0x1bc   :  { %v1397_v2 = vadd.f32 1e-05, %v1333_v6  ;;  %v7203_v63 = vpop.eup %7202 }
 0x1bd   :  { %v1459_v20 = vmul.f32 %v7203_v63, %v1363_v31 }
 0x1be   :  { %7206 = vrsqrt.f32 %v1397_v2 }
 0x1bf   :  { %v1204_v9 = vpop.xlane.xlu1 %1203  ;;  %1565 = vperm.xlu1 %6974, %v1459_v20  }
 0x1c0   :  { %v1332_v3 = vmul.f32 0.0012755102, %v1204_v9  ;;  %v1367_v9 = vld [vmem:[%s14202_s1 + $0xb0] sm:$0xff] }
 0x1c2   :  { %v1396_v49 = vadd.f32 1e-05, %v1332_v3 }
 0x1c3   :  { %v7205_v7 = vpop.eup %7204 }
 0x1c4   :  { %7208 = vrsqrt.f32 %v1396_v49  ;;  %v1458_v12 = vmul.f32 %v7205_v7, %v1362_v59 }
 0x1c5   :  { %v1231_v45 = vpop.xlane.xlu0 %1230 }
 0x1c6   :  { %v1335_v55 = vmul.f32 0.0012755102, %v1231_v45  ;;  %1560 = vperm.xlu0 %6975, %v1458_v12  }
 0x1c8   :  { %v1399_v57 = vadd.f32 1e-05, %v1335_v55  ;;  %v7207_v22 = vpop.eup %7206  ;;  %v1366_v55 = vld [vmem:[%s14202_s1 + $0xa8] sm:$0xff] }
 0x1c9   :  { %v1461_v60 = vmul.f32 %v7207_v22, %v1365_v5 }
 0x1ca   :  { %7210 = vrsqrt.f32 %v1399_v57 }
 0x1cb   :  { %1575 = vperm.xlu1 %6974, %v1461_v60  }
 0x1cc   :  { %v1222_v29 = vpop.xlane.xlu1 %1221 }
 0x1cd   :  { %v1334_v11 = vmul.f32 0.0012755102, %v1222_v29 }
 0x1ce   :  { %v7209_v31 = vpop.eup %7208 }
 0x1cf   :  { %v1398_v6 = vadd.f32 1e-05, %v1334_v11  ;;  %v1460_v63 = vmul.f32 %v7209_v31, %v1364_v36  ;;  %v1369_v11 = vld [vmem:[%s14202_s1 + $0xc0] sm:$0xff] }
 0x1d1   :  { %7212 = vrsqrt.f32 %v1398_v6  ;;  %1570 = vperm.xlu0 %6975, %v1460_v63   ;;  %v1368_v63 = vld [vmem:[%s14202_s1 + $0xb8] sm:$0xff] }
 0x1d2   :  { %v1249_v2 = vpop.xlane.xlu0 %1248 }
 0x1d3   :  { %v1337_v20 = vmul.f32 0.0012755102, %v1249_v2 }
 0x1d4   :  { %v7211_v59 = vpop.eup %7210 }
 0x1d5   :  { %v1401_v3 = vadd.f32 1e-05, %v1337_v20  ;;  %v1463_v7 = vmul.f32 %v7211_v59, %v1367_v9 }
 0x1d7   :  { %7214 = vrsqrt.f32 %v1401_v3  ;;  %v1240_v49 = vpop.xlane.xlu1 %1239  ;;  %1585 = vperm.xlu1 %6974, %v1463_v7   ;;  %v1371_v7 = vld [vmem:[%s14202_s1 + $0xd0] sm:$0xff] }
 0x1d8   :  { %v1336_v45 = vmul.f32 0.0012755102, %v1240_v49 }
 0x1da   :  { %v1400_v12 = vadd.f32 1e-05, %v1336_v45 }
 0x1db   :  { %v7213_v5 = vpop.eup %7212 }
 0x1dc   :  { %7216 = vrsqrt.f32 %v1400_v12  ;;  %v1462_v60 = vmul.f32 %v7213_v5, %v1366_v55 }
 0x1dd   :  { %v1267_v57 = vpop.xlane.xlu0 %1266 }
 0x1de   :  { %v1339_v22 = vmul.f32 0.0012755102, %v1267_v57  ;;  %1580 = vperm.xlu0 %6975, %v1462_v60   ;;  %v1370_v60 = vld [vmem:[%s14202_s1 + $0xc8] sm:$0xff] }
 0x1e0   :  { %v1403_v29 = vadd.f32 1e-05, %v1339_v22 }
 0x1e1   :  { %v7215_v36 = vpop.eup %7214 }
 0x1e2   :  { %7218 = vrsqrt.f32 %v1403_v29  ;;  %v1465_v31 = vmul.f32 %v7215_v36, %v1369_v11 }
 0x1e4   :  { %v1258_v6 = vpop.xlane.xlu1 %1257  ;;  %1595 = vperm.xlu1 %6974, %v1465_v31  }
 0x1e5   :  { %v1338_v2 = vmul.f32 0.0012755102, %v1258_v6 }
 0x1e6   :  { %v7217_v9 = vpop.eup %7216 }
 0x1e7   :  { %v1402_v20 = vadd.f32 1e-05, %v1338_v2  ;;  %v1464_v59 = vmul.f32 %v7217_v9, %v1368_v63  ;;  %v1373_v2 = vld [vmem:[%s14202_s1 + $0xe0] sm:$0xff] }
 0x1e9   :  { %7220 = vrsqrt.f32 %v1402_v20  ;;  %v1285_v3 = vpop.xlane.xlu0 %1284  ;;  %1590 = vperm.xlu0 %6975, %v1464_v59  }
 0x1ea   :  { %v1341_v49 = vmul.f32 0.0012755102, %v1285_v3 }
 0x1ec   :  { %v1405_v45 = vadd.f32 1e-05, %v1341_v49  ;;  %v7219_v12 = vpop.eup %7218  ;;  %v1372_v49 = vld [vmem:[%s14202_s1 + $0xd8] sm:$0xff] }
 0x1ed   :  { %v1467_v5 = vmul.f32 %v7219_v12, %v1371_v7 }
 0x1ee   :  { %7222 = vrsqrt.f32 %v1405_v45 }
 0x1ef   :  { %v1276_v55 = vpop.xlane.xlu1 %1275  ;;  %1605 = vperm.xlu1 %6974, %v1467_v5  }
 0x1f0   :  { %v1340_v57 = vmul.f32 0.0012755102, %v1276_v55 }
 0x1f2   :  { %v1404_v22 = vadd.f32 1e-05, %v1340_v57 }
 0x1f3   :  { %v7221_v29 = vpop.eup %7220 }
 0x1f4   :  { %7224 = vrsqrt.f32 %v1404_v22  ;;  %v1303_v11 = vpop.xlane.xlu0 %1302  ;;  %v1466_v6 = vmul.f32 %v7221_v29, %v1370_v60  ;;  %v1375_v22 = vld [vmem:[%s14202_s1 + $0xf0] sm:$0xff] }
 0x1f5   :  { %v1343_v36 = vmul.f32 0.0012755102, %v1303_v11 }
 0x1f6   :  { %1600 = vperm.xlu0 %6975, %v1466_v6  }
 0x1f7   :  { %v1407_v31 = vadd.f32 1e-05, %v1343_v36 }
 0x1f8   :  { %v7223_v63 = vpop.eup %7222 }
 0x1f9   :  { %7226 = vrsqrt.f32 %v1407_v31  ;;  %v1469_v9 = vmul.f32 %v7223_v63, %v1373_v2  ;;  %v1374_v2 = vld [vmem:[%s14202_s1 + $0xe8] sm:$0xff]  ;;  %v1887_v63 = vld [vmem:[%s14203_s2 + $0xf0] sm:$0xff] }
 0x1fa   :  { %v1294_v20 = vpop.xlane.xlu1 %1293 }
 0x1fb   :  { %v1342_v3 = vmul.f32 0.0012755102, %v1294_v20  ;;  %1615 = vperm.xlu1 %6974, %v1469_v9  }
 0x1fc   :  { %v10435_v59 = vpop.permute.xlu0 %2016 }
 0x1fd   :  { %v1406_v7 = vadd.f32 1e-05, %v1342_v3 }
 0x1fe   :  { %v7225_v45 = vpop.eup %7224 }
 0x1ff   :  { %7228 = vrsqrt.f32 %v1406_v7  ;;  %v1312_v12 = vpop.xlane.xlu1 %1311  ;;  %v1468_v55 = vmul.f32 %v7225_v45, %v1372_v49 }
 0x200   :  { %v1344_v5 = vmul.f32 0.0012755102, %v1312_v12  ;;  %v10440_v57 = vpop.permute.xlu0 %2026 }
 0x201   :  { %1610 = vperm.xlu0 %6975, %v1468_v55  }
 0x202   :  { %v1408_v60 = vadd.f32 1e-05, %v1344_v5  ;;  %v1376_v5 = vld [vmem:[%s14202_s1 + $0xf8] sm:$0xff] }
 0x203   :  { %v7227_v29 = vpop.eup %7226  ;;  %v10445_v11 = vpop.permute.xlu1 %2011 }
 0x204   :  { %7230 = vrsqrt.f32 %v1408_v60  ;;  %v1471_v36 = vmul.f32 %v7227_v29, %v1375_v22  ;;  %v1476_v6 = vpop.permute.xlu0 %1475 }
 0x205   :  { %v1634_v9 = vmul.f32 %v1476_v6, %v8445_v44  ;;  %v1636_v3 = vmul.f32 %v1476_v6, %v8460_v50  ;;  %v1633_v49 = vmul.f32 %v1476_v6, %v8440_v42  ;;  %v1635_v45 = vmul.f32 %v1476_v6, %v8450_v46 }
 0x206   :  { %1625 = vperm.xlu1 %6974, %v1471_v36  }
 0x207   :  { %v10447_v31 = vpop.permute.xlu1 %2021  ;;  %v2050_v44 = vadd.f32 %v9466_v14, %v1634_v9  ;;  %v2052_v50 = vadd.f32 %v9466_v14, %v1636_v3  ;;  %v2049_v42 = vadd.f32 %v9466_v14, %v1633_v49  ;;  %v2051_v60 = vadd.f32 %v9466_v14, %v1635_v45 }
 0x208   :  { %v10455_v20 = vpop.permute.xlu0 %2036  ;;  %v10481_v9 = vmul.f32 %v1476_v6, %v8470_v54  ;;  %v10484_v3 = vmul.f32 %v1476_v6, %v8465_v52  ;;  %v10487_v49 = vmul.f32 %v1476_v6, %v8475_v56 }
 0x209   :  { %14674 = vst [vmem:[#allocation219_spill] sm:$0xff] %v10455_v20  ;;  %v7229_v7 = vpop.eup %7228  ;;  %v2274_v45 = vmax.f32 %v2050_v44, 0.0 }
 0x20a   :  { %v1470_v12 = vmul.f32 %v7229_v7, %v1374_v2  ;;  %2041 = vperm.xlu1 %6974, %v1887_v63  }
 0x20b   :  { %v10461_v55 = vpop.permute.xlu1 %2031 }
 0x20c   :  { %1620 = vperm.xlu0 %6975, %v1470_v12   ;;  %v10466_v22 = vpop.permute.xlu0 %1500  ;;  %v2276_v12 = vmax.f32 %v2052_v50, 0.0 }
 0x20d   :  { %v1669_v46 = vmul.f32 %v10466_v22, %v8766_v53  ;;  %v1671_v29 = vmul.f32 %v10466_v22, %v8780_v47  ;;  %v1668_v36 = vmul.f32 %v10466_v22, %v8757_v28  ;;  %v1670_v63 = vmul.f32 %v10466_v22, %v8774_v30 }
 0x20e   :  { %v7231_v2 = vpop.eup %7230 }
 0x20f   :  { %v1472_v53 = vmul.f32 %v7231_v2, %v1376_v5  ;;  %v10489_v7 = vpop.permute.xlu1 %1480  ;;  %v10492_v47 = vadd.f32 %v9706_v18, %v1669_v46  ;;  %v10495_v28 = vadd.f32 %v9706_v18, %v1671_v29  ;;  %v10498_v30 = vadd.f32 %v9706_v18, %v1668_v36  ;;  %v1888_v29 = vld [vmem:[%s14203_s2 + $0xf8] sm:$0xff] }
 0x210   :  { %v1641_v54 = vmul.f32 %v10489_v7, %v8530_v25  ;;  %v1643_v52 = vmul.f32 %v10489_v7, %v8557_v51  ;;  %v1640_v56 = vmul.f32 %v10489_v7, %v8525_v23  ;;  %v1642_v6 = vmul.f32 %v10489_v7, %v8535_v27 }
 0x211   :  { %1630 = vperm.xlu0 %6975, %v1472_v53   ;;  %v2273_v5 = vmax.f32 %v2049_v42, 0.0  ;;  %v2275_v46 = vmax.f32 %v2051_v60, 0.0  ;;  %v10521_v42 = vadd.f32 %v9706_v18, %v1670_v63 }
 0x212   :  { %v2057_v25 = vadd.f32 %v9531_v34, %v1641_v54  ;;  %v2059_v36 = vadd.f32 %v9531_v34, %v1643_v52  ;;  %v2056_v51 = vadd.f32 %v9531_v34, %v1640_v56  ;;  %v2058_v23 = vadd.f32 %v9531_v34, %v1642_v6 }
 0x213   :  { %v10515_v2 = vpop.permute.xlu1 %1485 }
 0x214   :  { %v2281_v60 = vmax.f32 %v2057_v25, 0.0  ;;  %v2283_v53 = vmax.f32 %v2059_v36, 0.0  ;;  %v2280_v54 = vmax.f32 %v2056_v51, 0.0  ;;  %v2282_v24 = vmax.f32 %v2058_v23, 0.0 }
 0x215   :  { %2046 = vperm.xlu0 %6975, %v1888_v29   ;;  %v1648_v52 = vmul.f32 %v10515_v2, %v8435_v39  ;;  %v1650_v56 = vmul.f32 %v10515_v2, %v8486_v62  ;;  %v1647_v6 = vmul.f32 %v10515_v2, %v8430_v37  ;;  %v1649_v50 = vmul.f32 %v10515_v2, %v8455_v48  ;;  %v10537_v37 = vpop.permute.xlu0 %1510 }
 0x216   :  { %v2626_v44 = vpack.c.bf16 %v2281_v60, %v2274_v45  ;;  %v2628_v63 = vpack.c.bf16 %v2283_v53, %v2276_v12  ;;  %v2625_v27 = vpack.c.bf16 %v2280_v54, %v2273_v5  ;;  %v2627_v25 = vpack.c.bf16 %v2282_v24, %v2275_v46 }
 0x217   :  { %v10531_v36 = vpop.permute.xlu1 %1490  ;;  %v2064_v29 = vadd.f32 %v9596_v17, %v1648_v52  ;;  %v2066_v51 = vadd.f32 %v9596_v17, %v1650_v56  ;;  %v2063_v39 = vadd.f32 %v9596_v17, %v1647_v6  ;;  %v2065_v62 = vadd.f32 %v9596_v17, %v1649_v50 }
 0x218   :  { %3377 = vmatprep.subr.bf16.mxu0 %v2626_v44  ;;  %4050 = vmatprep.subr.bf16.mxu1 %v2628_v63  ;;  %v1655_v48 = vmul.f32 %v10531_v36, %v8640_v4  ;;  %v1657_v24 = vmul.f32 %v10531_v36, %v8660_v21  ;;  %v1654_v45 = vmul.f32 %v10531_v36, %v8634_v1  ;;  %v2310_v12 = vmax.f32 %v10521_v42, 0.0 }
 0x219   :  { %3378 = vmatpush1.bf16.msra.mxu0 %v2625_v27  ;;  %4051 = vmatpush1.bf16.msra.mxu1 %v2627_v25  ;;  %v2288_v5 = vmax.f32 %v2064_v29, 0.0  ;;  %v2290_v46 = vmax.f32 %v2066_v51, 0.0  ;;  %v2287_v23 = vmax.f32 %v2063_v39, 0.0  ;;  %v1656_v44 = vmul.f32 %v10531_v36, %v8650_v15  ;;  %v14675_v25 = vld [vmem:[#allocation13_spill] sm:$0xff]  ;;  %v14676_v51 = vld [vmem:[#allocation11_spill] sm:$0xff] }
 0x21a   :  { %v2071_v50 = vadd.f32 %v9660_v32, %v1655_v48  ;;  %v2073_v4 = vadd.f32 %v9660_v32, %v1657_v24  ;;  %v2070_v60 = vadd.f32 %v9660_v32, %v1654_v45  ;;  %v2289_v21 = vmax.f32 %v2065_v62, 0.0  ;;  %v14678_v45 = vld [vmem:[#allocation135_spill] sm:$0xff] }
 0x21b   :  { %v10551_v53 = vpop.permute.xlu1 %1495  ;;  %v2072_v1 = vadd.f32 %v9660_v32, %v1656_v44  ;;  %v1683_v27 = vmul.f32 %v10537_v37, %v8885_v35  ;;  %v1685_v42 = vmul.f32 %v10537_v37, %v8899_v40  ;;  %v1682_v15 = vmul.f32 %v10537_v37, %v8879_v16  ;;  %v14677_v35 = vld [vmem:[#allocation12_spill] sm:$0xff]  ;;  %v6976_v40 = vld [vmem:[#allocation2 + $0x4] ss:$8 sps:$4 sm:$0xff]  }
 0x21c   :  { %v2295_v54 = vmax.f32 %v2071_v50, 0.0  ;;  %v2297_v52 = vmax.f32 %v2073_v4, 0.0  ;;  %v2294_v56 = vmax.f32 %v2070_v60, 0.0  ;;  %v1662_v6 = vmul.f32 %v10551_v53, %v8582_v8  ;;  %3409 = vmatprep.mubr.bf16.mxu0 %v6976_v40  ;;  %4082 = vmatprep.mubr.bf16.mxu1 %v6976_v40 }
 0x21d   :  { %v2296_v63 = vmax.f32 %v2072_v1, 0.0  ;;  %v1664_v29 = vmul.f32 %v10551_v53, %v14675_v25  ;;  %v1661_v39 = vmul.f32 %v10551_v53, %v14676_v51  ;;  %v1663_v62 = vmul.f32 %v10551_v53, %v14677_v35  ;;  %v14679_v51 = vld [vmem:[#allocation21_spill] sm:$0xff] }
 0x21e   :  { %v2633_v48 = vpack.c.bf16 %v2295_v54, %v2288_v5  ;;  %v2635_v24 = vpack.c.bf16 %v2297_v52, %v2290_v46  ;;  %v2632_v16 = vpack.c.bf16 %v2294_v56, %v2287_v23  ;;  %v2078_v44 = vadd.f32 %v14678_v45, %v1662_v6  ;;  %v14680_v46 = vld [vmem:[#allocation139_spill] sm:$0xff]  ;;  %v14683_v35 = vld [vmem:[#allocation145_spill] sm:$0xff] }
 0x21f   :  { %v10569_v50 = vpop.permute.xlu1 %1505  ;;  %v2634_v4 = vpack.c.bf16 %v2296_v63, %v2289_v21  ;;  %v2080_v8 = vadd.f32 %v14678_v45, %v1664_v29  ;;  %v2077_v60 = vadd.f32 %v14678_v45, %v1661_v39  ;;  %v2079_v1 = vadd.f32 %v14678_v45, %v1663_v62  ;;  %v14681_v54 = vld [vmem:[#allocation23_spill] sm:$0xff] }
 0x220   :  { %3379 = vmatprep.subr.bf16.mxu0 %v2633_v48  ;;  %4052 = vmatprep.subr.bf16.mxu1 %v2635_v24  ;;  %v2302_v25 = vmax.f32 %v2078_v44, 0.0  ;;  %v1676_v5 = vmul.f32 %v10569_v50, %v14679_v51  ;;  %v2099_v23 = vadd.f32 %v14680_v46, %v1683_v27  ;;  %v1678_v52 = vmul.f32 %v10569_v50, %v14681_v54  ;;  %v14686_v51 = vld [vmem:[#allocation20_spill] sm:$0xff]  ;;  %v14688_v54 = vld [vmem:[#allocation37_spill] sm:$0xff] }
 0x221   :  { %3380 = vmatpush1.bf16.msra.mxu0 %v2632_v16  ;;  %4053 = vmatpush1.bf16.msra.mxu1 %v2634_v4  ;;  %v2304_v21 = vmax.f32 %v2080_v8, 0.0  ;;  %v2301_v56 = vmax.f32 %v2077_v60, 0.0  ;;  %v2303_v6 = vmax.f32 %v2079_v1, 0.0  ;;  %v2101_v63 = vadd.f32 %v14680_v46, %v1685_v42  ;;  %v10590_v42 = vpop.permute.xlu0 %1520 }
 0x222   :  { %v14682_v29 = vmax.f32 %v10492_v47, 0.0  ;;  %v2092_v62 = vadd.f32 %v14683_v35, %v1676_v5  ;;  %v2323_v48 = vmax.f32 %v2099_v23, 0.0  ;;  %v2094_v24 = vadd.f32 %v14683_v35, %v1678_v52  ;;  %v14687_v23 = vld [vmem:[#allocation22_spill] sm:$0xff] }
 0x223   :  { %v10584_v27 = vpop.permute.xlu1 %1515  ;;  %v14684_v44 = vmax.f32 %v10495_v28, 0.0  ;;  %v14685_v4 = vmax.f32 %v10498_v30, 0.0  ;;  %v2641_v60 = vpack.c.bf16 %v2310_v12, %v2303_v6  ;;  %v2325_v1 = vmax.f32 %v2101_v63, 0.0  ;;  %v14689_v12 = vld [vmem:[#allocation31_spill] sm:$0xff] }
 0x224   :  { %v2640_v39 = vpack.c.bf16 %v14682_v29, %v2302_v25  ;;  %v2316_v47 = vmax.f32 %v2092_v62, 0.0  ;;  %v2318_v25 = vmax.f32 %v2094_v24, 0.0  ;;  %v1675_v5 = vmul.f32 %v10569_v50, %v14686_v51 }
 0x225   :  { %v2642_v16 = vpack.c.bf16 %v14684_v44, %v2304_v21  ;;  %v2639_v8 = vpack.c.bf16 %v14685_v4, %v2301_v56  ;;  %v2098_v40 = vadd.f32 %v14680_v46, %v1682_v15  ;;  %v1677_v28 = vmul.f32 %v10569_v50, %v14687_v23 }
 0x226   :  { %3381 = vmatprep.subr.bf16.mxu0 %v2640_v39  ;;  %v1684_v30 = vmul.f32 %v10537_v37, %v14688_v54  ;;  %v1690_v52 = vmul.f32 %v10584_v27, %v14689_v12  ;;  %v2647_v21 = vpack.c.bf16 %v2323_v48, %v2316_v47  ;;  %v2649_v56 = vpack.c.bf16 %v2325_v1, %v2318_v25  ;;  %v14690_v39 = vld [vmem:[#allocation49_spill] sm:$0xff]  ;;  %v14692_v48 = vld [vmem:[#allocation51_spill] sm:$0xff] }
 0x227   :  { %4054 = vmatprep.subr.bf16.mxu1 %v2642_v16  ;;  %3382 = vmatpush1.bf16.msra.mxu0 %v2639_v8  ;;  %v2091_v6 = vadd.f32 %v14683_v35, %v1675_v5  ;;  %v2322_v63 = vmax.f32 %v2098_v40, 0.0  ;;  %v2093_v29 = vadd.f32 %v14683_v35, %v1677_v28  ;;  %v1697_v62 = vmul.f32 %v10590_v42, %v14690_v39  ;;  %v14691_v16 = vld [vmem:[#allocation33_spill] sm:$0xff]  ;;  %v10614_v40 = vpop.permute.xlu1 %1525 }
 0x228   :  { %4055 = vmatpush1.bf16.msra.mxu1 %v2641_v60  ;;  %v2100_v15 = vadd.f32 %v14680_v46, %v1684_v30  ;;  %v2106_v24 = vadd.f32 %v9879_v26, %v1690_v52  ;;  %3383 = vmatprep.subr.bf16.mxu0 %v2647_v21  ;;  %v1692_v4 = vmul.f32 %v10584_v27, %v14691_v16  ;;  %v14693_v60 = vld [vmem:[#allocation30_spill] sm:$0xff]  ;;  %v14694_v30 = vld [vmem:[#allocation48_spill] sm:$0xff]  ;;  %v10620_v52 = vpop.permute.xlu0 %1530 }
 0x229   :  { %4056 = vmatprep.subr.bf16.mxu1 %v2649_v56  ;;  %v2315_v44 = vmax.f32 %v2091_v6, 0.0  ;;  %v1699_v8 = vmul.f32 %v10590_v42, %v14692_v48  ;;  %v1689_v1 = vmul.f32 %v10584_v27, %v14693_v60  ;;  %v2317_v47 = vmax.f32 %v2093_v29, 0.0  ;;  %v14695_v29 = vld [vmem:[#allocation32_spill] sm:$0xff] }
 0x22a   :  { %v2324_v25 = vmax.f32 %v2100_v15, 0.0  ;;  %v2113_v51 = vadd.f32 %v9840_v33, %v1697_v62  ;;  %v2330_v5 = vmax.f32 %v2106_v24, 0.0  ;;  %v2108_v28 = vadd.f32 %v9879_v26, %v1692_v4  ;;  %v14696_v24 = vld [vmem:[#allocation50_spill] sm:$0xff] }
 0x22b   :  { %v2646_v23 = vpack.c.bf16 %v2322_v63, %v2315_v44  ;;  %v2115_v54 = vadd.f32 %v9840_v33, %v1699_v8  ;;  %v1696_v12 = vmul.f32 %v10590_v42, %v14694_v30  ;;  %v2105_v6 = vadd.f32 %v9879_v26, %v1689_v1  ;;  %v14697_v8 = vld [vmem:[#allocation42_spill] sm:$0xff]  ;;  %v14699_v30 = vld [vmem:[#allocation44_spill] sm:$0xff] }
 0x22c   :  { %v2648_v21 = vpack.c.bf16 %v2324_v25, %v2317_v47  ;;  %v2337_v56 = vmax.f32 %v2113_v51, 0.0  ;;  %v1691_v15 = vmul.f32 %v10584_v27, %v14695_v29  ;;  %v2332_v39 = vmax.f32 %v2108_v28, 0.0  ;;  %v14698_v51 = vld [vmem:[#allocation63_spill] sm:$0xff]  ;;  %v14701_v29 = vld [vmem:[#allocation157_spill] sm:$0xff] }
 0x22d   :  { %3384 = vmatpush1.bf16.msra.mxu0 %v2646_v23  ;;  %v2339_v62 = vmax.f32 %v2115_v54, 0.0  ;;  %v2112_v63 = vadd.f32 %v9840_v33, %v1696_v12  ;;  %v1698_v44 = vmul.f32 %v10590_v42, %v14696_v24  ;;  %v2329_v4 = vmax.f32 %v2105_v6, 0.0  ;;  %v14700_v12 = vld [vmem:[#allocation65_spill] sm:$0xff] }
 0x22e   :  { %4057 = vmatpush1.bf16.msra.mxu1 %v2648_v21  ;;  %v2654_v16 = vpack.c.bf16 %v2337_v56, %v2330_v5  ;;  %v2107_v48 = vadd.f32 %v9879_v26, %v1691_v15  ;;  %v1704_v60 = vmul.f32 %v10614_v40, %v14697_v8  ;;  %v1711_v23 = vmul.f32 %v10620_v52, %v14698_v51 }
 0x22f   :  { %v2656_v1 = vpack.c.bf16 %v2339_v62, %v2332_v39  ;;  %v2336_v47 = vmax.f32 %v2112_v63, 0.0  ;;  %v2114_v25 = vadd.f32 %v9840_v33, %v1698_v44  ;;  %v1706_v5 = vmul.f32 %v10614_v40, %v14699_v30  ;;  %v14702_v39 = vld [vmem:[#allocation41_spill] sm:$0xff]  ;;  %v10642_v63 = vpop.permute.xlu1 %1535 }
 0x230   :  { %3385 = vmatprep.subr.bf16.mxu0 %v2654_v16  ;;  %v2331_v28 = vmax.f32 %v2107_v48, 0.0  ;;  %v2120_v54 = vadd.f32 %v9948_v61, %v1704_v60  ;;  %v1713_v21 = vmul.f32 %v10620_v52, %v14700_v12  ;;  %v2127_v15 = vadd.f32 %v14701_v29, %v1711_v23  ;;  %14703 = vst [vmem:[#allocation13_spill] sm:$0xff] %v10642_v63  ;;  %v14704_v48 = vld [vmem:[#allocation62_spill] sm:$0xff] }
 0x231   :  { %4058 = vmatprep.subr.bf16.mxu1 %v2656_v1  ;;  %v2653_v56 = vpack.c.bf16 %v2336_v47, %v2329_v4  ;;  %v2338_v6 = vmax.f32 %v2114_v25, 0.0  ;;  %v1703_v62 = vmul.f32 %v10614_v40, %v14702_v39  ;;  %v2122_v44 = vadd.f32 %v9948_v61, %v1706_v5  ;;  %v14705_v47 = vld [vmem:[#allocation43_spill] sm:$0xff] }
 0x232   :  { %v2344_v24 = vmax.f32 %v2120_v54, 0.0  ;;  %v2129_v16 = vadd.f32 %v14701_v29, %v1713_v21  ;;  %v1710_v8 = vmul.f32 %v10620_v52, %v14704_v48  ;;  %v2351_v1 = vmax.f32 %v2127_v15, 0.0  ;;  %v14706_v54 = vld [vmem:[#allocation64_spill] sm:$0xff] }
 0x233   :  { %3386 = vmatpush1.bf16.msra.mxu0 %v2653_v56  ;;  %v2655_v60 = vpack.c.bf16 %v2338_v6, %v2331_v28  ;;  %v2119_v4 = vadd.f32 %v9948_v61, %v1703_v62  ;;  %v1705_v25 = vmul.f32 %v10614_v40, %v14705_v47  ;;  %v2346_v51 = vmax.f32 %v2122_v44, 0.0  ;;  %v14707_v56 = vld [vmem:[#allocation56_spill] sm:$0xff]  ;;  %v10657_v6 = vpop.permute.xlu0 %1540  ;;  %v14710_v47 = vld [vmem:[#allocation77_spill] sm:$0xff] }
 0x234   :  { %v2353_v23 = vmax.f32 %v2129_v16, 0.0  ;;  %v2126_v30 = vadd.f32 %v14701_v29, %v1710_v8  ;;  %v1712_v5 = vmul.f32 %v10620_v52, %v14706_v54  ;;  %v2661_v12 = vpack.c.bf16 %v2351_v1, %v2344_v24  ;;  %14708 = vst [vmem:[#allocation11_spill] sm:$0xff] %v10657_v6  ;;  %v14709_v16 = vld [vmem:[#allocation58_spill] sm:$0xff]  ;;  %v14711_v1 = vld [vmem:[#allocation79_spill] sm:$0xff] }
 0x235   :  { %4059 = vmatpush1.bf16.msra.mxu1 %v2655_v60  ;;  %v2343_v21 = vmax.f32 %v2119_v4, 0.0  ;;  %v2121_v39 = vadd.f32 %v9948_v61, %v1705_v25  ;;  %v1718_v28 = vmul.f32 %v10642_v63, %v14707_v56  ;;  %v1720_v48 = vmul.f32 %v10642_v63, %v14709_v16  ;;  %v10667_v25 = vpop.permute.xlu1 %1545  ;;  %v14713_v54 = vld [vmem:[#allocation55_spill] sm:$0xff]  ;;  %v14714_v16 = vld [vmem:[#allocation76_spill] sm:$0xff] }
 0x236   :  { %v2663_v15 = vpack.c.bf16 %v2353_v23, %v2346_v51  ;;  %v2350_v62 = vmax.f32 %v2126_v30, 0.0  ;;  %v2128_v44 = vadd.f32 %v14701_v29, %v1712_v5  ;;  %3387 = vmatprep.subr.bf16.mxu0 %v2661_v12  ;;  %v1725_v24 = vmul.f32 %v10657_v6, %v14710_v47  ;;  %14712 = vst [vmem:[#allocation12_spill] sm:$0xff] %v10667_v25  ;;  %v14716_v29 = vld [vmem:[#allocation78_spill] sm:$0xff] }
 0x237   :  { %v2345_v8 = vmax.f32 %v2121_v39, 0.0  ;;  %v2134_v60 = vadd.f32 %v10014_v13, %v1718_v28  ;;  %v1727_v4 = vmul.f32 %v10657_v6, %v14711_v1  ;;  %v2136_v30 = vadd.f32 %v10014_v13, %v1720_v48 }
 0x238   :  { %4060 = vmatprep.subr.bf16.mxu1 %v2663_v15  ;;  %v2660_v51 = vpack.c.bf16 %v2350_v62, %v2343_v21  ;;  %v2352_v23 = vmax.f32 %v2128_v44, 0.0  ;;  %v1717_v5 = vmul.f32 %v10642_v63, %v14713_v54  ;;  %v2141_v12 = vadd.f32 %v9982_v0, %v1725_v24  ;;  %v14715_v21 = vld [vmem:[#allocation57_spill] sm:$0xff] }
 0x239   :  { %v2358_v39 = vmax.f32 %v2134_v60, 0.0  ;;  %v2143_v56 = vadd.f32 %v9982_v0, %v1727_v4  ;;  %v1724_v28 = vmul.f32 %v10657_v6, %v14714_v16  ;;  %v2360_v1 = vmax.f32 %v2136_v30, 0.0  ;;  %v14717_v16 = vld [vmem:[#allocation70_spill] sm:$0xff] }
 0x23a   :  { %3388 = vmatpush1.bf16.msra.mxu0 %v2660_v51  ;;  %v2662_v47 = vpack.c.bf16 %v2352_v23, %v2345_v8  ;;  %v2133_v15 = vadd.f32 %v10014_v13, %v1717_v5  ;;  %v1719_v62 = vmul.f32 %v10642_v63, %v14715_v21  ;;  %v2365_v44 = vmax.f32 %v2141_v12, 0.0  ;;  %v14718_v51 = vld [vmem:[#allocation72_spill] sm:$0xff] }
 0x23b   :  { %v2367_v48 = vmax.f32 %v2143_v56, 0.0  ;;  %v2140_v54 = vadd.f32 %v9982_v0, %v1724_v28  ;;  %v1726_v24 = vmul.f32 %v10657_v6, %v14716_v29  ;;  %v1732_v8 = vmul.f32 %v10667_v25, %v14717_v16  ;;  %v10688_v56 = vpop.permute.xlu1 %1555 }
 0x23c   :  { %4061 = vmatpush1.bf16.msra.mxu1 %v2662_v47  ;;  %v2357_v60 = vmax.f32 %v2133_v15, 0.0  ;;  %v2135_v4 = vadd.f32 %v10014_v13, %v1719_v62  ;;  %v1734_v23 = vmul.f32 %v10667_v25, %v14718_v51  ;;  %v2668_v30 = vpack.c.bf16 %v2365_v44, %v2358_v39  ;;  %v14719_v47 = vld [vmem:[#allocation69_spill] sm:$0xff]  ;;  %v14720_v44 = vld [vmem:[#allocation71_spill] sm:$0xff] }
 0x23d   :  { %v2670_v5 = vpack.c.bf16 %v2367_v48, %v2360_v1  ;;  %v2364_v21 = vmax.f32 %v2140_v54, 0.0  ;;  %v2142_v12 = vadd.f32 %v9982_v0, %v1726_v24  ;;  %v2148_v29 = vadd.f32 %v10083_v10, %v1732_v8  ;;  %v14721_v24 = vld [vmem:[#allocation10_spill] sm:$0xff]  ;;  %v14732_v13 = vld [vmem:[#allocation85_spill] sm:$0xff] }
 0x23e   :  { %v2359_v28 = vmax.f32 %v2135_v4, 0.0  ;;  %v1731_v15 = vmul.f32 %v10667_v25, %v14719_v47  ;;  %v10695_v62 = vadd.f32 %v9466_v14, %v10481_v9  ;;  %3389 = vmatprep.subr.bf16.mxu0 %v2668_v30  ;;  %v2150_v1 = vadd.f32 %v10083_v10, %v1734_v23  ;;  %v14723_v30 = vld [vmem:[#allocation84_spill] sm:$0xff]  ;;  %v14725_v47 = vld [vmem:[#allocation91_spill] sm:$0xff]  ;;  %v14731_v0 = vld [vmem:[#allocation178_spill] sm:$0xff] }
 0x23f   :  { %4062 = vmatprep.subr.bf16.mxu1 %v2670_v5  ;;  %v2667_v16 = vpack.c.bf16 %v2364_v21, %v2357_v60  ;;  %v2366_v39 = vmax.f32 %v2142_v12, 0.0  ;;  %v1733_v48 = vmul.f32 %v10667_v25, %v14720_v44  ;;  %v1645_v4 = vmul.f32 %v10489_v7, %v14721_v24  ;;  %v10711_v60 = vpop.permute.xlu0 %1550  ;;  %v14724_v21 = vld [vmem:[#allocation9_spill] sm:$0xff] }
 0x240   :  { %v2147_v54 = vadd.f32 %v10083_v10, %v1731_v15  ;;  %v10705_v8 = vadd.f32 %v9466_v14, %v10484_v3  ;;  %v10709_v9 = vadd.f32 %v9466_v14, %v10487_v49  ;;  %14722 = vst [vmem:[#allocation135_spill] sm:$0xff] %v10711_v60  ;;  %v1746_v5 = vmul.f32 %v10688_v56, %v14723_v30  ;;  %v14726_v44 = vld [vmem:[#allocation93_spill] sm:$0xff]  ;;  %v14727_v49 = vld [vmem:[#allocation90_spill] sm:$0xff] }
 0x241   :  { %3390 = vmatpush1.bf16.msra.mxu0 %v2667_v16  ;;  %v2669_v51 = vpack.c.bf16 %v2366_v39, %v2359_v28  ;;  %v2149_v23 = vadd.f32 %v10083_v10, %v1733_v48  ;;  %v1644_v12 = vmul.f32 %v10489_v7, %v14724_v21  ;;  %v1739_v3 = vmul.f32 %v10711_v60, %v14725_v47  ;;  %v14728_v16 = vld [vmem:[#allocation92_spill] sm:$0xff]  ;;  %v14729_v48 = vld [vmem:[#allocation86_spill] sm:$0xff]  ;;  %v14730_v10 = vld [vmem:[#allocation83_spill] sm:$0xff] }
 0x242   :  { %v2372_v15 = vmax.f32 %v2148_v29, 0.0  ;;  %v1741_v14 = vmul.f32 %v10711_v60, %v14726_v44  ;;  %v1738_v24 = vmul.f32 %v10711_v60, %v14727_v49  ;;  %v2374_v28 = vmax.f32 %v2150_v1, 0.0 }
 0x243   :  { %4063 = vmatpush1.bf16.msra.mxu1 %v2669_v51  ;;  %v1740_v39 = vmul.f32 %v10711_v60, %v14728_v16  ;;  %v1748_v30 = vmul.f32 %v10688_v56, %v14729_v48  ;;  %v1745_v21 = vmul.f32 %v10688_v56, %v14730_v10  ;;  %v2155_v47 = vadd.f32 %v14731_v0, %v1739_v3 }
 0x244   :  { %v2157_v29 = vadd.f32 %v14731_v0, %v1741_v14  ;;  %v2154_v44 = vadd.f32 %v14731_v0, %v1738_v24  ;;  %v2371_v25 = vmax.f32 %v2147_v54, 0.0  ;;  %v2373_v51 = vmax.f32 %v2149_v23, 0.0  ;;  %v14733_v24 = vld [vmem:[#allocation8_spill] sm:$0xff] }
 0x245   :  { %v2156_v49 = vadd.f32 %v14731_v0, %v1740_v39  ;;  %v2162_v1 = vadd.f32 %v10151_v19, %v1746_v5  ;;  %v1747_v16 = vmul.f32 %v10688_v56, %v14732_v13  ;;  %v2379_v60 = vmax.f32 %v2155_v47, 0.0  ;;  %v10742_v39 = vpop.permute.xlu1 %1565 }
 0x246   :  { %v2381_v48 = vmax.f32 %v2157_v29, 0.0  ;;  %v2378_v6 = vmax.f32 %v2154_v44, 0.0  ;;  %v2061_v10 = vadd.f32 %v9531_v34, %v1645_v4  ;;  %v2164_v3 = vadd.f32 %v10151_v19, %v1748_v30 }
 0x247   :  { %v2380_v61 = vmax.f32 %v2156_v49, 0.0  ;;  %v2161_v14 = vadd.f32 %v10151_v19, %v1745_v21  ;;  %v1646_v54 = vmul.f32 %v10489_v7, %v14733_v24  ;;  %v2675_v23 = vpack.c.bf16 %v2379_v60, %v2372_v15 }
 0x248   :  { %v2677_v5 = vpack.c.bf16 %v2381_v48, %v2374_v28  ;;  %v2674_v0 = vpack.c.bf16 %v2378_v6, %v2371_v25  ;;  %v2278_v13 = vmax.f32 %v10695_v62, 0.0  ;;  %v2277_v47 = vmax.f32 %v10705_v8, 0.0  ;;  %v14734_v6 = vld [vmem:[#allocation98_spill] sm:$0xff]  ;;  %v10752_v62 = vpop.permute.xlu0 %1560  ;;  %v14735_v8 = vld [vmem:[#allocation100_spill] sm:$0xff]  ;;  %v14736_v28 = vld [vmem:[#allocation97_spill] sm:$0xff] }
 0x249   :  { %v2676_v63 = vpack.c.bf16 %v2380_v61, %v2373_v51  ;;  %v2279_v4 = vmax.f32 %v10709_v9, 0.0  ;;  %3391 = vmatprep.subr.bf16.mxu0 %v2675_v23  ;;  %v2386_v30 = vmax.f32 %v2162_v1, 0.0  ;;  %v2163_v21 = vadd.f32 %v10151_v19, %v1747_v16  ;;  %v14738_v51 = vld [vmem:[#allocation107_spill] sm:$0xff]  ;;  %v14739_v16 = vld [vmem:[#allocation104_spill] sm:$0xff]  ;;  %v14740_v48 = vld [vmem:[#allocation106_spill] sm:$0xff] }
 0x24a   :  { %4064 = vmatprep.subr.bf16.mxu1 %v2677_v5  ;;  %v2285_v29 = vmax.f32 %v2061_v10, 0.0  ;;  %v2060_v7 = vadd.f32 %v9531_v34, %v1644_v12  ;;  %3392 = vmatpush1.bf16.msra.mxu0 %v2674_v0  ;;  %v2388_v60 = vmax.f32 %v2164_v3, 0.0  ;;  %v2385_v15 = vmax.f32 %v2161_v14, 0.0  ;;  %v14737_v0 = vld [vmem:[#allocation105_spill] sm:$0xff]  ;;  %v14741_v14 = vld [vmem:[#allocation99_spill] sm:$0xff]  ;;  %v14742_v5 = vld [vmem:[#allocation188_spill] sm:$0xff] }
 0x24b   :  { %4065 = vmatpush1.bf16.msra.mxu1 %v2676_v63  ;;  %v1760_v61 = vmul.f32 %v10742_v39, %v14734_v6  ;;  %v2062_v25 = vadd.f32 %v9531_v34, %v1646_v54  ;;  %v1762_v9 = vmul.f32 %v10742_v39, %v14735_v8  ;;  %v1759_v44 = vmul.f32 %v10742_v39, %v14736_v28 }
 0x24c   :  { %v10758_v49 = vpack.c.bf16 %v2285_v29, %v2278_v13  ;;  %v2284_v12 = vmax.f32 %v2060_v7, 0.0  ;;  %v1753_v63 = vmul.f32 %v10752_v62, %v14737_v0  ;;  %v1755_v1 = vmul.f32 %v10752_v62, %v14738_v51 }
 0x24d   :  { %v1752_v34 = vmul.f32 %v10752_v62, %v14739_v16  ;;  %v1754_v10 = vmul.f32 %v10752_v62, %v14740_v48  ;;  %v2387_v3 = vmax.f32 %v2163_v21, 0.0  ;;  %v1761_v24 = vmul.f32 %v10742_v39, %v14741_v14 }
 0x24e   :  { %v10770_v54 = vpack.c.bf16 %v2284_v12, %v2277_v47  ;;  %v2286_v23 = vmax.f32 %v2062_v25, 0.0  ;;  %v2169_v13 = vadd.f32 %v14742_v5, %v1753_v63  ;;  %v2171_v29 = vadd.f32 %v14742_v5, %v1755_v1 }
 0x24f   :  { %v2168_v7 = vadd.f32 %v14742_v5, %v1752_v34  ;;  %v2170_v6 = vadd.f32 %v14742_v5, %v1754_v10  ;;  %v2176_v16 = vadd.f32 %v10225_v43, %v1760_v61  ;;  %v2178_v47 = vadd.f32 %v10225_v43, %v1762_v9 }
 0x250   :  { %v10776_v8 = vpack.c.bf16 %v2286_v23, %v2279_v4  ;;  %v2393_v28 = vmax.f32 %v2169_v13, 0.0  ;;  %v2395_v0 = vmax.f32 %v2171_v29, 0.0  ;;  %v2175_v25 = vadd.f32 %v10225_v43, %v1759_v44  ;;  %v10782_v4 = vpop.permute.xlu1 %1575  ;;  %v10784_v14 = vpop.permute.xlu0 %1570  ;;  %v14745_v13 = vld [vmem:[#allocation6_spill] sm:$0xff] }
 0x251   :  { %v2392_v51 = vmax.f32 %v2168_v7, 0.0  ;;  %v2394_v21 = vmax.f32 %v2170_v6, 0.0  ;;  %v2177_v12 = vadd.f32 %v10225_v43, %v1761_v24  ;;  %14743 = vst [vmem:[#allocation21_spill] sm:$0xff] %v10782_v4  ;;  %v2400_v10 = vmax.f32 %v2176_v16, 0.0  ;;  %14744 = vst [vmem:[#allocation139_spill] sm:$0xff] %v10784_v14  ;;  %v14746_v24 = vld [vmem:[#allocation119_spill] sm:$0xff] }
 0x252   :  { %v2682_v63 = vpack.c.bf16 %v2393_v28, %v2386_v30  ;;  %v2684_v1 = vpack.c.bf16 %v2395_v0, %v2388_v60  ;;  %v2402_v61 = vmax.f32 %v2178_v47, 0.0  ;;  %v2399_v23 = vmax.f32 %v2175_v25, 0.0  ;;  %v14747_v60 = vld [vmem:[#allocation121_spill] sm:$0xff]  ;;  %v14749_v7 = vld [vmem:[#allocation120_spill] sm:$0xff]  ;;  %v14752_v16 = vld [vmem:[#allocation111_spill] sm:$0xff] }
 0x253   :  { %v2681_v48 = vpack.c.bf16 %v2392_v51, %v2385_v15  ;;  %v2683_v34 = vpack.c.bf16 %v2394_v21, %v2387_v3  ;;  %v2401_v9 = vmax.f32 %v2177_v12, 0.0  ;;  %v1652_v44 = vmul.f32 %v10515_v2, %v14745_v13  ;;  %v14748_v3 = vld [vmem:[#allocation118_spill] sm:$0xff]  ;;  %v14750_v28 = vld [vmem:[#allocation112_spill] sm:$0xff]  ;;  %v14753_v25 = vld [vmem:[#allocation113_spill] sm:$0xff] }
 0x254   :  { %3393 = vmatprep.subr.bf16.mxu0 %v2682_v63  ;;  %4066 = vmatprep.subr.bf16.mxu1 %v2684_v1  ;;  %v1767_v30 = vmul.f32 %v10784_v14, %v14746_v24  ;;  %v1769_v15 = vmul.f32 %v10784_v14, %v14747_v60  ;;  %v1766_v29 = vmul.f32 %v10784_v14, %v14748_v3  ;;  %v14751_v51 = vld [vmem:[#allocation114_spill] sm:$0xff]  ;;  %v14754_v63 = vld [vmem:[#allocation197_spill] sm:$0xff] }
 0x255   :  { %3394 = vmatpush1.bf16.msra.mxu0 %v2681_v48  ;;  %4067 = vmatpush1.bf16.msra.mxu1 %v2683_v34  ;;  %v1768_v6 = vmul.f32 %v10784_v14, %v14749_v7  ;;  %v1774_v0 = vmul.f32 %v10782_v4, %v14750_v28  ;;  %v1776_v21 = vmul.f32 %v10782_v4, %v14751_v51  ;;  %v14755_v24 = vld [vmem:[#allocation18_spill] sm:$0xff]  ;;  %v14756_v7 = vld [vmem:[#allocation5_spill] sm:$0xff] }
 0x256   :  { %v1773_v47 = vmul.f32 %v10782_v4, %v14752_v16  ;;  %v1775_v12 = vmul.f32 %v10782_v4, %v14753_v25  ;;  %v2183_v1 = vadd.f32 %v14754_v63, %v1767_v30  ;;  %v2185_v48 = vadd.f32 %v14754_v63, %v1769_v15  ;;  %v14757_v14 = vld [vmem:[#allocation29_spill] sm:$0xff] }
 0x257   :  { %v2182_v34 = vadd.f32 %v14754_v63, %v1766_v29  ;;  %v2184_v13 = vadd.f32 %v14754_v63, %v1768_v6  ;;  %v1659_v60 = vmul.f32 %v10531_v36, %v14755_v24  ;;  %v10811_v3 = vadd.f32 %v9596_v17, %v1652_v44 }
 0x258   :  { %v1651_v28 = vmul.f32 %v10515_v2, %v14756_v7  ;;  %v2407_v51 = vmax.f32 %v2183_v1, 0.0  ;;  %v2409_v16 = vmax.f32 %v2185_v48, 0.0  ;;  %v2190_v30 = vadd.f32 %v10277_v41, %v1774_v0  ;;  %v14758_v7 = vld [vmem:[#allocation27_spill] sm:$0xff] }
 0x259   :  { %v2406_v25 = vmax.f32 %v2182_v34, 0.0  ;;  %v2408_v4 = vmax.f32 %v2184_v13, 0.0  ;;  %v2192_v15 = vadd.f32 %v10277_v41, %v1776_v21  ;;  %v2189_v29 = vadd.f32 %v10277_v41, %v1773_v47  ;;  %v14759_v47 = vld [vmem:[#allocation17_spill] sm:$0xff]  ;;  %v14763_v13 = vld [vmem:[#allocation7_spill] sm:$0xff] }
 0x25a   :  { %v2191_v6 = vadd.f32 %v10277_v41, %v1775_v12  ;;  %v2689_v63 = vpack.c.bf16 %v2407_v51, %v2400_v10  ;;  %v2691_v24 = vpack.c.bf16 %v2409_v16, %v2402_v61  ;;  %v1673_v5 = vmul.f32 %v10466_v22, %v14757_v14  ;;  %v14760_v61 = vld [vmem:[#allocation28_spill] sm:$0xff]  ;;  %v14764_v51 = vld [vmem:[#allocation19_spill] sm:$0xff] }
 0x25b   :  { %v2688_v43 = vpack.c.bf16 %v2406_v25, %v2399_v23  ;;  %v2690_v44 = vpack.c.bf16 %v2408_v4, %v2401_v9  ;;  %v10823_v1 = vmul.f32 %v10466_v22, %v14758_v7  ;;  %v10826_v0 = vadd.f32 %v9660_v32, %v1659_v60  ;;  %v10835_v23 = vpop.permute.xlu1 %1585  ;;  %v14765_v16 = vld [vmem:[#allocation16_spill] sm:$0xff]  ;;  %v14770_v7 = vld [vmem:[#allocation126_spill] sm:$0xff] }
 0x25c   :  { %3395 = vmatprep.subr.bf16.mxu0 %v2689_v63  ;;  %4068 = vmatprep.subr.bf16.mxu1 %v2691_v24  ;;  %v1658_v10 = vmul.f32 %v10531_v36, %v14759_v47  ;;  %v10833_v4 = vmul.f32 %v10466_v22, %v14760_v61  ;;  %14761 = vst [vmem:[#allocation23_spill] sm:$0xff] %v10835_v23  ;;  %v2414_v14 = vmax.f32 %v2190_v30, 0.0  ;;  %v2416_v9 = vmax.f32 %v2192_v15, 0.0  ;;  %v14767_v15 = vld [vmem:[#allocation136_spill] sm:$0xff]  ;;  %v14772_v61 = vld [vmem:[#allocation125_spill] sm:$0xff] }
 0x25d   :  { %3396 = vmatpush1.bf16.msra.mxu0 %v2688_v43  ;;  %4069 = vmatpush1.bf16.msra.mxu1 %v2690_v44  ;;  %v2413_v12 = vmax.f32 %v2189_v29, 0.0  ;;  %v10838_v63 = vadd.f32 %v9596_v17, %v1651_v28  ;;  %v10840_v48 = vpop.permute.xlu0 %1580  ;;  %v2415_v34 = vmax.f32 %v2191_v6, 0.0  ;;  %v1653_v60 = vmul.f32 %v10515_v2, %v14763_v13  ;;  %v14766_v43 = vld [vmem:[#allocation133_spill] sm:$0xff]  ;;  %v14768_v28 = vld [vmem:[#allocation132_spill] sm:$0xff]  ;;  %v14769_v44 = vld [vmem:[#allocation134_spill] sm:$0xff] }
 0x25e   :  { %14762 = vst [vmem:[#allocation145_spill] sm:$0xff] %v10840_v48  ;;  %v1660_v22 = vmul.f32 %v10531_v36, %v14764_v51  ;;  %v1666_v25 = vmul.f32 %v10551_v53, %v14765_v16  ;;  %v1781_v30 = vmul.f32 %v10840_v48, %v14766_v43  ;;  %v1783_v29 = vmul.f32 %v10840_v48, %v14767_v15  ;;  %v14771_v47 = vld [vmem:[#allocation128_spill] sm:$0xff]  ;;  %v14773_v51 = vld [vmem:[#allocation127_spill] sm:$0xff] }
 0x25f   :  { %v1780_v24 = vmul.f32 %v10840_v48, %v14768_v28  ;;  %v1782_v6 = vmul.f32 %v10840_v48, %v14769_v44  ;;  %v1788_v2 = vmul.f32 %v10835_v23, %v14770_v7  ;;  %v1790_v36 = vmul.f32 %v10835_v23, %v14771_v47 }
 0x260   :  { %v1787_v13 = vmul.f32 %v10835_v23, %v14772_v61  ;;  %v1789_v16 = vmul.f32 %v10835_v23, %v14773_v51  ;;  %v2197_v43 = vadd.f32 %v10245_v58, %v1781_v30  ;;  %v2199_v15 = vadd.f32 %v10245_v58, %v1783_v29 }
 0x261   :  { %v2196_v28 = vadd.f32 %v10245_v58, %v1780_v24  ;;  %v2198_v44 = vadd.f32 %v10245_v58, %v1782_v6  ;;  %v10869_v21 = vadd.f32 %v9660_v32, %v1658_v10  ;;  %v10872_v7 = vadd.f32 %v9596_v17, %v1653_v60 }
 0x262   :  { %v10875_v47 = vadd.f32 %v9660_v32, %v1660_v22  ;;  %v10878_v61 = vadd.f32 %v14678_v45, %v1666_v25  ;;  %v2421_v51 = vmax.f32 %v2197_v43, 0.0  ;;  %v2423_v30 = vmax.f32 %v2199_v15, 0.0 }
 0x263   :  { %v2420_v23 = vmax.f32 %v2196_v28, 0.0  ;;  %v2422_v29 = vmax.f32 %v2198_v44, 0.0  ;;  %v2204_v24 = vadd.f32 %v10323_v38, %v1788_v2  ;;  %v2206_v6 = vadd.f32 %v10323_v38, %v1790_v36  ;;  %v10888_v28 = vpop.permute.xlu1 %1595 }
 0x264   :  { %v2203_v10 = vadd.f32 %v10323_v38, %v1787_v13  ;;  %v2205_v58 = vadd.f32 %v10323_v38, %v1789_v16  ;;  %v2696_v17 = vpack.c.bf16 %v2421_v51, %v2414_v14  ;;  %v2698_v60 = vpack.c.bf16 %v2423_v30, %v2416_v9  ;;  %14774 = vst [vmem:[#allocation20_spill] sm:$0xff] %v10888_v28  ;;  %v14778_v16 = vld [vmem:[#allocation152_spill] sm:$0xff]  ;;  %v14781_v30 = vld [vmem:[#allocation142_spill] sm:$0xff] }
 0x265   :  { %v2695_v41 = vpack.c.bf16 %v2420_v23, %v2413_v12  ;;  %v2697_v32 = vpack.c.bf16 %v2422_v29, %v2415_v34  ;;  %v2299_v22 = vmax.f32 %v10826_v0, 0.0  ;;  %v2291_v25 = vmax.f32 %v10838_v63, 0.0  ;;  %v14775_v23 = vld [vmem:[#allocation14_spill] sm:$0xff]  ;;  %v14782_v29 = vld [vmem:[#allocation144_spill] sm:$0xff] }
 0x266   :  { %v2298_v43 = vmax.f32 %v10869_v21, 0.0  ;;  %v2089_v15 = vadd.f32 %v9706_v18, %v1673_v5  ;;  %3397 = vmatprep.subr.bf16.mxu0 %v2696_v17  ;;  %4070 = vmatprep.subr.bf16.mxu1 %v2698_v60  ;;  %v2293_v2 = vmax.f32 %v10872_v7, 0.0  ;;  %v2300_v36 = vmax.f32 %v10875_v47, 0.0  ;;  %v14777_v34 = vld [vmem:[#allocation150_spill] sm:$0xff]  ;;  %v14779_v7 = vld [vmem:[#allocation149_spill] sm:$0xff] }
 0x267   :  { %v2306_v14 = vmax.f32 %v10878_v61, 0.0  ;;  %v1665_v9 = vmul.f32 %v10551_v53, %v14775_v23  ;;  %3398 = vmatpush1.bf16.msra.mxu0 %v2695_v41  ;;  %4071 = vmatpush1.bf16.msra.mxu1 %v2697_v32  ;;  %v2428_v21 = vmax.f32 %v2204_v24, 0.0  ;;  %v2430_v12 = vmax.f32 %v2206_v6, 0.0  ;;  %v14780_v61 = vld [vmem:[#allocation151_spill] sm:$0xff]  ;;  %v14783_v6 = vld [vmem:[#allocation141_spill] sm:$0xff]  ;;  %v14784_v17 = vld [vmem:[#allocation214_spill] sm:$0xff] }
 0x268   :  { %v10895_v0 = vpop.permute.xlu0 %1590  ;;  %v2427_v5 = vmax.f32 %v2203_v10, 0.0  ;;  %v2429_v63 = vmax.f32 %v2205_v58, 0.0  ;;  %v1802_v41 = vmul.f32 %v10888_v28, %v14781_v30  ;;  %v1804_v24 = vmul.f32 %v10888_v28, %v14782_v29  ;;  %v14786_v29 = vld [vmem:[#allocation15_spill] sm:$0xff] }
 0x269   :  { %14776 = vst [vmem:[#allocation22_spill] sm:$0xff] %v10895_v0  ;;  %v1795_v13 = vmul.f32 %v10895_v0, %v14777_v34  ;;  %v1797_v44 = vmul.f32 %v10895_v0, %v14778_v16  ;;  %v1794_v47 = vmul.f32 %v10895_v0, %v14779_v7  ;;  %v1796_v51 = vmul.f32 %v10895_v0, %v14780_v61  ;;  %v14785_v16 = vld [vmem:[#allocation143_spill] sm:$0xff] }
 0x26a   :  { %v1801_v58 = vmul.f32 %v10888_v28, %v14783_v6  ;;  %v2313_v10 = vmax.f32 %v2089_v15, 0.0  ;;  %v1803_v7 = vmul.f32 %v10888_v28, %v14785_v16  ;;  %v10918_v61 = vadd.f32 %v14678_v45, %v1665_v9 }
 0x26b   :  { %v2211_v60 = vadd.f32 %v14784_v17, %v1795_v13  ;;  %v2213_v32 = vadd.f32 %v14784_v17, %v1797_v44  ;;  %v2210_v23 = vadd.f32 %v14784_v17, %v1794_v47  ;;  %v2212_v34 = vadd.f32 %v14784_v17, %v1796_v51  ;;  %v14787_v17 = vld [vmem:[#allocation26_spill] sm:$0xff] }
 0x26c   :  { %v10922_v30 = vadd.f32 %v9706_v18, %v10823_v1  ;;  %v1667_v15 = vmul.f32 %v10551_v53, %v14786_v29  ;;  %v2218_v47 = vadd.f32 %v10445_v11, %v1802_v41  ;;  %v2220_v51 = vadd.f32 %v10445_v11, %v1804_v24 }
 0x26d   :  { %v2435_v13 = vmax.f32 %v2211_v60, 0.0  ;;  %v2437_v6 = vmax.f32 %v2213_v32, 0.0  ;;  %v2434_v44 = vmax.f32 %v2210_v23, 0.0  ;;  %v2436_v38 = vmax.f32 %v2212_v34, 0.0  ;;  %v14795_v34 = vld [vmem:[#allocation167_spill] sm:$0xff] }
 0x26e   :  { %v2217_v16 = vadd.f32 %v10445_v11, %v1801_v58  ;;  %v1680_v9 = vmul.f32 %v10569_v50, %v14787_v17  ;;  %v10931_v19 = vpop.permute.xlu1 %1605  ;;  %v14788_v53 = vmax.f32 %v10811_v3, 0.0  ;;  %v10937_v32 = vpack.c.bf16 %v2298_v43, %v2291_v25  ;;  %v14789_v25 = vld [vmem:[#allocation40_spill] sm:$0xff]  ;;  %v14794_v17 = vld [vmem:[#allocation165_spill] sm:$0xff] }
 0x26f   :  { %v2703_v28 = vpack.c.bf16 %v2435_v13, %v2428_v21  ;;  %v2705_v0 = vpack.c.bf16 %v2437_v6, %v2430_v12  ;;  %v2702_v1 = vpack.c.bf16 %v2434_v44, %v2427_v5  ;;  %v2704_v48 = vpack.c.bf16 %v2436_v38, %v2429_v63  ;;  %v14791_v5 = vld [vmem:[#allocation24_spill] sm:$0xff]  ;;  %v14792_v63 = vld [vmem:[#allocation166_spill] sm:$0xff] }
 0x270   :  { %v10935_v60 = vpack.c.bf16 %v2299_v22, %v14788_v53  ;;  %v10939_v41 = vpack.c.bf16 %v2300_v36, %v2293_v2  ;;  %v10941_v24 = vpack.c.bf16 %v2313_v10, %v2306_v14  ;;  %v2219_v58 = vadd.f32 %v10445_v11, %v1803_v7  ;;  %v14797_v6 = vld [vmem:[#allocation156_spill] sm:$0xff] }
 0x271   :  { %3399 = vmatprep.subr.bf16.mxu0 %v2703_v28  ;;  %4072 = vmatprep.subr.bf16.mxu1 %v2705_v0  ;;  %v10947_v12 = vadd.f32 %v14678_v45, %v1667_v15  ;;  %v2442_v3 = vmax.f32 %v2218_v47, 0.0  ;;  %v10951_v22 = vadd.f32 %v9706_v18, %v10833_v4  ;;  %v1687_v43 = vmul.f32 %v10537_v37, %v14789_v25  ;;  %v14790_v0 = vld [vmem:[#allocation158_spill] sm:$0xff]  ;;  %v14793_v4 = vld [vmem:[#allocation169_spill] sm:$0xff]  ;;  %v14796_v15 = vld [vmem:[#allocation160_spill] sm:$0xff] }
 0x272   :  { %3400 = vmatpush1.bf16.msra.mxu0 %v2702_v1  ;;  %4073 = vmatpush1.bf16.msra.mxu1 %v2704_v48  ;;  %v10956_v28 = vadd.f32 %v14683_v35, %v1680_v9  ;;  %v2444_v36 = vmax.f32 %v2220_v51, 0.0  ;;  %v2441_v14 = vmax.f32 %v2217_v16, 0.0  ;;  %v1816_v45 = vmul.f32 %v10931_v19, %v14790_v0  ;;  %v14798_v47 = vld [vmem:[#allocation159_spill] sm:$0xff]  ;;  %v14799_v0 = vld [vmem:[#allocation38_spill] sm:$0xff] }
 0x273   :  { %v1679_v48 = vmul.f32 %v10569_v50, %v14791_v5  ;;  %v2443_v29 = vmax.f32 %v2219_v58, 0.0  ;;  %v1818_v13 = vmul.f32 %v10931_v19, %v14796_v15  ;;  %v1815_v44 = vmul.f32 %v10931_v19, %v14797_v6 }
 0x274   :  { %v1817_v51 = vmul.f32 %v10931_v19, %v14798_v47  ;;  %v2232_v25 = vadd.f32 %v10447_v31, %v1816_v45  ;;  %v10984_v58 = vadd.f32 %v14680_v46, %v1687_v43  ;;  %v1686_v5 = vmul.f32 %v10537_v37, %v14799_v0  ;;  %v14800_v45 = vld [vmem:[#allocation25_spill] sm:$0xff] }
 0x275   :  { %v10958_v2 = vpop.permute.xlu0 %1600  ;;  %v1681_v43 = vmul.f32 %v10569_v50, %v14800_v45 }
 0x276   :  { %v1809_v18 = vmul.f32 %v10958_v2, %v14792_v63  ;;  %v1811_v10 = vmul.f32 %v10958_v2, %v14793_v4  ;;  %v1808_v23 = vmul.f32 %v10958_v2, %v14794_v17  ;;  %v1810_v7 = vmul.f32 %v10958_v2, %v14795_v34 }
 0x277   :  { %v10989_v63 = vadd.f32 %v14683_v35, %v1679_v48  ;;  %v2307_v48 = vmax.f32 %v10947_v12, 0.0 }
 0x278   :  { %v2225_v16 = vadd.f32 %v10435_v59, %v1809_v18  ;;  %v2227_v9 = vadd.f32 %v10435_v59, %v1811_v10  ;;  %v2224_v1 = vadd.f32 %v10435_v59, %v1808_v23  ;;  %v2226_v53 = vadd.f32 %v10435_v59, %v1810_v7 }
 0x279   :  { %v2234_v10 = vadd.f32 %v10447_v31, %v1818_v13  ;;  %v2231_v23 = vadd.f32 %v10447_v31, %v1815_v44  ;;  %v2233_v7 = vadd.f32 %v10447_v31, %v1817_v51  ;;  %v2456_v44 = vmax.f32 %v2232_v25, 0.0  ;;  %v14803_v25 = vld [vmem:[#allocation186_spill] sm:$0xff] }
 0x27a   :  { %v2449_v4 = vmax.f32 %v2225_v16, 0.0  ;;  %v2451_v17 = vmax.f32 %v2227_v9, 0.0  ;;  %v2448_v18 = vmax.f32 %v2224_v1, 0.0  ;;  %v2450_v34 = vmax.f32 %v2226_v53, 0.0  ;;  %v11000_v13 = vpop.permute.xlu1 %1615  ;;  %v14802_v53 = vld [vmem:[#allocation184_spill] sm:$0xff] }
 0x27b   :  { %v2314_v16 = vmax.f32 %v10951_v22, 0.0  ;;  %v2320_v9 = vmax.f32 %v10956_v28, 0.0  ;;  %v2102_v1 = vadd.f32 %v14680_v46, %v1686_v5  ;;  %v2327_v51 = vmax.f32 %v10984_v58, 0.0 }
 0x27c   :  { %v2710_v15 = vpack.c.bf16 %v2449_v4, %v2442_v3  ;;  %v2712_v6 = vpack.c.bf16 %v2451_v17, %v2444_v36  ;;  %v2709_v47 = vpack.c.bf16 %v2448_v18, %v2441_v14  ;;  %v2711_v0 = vpack.c.bf16 %v2450_v34, %v2443_v29  ;;  %v14801_v3 = vld [vmem:[#allocation39_spill] sm:$0xff]  ;;  %v14805_v17 = vld [vmem:[#allocation185_spill] sm:$0xff] }
 0x27d   :  { %v2319_v50 = vmax.f32 %v10989_v63, 0.0  ;;  %v1688_v36 = vmul.f32 %v10537_v37, %v14801_v3  ;;  %v2458_v12 = vmax.f32 %v2234_v10, 0.0  ;;  %v2455_v22 = vmax.f32 %v2231_v23, 0.0  ;;  %v14804_v4 = vld [vmem:[#allocation183_spill] sm:$0xff]  ;;  %v14807_v10 = vld [vmem:[#allocation177_spill] sm:$0xff] }
 0x27e   :  { %3401 = vmatprep.subr.bf16.mxu0 %v2710_v15  ;;  %4074 = vmatprep.subr.bf16.mxu1 %v2712_v6  ;;  %v2457_v28 = vmax.f32 %v2233_v7, 0.0  ;;  %v2097_v29 = vadd.f32 %v14683_v35, %v1681_v43  ;;  %v14806_v18 = vld [vmem:[#allocation175_spill] sm:$0xff]  ;;  %v1832_v23 = vmul.f32 %v11000_v13, %v14807_v10  ;;  %v2326_v7 = vmax.f32 %v2102_v1, 0.0  ;;  %v14808_v35 = vld [vmem:[#allocation36_spill] sm:$0xff] }
 0x27f   :  { %3402 = vmatpush1.bf16.msra.mxu0 %v2709_v47  ;;  %4075 = vmatpush1.bf16.msra.mxu1 %v2711_v0  ;;  %v1830_v34 = vmul.f32 %v11000_v13, %v14806_v18  ;;  %v1694_v45 = vmul.f32 %v10584_v27, %v14808_v35  ;;  %v14809_v0 = vld [vmem:[#allocation174_spill] sm:$0xff] }
 0x280   :  { %v11006_v14 = vpop.permute.xlu0 %1610  ;;  %v1829_v3 = vmul.f32 %v11000_v13, %v14809_v0  ;;  %v2321_v1 = vmax.f32 %v2097_v29, 0.0  ;;  %v14813_v29 = vmax.f32 %v10918_v61, 0.0 }
 0x281   :  { %v1823_v5 = vmul.f32 %v11006_v14, %v14802_v53  ;;  %v1825_v58 = vmul.f32 %v11006_v14, %v14803_v25  ;;  %v1822_v63 = vmul.f32 %v11006_v14, %v14804_v4  ;;  %v1824_v37 = vmul.f32 %v11006_v14, %v14805_v17  ;;  %v14810_v53 = vld [vmem:[#allocation176_spill] sm:$0xff] }
 0x282   :  { %v1831_v25 = vmul.f32 %v11000_v13, %v14810_v53  ;;  %v2104_v4 = vadd.f32 %v14680_v46, %v1688_v36  ;;  %v11039_v0 = vadd.f32 %v9879_v26, %v1694_v45  ;;  %v2245_v45 = vadd.f32 %v10461_v55, %v1829_v3 }
 0x283   :  { %v2239_v43 = vadd.f32 %v10440_v57, %v1823_v5  ;;  %v2241_v15 = vadd.f32 %v10440_v57, %v1825_v58  ;;  %v2238_v6 = vadd.f32 %v10440_v57, %v1822_v63  ;;  %v2240_v47 = vadd.f32 %v10440_v57, %v1824_v37  ;;  %v14812_v37 = vld [vmem:[#allocation54_spill] sm:$0xff] }
 0x284   :  { %v2246_v58 = vadd.f32 %v10461_v55, %v1830_v34  ;;  %v2248_v63 = vadd.f32 %v10461_v55, %v1832_v23  ;;  %v1701_v38 = vmul.f32 %v10590_v42, %v14812_v37  ;;  %v11049_v34 = vpack.c.bf16 %v2327_v51, %v2320_v9  ;;  %v14822_v37 = vld [vmem:[#allocation195_spill] sm:$0xff] }
 0x285   :  { %v2463_v17 = vmax.f32 %v2239_v43, 0.0  ;;  %v2465_v18 = vmax.f32 %v2241_v15, 0.0  ;;  %v2462_v10 = vmax.f32 %v2238_v6, 0.0  ;;  %v2464_v35 = vmax.f32 %v2240_v47, 0.0  ;;  %v11032_v5 = vpop.permute.xlu1 %1625  ;;  %v14817_v47 = vld [vmem:[#allocation201_spill] sm:$0xff] }
 0x286   :  { %14811 = vst [vmem:[#allocation37_spill] sm:$0xff] %v11032_v5  ;;  %v14814_v43 = vmax.f32 %v10922_v30, 0.0  ;;  %v11047_v6 = vpack.c.bf16 %v2314_v16, %v2307_v48  ;;  %v2328_v23 = vmax.f32 %v2104_v4, 0.0  ;;  %v11058_v30 = vadd.f32 %v9840_v33, %v1701_v38  ;;  %v14815_v48 = vld [vmem:[#allocation34_spill] sm:$0xff]  ;;  %v14819_v4 = vld [vmem:[#allocation200_spill] sm:$0xff] }
 0x287   :  { %v2717_v53 = vpack.c.bf16 %v2463_v17, %v2456_v44  ;;  %v2719_v21 = vpack.c.bf16 %v2465_v18, %v2458_v12  ;;  %v2716_v46 = vpack.c.bf16 %v2462_v10, %v2455_v22  ;;  %v2718_v36 = vpack.c.bf16 %v2464_v35, %v2457_v28  ;;  %v14816_v28 = vld [vmem:[#allocation52_spill] sm:$0xff]  ;;  %v14820_v17 = vld [vmem:[#allocation202_spill] sm:$0xff] }
 0x288   :  { %v11045_v15 = vpack.c.bf16 %v14814_v43, %v14813_v29  ;;  %v2247_v44 = vadd.f32 %v10461_v55, %v1831_v25  ;;  %v11053_v12 = vpack.c.bf16 %v2326_v7, %v2319_v50  ;;  %v11055_v61 = vpack.c.bf16 %v2328_v23, %v2321_v1  ;;  %v14818_v25 = vld [vmem:[#allocation204_spill] sm:$0xff] }
 0x289   :  { %3403 = vmatprep.subr.bf16.mxu0 %v2717_v53  ;;  %4076 = vmatprep.subr.bf16.mxu1 %v2719_v21  ;;  %v1693_v16 = vmul.f32 %v10584_v27, %v14815_v48  ;;  %v2470_v51 = vmax.f32 %v2246_v58, 0.0  ;;  %v2472_v21 = vmax.f32 %v2248_v63, 0.0  ;;  %v1700_v50 = vmul.f32 %v10590_v42, %v14816_v28  ;;  %v11067_v7 = vpop.permute.xlu1 %2041  ;;  %v14821_v58 = vld [vmem:[#allocation193_spill] sm:$0xff]  ;;  %v14824_v28 = vld [vmem:[#allocation194_spill] sm:$0xff] }
 0x28a   :  { %3404 = vmatpush1.bf16.msra.mxu0 %v2716_v46  ;;  %4077 = vmatpush1.bf16.msra.mxu1 %v2718_v36  ;;  %v2469_v10 = vmax.f32 %v2245_v45, 0.0  ;;  %v2471_v35 = vmax.f32 %v2247_v44, 0.0  ;;  %v1844_v63 = vmul.f32 %v11032_v5, %v14821_v58  ;;  %v1846_v53 = vmul.f32 %v11032_v5, %v14822_v37  ;;  %v14823_v45 = vld [vmem:[#allocation191_spill] sm:$0xff] }
 0x28b   :  { %v11062_v9 = vpop.permute.xlu0 %1620  ;;  %v1843_v44 = vmul.f32 %v11032_v5, %v14823_v45  ;;  %v2109_v58 = vadd.f32 %v9879_v26, %v1693_v16 }
 0x28c   :  { %v1837_v3 = vmul.f32 %v11062_v9, %v14817_v47  ;;  %v1839_v38 = vmul.f32 %v11062_v9, %v14818_v25  ;;  %v1836_v1 = vmul.f32 %v11062_v9, %v14819_v4  ;;  %v1838_v18 = vmul.f32 %v11062_v9, %v14820_v17 }
 0x28d   :  { %v2260_v23 = vadd.f32 %v11067_v7, %v1844_v63  ;;  %v2262_v48 = vadd.f32 %v11067_v7, %v1846_v53  ;;  %v1845_v47 = vmul.f32 %v11032_v5, %v14824_v28  ;;  %v2116_v63 = vadd.f32 %v9840_v33, %v1700_v50  ;;  %v14826_v5 = vld [vmem:[#allocation213_spill] sm:$0xff] }
 0x28e   :  { %v2253_v46 = vadd.f32 %v10455_v20, %v1837_v3  ;;  %v2255_v36 = vadd.f32 %v10455_v20, %v1839_v38  ;;  %v2252_v29 = vadd.f32 %v10455_v20, %v1836_v1  ;;  %v2254_v43 = vadd.f32 %v10455_v20, %v1838_v18  ;;  %v14825_v20 = vld [vmem:[#allocation208_spill] sm:$0xff] }
 0x28f   :  { %v2259_v1 = vadd.f32 %v11067_v7, %v1843_v44  ;;  %v2261_v18 = vadd.f32 %v11067_v7, %v1845_v47  ;;  %v2484_v16 = vmax.f32 %v2260_v23, 0.0  ;;  %v2333_v23 = vmax.f32 %v2109_v58, 0.0  ;;  %v14833_v58 = vld [vmem:[#allocation45_spill] sm:$0xff] }
 0x290   :  { %v11091_v25 = vpop.permute.xlu0 %1630  ;;  %v2477_v4 = vmax.f32 %v2253_v46, 0.0  ;;  %v2479_v3 = vmax.f32 %v2255_v36, 0.0  ;;  %v2476_v17 = vmax.f32 %v2252_v29, 0.0  ;;  %v2478_v38 = vmax.f32 %v2254_v43, 0.0  ;;  %v14827_v36 = vld [vmem:[#allocation207_spill] sm:$0xff] }
 0x291   :  { %v1851_v28 = vmul.f32 %v11091_v25, %v14825_v20  ;;  %v1853_v46 = vmul.f32 %v11091_v25, %v14826_v5  ;;  %v1850_v29 = vmul.f32 %v11091_v25, %v14827_v36  ;;  %v2341_v43 = vmax.f32 %v11058_v30, 0.0  ;;  %v14832_v36 = vld [vmem:[#allocation68_spill] sm:$0xff] }
 0x292   :  { %v2724_v37 = vpack.c.bf16 %v2477_v4, %v2470_v51  ;;  %v2726_v53 = vpack.c.bf16 %v2479_v3, %v2472_v21  ;;  %v2723_v45 = vpack.c.bf16 %v2476_v17, %v2469_v10  ;;  %v2725_v22 = vpack.c.bf16 %v2478_v38, %v2471_v35  ;;  %v14828_v21 = vld [vmem:[#allocation210_spill] sm:$0xff]  ;;  %v14829_v10 = vld [vmem:[#allocation35_spill] sm:$0xff] }
 0x293   :  { %v2486_v51 = vmax.f32 %v2262_v48, 0.0  ;;  %v1852_v50 = vmul.f32 %v11091_v25, %v14828_v21  ;;  %v1695_v20 = vmul.f32 %v10584_v27, %v14829_v10  ;;  %v2483_v47 = vmax.f32 %v2259_v1, 0.0  ;;  %v14834_v10 = vld [vmem:[#allocation66_spill] sm:$0xff] }
 0x294   :  { %v11104_v44 = vpop.permute.xlu0 %2046  ;;  %3405 = vmatprep.subr.bf16.mxu0 %v2724_v37  ;;  %4078 = vmatprep.subr.bf16.mxu1 %v2726_v53  ;;  %v2485_v3 = vmax.f32 %v2261_v18, 0.0  ;;  %v2340_v48 = vmax.f32 %v2116_v63, 0.0  ;;  %v14830_v53 = vld [vmem:[#allocation53_spill] sm:$0xff]  ;;  %v1715_v1 = vmul.f32 %v10620_v52, %v14832_v36  ;;  %v1707_v63 = vmul.f32 %v10614_v40, %v14833_v58  ;;  %v14845_v36 = vld [vmem:[#allocation11_spill] sm:$0xff]  ;;  %v14847_v58 = vld [vmem:[#allocation172_spill] sm:$0xff] }
 0x295   :  { %3406 = vmatpush1.bf16.msra.mxu0 %v2723_v45  ;;  %4079 = vmatpush1.bf16.msra.mxu1 %v2725_v22  ;;  %v2267_v5 = vadd.f32 %v11104_v44, %v1851_v28  ;;  %v2269_v35 = vadd.f32 %v11104_v44, %v1853_v46  ;;  %v2266_v30 = vadd.f32 %v11104_v44, %v1850_v29  ;;  %v14831_v28 = vld [vmem:[#allocation47_spill] sm:$0xff] }
 0x296   :  { %v2268_v4 = vadd.f32 %v11104_v44, %v1852_v50  ;;  %v1702_v27 = vmul.f32 %v10590_v42, %v14830_v53  ;;  %v2111_v22 = vadd.f32 %v9879_v26, %v1695_v20  ;;  %v1708_v46 = vmul.f32 %v10614_v40, %v14831_v28  ;;  %v14835_v42 = vld [vmem:[#allocation46_spill] sm:$0xff]  ;;  %v14836_v26 = vld [vmem:[#allocation67_spill] sm:$0xff] }
 0x297   :  { %v2491_v17 = vmax.f32 %v2267_v5, 0.0  ;;  %v2493_v38 = vmax.f32 %v2269_v35, 0.0  ;;  %v2490_v37 = vmax.f32 %v2266_v30, 0.0  ;;  %v1714_v5 = vmul.f32 %v10620_v52, %v14834_v10  ;;  %v6978_v30 = vld [vmem:[#allocation2] ss:$8 sps:$4 sm:$0xff]   ;;  %v14841_v53 = vld [vmem:[#allocation59_spill] sm:$0xff] }
 0x298   :  { %v2492_v45 = vmax.f32 %v2268_v4, 0.0  ;;  %v1709_v35 = vmul.f32 %v10614_v40, %v14835_v42  ;;  %v1716_v20 = vmul.f32 %v10620_v52, %v14836_v26  ;;  %v14838_v4 = vld [vmem:[#allocation61_spill] sm:$0xff]  ;;  %v14840_v40 = vld [vmem:[#allocation163_spill] sm:$0xff]  ;;  %v14850_v42 = vld [vmem:[#allocation12_spill] sm:$0xff] }
 0x299   :  { %v2731_v29 = vpack.c.bf16 %v2491_v17, %v2484_v16  ;;  %v2733_v21 = vpack.c.bf16 %v2493_v38, %v2486_v51  ;;  %v2730_v18 = vpack.c.bf16 %v2490_v37, %v2483_v47  ;;  %v14837_v16 = vmax.f32 %v11039_v0, 0.0  ;;  %v14849_v10 = vld [vmem:[#allocation75_spill] sm:$0xff] }
 0x29a   :  { %v2732_v50 = vpack.c.bf16 %v2492_v45, %v2485_v3  ;;  %v2118_v47 = vadd.f32 %v9840_v33, %v1702_v27  ;;  %v14839_v3 = vld [vmem:[#allocation13_spill] sm:$0xff]  ;;  %v11136_v38 = vpack.c.bf16 %v2340_v48, %v2333_v23  ;;  %v2124_v37 = vadd.f32 %v14840_v40, %v1708_v46  ;;  %v14844_v27 = vld [vmem:[#allocation82_spill] sm:$0xff] }
 0x29b   :  { %3407 = vmatprep.subr.bf16.mxu0 %v2731_v29  ;;  %4080 = vmatprep.subr.bf16.mxu1 %v2733_v21  ;;  %v11131_v51 = vpack.c.bf16 %v2341_v43, %v14837_v16  ;;  %v1722_v17 = vmul.f32 %v14839_v3, %v14838_v4  ;;  %v1721_v52 = vmul.f32 %v14839_v3, %v14841_v53  ;;  %v14842_v45 = vmov 0   ;;  %v14843_v43 = vld [vmem:[#allocation157_spill] sm:$0xff]  ;;  %v6979_v21 = vld [vmem:[#allocation2 + $0x14] ss:$8 sps:$4 sm:$0xff]  }
 0x29c   :  { %3408 = vmatpush1.bf16.msra.mxu0 %v2730_v18  ;;  %4081 = vmatpush1.bf16.msra.mxu1 %v2732_v50  ;;  %v2335_v0 = vmax.f32 %v2111_v22, 0.0  ;;  %v2131_v28 = vadd.f32 %v14843_v43, %v1715_v1  ;;  %v2123_v33 = vadd.f32 %v14840_v40, %v1707_v63  ;;  %v1729_v29 = vmul.f32 %v14845_v36, %v14844_v27  ;;  %v14846_v18 = vld [vmem:[#allocation80_spill] sm:$0xff]  ;;  %v14856_v27 = vld [vmem:[#allocation94_spill] sm:$0xff] }
 0x29d   :  { %4723 = vmatprep.subr.bf16.mxu0 %v10758_v49  ;;  %5396 = vmatprep.subr.bf16.mxu1 %v14842_v45  ;;  %v2130_v23 = vadd.f32 %v14843_v43, %v1714_v5  ;;  %v2125_v48 = vadd.f32 %v14840_v40, %v1709_v35  ;;  %v2132_v46 = vadd.f32 %v14843_v43, %v1716_v20  ;;  %v2342_v22 = vmax.f32 %v2118_v47, 0.0  ;;  %v14848_v50 = vld [vmem:[#allocation60_spill] sm:$0xff]  ;;  %v14851_v20 = vld [vmem:[#allocation81_spill] sm:$0xff] }
 0x29e   :  { %v1728_v49 = vmul.f32 %v14845_v36, %v14846_v18  ;;  %v2138_v1 = vadd.f32 %v14847_v58, %v1722_v17  ;;  %v1723_v63 = vmul.f32 %v14839_v3, %v14848_v50  ;;  %v1736_v26 = vmul.f32 %v14850_v42, %v14849_v10  ;;  %v14853_v17 = vld [vmem:[#allocation168_spill] sm:$0xff]  ;;  %v6982_v10 = vld [vmem:[#allocation2 + $0x24] ss:$8 sps:$4 sm:$0xff]  }
 0x29f   :  { %3410 = vmatmul.mubr.bf16.vlgmr.msra.gmra.mrb[0].mxu0 %v6978_v30  ;;  %4083 = vmatmul.mubr.bf16.vlgmr.msra.gmra.mrb[0].mxu1 %v6978_v30  ;;  %v2348_v5 = vmax.f32 %v2124_v37, 0.0  ;;  %v2137_v35 = vadd.f32 %v14847_v58, %v1721_v52  ;;  %v1730_v16 = vmul.f32 %v14845_v36, %v14851_v20  ;;  %v14852_v30 = vld [vmem:[#allocation73_spill] sm:$0xff]  ;;  %v11166_v4 = vpack.c.bf16 %v2342_v22, %v2335_v0  ;;  %v14854_v40 = vld [vmem:[#allocation96_spill] sm:$0xff] }
 0x2a0   :  { %4724 = vmatpush1.bf16.msra.mxu0 %v10770_v54  ;;  %5397 = vmatpush1.bf16.msra.mxu1 %v10776_v8  ;;  %v1735_v47 = vmul.f32 %v14850_v42, %v14852_v30  ;;  %v2355_v3 = vmax.f32 %v2131_v28, 0.0  ;;  %v2145_v54 = vadd.f32 %v14853_v17, %v1729_v29  ;;  %v14855_v8 = vld [vmem:[#allocation135_spill] sm:$0xff]  ;;  %v2347_v53 = vmax.f32 %v2123_v33, 0.0  ;;  %v14857_v28 = vld [vmem:[#allocation182_spill] sm:$0xff] }
 0x2a1   :  { %4725 = vmatprep.subr.bf16.mxu0 %v10935_v60  ;;  %5398 = vmatprep.subr.bf16.mxu1 %v14842_v45  ;;  %v1743_v37 = vmul.f32 %v14855_v8, %v14854_v40  ;;  %v2349_v52 = vmax.f32 %v2125_v48, 0.0  ;;  %v2144_v43 = vadd.f32 %v14853_v17, %v1728_v49  ;;  %v1742_v36 = vmul.f32 %v14855_v8, %v14856_v27  ;;  %v6981_v60 = vld [vmem:[#allocation2 + $0x10] ss:$8 sps:$4 sm:$0xff]  }
 0x2a2   :  { %3419 = vmatprep.mubr.bf16.mxu0 %v6979_v21  ;;  %4092 = vmatprep.mubr.bf16.mxu1 %v6979_v21  ;;  %v2354_v18 = vmax.f32 %v2130_v23, 0.0  ;;  %v2362_v50 = vmax.f32 %v2138_v1, 0.0  ;;  %v2139_v0 = vadd.f32 %v14847_v58, %v1723_v63  ;;  %v2152_v22 = vadd.f32 %v14857_v28, %v1736_v26  ;;  %v14858_v58 = vld [vmem:[#allocation178_spill] sm:$0xff] }
 0x2a3   :  { %v2356_v29 = vmax.f32 %v2132_v46, 0.0  ;;  %v2361_v21 = vmax.f32 %v2137_v35, 0.0  ;;  %v2146_v33 = vadd.f32 %v14853_v17, %v1730_v16  ;;  %v2151_v48 = vadd.f32 %v14857_v28, %v1735_v47  ;;  %v14859_v63 = vld [vmem:[#allocation74_spill] sm:$0xff]  ;;  %v14860_v16 = vld [vmem:[#allocation95_spill] sm:$0xff]  ;;  %v14861_v17 = vld [vmem:[#allocation89_spill] sm:$0xff] }
 0x2a4   :  { %4726 = vmatpush1.bf16.msra.mxu0 %v10937_v32  ;;  %5399 = vmatpush1.bf16.msra.mxu1 %v10939_v41  ;;  %v11182_v23 = vpack.c.bf16 %v2355_v3, %v2348_v5  ;;  %v2369_v49 = vmax.f32 %v2145_v54, 0.0  ;;  %v2159_v1 = vadd.f32 %v14858_v58, %v1743_v37  ;;  %v1737_v32 = vmul.f32 %v14850_v42, %v14859_v63 }
 0x2a5   :  { %4727 = vmatprep.subr.bf16.mxu0 %v10941_v24  ;;  %5400 = vmatprep.subr.bf16.mxu1 %v14842_v45  ;;  %v11187_v41 = vpack.c.bf16 %v2354_v18, %v2347_v53  ;;  %v11189_v46 = vpack.c.bf16 %v2356_v29, %v2349_v52  ;;  %v2368_v26 = vmax.f32 %v2144_v43, 0.0  ;;  %v2158_v35 = vadd.f32 %v14858_v58, %v1742_v36  ;;  %v14862_v53 = vld [vmem:[#allocation110_spill] sm:$0xff]  ;;  %v14864_v43 = vld [vmem:[#allocation108_spill] sm:$0xff]  ;;  %v14867_v29 = vld [vmem:[#allocation103_spill] sm:$0xff] }
 0x2a6   :  { %v11192_v24 = vpack.c.bf16 %v2369_v49, %v2362_v50  ;;  %v2363_v5 = vmax.f32 %v2139_v0, 0.0  ;;  %v2376_v20 = vmax.f32 %v2152_v22, 0.0  ;;  %v1744_v30 = vmul.f32 %v14855_v8, %v14860_v16  ;;  %v14865_v36 = vld [vmem:[#allocation88_spill] sm:$0xff]  ;;  %v6984_v50 = vld [vmem:[#allocation2 + $0x20] ss:$8 sps:$4 sm:$0xff]  }
 0x2a7   :  { %3420 = vmatmul.mubr.bf16.gmra.mrb[4].mxu0 %v6981_v60  ;;  %4093 = vmatmul.mubr.bf16.gmra.mrb[4].mxu1 %v6981_v60  ;;  %v11198_v42 = vpack.c.bf16 %v2368_v26, %v2361_v21  ;;  %v2370_v47 = vmax.f32 %v2146_v33, 0.0  ;;  %v2375_v3 = vmax.f32 %v2151_v48, 0.0  ;;  %v1750_v54 = vmul.f32 %v10688_v56, %v14861_v17  ;;  %v14866_v60 = vld [vmem:[#allocation109_spill] sm:$0xff]  ;;  %v14873_v16 = vld [vmem:[#allocation122_spill] sm:$0xff] }
 0x2a8   :  { %4728 = vmatpush1.bf16.msra.mxu0 %v11045_v15  ;;  %5401 = vmatpush1.bf16.msra.mxu1 %v11047_v6  ;;  %v2383_v40 = vmax.f32 %v2159_v1, 0.0  ;;  %v2153_v37 = vadd.f32 %v14857_v28, %v1737_v32  ;;  %v1757_v8 = vmul.f32 %v10752_v62, %v14862_v53  ;;  %v14863_v15 = vld [vmem:[#allocation87_spill] sm:$0xff]  ;;  %v2382_v52 = vmax.f32 %v2158_v35, 0.0  ;;  %v14869_v49 = vld [vmem:[#allocation101_spill] sm:$0xff]  ;;  %v14875_v17 = vld [vmem:[#allocation102_spill] sm:$0xff] }
 0x2a9   :  { %4729 = vmatprep.subr.bf16.mxu0 %v11049_v34  ;;  %5402 = vmatprep.subr.bf16.mxu1 %v14842_v45  ;;  %v1749_v6 = vmul.f32 %v10688_v56, %v14863_v15  ;;  %v1756_v27 = vmul.f32 %v10752_v62, %v14864_v43  ;;  %v1751_v34 = vmul.f32 %v10688_v56, %v14865_v36  ;;  %v14868_v56 = vld [vmem:[#allocation192_spill] sm:$0xff]  ;;  %v14879_v43 = vld [vmem:[#allocation115_spill] sm:$0xff] }
 0x2aa   :  { %3429 = vmatprep.mubr.bf16.mxu0 %v6982_v10  ;;  %4102 = vmatprep.mubr.bf16.mxu1 %v6982_v10  ;;  %v1758_v18 = vmul.f32 %v10752_v62, %v14866_v60  ;;  %v11215_v0 = vpack.c.bf16 %v2370_v47, %v2363_v5  ;;  %v11217_v28 = vpack.c.bf16 %v2383_v40, %v2376_v20  ;;  %v2377_v1 = vmax.f32 %v2153_v37, 0.0  ;;  %v14871_v10 = vld [vmem:[#allocation124_spill] sm:$0xff]  ;;  %v14874_v47 = vld [vmem:[#allocation203_spill] sm:$0xff]  ;;  %v14876_v40 = vld [vmem:[#allocation117_spill] sm:$0xff] }
 0x2ab   :  { %v2160_v22 = vadd.f32 %v14858_v58, %v1744_v30  ;;  %v1764_v21 = vmul.f32 %v10742_v39, %v14867_v29  ;;  %v11224_v33 = vpack.c.bf16 %v2382_v52, %v2375_v3  ;;  %v2166_v48 = vadd.f32 %v14868_v56, %v1750_v54  ;;  %v14870_v58 = vld [vmem:[#allocation188_spill] sm:$0xff]  ;;  %v14877_v37 = vld [vmem:[#allocation21_spill] sm:$0xff] }
 0x2ac   :  { %4730 = vmatpush1.bf16.msra.mxu0 %v11053_v12  ;;  %5403 = vmatpush1.bf16.msra.mxu1 %v11055_v61  ;;  %v1763_v62 = vmul.f32 %v10742_v39, %v14869_v49  ;;  %v2173_v63 = vadd.f32 %v14870_v58, %v1757_v8  ;;  %v2165_v32 = vadd.f32 %v14868_v56, %v1749_v6  ;;  %v14872_v12 = vld [vmem:[#allocation139_spill] sm:$0xff] }
 0x2ad   :  { %4731 = vmatprep.subr.bf16.mxu0 %v11131_v51  ;;  %5404 = vmatprep.subr.bf16.mxu1 %v14842_v45  ;;  %v1771_v26 = vmul.f32 %v14872_v12, %v14871_v10  ;;  %v6985_v61 = vld [vmem:[#allocation2 + $0x34] ss:$8 sps:$4 sm:$0xff]   ;;  %v2172_v35 = vadd.f32 %v14870_v58, %v1756_v27  ;;  %v2167_v5 = vadd.f32 %v14868_v56, %v1751_v34  ;;  %v2384_v30 = vmax.f32 %v2160_v22, 0.0  ;;  %v14880_v34 = vld [vmem:[#allocation197_spill] sm:$0xff] }
 0x2ae   :  { %v2174_v20 = vadd.f32 %v14870_v58, %v1758_v18  ;;  %v1770_v51 = vmul.f32 %v14872_v12, %v14873_v16  ;;  %v2180_v3 = vadd.f32 %v14874_v47, %v1764_v21  ;;  %v1765_v54 = vmul.f32 %v10742_v39, %v14875_v17  ;;  %v14878_v6 = vld [vmem:[#allocation123_spill] sm:$0xff]  ;;  %v14882_v18 = vld [vmem:[#allocation145_spill] sm:$0xff]  ;;  %v14886_v16 = vld [vmem:[#allocation116_spill] sm:$0xff] }
 0x2af   :  { %3430 = vmatmul.mubr.bf16.gmra.mrb[8].mxu0 %v6984_v50  ;;  %4103 = vmatmul.mubr.bf16.gmra.mrb[8].mxu1 %v6984_v50  ;;  %v1778_v53 = vmul.f32 %v14877_v37, %v14876_v40  ;;  %v2390_v8 = vmax.f32 %v2166_v48, 0.0  ;;  %v2179_v15 = vadd.f32 %v14874_v47, %v1763_v62  ;;  %v1772_v52 = vmul.f32 %v14872_v12, %v14878_v6  ;;  %v14883_v21 = vld [vmem:[#allocation137_spill] sm:$0xff]  ;;  %v6987_v48 = vld [vmem:[#allocation2 + $0x30] ss:$8 sps:$4 sm:$0xff]  }
 0x2b0   :  { %4732 = vmatpush1.bf16.msra.mxu0 %v11136_v38  ;;  %5405 = vmatpush1.bf16.msra.mxu1 %v11166_v4  ;;  %v1777_v27 = vmul.f32 %v14877_v37, %v14879_v43  ;;  %v2680_v39 = vpack.c.bf16 %v2384_v30, %v2377_v1  ;;  %v2397_v36 = vmax.f32 %v2173_v63, 0.0  ;;  %v2187_v60 = vadd.f32 %v14880_v34, %v1771_v26  ;;  %v14881_v38 = vld [vmem:[#allocation140_spill] sm:$0xff]  ;;  %v14884_v1 = vld [vmem:[#allocation211_spill] sm:$0xff] }
 0x2b1   :  { %4733 = vmatprep.subr.bf16.mxu0 %v11182_v23  ;;  %5406 = vmatprep.subr.bf16.mxu1 %v14842_v45  ;;  %v1785_v4 = vmul.f32 %v14882_v18, %v14881_v38  ;;  %v2389_v50 = vmax.f32 %v2165_v32, 0.0  ;;  %v2391_v22 = vmax.f32 %v2167_v5, 0.0  ;;  %v2186_v29 = vadd.f32 %v14880_v34, %v1770_v51  ;;  %v14889_v6 = vld [vmem:[#allocation23_spill] sm:$0xff] }
 0x2b2   :  { %3439 = vmatprep.mubr.bf16.mxu0 %v6985_v61  ;;  %4112 = vmatprep.mubr.bf16.mxu1 %v6985_v61  ;;  %v1784_v56 = vmul.f32 %v14882_v18, %v14883_v21  ;;  %v2396_v23 = vmax.f32 %v2172_v35, 0.0  ;;  %v2404_v49 = vmax.f32 %v2180_v3, 0.0  ;;  %v2181_v62 = vadd.f32 %v14874_v47, %v1765_v54  ;;  %v14885_v35 = vld [vmem:[#allocation205_spill] sm:$0xff]  ;;  %v14887_v54 = vld [vmem:[#allocation138_spill] sm:$0xff] }
 0x2b3   :  { %v2194_v58 = vadd.f32 %v14884_v1, %v1778_v53  ;;  %v2398_v63 = vmax.f32 %v2174_v20, 0.0  ;;  %v2403_v10 = vmax.f32 %v2179_v15, 0.0  ;;  %v2188_v32 = vadd.f32 %v14880_v34, %v1772_v52  ;;  %v14888_v15 = vld [vmem:[#allocation131_spill] sm:$0xff]  ;;  %v14891_v34 = vld [vmem:[#allocation22_spill] sm:$0xff] }
 0x2b4   :  { %4734 = vmatpush1.bf16.msra.mxu0 %v11187_v41  ;;  %5407 = vmatpush1.bf16.msra.mxu1 %v11189_v46  ;;  %v2193_v12 = vadd.f32 %v14884_v1, %v1777_v27  ;;  %v2686_v26 = vpack.c.bf16 %v2397_v36, %v2390_v8  ;;  %v2411_v61 = vmax.f32 %v2187_v60, 0.0  ;;  %v2201_v5 = vadd.f32 %v14885_v35, %v1785_v4  ;;  %v6988_v41 = vld [vmem:[#allocation2 + $0x44] ss:$8 sps:$4 sm:$0xff]   ;;  %v14890_v36 = vld [vmem:[#allocation155_spill] sm:$0xff]  ;;  %v6990_v21 = vld [vmem:[#allocation2 + $0x40] ss:$8 sps:$4 sm:$0xff]  }
 0x2b5   :  { %4735 = vmatprep.subr.bf16.mxu0 %v11192_v24  ;;  %5408 = vmatprep.subr.bf16.mxu1 %v14842_v45  ;;  %v1779_v51 = vmul.f32 %v14877_v37, %v14886_v16  ;;  %v2685_v30 = vpack.c.bf16 %v2396_v23, %v2389_v50  ;;  %v2687_v46 = vpack.c.bf16 %v2398_v63, %v2391_v22  ;;  %v2410_v20 = vmax.f32 %v2186_v29, 0.0  ;;  %v14894_v50 = vld [vmem:[#allocation130_spill] sm:$0xff] }
 0x2b6   :  { %v2200_v47 = vadd.f32 %v14885_v35, %v1784_v56  ;;  %v2693_v3 = vpack.c.bf16 %v2411_v61, %v2404_v49  ;;  %v2405_v17 = vmax.f32 %v2181_v62, 0.0  ;;  %v2418_v24 = vmax.f32 %v2194_v58, 0.0  ;;  %v14895_v22 = vld [vmem:[#allocation154_spill] sm:$0xff]  ;;  %v14896_v49 = vld [vmem:[#allocation148_spill] sm:$0xff] }
 0x2b7   :  { %3440 = vmatmul.mubr.bf16.gmra.mrb[12].mxu0 %v6987_v48  ;;  %4113 = vmatmul.mubr.bf16.gmra.mrb[12].mxu1 %v6987_v48  ;;  %v1786_v40 = vmul.f32 %v14882_v18, %v14887_v54  ;;  %v11276_v53 = vpack.c.bf16 %v2410_v20, %v2403_v10  ;;  %v2412_v37 = vmax.f32 %v2188_v32, 0.0  ;;  %v2417_v8 = vmax.f32 %v2193_v12, 0.0  ;;  %v14893_v18 = vld [vmem:[#allocation153_spill] sm:$0xff]  ;;  %v14897_v62 = vld [vmem:[#allocation20_spill] sm:$0xff]  ;;  %v14898_v63 = vld [vmem:[#allocation218_spill] sm:$0xff] }
 0x2b8   :  { %4736 = vmatpush1.bf16.msra.mxu0 %v11198_v42  ;;  %5409 = vmatpush1.bf16.msra.mxu1 %v11215_v0  ;;  %v1792_v52 = vmul.f32 %v14889_v6, %v14888_v15  ;;  %v2425_v43 = vmax.f32 %v2201_v5, 0.0  ;;  %v2195_v27 = vadd.f32 %v14884_v1, %v1779_v51  ;;  %v1799_v60 = vmul.f32 %v14891_v34, %v14890_v36  ;;  %v14892_v42 = vld [vmem:[#allocation129_spill] sm:$0xff]  ;;  %v14899_v32 = vld [vmem:[#allocation146_spill] sm:$0xff]  ;;  %v14903_v54 = vld [vmem:[#allocation147_spill] sm:$0xff] }
 0x2b9   :  { %4737 = vmatprep.subr.bf16.mxu0 %v11217_v28  ;;  %5410 = vmatprep.subr.bf16.mxu1 %v14842_v45  ;;  %v1791_v0 = vmul.f32 %v14889_v6, %v14892_v42  ;;  %v2424_v38 = vmax.f32 %v2200_v47, 0.0  ;;  %v1798_v4 = vmul.f32 %v14891_v34, %v14893_v18  ;;  %v1793_v28 = vmul.f32 %v14889_v6, %v14894_v50  ;;  %v14900_v5 = vld [vmem:[#allocation214_spill] sm:$0xff]  ;;  %v14901_v51 = vld [vmem:[#allocation173_spill] sm:$0xff] }
 0x2ba   :  { %3449 = vmatprep.mubr.bf16.mxu0 %v6988_v41  ;;  %4122 = vmatprep.mubr.bf16.mxu1 %v6988_v41  ;;  %v1800_v29 = vmul.f32 %v14891_v34, %v14895_v22  ;;  %v2694_v56 = vpack.c.bf16 %v2412_v37, %v2405_v17  ;;  %v2700_v48 = vpack.c.bf16 %v2425_v43, %v2418_v24  ;;  %v2419_v61 = vmax.f32 %v2195_v27, 0.0  ;;  %v14902_v17 = vld [vmem:[#allocation170_spill] sm:$0xff]  ;;  %v14904_v37 = vld [vmem:[#allocation164_spill] sm:$0xff]  ;;  %v14905_v43 = vld [vmem:[#allocation171_spill] sm:$0xff] }
 0x2bb   :  { %v2202_v23 = vadd.f32 %v14885_v35, %v1786_v40  ;;  %v1806_v1 = vmul.f32 %v14897_v62, %v14896_v49  ;;  %v11297_v58 = vpack.c.bf16 %v2424_v38, %v2417_v8  ;;  %v2208_v10 = vadd.f32 %v14898_v63, %v1792_v52  ;;  %v14906_v42 = vld [vmem:[#allocation189_spill] sm:$0xff]  ;;  %v14908_v49 = vld [vmem:[#allocation187_spill] sm:$0xff] }
 0x2bc   :  { %4738 = vmatpush1.bf16.msra.mxu0 %v11224_v33  ;;  %5411 = vmatpush1.bf16.msra.mxu1 %v2680_v39  ;;  %v1805_v12 = vmul.f32 %v14897_v62, %v14899_v32  ;;  %v2215_v16 = vadd.f32 %v14900_v5, %v1799_v60  ;;  %v2207_v35 = vadd.f32 %v14898_v63, %v1791_v0  ;;  %v6991_v33 = vld [vmem:[#allocation2 + $0x54] ss:$8 sps:$4 sm:$0xff]  }
 0x2bd   :  { %4739 = vmatprep.subr.bf16.mxu0 %v2686_v26  ;;  %5412 = vmatprep.subr.bf16.mxu1 %v14842_v45  ;;  %v1813_v41 = vmul.f32 %v10958_v2, %v14901_v51  ;;  %v2214_v39 = vadd.f32 %v14900_v5, %v1798_v4  ;;  %v2209_v20 = vadd.f32 %v14898_v63, %v1793_v28  ;;  %v2426_v15 = vmax.f32 %v2202_v23, 0.0  ;;  %v6993_v4 = vld [vmem:[#allocation2 + $0x50] ss:$8 sps:$4 sm:$0xff]   ;;  %v14909_v63 = vld [vmem:[#allocation162_spill] sm:$0xff]  ;;  %v14911_v51 = vld [vmem:[#allocation181_spill] sm:$0xff] }
 0x2be   :  { %v2216_v47 = vadd.f32 %v14900_v5, %v1800_v29  ;;  %v1812_v26 = vmul.f32 %v10958_v2, %v14902_v17  ;;  %v2222_v24 = vadd.f32 %v10445_v11, %v1806_v1  ;;  %v1807_v40 = vmul.f32 %v14897_v62, %v14903_v54 }
 0x2bf   :  { %3450 = vmatmul.mubr.bf16.gmra.mrb[16].mxu0 %v6990_v21  ;;  %4123 = vmatmul.mubr.bf16.gmra.mrb[16].mxu1 %v6990_v21  ;;  %v1820_v8 = vmul.f32 %v10931_v19, %v14904_v37  ;;  %v2432_v6 = vmax.f32 %v2208_v10, 0.0  ;;  %v2221_v52 = vadd.f32 %v10445_v11, %v1805_v12  ;;  %v1814_v27 = vmul.f32 %v10958_v2, %v14905_v43  ;;  %v14907_v21 = vld [vmem:[#allocation161_spill] sm:$0xff] }
 0x2c0   :  { %4740 = vmatpush1.bf16.msra.mxu0 %v2685_v30  ;;  %5413 = vmatpush1.bf16.msra.mxu1 %v2687_v46  ;;  %v2439_v36 = vmax.f32 %v2215_v16, 0.0  ;;  %v2431_v34 = vmax.f32 %v2207_v35, 0.0  ;;  %v2229_v60 = vadd.f32 %v10435_v59, %v1813_v41  ;;  %v1827_v0 = vmul.f32 %v11006_v14, %v14906_v42 }
 0x2c1   :  { %4741 = vmatprep.subr.bf16.mxu0 %v2693_v3  ;;  %5414 = vmatprep.subr.bf16.mxu1 %v14842_v45  ;;  %v2701_v30 = vpack.c.bf16 %v2426_v15, %v2419_v61  ;;  %v2438_v46 = vmax.f32 %v2214_v39, 0.0  ;;  %v2433_v38 = vmax.f32 %v2209_v20, 0.0  ;;  %v2228_v18 = vadd.f32 %v10435_v59, %v1812_v26  ;;  %v6994_v61 = vld [vmem:[#allocation2 + $0x64] ss:$8 sps:$4 sm:$0xff]   ;;  %v14912_v26 = vld [vmem:[#allocation212_spill] sm:$0xff] }
 0x2c2   :  { %3459 = vmatprep.mubr.bf16.mxu0 %v6991_v33  ;;  %4132 = vmatprep.mubr.bf16.mxu1 %v6991_v33  ;;  %v2440_v50 = vmax.f32 %v2216_v47, 0.0  ;;  %v2446_v2 = vmax.f32 %v2222_v24, 0.0  ;;  %v2223_v3 = vadd.f32 %v10445_v11, %v1807_v40  ;;  %v2236_v28 = vadd.f32 %v10447_v31, %v1820_v8  ;;  %v14914_v40 = vld [vmem:[#allocation179_spill] sm:$0xff] }
 0x2c3   :  { %v2445_v22 = vmax.f32 %v2221_v52, 0.0  ;;  %v2230_v29 = vadd.f32 %v10435_v59, %v1814_v27  ;;  %v1819_v23 = vmul.f32 %v10931_v19, %v14907_v21  ;;  %v1826_v62 = vmul.f32 %v11006_v14, %v14908_v49  ;;  %v14915_v8 = vld [vmem:[#allocation215_spill] sm:$0xff]  ;;  %v14922_v49 = vld [vmem:[#allocation217_spill] sm:$0xff] }
 0x2c4   :  { %4742 = vmatpush1.bf16.msra.mxu0 %v11276_v53  ;;  %5415 = vmatpush1.bf16.msra.mxu1 %v2694_v56  ;;  %v2453_v1 = vmax.f32 %v2229_v60, 0.0  ;;  %v2243_v11 = vadd.f32 %v10440_v57, %v1827_v0  ;;  %v1821_v10 = vmul.f32 %v10931_v19, %v14909_v63  ;;  %v14910_v53 = vld [vmem:[#allocation190_spill] sm:$0xff]  ;;  %v2707_v32 = vpack.c.bf16 %v2439_v36, %v2432_v6  ;;  %v14923_v63 = vld [vmem:[#allocation196_spill] sm:$0xff] }
 0x2c5   :  { %4743 = vmatprep.subr.bf16.mxu0 %v2700_v48  ;;  %5416 = vmatprep.subr.bf16.mxu1 %v14842_v45  ;;  %v1828_v56 = vmul.f32 %v11006_v14, %v14910_v53  ;;  %v2706_v59 = vpack.c.bf16 %v2438_v46, %v2431_v34  ;;  %v2708_v12 = vpack.c.bf16 %v2440_v50, %v2433_v38  ;;  %v2452_v5 = vmax.f32 %v2228_v18, 0.0  ;;  %v6996_v6 = vld [vmem:[#allocation2 + $0x60] ss:$8 sps:$4 sm:$0xff]   ;;  %v14919_v38 = vld [vmem:[#allocation219_spill] sm:$0xff] }
 0x2c6   :  { %v2714_v16 = vpack.c.bf16 %v2453_v1, %v2446_v2  ;;  %v2447_v48 = vmax.f32 %v2223_v3, 0.0  ;;  %v2460_v35 = vmax.f32 %v2236_v28, 0.0  ;;  %v1834_v41 = vmul.f32 %v11000_v13, %v14911_v51  ;;  %v14917_v34 = vld [vmem:[#allocation209_spill] sm:$0xff]  ;;  %v6997_v28 = vld [vmem:[#allocation2 + $0x74] ss:$8 sps:$4 sm:$0xff]  }
 0x2c7   :  { %3460 = vmatmul.mubr.bf16.gmra.mrb[20].mxu0 %v6993_v4  ;;  %4133 = vmatmul.mubr.bf16.gmra.mrb[20].mxu1 %v6993_v4  ;;  %v2713_v19 = vpack.c.bf16 %v2452_v5, %v2445_v22  ;;  %v2454_v33 = vmax.f32 %v2230_v29, 0.0  ;;  %v2235_v14 = vadd.f32 %v10447_v31, %v1819_v23  ;;  %v2242_v39 = vadd.f32 %v10440_v57, %v1826_v62  ;;  %v14920_v4 = vld [vmem:[#allocation199_spill] sm:$0xff]  ;;  %v14921_v50 = vld [vmem:[#allocation37_spill] sm:$0xff] }
 0x2c8   :  { %4744 = vmatpush1.bf16.msra.mxu0 %v11297_v58  ;;  %5417 = vmatpush1.bf16.msra.mxu1 %v2701_v30  ;;  %v2467_v20 = vmax.f32 %v2243_v11, 0.0  ;;  %v2237_v47 = vadd.f32 %v10447_v31, %v1821_v10  ;;  %v2244_v17 = vadd.f32 %v10440_v57, %v1828_v56  ;;  %v1841_v24 = vmul.f32 %v11062_v9, %v14912_v26  ;;  %v14913_v58 = vld [vmem:[#allocation180_spill] sm:$0xff]  ;;  %v14916_v57 = vld [vmem:[#allocation206_spill] sm:$0xff] }
 0x2c9   :  { %4745 = vmatprep.subr.bf16.mxu0 %v2707_v32  ;;  %5418 = vmatprep.subr.bf16.mxu1 %v14842_v45  ;;  %v1833_v54 = vmul.f32 %v11000_v13, %v14913_v58  ;;  %v1835_v37 = vmul.f32 %v11000_v13, %v14914_v40  ;;  %v1854_v15 = vmul.f32 %v11091_v25, %v14915_v8  ;;  %v2459_v36 = vmax.f32 %v2235_v14, 0.0  ;;  %v14918_v13 = vld [vmem:[#allocation216_spill] sm:$0xff]  ;;  %v7006_v8 = vld [vmem:[#allocation2 + $0xa4] ss:$8 sps:$4 sm:$0xff]  }
 0x2ca   :  { %3469 = vmatprep.mubr.bf16.mxu0 %v6994_v61  ;;  %4142 = vmatprep.mubr.bf16.mxu1 %v6994_v61  ;;  %v2715_v52 = vpack.c.bf16 %v2454_v33, %v2447_v48  ;;  %v2721_v43 = vpack.c.bf16 %v2467_v20, %v2460_v35  ;;  %v2250_v31 = vadd.f32 %v10461_v55, %v1834_v41  ;;  %v2466_v30 = vmax.f32 %v2242_v39, 0.0  ;;  %v6999_v35 = vld [vmem:[#allocation2 + $0x70] ss:$8 sps:$4 sm:$0xff]   ;;  %v7003_v40 = vld [vmem:[#allocation2 + $0x94] ss:$8 sps:$4 sm:$0xff]  }
 0x2cb   :  { %v1840_v27 = vmul.f32 %v11062_v9, %v14916_v57  ;;  %v1842_v60 = vmul.f32 %v11062_v9, %v14917_v34  ;;  %v2270_v42 = vadd.f32 %v11104_v44, %v1854_v15  ;;  %v1856_v0 = vmul.f32 %v11091_v25, %v14918_v13  ;;  %v7008_v15 = vld [vmem:[#allocation2 + $0xa0] ss:$8 sps:$4 sm:$0xff]   ;;  %v7017_v57 = vld [vmem:[#allocation2 + $0xd0] ss:$8 sps:$4 sm:$0xff]   ;;  %v7021_v34 = vld [vmem:[#allocation2 + $0xf4] ss:$8 sps:$4 sm:$0xff]  }
 0x2cc   :  { %4746 = vmatpush1.bf16.msra.mxu0 %v2706_v59  ;;  %5419 = vmatpush1.bf16.msra.mxu1 %v2708_v12  ;;  %v2461_v46 = vmax.f32 %v2237_v47, 0.0  ;;  %v2257_v18 = vadd.f32 %v14919_v38, %v1841_v24  ;;  %v1848_v2 = vmul.f32 %v14921_v50, %v14920_v4  ;;  %v2468_v3 = vmax.f32 %v2244_v17, 0.0  ;;  %v7000_v47 = vld [vmem:[#allocation2 + $0x84] ss:$8 sps:$4 sm:$0xff]   ;;  %v7026_v13 = vld [vmem:[#allocation2 + $0x100] ss:$8 sps:$4 sm:$0xff]  }
 0x2cd   :  { %4747 = vmatprep.subr.bf16.mxu0 %v2714_v16  ;;  %5420 = vmatprep.subr.bf16.mxu1 %v14842_v45  ;;  %v2249_v22 = vadd.f32 %v10461_v55, %v1833_v54  ;;  %v2251_v9 = vadd.f32 %v10461_v55, %v1835_v37  ;;  %v2272_v29 = vadd.f32 %v11104_v44, %v1856_v0  ;;  %v2474_v21 = vmax.f32 %v2250_v31, 0.0  ;;  %v14924_v55 = vld [vmem:[#allocation198_spill] sm:$0xff]  ;;  %v7005_v37 = vld [vmem:[#allocation2 + $0x90] ss:$8 sps:$4 sm:$0xff]   ;;  %v7015_v31 = vld [vmem:[#allocation2 + $0xd4] ss:$8 sps:$4 sm:$0xff]  }
 0x2ce   :  { %v2256_v23 = vadd.f32 %v14919_v38, %v1840_v27  ;;  %v1855_v62 = vmul.f32 %v11091_v25, %v14922_v49  ;;  %v2264_v1 = vadd.f32 %v11067_v7, %v1848_v2  ;;  %v2258_v11 = vadd.f32 %v14919_v38, %v1842_v60  ;;  %v7002_v54 = vld [vmem:[#allocation2 + $0x80] ss:$8 sps:$4 sm:$0xff]   ;;  %v7018_v27 = vld [vmem:[#allocation2 + $0xe4] ss:$8 sps:$4 sm:$0xff]   ;;  %v7023_v60 = vld [vmem:[#allocation2 + $0xf0] ss:$8 sps:$4 sm:$0xff]  }
 0x2cf   :  { %3470 = vmatmul.mubr.bf16.gmra.mrb[24].mxu0 %v6996_v6  ;;  %4143 = vmatmul.mubr.bf16.gmra.mrb[24].mxu1 %v6996_v6  ;;  %v1847_v10 = vmul.f32 %v14921_v50, %v14923_v63  ;;  %v1849_v53 = vmul.f32 %v14921_v50, %v14924_v55  ;;  %v2720_v56 = vpack.c.bf16 %v2466_v30, %v2459_v36  ;;  %v2481_v59 = vmax.f32 %v2257_v18, 0.0  ;;  %v7011_v6 = vld [vmem:[#allocation2 + $0xb0] ss:$8 sps:$4 sm:$0xff]   ;;  %v7020_v36 = vld [vmem:[#allocation2 + $0xe0] ss:$8 sps:$4 sm:$0xff]  }
 0x2d0   :  { %4748 = vmatpush1.bf16.msra.mxu0 %v2713_v19  ;;  %5421 = vmatpush1.bf16.msra.mxu1 %v2715_v52  ;;  %v2722_v32 = vpack.c.bf16 %v2468_v3, %v2461_v46  ;;  %v2271_v25 = vadd.f32 %v11104_v44, %v1855_v62  ;;  %v2473_v12 = vmax.f32 %v2249_v22, 0.0  ;;  %v2475_v61 = vmax.f32 %v2251_v9, 0.0  ;;  %v7012_v52 = vld [vmem:[#allocation2 + $0xc4] ss:$8 sps:$4 sm:$0xff]   ;;  %v7027_v0 = vld [vmem:[#allocation2 + $0x114] ss:$8 sps:$4 sm:$0xff]  }
 0x2d1   :  { %4749 = vmatprep.subr.bf16.mxu0 %v2721_v43  ;;  %5422 = vmatprep.subr.bf16.mxu1 %v14842_v45  ;;  %v2263_v5 = vadd.f32 %v11067_v7, %v1847_v10  ;;  %v2265_v16 = vadd.f32 %v11067_v7, %v1849_v53  ;;  %v2728_v48 = vpack.c.bf16 %v2481_v59, %v2474_v21  ;;  %v2488_v51 = vmax.f32 %v2264_v1, 0.0  ;;  %v7014_v43 = vld [vmem:[#allocation2 + $0xc0] ss:$8 sps:$4 sm:$0xff]   ;;  %v7029_v30 = vld [vmem:[#allocation2 + $0x110] ss:$8 sps:$4 sm:$0xff]  }
 0x2d2   :  { %3479 = vmatprep.mubr.bf16.mxu0 %v6997_v28  ;;  %4152 = vmatprep.mubr.bf16.mxu1 %v6997_v28  ;;  %v2480_v41 = vmax.f32 %v2256_v23, 0.0  ;;  %v2482_v19 = vmax.f32 %v2258_v11, 0.0  ;;  %v2495_v33 = vmax.f32 %v2271_v25, 0.0  ;;  %v2494_v7 = vmax.f32 %v2270_v42, 0.0  ;;  %v7024_v42 = vld [vmem:[#allocation2 + $0x104] ss:$8 sps:$4 sm:$0xff]  }
 0x2d3   :  { %v2487_v39 = vmax.f32 %v2263_v5, 0.0  ;;  %v2489_v20 = vmax.f32 %v2265_v16, 0.0  ;;  %v2496_v26 = vmax.f32 %v2272_v29, 0.0  ;;  %v7030_v46 = vld [vmem:[#allocation2 + $0x124] ss:$8 sps:$4 sm:$0xff]  }
 0x2d4   :  { %4750 = vmatpush1.bf16.msra.mxu0 %v2720_v56  ;;  %5423 = vmatpush1.bf16.msra.mxu1 %v2722_v32  ;;  %v2727_v44 = vpack.c.bf16 %v2480_v41, %v2473_v12  ;;  %v2729_v14 = vpack.c.bf16 %v2482_v19, %v2475_v61  ;;  %v2735_v17 = vpack.c.bf16 %v2495_v33, %v2488_v51  ;;  %v7032_v38 = vld [vmem:[#allocation2 + $0x120] ss:$8 sps:$4 sm:$0xff]   ;;  %v7033_v18 = vld [vmem:[#allocation2 + $0x134] ss:$8 sps:$4 sm:$0xff]   ;;  %v7035_v4 = vld [vmem:[#allocation2 + $0x130] ss:$8 sps:$4 sm:$0xff]  }
 0x2d5   :  { %4751 = vmatprep.subr.bf16.mxu0 %v2728_v48  ;;  %5424 = vmatprep.subr.bf16.mxu1 %v14842_v45  ;;  %v2734_v24 = vpack.c.bf16 %v2494_v7, %v2487_v39  ;;  %v2736_v58 = vpack.c.bf16 %v2496_v26, %v2489_v20  ;;  %v7036_v50 = vld [vmem:[#allocation2 + $0x144] ss:$8 sps:$4 sm:$0xff]   ;;  %v7038_v2 = vld [vmem:[#allocation2 + $0x140] ss:$8 sps:$4 sm:$0xff]   ;;  %v7039_v3 = vld [vmem:[#allocation2 + $0x154] ss:$8 sps:$4 sm:$0xff]  }
 0x2d6   :  { %v7041_v28 = vld [vmem:[#allocation2 + $0x150] ss:$8 sps:$4 sm:$0xff]   ;;  %v7042_v22 = vld [vmem:[#allocation2 + $0x164] ss:$8 sps:$4 sm:$0xff]   ;;  %v7044_v9 = vld [vmem:[#allocation2 + $0x160] ss:$8 sps:$4 sm:$0xff]  }
 0x2d7   :  { %3480 = vmatmul.mubr.bf16.gmra.mrb[28].mxu0 %v6999_v35  ;;  %4153 = vmatmul.mubr.bf16.gmra.mrb[28].mxu1 %v6999_v35  ;;  %v7045_v29 = vld [vmem:[#allocation2 + $0x174] ss:$8 sps:$4 sm:$0xff]   ;;  %v7047_v21 = vld [vmem:[#allocation2 + $0x170] ss:$8 sps:$4 sm:$0xff]   ;;  %v7048_v23 = vld [vmem:[#allocation2 + $0x184] ss:$8 sps:$4 sm:$0xff]  }
 0x2d8   :  { %4752 = vmatpush1.bf16.msra.mxu0 %v2727_v44  ;;  %5425 = vmatpush1.bf16.msra.mxu1 %v2729_v14  ;;  %v7050_v49 = vld [vmem:[#allocation2 + $0x180] ss:$8 sps:$4 sm:$0xff]   ;;  %v7051_v62 = vld [vmem:[#allocation2 + $0x194] ss:$8 sps:$4 sm:$0xff]   ;;  %v7053_v1 = vld [vmem:[#allocation2 + $0x190] ss:$8 sps:$4 sm:$0xff]  }
 0x2d9   :  { %4753 = vmatprep.subr.bf16.mxu0 %v2735_v17  ;;  %5426 = vmatprep.subr.bf16.mxu1 %v14842_v45  ;;  %v7009_v45 = vld [vmem:[#allocation2 + $0xb4] ss:$8 sps:$4 sm:$0xff]   ;;  %v7054_v11 = vld [vmem:[#allocation2 + $0x1a4] ss:$8 sps:$4 sm:$0xff]   ;;  %v7056_v63 = vld [vmem:[#allocation2 + $0x1a0] ss:$8 sps:$4 sm:$0xff]  }
 0x2da   :  { %3489 = vmatprep.mubr.bf16.mxu0 %v7000_v47  ;;  %4162 = vmatprep.mubr.bf16.mxu1 %v7000_v47  ;;  %v7057_v10 = vld [vmem:[#allocation2 + $0x1b4] ss:$8 sps:$4 sm:$0xff]   ;;  %v7059_v59 = vld [vmem:[#allocation2 + $0x1b0] ss:$8 sps:$4 sm:$0xff]   ;;  %v7060_v61 = vld [vmem:[#allocation2 + $0x1c4] ss:$8 sps:$4 sm:$0xff]  }
 0x2db   :  { %v7062_v19 = vld [vmem:[#allocation2 + $0x1c0] ss:$8 sps:$4 sm:$0xff]   ;;  %v7063_v14 = vld [vmem:[#allocation2 + $0x1d4] ss:$8 sps:$4 sm:$0xff]  }
 0x2dc   :  { %4754 = vmatpush1.bf16.msra.mxu0 %v2734_v24  ;;  %5427 = vmatpush1.bf16.msra.mxu1 %v2736_v58  ;;  %v7065_v24 = vld [vmem:[#allocation2 + $0x1d0] ss:$8 sps:$4 sm:$0xff]  }
 0x2df   :  { %3490 = vmatmul.mubr.bf16.gmra.mrb[32].mxu0 %v7002_v54  ;;  %4163 = vmatmul.mubr.bf16.gmra.mrb[32].mxu1 %v7002_v54 }
 0x2e0   :  { %3499 = vmatprep.mubr.bf16.mxu0 %v7003_v40  ;;  %4172 = vmatprep.mubr.bf16.mxu1 %v7003_v40  ;;  %v7066_v40 = vld [vmem:[#allocation2 + $0x1e4] ss:$8 sps:$4 sm:$0xff]  }
 0x2e7   :  { %3500 = vmatmul.mubr.bf16.gmra.mrb[36].mxu0 %v7005_v37  ;;  %4173 = vmatmul.mubr.bf16.gmra.mrb[36].mxu1 %v7005_v37 }
 0x2e8   :  { %3509 = vmatprep.mubr.bf16.mxu0 %v7006_v8  ;;  %4182 = vmatprep.mubr.bf16.mxu1 %v7006_v8 }
 0x2ef   :  { %3510 = vmatmul.mubr.bf16.gmra.mrb[40].mxu0 %v7008_v15  ;;  %4183 = vmatmul.mubr.bf16.gmra.mrb[40].mxu1 %v7008_v15 }
 0x2f0   :  { %3519 = vmatprep.mubr.bf16.mxu0 %v7009_v45  ;;  %4192 = vmatprep.mubr.bf16.mxu1 %v7009_v45 }
 0x2f7   :  { %3520 = vmatmul.mubr.bf16.gmra.mrb[44].mxu0 %v7011_v6  ;;  %4193 = vmatmul.mubr.bf16.gmra.mrb[44].mxu1 %v7011_v6 }
 0x2f8   :  { %3529 = vmatprep.mubr.bf16.mxu0 %v7012_v52  ;;  %4202 = vmatprep.mubr.bf16.mxu1 %v7012_v52 }
 0x2ff   :  { %3530 = vmatmul.mubr.bf16.gmra.mrb[48].mxu0 %v7014_v43  ;;  %4203 = vmatmul.mubr.bf16.gmra.mrb[48].mxu1 %v7014_v43  ;;  %v7068_v43 = vld [vmem:[#allocation2 + $0x1e0] ss:$8 sps:$4 sm:$0xff]  }
 0x300   :  { %3539 = vmatprep.mubr.bf16.mxu0 %v7015_v31  ;;  %4212 = vmatprep.mubr.bf16.mxu1 %v7015_v31 }
 0x307   :  { %3540 = vmatmul.mubr.bf16.gmra.mrb[52].mxu0 %v7017_v57  ;;  %4213 = vmatmul.mubr.bf16.gmra.mrb[52].mxu1 %v7017_v57 }
 0x308   :  { %3549 = vmatprep.mubr.bf16.mxu0 %v7018_v27  ;;  %4222 = vmatprep.mubr.bf16.mxu1 %v7018_v27  ;;  %v7069_v27 = vld [vmem:[#allocation2 + $0x1f4] ss:$8 sps:$4 sm:$0xff]  }
 0x30f   :  { %3550 = vmatmul.mubr.bf16.gmra.mrb[56].mxu0 %v7020_v36  ;;  %4223 = vmatmul.mubr.bf16.gmra.mrb[56].mxu1 %v7020_v36 }
 0x310   :  { %3559 = vmatprep.mubr.bf16.mxu0 %v7021_v34  ;;  %4232 = vmatprep.mubr.bf16.mxu1 %v7021_v34 }
 0x317   :  { %3560 = vmatmul.mubr.bf16.gmra.mrb[60].mxu0 %v7023_v60  ;;  %4233 = vmatmul.mubr.bf16.gmra.mrb[60].mxu1 %v7023_v60 }
 0x318   :  { %3569 = vmatprep.mubr.bf16.mxu0 %v7024_v42  ;;  %4242 = vmatprep.mubr.bf16.mxu1 %v7024_v42 }
 0x31f   :  { %3570 = vmatmul.mubr.bf16.gmra.mrb[64].mxu0 %v7026_v13  ;;  %4243 = vmatmul.mubr.bf16.gmra.mrb[64].mxu1 %v7026_v13 }
 0x320   :  { %3579 = vmatprep.mubr.bf16.mxu0 %v7027_v0  ;;  %4252 = vmatprep.mubr.bf16.mxu1 %v7027_v0 }
 0x327   :  { %3580 = vmatmul.mubr.bf16.gmra.mrb[68].mxu0 %v7029_v30  ;;  %4253 = vmatmul.mubr.bf16.gmra.mrb[68].mxu1 %v7029_v30  ;;  %v7071_v30 = vld [vmem:[#allocation2 + $0x1f0] ss:$8 sps:$4 sm:$0xff]  }
 0x328   :  { %3589 = vmatprep.mubr.bf16.mxu0 %v7030_v46  ;;  %4262 = vmatprep.mubr.bf16.mxu1 %v7030_v46 }
 0x32f   :  { %3590 = vmatmul.mubr.bf16.gmra.mrb[72].mxu0 %v7032_v38  ;;  %4263 = vmatmul.mubr.bf16.gmra.mrb[72].mxu1 %v7032_v38 }
 0x330   :  { %3599 = vmatprep.mubr.bf16.mxu0 %v7033_v18  ;;  %4272 = vmatprep.mubr.bf16.mxu1 %v7033_v18  ;;  %v7072_v18 = vld [vmem:[#allocation2 + $0x204] ss:$8 sps:$4 sm:$0xff]  }
 0x337   :  { %3600 = vmatmul.mubr.bf16.gmra.mrb[76].mxu0 %v7035_v4  ;;  %4273 = vmatmul.mubr.bf16.gmra.mrb[76].mxu1 %v7035_v4 }
 0x338   :  { %3609 = vmatprep.mubr.bf16.mxu0 %v7036_v50  ;;  %4282 = vmatprep.mubr.bf16.mxu1 %v7036_v50 }
 0x33f   :  { %3610 = vmatmul.mubr.bf16.gmra.mrb[80].mxu0 %v7038_v2  ;;  %4283 = vmatmul.mubr.bf16.gmra.mrb[80].mxu1 %v7038_v2 }
 0x340   :  { %3619 = vmatprep.mubr.bf16.mxu0 %v7039_v3  ;;  %4292 = vmatprep.mubr.bf16.mxu1 %v7039_v3 }
 0x347   :  { %3620 = vmatmul.mubr.bf16.gmra.mrb[84].mxu0 %v7041_v28  ;;  %4293 = vmatmul.mubr.bf16.gmra.mrb[84].mxu1 %v7041_v28 }
 0x348   :  { %3629 = vmatprep.mubr.bf16.mxu0 %v7042_v22  ;;  %4302 = vmatprep.mubr.bf16.mxu1 %v7042_v22 }
 0x34f   :  { %3630 = vmatmul.mubr.bf16.gmra.mrb[88].mxu0 %v7044_v9  ;;  %4303 = vmatmul.mubr.bf16.gmra.mrb[88].mxu1 %v7044_v9  ;;  %v7074_v9 = vld [vmem:[#allocation2 + $0x200] ss:$8 sps:$4 sm:$0xff]  }
 0x350   :  { %3639 = vmatprep.mubr.bf16.mxu0 %v7045_v29  ;;  %4312 = vmatprep.mubr.bf16.mxu1 %v7045_v29 }
 0x357   :  { %3640 = vmatmul.mubr.bf16.gmra.mrb[92].mxu0 %v7047_v21  ;;  %4313 = vmatmul.mubr.bf16.gmra.mrb[92].mxu1 %v7047_v21 }
 0x358   :  { %3649 = vmatprep.mubr.bf16.mxu0 %v7048_v23  ;;  %4322 = vmatprep.mubr.bf16.mxu1 %v7048_v23  ;;  %v7075_v23 = vld [vmem:[#allocation2 + $0x214] ss:$8 sps:$4 sm:$0xff]  }
 0x35f   :  { %3650 = vmatmul.mubr.bf16.gmra.mrb[96].mxu0 %v7050_v49  ;;  %4323 = vmatmul.mubr.bf16.gmra.mrb[96].mxu1 %v7050_v49 }
 0x360   :  { %3659 = vmatprep.mubr.bf16.mxu0 %v7051_v62  ;;  %4332 = vmatprep.mubr.bf16.mxu1 %v7051_v62 }
 0x367   :  { %3660 = vmatmul.mubr.bf16.gmra.mrb[100].mxu0 %v7053_v1  ;;  %4333 = vmatmul.mubr.bf16.gmra.mrb[100].mxu1 %v7053_v1 }
 0x368   :  { %3669 = vmatprep.mubr.bf16.mxu0 %v7054_v11  ;;  %4342 = vmatprep.mubr.bf16.mxu1 %v7054_v11 }
 0x36f   :  { %3670 = vmatmul.mubr.bf16.gmra.mrb[104].mxu0 %v7056_v63  ;;  %4343 = vmatmul.mubr.bf16.gmra.mrb[104].mxu1 %v7056_v63 }
 0x370   :  { %3679 = vmatprep.mubr.bf16.mxu0 %v7057_v10  ;;  %4352 = vmatprep.mubr.bf16.mxu1 %v7057_v10 }
 0x372   :  { %v3411_v55 = vpop.f32.mrb[0].mxu0  ;;  %v4084_v53 = vpop.f32.mrb[0].mxu1 }
 0x373   :  { %5941 = vst [vmem:[%s14205_s4] sm:$0xff] %v3411_v55  ;;  %5943 = vst [vmem:[%s14205_s4 + $0x10] sm:$0xff] %v4084_v53  ;;  %v3413_v56 = vpop.f32.mrb[1].mxu0  ;;  %v4086_v32 = vpop.f32.mrb[1].mxu1  ;;  %v7077_v55 = vld [vmem:[#allocation2 + $0x210] ss:$8 sps:$4 sm:$0xff]  }
 0x374   :  { %5942 = vst [vmem:[%s14205_s4 + $0x8] sm:$0xff] %v3413_v56  ;;  %5944 = vst [vmem:[%s14205_s4 + $0x18] sm:$0xff] %v4086_v32  ;;  %v3415_v25 = vpop.f32.mrb[2].mxu0  ;;  %v4088_v12 = vpop.f32.mrb[2].mxu1  ;;  %v7078_v32 = vld [vmem:[#allocation2 + $0x224] ss:$8 sps:$4 sm:$0xff]  }
 0x375   :  { %5948 = vst [vmem:[%s14205_s4 + $0x38] sm:$0xff] %v3415_v25  ;;  %5950 = vst [vmem:[%s14205_s4 + $0x48] sm:$0xff] %v4088_v12  ;;  %v3417_v5 = vpop.f32.mrb[3].mxu0  ;;  %v4090_v16 = vpop.f32.mrb[3].mxu1 }
 0x376   :  { %5949 = vst [vmem:[%s14205_s4 + $0x40] sm:$0xff] %v3417_v5  ;;  %5951 = vst [vmem:[%s14205_s4 + $0x50] sm:$0xff] %v4090_v16 }
 0x377   :  { %3680 = vmatmul.mubr.bf16.gmra.mrb[108].mxu0 %v7059_v59  ;;  %4353 = vmatmul.mubr.bf16.gmra.mrb[108].mxu1 %v7059_v59 }
 0x378   :  { %3689 = vmatprep.mubr.bf16.mxu0 %v7060_v61  ;;  %4362 = vmatprep.mubr.bf16.mxu1 %v7060_v61 }
 0x37a   :  { %v3421_v48 = vpop.f32.mrb[4].mxu0  ;;  %v4094_v35 = vpop.f32.mrb[4].mxu1 }
 0x37b   :  { %5955 = vst [vmem:[%s14205_s4 + $0x70] sm:$0xff] %v3421_v48  ;;  %5957 = vst [vmem:[%s14205_s4 + $0x80] sm:$0xff] %v4094_v35  ;;  %v3423_v51 = vpop.f32.mrb[5].mxu0  ;;  %v4096_v41 = vpop.f32.mrb[5].mxu1  ;;  %v7080_v48 = vld [vmem:[#allocation2 + $0x220] ss:$8 sps:$4 sm:$0xff]  }
 0x37c   :  { %5956 = vst [vmem:[%s14205_s4 + $0x78] sm:$0xff] %v3423_v51  ;;  %5958 = vst [vmem:[%s14205_s4 + $0x88] sm:$0xff] %v4096_v41  ;;  %v3425_v33 = vpop.f32.mrb[6].mxu0  ;;  %v4098_v44 = vpop.f32.mrb[6].mxu1  ;;  %v7081_v41 = vld [vmem:[#allocation2 + $0x234] ss:$8 sps:$4 sm:$0xff]  }
 0x37d   :  { %5962 = vst [vmem:[%s14205_s4 + $0xa8] sm:$0xff] %v3425_v33  ;;  %5964 = vst [vmem:[%s14205_s4 + $0xb8] sm:$0xff] %v4098_v44  ;;  %v3427_v39 = vpop.f32.mrb[7].mxu0  ;;  %v4100_v20 = vpop.f32.mrb[7].mxu1 }
 0x37e   :  { %5963 = vst [vmem:[%s14205_s4 + $0xb0] sm:$0xff] %v3427_v39  ;;  %5965 = vst [vmem:[%s14205_s4 + $0xc0] sm:$0xff] %v4100_v20 }
 0x37f   :  { %3690 = vmatmul.mubr.bf16.gmra.mrb[112].mxu0 %v7062_v19  ;;  %4363 = vmatmul.mubr.bf16.gmra.mrb[112].mxu1 %v7062_v19 }
 0x380   :  { %3699 = vmatprep.mubr.bf16.mxu0 %v7063_v14  ;;  %4372 = vmatprep.mubr.bf16.mxu1 %v7063_v14 }
 0x382   :  { %v3431_v47 = vpop.f32.mrb[8].mxu0  ;;  %v4104_v17 = vpop.f32.mrb[8].mxu1 }
 0x383   :  { %5969 = vst [vmem:[%s14205_s4 + $0xe0] sm:$0xff] %v3431_v47  ;;  %5971 = vst [vmem:[%s14205_s4 + $0xf0] sm:$0xff] %v4104_v17  ;;  %v3433_v7 = vpop.f32.mrb[9].mxu0  ;;  %v4106_v26 = vpop.f32.mrb[9].mxu1  ;;  %v7083_v47 = vld [vmem:[#allocation2 + $0x230] ss:$8 sps:$4 sm:$0xff]  }
 0x384   :  { %5970 = vst [vmem:[%s14205_s4 + $0xe8] sm:$0xff] %v3433_v7  ;;  %5972 = vst [vmem:[%s14205_s4 + $0xf8] sm:$0xff] %v4106_v26  ;;  %v3435_v58 = vpop.f32.mrb[10].mxu0  ;;  %v4108_v54 = vpop.f32.mrb[10].mxu1  ;;  %v7084_v26 = vld [vmem:[#allocation2 + $0x244] ss:$8 sps:$4 sm:$0xff]  }
 0x385   :  { %5976 = vst [vmem:[%s14205_s4 + $0x118] sm:$0xff] %v3435_v58  ;;  %5978 = vst [vmem:[%s14205_s4 + $0x128] sm:$0xff] %v4108_v54  ;;  %v3437_v37 = vpop.f32.mrb[11].mxu0  ;;  %v4110_v8 = vpop.f32.mrb[11].mxu1 }
 0x386   :  { %5977 = vst [vmem:[%s14205_s4 + $0x120] sm:$0xff] %v3437_v37  ;;  %5979 = vst [vmem:[%s14205_s4 + $0x130] sm:$0xff] %v4110_v8 }
 0x387   :  { %3700 = vmatmul.mubr.bf16.gmra.mrb[116].mxu0 %v7065_v24  ;;  %4373 = vmatmul.mubr.bf16.gmra.mrb[116].mxu1 %v7065_v24 }
 0x388   :  { %3709 = vmatprep.mubr.bf16.mxu0 %v7066_v40  ;;  %4382 = vmatprep.mubr.bf16.mxu1 %v7066_v40 }
 0x38a   :  { %v3441_v15 = vpop.f32.mrb[12].mxu0  ;;  %v4114_v45 = vpop.f32.mrb[12].mxu1 }
 0x38b   :  { %5983 = vst [vmem:[%s14205_s4 + $0x150] sm:$0xff] %v3441_v15  ;;  %5985 = vst [vmem:[%s14205_s4 + $0x160] sm:$0xff] %v4114_v45  ;;  %v3443_v6 = vpop.f32.mrb[13].mxu0  ;;  %v4116_v52 = vpop.f32.mrb[13].mxu1  ;;  %v7086_v15 = vld [vmem:[#allocation2 + $0x240] ss:$8 sps:$4 sm:$0xff]  }
 0x38c   :  { %5984 = vst [vmem:[%s14205_s4 + $0x158] sm:$0xff] %v3443_v6  ;;  %5986 = vst [vmem:[%s14205_s4 + $0x168] sm:$0xff] %v4116_v52  ;;  %v3445_v31 = vpop.f32.mrb[14].mxu0  ;;  %v4118_v57 = vpop.f32.mrb[14].mxu1  ;;  %v7087_v52 = vld [vmem:[#allocation2 + $0x254] ss:$8 sps:$4 sm:$0xff]  }
 0x38d   :  { %5990 = vst [vmem:[%s14205_s4 + $0x188] sm:$0xff] %v3445_v31  ;;  %5992 = vst [vmem:[%s14205_s4 + $0x198] sm:$0xff] %v4118_v57  ;;  %v3447_v36 = vpop.f32.mrb[15].mxu0  ;;  %v4120_v34 = vpop.f32.mrb[15].mxu1 }
 0x38e   :  { %5991 = vst [vmem:[%s14205_s4 + $0x190] sm:$0xff] %v3447_v36  ;;  %5993 = vst [vmem:[%s14205_s4 + $0x1a0] sm:$0xff] %v4120_v34 }
 0x38f   :  { %3710 = vmatmul.mubr.bf16.gmra.mrb[120].mxu0 %v7068_v43  ;;  %4383 = vmatmul.mubr.bf16.gmra.mrb[120].mxu1 %v7068_v43 }
 0x390   :  { %3719 = vmatprep.mubr.bf16.mxu0 %v7069_v27  ;;  %4392 = vmatprep.mubr.bf16.mxu1 %v7069_v27 }
 0x392   :  { %v3451_v60 = vpop.f32.mrb[16].mxu0  ;;  %v4124_v42 = vpop.f32.mrb[16].mxu1 }
 0x393   :  { %5997 = vst [vmem:[%s14205_s4 + $0x1c0] sm:$0xff] %v3451_v60  ;;  %5999 = vst [vmem:[%s14205_s4 + $0x1d0] sm:$0xff] %v4124_v42  ;;  %v3453_v13 = vpop.f32.mrb[17].mxu0  ;;  %v4126_v0 = vpop.f32.mrb[17].mxu1  ;;  %v7089_v60 = vld [vmem:[#allocation2 + $0x250] ss:$8 sps:$4 sm:$0xff]  }
 0x394   :  { %5998 = vst [vmem:[%s14205_s4 + $0x1c8] sm:$0xff] %v3453_v13  ;;  %6000 = vst [vmem:[%s14205_s4 + $0x1d8] sm:$0xff] %v4126_v0  ;;  %v3455_v46 = vpop.f32.mrb[18].mxu0  ;;  %v4128_v38 = vpop.f32.mrb[18].mxu1  ;;  %v7090_v0 = vld [vmem:[#allocation2 + $0x264] ss:$8 sps:$4 sm:$0xff]  }
 0x395   :  { %6004 = vst [vmem:[%s14205_s4 + $0x1f8] sm:$0xff] %v3455_v46  ;;  %6006 = vst [vmem:[%s14205_s4 + $0x208] sm:$0xff] %v4128_v38  ;;  %v3457_v4 = vpop.f32.mrb[19].mxu0  ;;  %v4130_v50 = vpop.f32.mrb[19].mxu1 }
 0x396   :  { %6005 = vst [vmem:[%s14205_s4 + $0x200] sm:$0xff] %v3457_v4  ;;  %6007 = vst [vmem:[%s14205_s4 + $0x210] sm:$0xff] %v4130_v50 }
 0x397   :  { %3720 = vmatmul.mubr.bf16.gmra.mrb[124].mxu0 %v7071_v30  ;;  %4393 = vmatmul.mubr.bf16.gmra.mrb[124].mxu1 %v7071_v30 }
 0x398   :  { %3729 = vmatprep.mubr.bf16.mxu0 %v7072_v18  ;;  %4402 = vmatprep.mubr.bf16.mxu1 %v7072_v18 }
 0x39a   :  { %v3461_v2 = vpop.f32.mrb[20].mxu0  ;;  %v4134_v3 = vpop.f32.mrb[20].mxu1 }
 0x39b   :  { %6011 = vst [vmem:[%s14205_s4 + $0x230] sm:$0xff] %v3461_v2  ;;  %6013 = vst [vmem:[%s14205_s4 + $0x240] sm:$0xff] %v4134_v3  ;;  %v3463_v28 = vpop.f32.mrb[21].mxu0  ;;  %v4136_v22 = vpop.f32.mrb[21].mxu1  ;;  %v7092_v2 = vld [vmem:[#allocation2 + $0x260] ss:$8 sps:$4 sm:$0xff]  }
 0x39c   :  { %6012 = vst [vmem:[%s14205_s4 + $0x238] sm:$0xff] %v3463_v28  ;;  %6014 = vst [vmem:[%s14205_s4 + $0x248] sm:$0xff] %v4136_v22  ;;  %v3465_v29 = vpop.f32.mrb[22].mxu0  ;;  %v4138_v21 = vpop.f32.mrb[22].mxu1  ;;  %v7093_v22 = vld [vmem:[#allocation2 + $0x274] ss:$8 sps:$4 sm:$0xff]  }
 0x39d   :  { %6018 = vst [vmem:[%s14205_s4 + $0x268] sm:$0xff] %v3465_v29  ;;  %6020 = vst [vmem:[%s14205_s4 + $0x278] sm:$0xff] %v4138_v21  ;;  %v3467_v49 = vpop.f32.mrb[23].mxu0  ;;  %v4140_v62 = vpop.f32.mrb[23].mxu1 }
 0x39e   :  { %6019 = vst [vmem:[%s14205_s4 + $0x270] sm:$0xff] %v3467_v49  ;;  %6021 = vst [vmem:[%s14205_s4 + $0x280] sm:$0xff] %v4140_v62 }
 0x39f   :  { %3730 = vmatmul.mubr.bf16.gmra.mrb[128].mxu0 %v7074_v9  ;;  %4403 = vmatmul.mubr.bf16.gmra.mrb[128].mxu1 %v7074_v9 }
 0x3a0   :  { %3739 = vmatprep.mubr.bf16.mxu0 %v7075_v23  ;;  %4412 = vmatprep.mubr.bf16.mxu1 %v7075_v23 }
 0x3a2   :  { %v3471_v1 = vpop.f32.mrb[24].mxu0  ;;  %v4144_v11 = vpop.f32.mrb[24].mxu1 }
 0x3a3   :  { %6025 = vst [vmem:[%s14205_s4 + $0x2a0] sm:$0xff] %v3471_v1  ;;  %6027 = vst [vmem:[%s14205_s4 + $0x2b0] sm:$0xff] %v4144_v11  ;;  %v3473_v63 = vpop.f32.mrb[25].mxu0  ;;  %v4146_v10 = vpop.f32.mrb[25].mxu1  ;;  %v7095_v1 = vld [vmem:[#allocation2 + $0x270] ss:$8 sps:$4 sm:$0xff]  }
 0x3a4   :  { %6026 = vst [vmem:[%s14205_s4 + $0x2a8] sm:$0xff] %v3473_v63  ;;  %6028 = vst [vmem:[%s14205_s4 + $0x2b8] sm:$0xff] %v4146_v10  ;;  %v3475_v53 = vpop.f32.mrb[26].mxu0  ;;  %v4148_v56 = vpop.f32.mrb[26].mxu1  ;;  %v7096_v10 = vld [vmem:[#allocation2 + $0x284] ss:$8 sps:$4 sm:$0xff]  }
 0x3a5   :  { %6032 = vst [vmem:[%s14205_s4 + $0x2d8] sm:$0xff] %v3475_v53  ;;  %6034 = vst [vmem:[%s14205_s4 + $0x2e8] sm:$0xff] %v4148_v56  ;;  %v3477_v59 = vpop.f32.mrb[27].mxu0  ;;  %v4150_v25 = vpop.f32.mrb[27].mxu1 }
 0x3a6   :  { %6033 = vst [vmem:[%s14205_s4 + $0x2e0] sm:$0xff] %v3477_v59  ;;  %6035 = vst [vmem:[%s14205_s4 + $0x2f0] sm:$0xff] %v4150_v25 }
 0x3a7   :  { %3740 = vmatmul.mubr.bf16.gmra.mrb[132].mxu0 %v7077_v55  ;;  %4413 = vmatmul.mubr.bf16.gmra.mrb[132].mxu1 %v7077_v55 }
 0x3a8   :  { %3749 = vmatprep.mubr.bf16.mxu0 %v7078_v32  ;;  %4422 = vmatprep.mubr.bf16.mxu1 %v7078_v32 }
 0x3aa   :  { %v3481_v12 = vpop.f32.mrb[28].mxu0  ;;  %v4154_v61 = vpop.f32.mrb[28].mxu1 }
 0x3ab   :  { %6039 = vst [vmem:[%s14205_s4 + $0x310] sm:$0xff] %v3481_v12  ;;  %6041 = vst [vmem:[%s14205_s4 + $0x320] sm:$0xff] %v4154_v61  ;;  %v3483_v5 = vpop.f32.mrb[29].mxu0  ;;  %v4156_v16 = vpop.f32.mrb[29].mxu1  ;;  %v7098_v12 = vld [vmem:[#allocation2 + $0x280] ss:$8 sps:$4 sm:$0xff]  }
 0x3ac   :  { %6040 = vst [vmem:[%s14205_s4 + $0x318] sm:$0xff] %v3483_v5  ;;  %6042 = vst [vmem:[%s14205_s4 + $0x328] sm:$0xff] %v4156_v16  ;;  %v3485_v35 = vpop.f32.mrb[30].mxu0  ;;  %v4158_v51 = vpop.f32.mrb[30].mxu1  ;;  %v7099_v16 = vld [vmem:[#allocation2 + $0x294] ss:$8 sps:$4 sm:$0xff]  }
 0x3ad   :  { %6046 = vst [vmem:[%s14205_s4 + $0x348] sm:$0xff] %v3485_v35  ;;  %6048 = vst [vmem:[%s14205_s4 + $0x358] sm:$0xff] %v4158_v51  ;;  %v3487_v19 = vpop.f32.mrb[31].mxu0  ;;  %v4160_v33 = vpop.f32.mrb[31].mxu1 }
 0x3ae   :  { %6047 = vst [vmem:[%s14205_s4 + $0x350] sm:$0xff] %v3487_v19  ;;  %6049 = vst [vmem:[%s14205_s4 + $0x360] sm:$0xff] %v4160_v33 }
 0x3af   :  { %3750 = vmatmul.mubr.bf16.gmra.mrb[136].mxu0 %v7080_v48  ;;  %4423 = vmatmul.mubr.bf16.gmra.mrb[136].mxu1 %v7080_v48 }
 0x3b0   :  { %3759 = vmatprep.mubr.bf16.mxu0 %v7081_v41  ;;  %4432 = vmatprep.mubr.bf16.mxu1 %v7081_v41 }
 0x3b2   :  { %v3491_v44 = vpop.f32.mrb[32].mxu0  ;;  %v4164_v14 = vpop.f32.mrb[32].mxu1 }
 0x3b3   :  { %6053 = vst [vmem:[%s14205_s4 + $0x380] sm:$0xff] %v3491_v44  ;;  %6055 = vst [vmem:[%s14205_s4 + $0x390] sm:$0xff] %v4164_v14  ;;  %v3493_v39 = vpop.f32.mrb[33].mxu0  ;;  %v4166_v20 = vpop.f32.mrb[33].mxu1  ;;  %v7101_v44 = vld [vmem:[#allocation2 + $0x290] ss:$8 sps:$4 sm:$0xff]  }
 0x3b4   :  { %6054 = vst [vmem:[%s14205_s4 + $0x388] sm:$0xff] %v3493_v39  ;;  %6056 = vst [vmem:[%s14205_s4 + $0x398] sm:$0xff] %v4166_v20  ;;  %v3495_v17 = vpop.f32.mrb[34].mxu0  ;;  %v4168_v7 = vpop.f32.mrb[34].mxu1  ;;  %v7102_v20 = vld [vmem:[#allocation2 + $0x2a4] ss:$8 sps:$4 sm:$0xff]  }
 0x3b5   :  { %6060 = vst [vmem:[%s14205_s4 + $0x3b8] sm:$0xff] %v3495_v17  ;;  %6062 = vst [vmem:[%s14205_s4 + $0x3c8] sm:$0xff] %v4168_v7  ;;  %v3497_v24 = vpop.f32.mrb[35].mxu0  ;;  %v4170_v58 = vpop.f32.mrb[35].mxu1 }
 0x3b6   :  { %6061 = vst [vmem:[%s14205_s4 + $0x3c0] sm:$0xff] %v3497_v24  ;;  %6063 = vst [vmem:[%s14205_s4 + $0x3d0] sm:$0xff] %v4170_v58 }
 0x3b7   :  { %3760 = vmatmul.mubr.bf16.gmra.mrb[140].mxu0 %v7083_v47  ;;  %4433 = vmatmul.mubr.bf16.gmra.mrb[140].mxu1 %v7083_v47 }
 0x3b8   :  { %3769 = vmatprep.mubr.bf16.mxu0 %v7084_v26  ;;  %4442 = vmatprep.mubr.bf16.mxu1 %v7084_v26 }
 0x3ba   :  { %v3501_v54 = vpop.f32.mrb[36].mxu0  ;;  %v4174_v40 = vpop.f32.mrb[36].mxu1 }
 0x3bb   :  { %6067 = vst [vmem:[%s14205_s4 + $0x3f0] sm:$0xff] %v3501_v54  ;;  %6069 = vst [vmem:[%s14205_s4 + $0x400] sm:$0xff] %v4174_v40  ;;  %v3503_v37 = vpop.f32.mrb[37].mxu0  ;;  %v4176_v8 = vpop.f32.mrb[37].mxu1  ;;  %v7104_v54 = vld [vmem:[#allocation2 + $0x2a0] ss:$8 sps:$4 sm:$0xff]  }
 0x3bc   :  { %6068 = vst [vmem:[%s14205_s4 + $0x3f8] sm:$0xff] %v3503_v37  ;;  %6070 = vst [vmem:[%s14205_s4 + $0x408] sm:$0xff] %v4176_v8  ;;  %v3505_v45 = vpop.f32.mrb[38].mxu0  ;;  %v4178_v6 = vpop.f32.mrb[38].mxu1  ;;  %v7105_v8 = vld [vmem:[#allocation2 + $0x2b4] ss:$8 sps:$4 sm:$0xff]  }
 0x3bd   :  { %6074 = vst [vmem:[%s14205_s4 + $0x428] sm:$0xff] %v3505_v45  ;;  %6076 = vst [vmem:[%s14205_s4 + $0x438] sm:$0xff] %v4178_v6  ;;  %v3507_v43 = vpop.f32.mrb[39].mxu0  ;;  %v4180_v31 = vpop.f32.mrb[39].mxu1 }
 0x3be   :  { %6075 = vst [vmem:[%s14205_s4 + $0x430] sm:$0xff] %v3507_v43  ;;  %6077 = vst [vmem:[%s14205_s4 + $0x440] sm:$0xff] %v4180_v31 }
 0x3bf   :  { %3770 = vmatmul.mubr.bf16.gmra.mrb[144].mxu0 %v7086_v15  ;;  %4443 = vmatmul.mubr.bf16.gmra.mrb[144].mxu1 %v7086_v15 }
 0x3c0   :  { %3779 = vmatprep.mubr.bf16.mxu0 %v7087_v52  ;;  %4452 = vmatprep.mubr.bf16.mxu1 %v7087_v52 }
 0x3c2   :  { %v3511_v57 = vpop.f32.mrb[40].mxu0  ;;  %v4184_v27 = vpop.f32.mrb[40].mxu1 }
 0x3c3   :  { %6081 = vst [vmem:[%s14205_s4 + $0x460] sm:$0xff] %v3511_v57  ;;  %6083 = vst [vmem:[%s14205_s4 + $0x470] sm:$0xff] %v4184_v27  ;;  %v3513_v36 = vpop.f32.mrb[41].mxu0  ;;  %v4186_v34 = vpop.f32.mrb[41].mxu1  ;;  %v7107_v57 = vld [vmem:[#allocation2 + $0x2b0] ss:$8 sps:$4 sm:$0xff]  }
 0x3c4   :  { %6082 = vst [vmem:[%s14205_s4 + $0x468] sm:$0xff] %v3513_v36  ;;  %6084 = vst [vmem:[%s14205_s4 + $0x478] sm:$0xff] %v4186_v34  ;;  %v3515_v42 = vpop.f32.mrb[42].mxu0  ;;  %v4188_v13 = vpop.f32.mrb[42].mxu1  ;;  %v7108_v34 = vld [vmem:[#allocation2 + $0x2c4] ss:$8 sps:$4 sm:$0xff]  }
 0x3c5   :  { %6088 = vst [vmem:[%s14205_s4 + $0x498] sm:$0xff] %v3515_v42  ;;  %6090 = vst [vmem:[%s14205_s4 + $0x4a8] sm:$0xff] %v4188_v13  ;;  %v3517_v30 = vpop.f32.mrb[43].mxu0  ;;  %v4190_v46 = vpop.f32.mrb[43].mxu1 }
 0x3c6   :  { %6089 = vst [vmem:[%s14205_s4 + $0x4a0] sm:$0xff] %v3517_v30  ;;  %6091 = vst [vmem:[%s14205_s4 + $0x4b0] sm:$0xff] %v4190_v46 }
 0x3c7   :  { %3780 = vmatmul.mubr.bf16.gmra.mrb[148].mxu0 %v7089_v60  ;;  %4453 = vmatmul.mubr.bf16.gmra.mrb[148].mxu1 %v7089_v60 }
 0x3c8   :  { %3789 = vmatprep.mubr.bf16.mxu0 %v7090_v0  ;;  %4462 = vmatprep.mubr.bf16.mxu1 %v7090_v0 }
 0x3ca   :  { %v3521_v38 = vpop.f32.mrb[44].mxu0  ;;  %v4194_v18 = vpop.f32.mrb[44].mxu1 }
 0x3cb   :  { %6095 = vst [vmem:[%s14205_s4 + $0x4d0] sm:$0xff] %v3521_v38  ;;  %6097 = vst [vmem:[%s14205_s4 + $0x4e0] sm:$0xff] %v4194_v18  ;;  %v3523_v4 = vpop.f32.mrb[45].mxu0  ;;  %v4196_v50 = vpop.f32.mrb[45].mxu1  ;;  %v7110_v38 = vld [vmem:[#allocation2 + $0x2c0] ss:$8 sps:$4 sm:$0xff]  }
 0x3cc   :  { %6096 = vst [vmem:[%s14205_s4 + $0x4d8] sm:$0xff] %v3523_v4  ;;  %6098 = vst [vmem:[%s14205_s4 + $0x4e8] sm:$0xff] %v4196_v50  ;;  %v3525_v3 = vpop.f32.mrb[46].mxu0  ;;  %v4198_v28 = vpop.f32.mrb[46].mxu1  ;;  %v7111_v50 = vld [vmem:[#allocation2 + $0x2d4] ss:$8 sps:$4 sm:$0xff]  }
 0x3cd   :  { %6102 = vst [vmem:[%s14205_s4 + $0x508] sm:$0xff] %v3525_v3  ;;  %6104 = vst [vmem:[%s14205_s4 + $0x518] sm:$0xff] %v4198_v28  ;;  %v3527_v9 = vpop.f32.mrb[47].mxu0  ;;  %v4200_v29 = vpop.f32.mrb[47].mxu1 }
 0x3ce   :  { %6103 = vst [vmem:[%s14205_s4 + $0x510] sm:$0xff] %v3527_v9  ;;  %6105 = vst [vmem:[%s14205_s4 + $0x520] sm:$0xff] %v4200_v29 }
 0x3cf   :  { %3790 = vmatmul.mubr.bf16.gmra.mrb[152].mxu0 %v7092_v2  ;;  %4463 = vmatmul.mubr.bf16.gmra.mrb[152].mxu1 %v7092_v2 }
 0x3d0   :  { %3799 = vmatprep.mubr.bf16.mxu0 %v7093_v22  ;;  %4472 = vmatprep.mubr.bf16.mxu1 %v7093_v22 }
 0x3d2   :  { %v3531_v21 = vpop.f32.mrb[48].mxu0  ;;  %v4204_v23 = vpop.f32.mrb[48].mxu1 }
 0x3d3   :  { %6109 = vst [vmem:[%s14205_s4 + $0x540] sm:$0xff] %v3531_v21  ;;  %6111 = vst [vmem:[%s14205_s4 + $0x550] sm:$0xff] %v4204_v23  ;;  %v3533_v49 = vpop.f32.mrb[49].mxu0  ;;  %v4206_v62 = vpop.f32.mrb[49].mxu1  ;;  %v7113_v21 = vld [vmem:[#allocation2 + $0x2d0] ss:$8 sps:$4 sm:$0xff]  }
 0x3d4   :  { %6110 = vst [vmem:[%s14205_s4 + $0x548] sm:$0xff] %v3533_v49  ;;  %6112 = vst [vmem:[%s14205_s4 + $0x558] sm:$0xff] %v4206_v62  ;;  %v3535_v11 = vpop.f32.mrb[50].mxu0  ;;  %v4208_v63 = vpop.f32.mrb[50].mxu1  ;;  %v7114_v62 = vld [vmem:[#allocation2 + $0x2e4] ss:$8 sps:$4 sm:$0xff]  }
 0x3d5   :  { %6116 = vst [vmem:[%s14205_s4 + $0x578] sm:$0xff] %v3535_v11  ;;  %6118 = vst [vmem:[%s14205_s4 + $0x588] sm:$0xff] %v4208_v63  ;;  %v3537_v55 = vpop.f32.mrb[51].mxu0  ;;  %v4210_v53 = vpop.f32.mrb[51].mxu1 }
 0x3d6   :  { %6117 = vst [vmem:[%s14205_s4 + $0x580] sm:$0xff] %v3537_v55  ;;  %6119 = vst [vmem:[%s14205_s4 + $0x590] sm:$0xff] %v4210_v53 }
 0x3d7   :  { %3800 = vmatmul.mubr.bf16.gmra.mrb[156].mxu0 %v7095_v1  ;;  %4473 = vmatmul.mubr.bf16.gmra.mrb[156].mxu1 %v7095_v1 }
 0x3d8   :  { %3809 = vmatprep.mubr.bf16.mxu0 %v7096_v10  ;;  %4482 = vmatprep.mubr.bf16.mxu1 %v7096_v10 }
 0x3da   :  { %v3541_v56 = vpop.f32.mrb[52].mxu0  ;;  %v4214_v32 = vpop.f32.mrb[52].mxu1 }
 0x3db   :  { %6123 = vst [vmem:[%s14205_s4 + $0x5b0] sm:$0xff] %v3541_v56  ;;  %6125 = vst [vmem:[%s14205_s4 + $0x5c0] sm:$0xff] %v4214_v32  ;;  %v3543_v59 = vpop.f32.mrb[53].mxu0  ;;  %v4216_v25 = vpop.f32.mrb[53].mxu1  ;;  %v7116_v56 = vld [vmem:[#allocation2 + $0x2e0] ss:$8 sps:$4 sm:$0xff]  }
 0x3dc   :  { %6124 = vst [vmem:[%s14205_s4 + $0x5b8] sm:$0xff] %v3543_v59  ;;  %6126 = vst [vmem:[%s14205_s4 + $0x5c8] sm:$0xff] %v4216_v25  ;;  %v3545_v61 = vpop.f32.mrb[54].mxu0  ;;  %v4218_v5 = vpop.f32.mrb[54].mxu1  ;;  %v7117_v25 = vld [vmem:[#allocation2 + $0x2f4] ss:$8 sps:$4 sm:$0xff]  }
 0x3dd   :  { %6130 = vst [vmem:[%s14205_s4 + $0x5e8] sm:$0xff] %v3545_v61  ;;  %6132 = vst [vmem:[%s14205_s4 + $0x5f8] sm:$0xff] %v4218_v5  ;;  %v3547_v48 = vpop.f32.mrb[55].mxu0  ;;  %v4220_v35 = vpop.f32.mrb[55].mxu1 }
 0x3de   :  { %6131 = vst [vmem:[%s14205_s4 + $0x5f0] sm:$0xff] %v3547_v48  ;;  %6133 = vst [vmem:[%s14205_s4 + $0x600] sm:$0xff] %v4220_v35 }
 0x3df   :  { %3810 = vmatmul.mubr.bf16.gmra.mrb[160].mxu0 %v7098_v12  ;;  %4483 = vmatmul.mubr.bf16.gmra.mrb[160].mxu1 %v7098_v12 }
 0x3e0   :  { %3819 = vmatprep.mubr.bf16.mxu0 %v7099_v16  ;;  %4492 = vmatprep.mubr.bf16.mxu1 %v7099_v16 }
 0x3e2   :  { %v3551_v51 = vpop.f32.mrb[56].mxu0  ;;  %v4224_v41 = vpop.f32.mrb[56].mxu1 }
 0x3e3   :  { %6137 = vst [vmem:[%s14205_s4 + $0x620] sm:$0xff] %v3551_v51  ;;  %6139 = vst [vmem:[%s14205_s4 + $0x630] sm:$0xff] %v4224_v41  ;;  %v3553_v19 = vpop.f32.mrb[57].mxu0  ;;  %v4226_v33 = vpop.f32.mrb[57].mxu1  ;;  %v7119_v51 = vld [vmem:[#allocation2 + $0x2f0] ss:$8 sps:$4 sm:$0xff]  }
 0x3e4   :  { %6138 = vst [vmem:[%s14205_s4 + $0x628] sm:$0xff] %v3553_v19  ;;  %6140 = vst [vmem:[%s14205_s4 + $0x638] sm:$0xff] %v4226_v33  ;;  %v3555_v14 = vpop.f32.mrb[58].mxu0  ;;  %v4228_v39 = vpop.f32.mrb[58].mxu1  ;;  %v7120_v33 = vld [vmem:[#allocation2 + $0x304] ss:$8 sps:$4 sm:$0xff]  }
 0x3e5   :  { %6144 = vst [vmem:[%s14205_s4 + $0x658] sm:$0xff] %v3555_v14  ;;  %6146 = vst [vmem:[%s14205_s4 + $0x668] sm:$0xff] %v4228_v39  ;;  %v3557_v47 = vpop.f32.mrb[59].mxu0  ;;  %v4230_v17 = vpop.f32.mrb[59].mxu1 }
 0x3e6   :  { %6145 = vst [vmem:[%s14205_s4 + $0x660] sm:$0xff] %v3557_v47  ;;  %6147 = vst [vmem:[%s14205_s4 + $0x670] sm:$0xff] %v4230_v17 }
 0x3e7   :  { %3820 = vmatmul.mubr.bf16.gmra.mrb[164].mxu0 %v7101_v44  ;;  %4493 = vmatmul.mubr.bf16.gmra.mrb[164].mxu1 %v7101_v44 }
 0x3e8   :  { %3829 = vmatprep.mubr.bf16.mxu0 %v7102_v20  ;;  %4502 = vmatprep.mubr.bf16.mxu1 %v7102_v20 }
 0x3ea   :  { %v3561_v7 = vpop.f32.mrb[60].mxu0  ;;  %v4234_v26 = vpop.f32.mrb[60].mxu1 }
 0x3eb   :  { %6151 = vst [vmem:[%s14205_s4 + $0x690] sm:$0xff] %v3561_v7  ;;  %6153 = vst [vmem:[%s14205_s4 + $0x6a0] sm:$0xff] %v4234_v26  ;;  %v3563_v24 = vpop.f32.mrb[61].mxu0  ;;  %v4236_v58 = vpop.f32.mrb[61].mxu1  ;;  %v7122_v7 = vld [vmem:[#allocation2 + $0x300] ss:$8 sps:$4 sm:$0xff]  }
 0x3ec   :  { %6152 = vst [vmem:[%s14205_s4 + $0x698] sm:$0xff] %v3563_v24  ;;  %6154 = vst [vmem:[%s14205_s4 + $0x6a8] sm:$0xff] %v4236_v58  ;;  %v3565_v40 = vpop.f32.mrb[62].mxu0  ;;  %v4238_v37 = vpop.f32.mrb[62].mxu1  ;;  %v7123_v58 = vld [vmem:[#allocation2 + $0x314] ss:$8 sps:$4 sm:$0xff]  }
 0x3ed   :  { %6158 = vst [vmem:[%s14205_s4 + $0x6c8] sm:$0xff] %v3565_v40  ;;  %6160 = vst [vmem:[%s14205_s4 + $0x6d8] sm:$0xff] %v4238_v37  ;;  %v3567_v15 = vpop.f32.mrb[63].mxu0  ;;  %v4240_v45 = vpop.f32.mrb[63].mxu1 }
 0x3ee   :  { %6159 = vst [vmem:[%s14205_s4 + $0x6d0] sm:$0xff] %v3567_v15  ;;  %6161 = vst [vmem:[%s14205_s4 + $0x6e0] sm:$0xff] %v4240_v45 }
 0x3ef   :  { %3830 = vmatmul.mubr.bf16.gmra.mrb[168].mxu0 %v7104_v54  ;;  %4503 = vmatmul.mubr.bf16.gmra.mrb[168].mxu1 %v7104_v54 }
 0x3f0   :  { %3839 = vmatprep.mubr.bf16.mxu0 %v7105_v8  ;;  %4512 = vmatprep.mubr.bf16.mxu1 %v7105_v8 }
 0x3f2   :  { %v3571_v6 = vpop.f32.mrb[64].mxu0  ;;  %v4244_v52 = vpop.f32.mrb[64].mxu1 }
 0x3f3   :  { %6165 = vst [vmem:[%s14205_s4 + $0x700] sm:$0xff] %v3571_v6  ;;  %6167 = vst [vmem:[%s14205_s4 + $0x710] sm:$0xff] %v4244_v52  ;;  %v3573_v43 = vpop.f32.mrb[65].mxu0  ;;  %v4246_v31 = vpop.f32.mrb[65].mxu1  ;;  %v7125_v6 = vld [vmem:[#allocation2 + $0x310] ss:$8 sps:$4 sm:$0xff]  }
 0x3f4   :  { %6166 = vst [vmem:[%s14205_s4 + $0x708] sm:$0xff] %v3573_v43  ;;  %6168 = vst [vmem:[%s14205_s4 + $0x718] sm:$0xff] %v4246_v31  ;;  %v3575_v27 = vpop.f32.mrb[66].mxu0  ;;  %v4248_v36 = vpop.f32.mrb[66].mxu1  ;;  %v7126_v31 = vld [vmem:[#allocation2 + $0x324] ss:$8 sps:$4 sm:$0xff]  }
 0x3f5   :  { %6172 = vst [vmem:[%s14205_s4 + $0x738] sm:$0xff] %v3575_v27  ;;  %6174 = vst [vmem:[%s14205_s4 + $0x748] sm:$0xff] %v4248_v36  ;;  %v3577_v60 = vpop.f32.mrb[67].mxu0  ;;  %v4250_v42 = vpop.f32.mrb[67].mxu1 }
 0x3f6   :  { %6173 = vst [vmem:[%s14205_s4 + $0x740] sm:$0xff] %v3577_v60  ;;  %6175 = vst [vmem:[%s14205_s4 + $0x750] sm:$0xff] %v4250_v42 }
 0x3f7   :  { %3840 = vmatmul.mubr.bf16.gmra.mrb[172].mxu0 %v7107_v57  ;;  %4513 = vmatmul.mubr.bf16.gmra.mrb[172].mxu1 %v7107_v57 }
 0x3f8   :  { %3849 = vmatprep.mubr.bf16.mxu0 %v7108_v34  ;;  %4522 = vmatprep.mubr.bf16.mxu1 %v7108_v34 }
 0x3fa   :  { %v3581_v13 = vpop.f32.mrb[68].mxu0  ;;  %v4254_v0 = vpop.f32.mrb[68].mxu1 }
 0x3fb   :  { %6179 = vst [vmem:[%s14205_s4 + $0x770] sm:$0xff] %v3581_v13  ;;  %6181 = vst [vmem:[%s14205_s4 + $0x780] sm:$0xff] %v4254_v0  ;;  %v3583_v30 = vpop.f32.mrb[69].mxu0  ;;  %v4256_v46 = vpop.f32.mrb[69].mxu1  ;;  %v7128_v13 = vld [vmem:[#allocation2 + $0x320] ss:$8 sps:$4 sm:$0xff]  }
 0x3fc   :  { %6180 = vst [vmem:[%s14205_s4 + $0x778] sm:$0xff] %v3583_v30  ;;  %6182 = vst [vmem:[%s14205_s4 + $0x788] sm:$0xff] %v4256_v46  ;;  %v3585_v18 = vpop.f32.mrb[70].mxu0  ;;  %v4258_v4 = vpop.f32.mrb[70].mxu1  ;;  %v7129_v46 = vld [vmem:[#allocation2 + $0x334] ss:$8 sps:$4 sm:$0xff]  }
 0x3fd   :  { %6186 = vst [vmem:[%s14205_s4 + $0x7a8] sm:$0xff] %v3585_v18  ;;  %6188 = vst [vmem:[%s14205_s4 + $0x7b8] sm:$0xff] %v4258_v4  ;;  %v3587_v2 = vpop.f32.mrb[71].mxu0  ;;  %v4260_v3 = vpop.f32.mrb[71].mxu1 }
 0x3fe   :  { %6187 = vst [vmem:[%s14205_s4 + $0x7b0] sm:$0xff] %v3587_v2  ;;  %6189 = vst [vmem:[%s14205_s4 + $0x7c0] sm:$0xff] %v4260_v3 }
 0x3ff   :  { %3850 = vmatmul.mubr.bf16.gmra.mrb[176].mxu0 %v7110_v38  ;;  %4523 = vmatmul.mubr.bf16.gmra.mrb[176].mxu1 %v7110_v38 }
 0x400   :  { %3859 = vmatprep.mubr.bf16.mxu0 %v7111_v50  ;;  %4532 = vmatprep.mubr.bf16.mxu1 %v7111_v50 }
 0x402   :  { %v3591_v28 = vpop.f32.mrb[72].mxu0  ;;  %v4264_v22 = vpop.f32.mrb[72].mxu1 }
 0x403   :  { %6193 = vst [vmem:[%s14205_s4 + $0x7e0] sm:$0xff] %v3591_v28  ;;  %6195 = vst [vmem:[%s14205_s4 + $0x7f0] sm:$0xff] %v4264_v22  ;;  %v3593_v9 = vpop.f32.mrb[73].mxu0  ;;  %v4266_v29 = vpop.f32.mrb[73].mxu1  ;;  %v7131_v28 = vld [vmem:[#allocation2 + $0x330] ss:$8 sps:$4 sm:$0xff]  }
 0x404   :  { %6194 = vst [vmem:[%s14205_s4 + $0x7e8] sm:$0xff] %v3593_v9  ;;  %6196 = vst [vmem:[%s14205_s4 + $0x7f8] sm:$0xff] %v4266_v29  ;;  %v3595_v23 = vpop.f32.mrb[74].mxu0  ;;  %v4268_v49 = vpop.f32.mrb[74].mxu1  ;;  %v7132_v29 = vld [vmem:[#allocation2 + $0x344] ss:$8 sps:$4 sm:$0xff]  }
 0x405   :  { %6200 = vst [vmem:[%s14205_s4 + $0x818] sm:$0xff] %v3595_v23  ;;  %6202 = vst [vmem:[%s14205_s4 + $0x828] sm:$0xff] %v4268_v49  ;;  %v3597_v1 = vpop.f32.mrb[75].mxu0  ;;  %v4270_v11 = vpop.f32.mrb[75].mxu1 }
 0x406   :  { %6201 = vst [vmem:[%s14205_s4 + $0x820] sm:$0xff] %v3597_v1  ;;  %6203 = vst [vmem:[%s14205_s4 + $0x830] sm:$0xff] %v4270_v11 }
 0x407   :  { %3860 = vmatmul.mubr.bf16.gmra.mrb[180].mxu0 %v7113_v21  ;;  %4533 = vmatmul.mubr.bf16.gmra.mrb[180].mxu1 %v7113_v21 }
 0x408   :  { %3869 = vmatprep.mubr.bf16.mxu0 %v7114_v62  ;;  %4542 = vmatprep.mubr.bf16.mxu1 %v7114_v62 }
 0x40a   :  { %v3601_v63 = vpop.f32.mrb[76].mxu0  ;;  %v4274_v10 = vpop.f32.mrb[76].mxu1 }
 0x40b   :  { %6207 = vst [vmem:[%s14205_s4 + $0x850] sm:$0xff] %v3601_v63  ;;  %6209 = vst [vmem:[%s14205_s4 + $0x860] sm:$0xff] %v4274_v10  ;;  %v3603_v55 = vpop.f32.mrb[77].mxu0  ;;  %v4276_v53 = vpop.f32.mrb[77].mxu1  ;;  %v7134_v63 = vld [vmem:[#allocation2 + $0x340] ss:$8 sps:$4 sm:$0xff]  }
 0x40c   :  { %6208 = vst [vmem:[%s14205_s4 + $0x858] sm:$0xff] %v3603_v55  ;;  %6210 = vst [vmem:[%s14205_s4 + $0x868] sm:$0xff] %v4276_v53  ;;  %v3605_v32 = vpop.f32.mrb[78].mxu0  ;;  %v4278_v59 = vpop.f32.mrb[78].mxu1  ;;  %v7135_v53 = vld [vmem:[#allocation2 + $0x354] ss:$8 sps:$4 sm:$0xff]  }
 0x40d   :  { %6214 = vst [vmem:[%s14205_s4 + $0x888] sm:$0xff] %v3605_v32  ;;  %6216 = vst [vmem:[%s14205_s4 + $0x898] sm:$0xff] %v4278_v59  ;;  %v3607_v12 = vpop.f32.mrb[79].mxu0  ;;  %v4280_v61 = vpop.f32.mrb[79].mxu1 }
 0x40e   :  { %6215 = vst [vmem:[%s14205_s4 + $0x890] sm:$0xff] %v3607_v12  ;;  %6217 = vst [vmem:[%s14205_s4 + $0x8a0] sm:$0xff] %v4280_v61 }
 0x40f   :  { %3870 = vmatmul.mubr.bf16.gmra.mrb[184].mxu0 %v7116_v56  ;;  %4543 = vmatmul.mubr.bf16.gmra.mrb[184].mxu1 %v7116_v56 }
 0x410   :  { %3879 = vmatprep.mubr.bf16.mxu0 %v7117_v25  ;;  %4552 = vmatprep.mubr.bf16.mxu1 %v7117_v25 }
 0x412   :  { %v3611_v5 = vpop.f32.mrb[80].mxu0  ;;  %v4284_v16 = vpop.f32.mrb[80].mxu1 }
 0x413   :  { %6221 = vst [vmem:[%s14205_s4 + $0x8c0] sm:$0xff] %v3611_v5  ;;  %6223 = vst [vmem:[%s14205_s4 + $0x8d0] sm:$0xff] %v4284_v16  ;;  %v3613_v48 = vpop.f32.mrb[81].mxu0  ;;  %v4286_v35 = vpop.f32.mrb[81].mxu1  ;;  %v7137_v5 = vld [vmem:[#allocation2 + $0x350] ss:$8 sps:$4 sm:$0xff]  }
 0x414   :  { %6222 = vst [vmem:[%s14205_s4 + $0x8c8] sm:$0xff] %v3613_v48  ;;  %6224 = vst [vmem:[%s14205_s4 + $0x8d8] sm:$0xff] %v4286_v35  ;;  %v3615_v41 = vpop.f32.mrb[82].mxu0  ;;  %v4288_v19 = vpop.f32.mrb[82].mxu1  ;;  %v7138_v35 = vld [vmem:[#allocation2 + $0x364] ss:$8 sps:$4 sm:$0xff]  }
 0x415   :  { %6228 = vst [vmem:[%s14205_s4 + $0x8f8] sm:$0xff] %v3615_v41  ;;  %6230 = vst [vmem:[%s14205_s4 + $0x908] sm:$0xff] %v4288_v19  ;;  %v3617_v44 = vpop.f32.mrb[83].mxu0  ;;  %v4290_v14 = vpop.f32.mrb[83].mxu1 }
 0x416   :  { %6229 = vst [vmem:[%s14205_s4 + $0x900] sm:$0xff] %v3617_v44  ;;  %6231 = vst [vmem:[%s14205_s4 + $0x910] sm:$0xff] %v4290_v14 }
 0x417   :  { %3880 = vmatmul.mubr.bf16.gmra.mrb[188].mxu0 %v7119_v51  ;;  %4553 = vmatmul.mubr.bf16.gmra.mrb[188].mxu1 %v7119_v51 }
 0x418   :  { %3889 = vmatprep.mubr.bf16.mxu0 %v7120_v33  ;;  %4562 = vmatprep.mubr.bf16.mxu1 %v7120_v33 }
 0x41a   :  { %v3621_v39 = vpop.f32.mrb[84].mxu0  ;;  %v4294_v20 = vpop.f32.mrb[84].mxu1 }
 0x41b   :  { %6235 = vst [vmem:[%s14205_s4 + $0x930] sm:$0xff] %v3621_v39  ;;  %6237 = vst [vmem:[%s14205_s4 + $0x940] sm:$0xff] %v4294_v20  ;;  %v3623_v47 = vpop.f32.mrb[85].mxu0  ;;  %v4296_v17 = vpop.f32.mrb[85].mxu1  ;;  %v7140_v39 = vld [vmem:[#allocation2 + $0x360] ss:$8 sps:$4 sm:$0xff]  }
 0x41c   :  { %6236 = vst [vmem:[%s14205_s4 + $0x938] sm:$0xff] %v3623_v47  ;;  %6238 = vst [vmem:[%s14205_s4 + $0x948] sm:$0xff] %v4296_v17  ;;  %v3625_v26 = vpop.f32.mrb[86].mxu0  ;;  %v4298_v24 = vpop.f32.mrb[86].mxu1  ;;  %v7141_v17 = vld [vmem:[#allocation2 + $0x374] ss:$8 sps:$4 sm:$0xff]  }
 0x41d   :  { %6242 = vst [vmem:[%s14205_s4 + $0x968] sm:$0xff] %v3625_v26  ;;  %6244 = vst [vmem:[%s14205_s4 + $0x978] sm:$0xff] %v4298_v24  ;;  %v3627_v54 = vpop.f32.mrb[87].mxu0  ;;  %v4300_v40 = vpop.f32.mrb[87].mxu1 }
 0x41e   :  { %6243 = vst [vmem:[%s14205_s4 + $0x970] sm:$0xff] %v3627_v54  ;;  %6245 = vst [vmem:[%s14205_s4 + $0x980] sm:$0xff] %v4300_v40 }
 0x41f   :  { %3890 = vmatmul.mubr.bf16.gmra.mrb[192].mxu0 %v7122_v7  ;;  %4563 = vmatmul.mubr.bf16.gmra.mrb[192].mxu1 %v7122_v7 }
 0x420   :  { %3899 = vmatprep.mubr.bf16.mxu0 %v7123_v58  ;;  %4572 = vmatprep.mubr.bf16.mxu1 %v7123_v58 }
 0x422   :  { %v3631_v37 = vpop.f32.mrb[88].mxu0  ;;  %v4304_v8 = vpop.f32.mrb[88].mxu1 }
 0x423   :  { %6249 = vst [vmem:[%s14205_s4 + $0x9a0] sm:$0xff] %v3631_v37  ;;  %6251 = vst [vmem:[%s14205_s4 + $0x9b0] sm:$0xff] %v4304_v8  ;;  %v3633_v15 = vpop.f32.mrb[89].mxu0  ;;  %v4306_v45 = vpop.f32.mrb[89].mxu1  ;;  %v7143_v37 = vld [vmem:[#allocation2 + $0x370] ss:$8 sps:$4 sm:$0xff]  }
 0x424   :  { %6250 = vst [vmem:[%s14205_s4 + $0x9a8] sm:$0xff] %v3633_v15  ;;  %6252 = vst [vmem:[%s14205_s4 + $0x9b8] sm:$0xff] %v4306_v45  ;;  %v3635_v52 = vpop.f32.mrb[90].mxu0  ;;  %v4308_v43 = vpop.f32.mrb[90].mxu1  ;;  %v7144_v45 = vld [vmem:[#allocation2 + $0x384] ss:$8 sps:$4 sm:$0xff]  }
 0x425   :  { %6256 = vst [vmem:[%s14205_s4 + $0x9d8] sm:$0xff] %v3635_v52  ;;  %6258 = vst [vmem:[%s14205_s4 + $0x9e8] sm:$0xff] %v4308_v43  ;;  %v3637_v57 = vpop.f32.mrb[91].mxu0  ;;  %v4310_v27 = vpop.f32.mrb[91].mxu1 }
 0x426   :  { %6257 = vst [vmem:[%s14205_s4 + $0x9e0] sm:$0xff] %v3637_v57  ;;  %6259 = vst [vmem:[%s14205_s4 + $0x9f0] sm:$0xff] %v4310_v27 }
 0x427   :  { %3900 = vmatmul.mubr.bf16.gmra.mrb[196].mxu0 %v7125_v6  ;;  %4573 = vmatmul.mubr.bf16.gmra.mrb[196].mxu1 %v7125_v6 }
 0x428   :  { %3909 = vmatprep.mubr.bf16.mxu0 %v7126_v31  ;;  %4582 = vmatprep.mubr.bf16.mxu1 %v7126_v31 }
 0x42a   :  { %v3641_v36 = vpop.f32.mrb[92].mxu0  ;;  %v4314_v34 = vpop.f32.mrb[92].mxu1 }
 0x42b   :  { %6263 = vst [vmem:[%s14205_s4 + $0xa10] sm:$0xff] %v3641_v36  ;;  %6265 = vst [vmem:[%s14205_s4 + $0xa20] sm:$0xff] %v4314_v34  ;;  %v3643_v60 = vpop.f32.mrb[93].mxu0  ;;  %v4316_v42 = vpop.f32.mrb[93].mxu1  ;;  %v7146_v36 = vld [vmem:[#allocation2 + $0x380] ss:$8 sps:$4 sm:$0xff]  }
 0x42c   :  { %6264 = vst [vmem:[%s14205_s4 + $0xa18] sm:$0xff] %v3643_v60  ;;  %6266 = vst [vmem:[%s14205_s4 + $0xa28] sm:$0xff] %v4316_v42  ;;  %v3645_v0 = vpop.f32.mrb[94].mxu0  ;;  %v4318_v30 = vpop.f32.mrb[94].mxu1  ;;  %v7147_v42 = vld [vmem:[#allocation2 + $0x394] ss:$8 sps:$4 sm:$0xff]  }
 0x42d   :  { %6270 = vst [vmem:[%s14205_s4 + $0xa48] sm:$0xff] %v3645_v0  ;;  %6272 = vst [vmem:[%s14205_s4 + $0xa58] sm:$0xff] %v4318_v30  ;;  %v3647_v38 = vpop.f32.mrb[95].mxu0  ;;  %v4320_v18 = vpop.f32.mrb[95].mxu1 }
 0x42e   :  { %6271 = vst [vmem:[%s14205_s4 + $0xa50] sm:$0xff] %v3647_v38  ;;  %6273 = vst [vmem:[%s14205_s4 + $0xa60] sm:$0xff] %v4320_v18 }
 0x42f   :  { %3910 = vmatmul.mubr.bf16.gmra.mrb[200].mxu0 %v7128_v13  ;;  %4583 = vmatmul.mubr.bf16.gmra.mrb[200].mxu1 %v7128_v13 }
 0x430   :  { %3919 = vmatprep.mubr.bf16.mxu0 %v7129_v46  ;;  %4592 = vmatprep.mubr.bf16.mxu1 %v7129_v46 }
 0x432   :  { %v3651_v4 = vpop.f32.mrb[96].mxu0  ;;  %v4324_v50 = vpop.f32.mrb[96].mxu1 }
 0x433   :  { %6277 = vst [vmem:[%s14205_s4 + $0xa80] sm:$0xff] %v3651_v4  ;;  %6279 = vst [vmem:[%s14205_s4 + $0xa90] sm:$0xff] %v4324_v50  ;;  %v3653_v2 = vpop.f32.mrb[97].mxu0  ;;  %v4326_v3 = vpop.f32.mrb[97].mxu1  ;;  %v7149_v4 = vld [vmem:[#allocation2 + $0x390] ss:$8 sps:$4 sm:$0xff]  }
 0x434   :  { %6278 = vst [vmem:[%s14205_s4 + $0xa88] sm:$0xff] %v3653_v2  ;;  %6280 = vst [vmem:[%s14205_s4 + $0xa98] sm:$0xff] %v4326_v3  ;;  %v3655_v22 = vpop.f32.mrb[98].mxu0  ;;  %v4328_v9 = vpop.f32.mrb[98].mxu1  ;;  %v7150_v3 = vld [vmem:[#allocation2 + $0x3a4] ss:$8 sps:$4 sm:$0xff]  }
 0x435   :  { %6284 = vst [vmem:[%s14205_s4 + $0xab8] sm:$0xff] %v3655_v22  ;;  %6286 = vst [vmem:[%s14205_s4 + $0xac8] sm:$0xff] %v4328_v9  ;;  %v3657_v21 = vpop.f32.mrb[99].mxu0  ;;  %v4330_v23 = vpop.f32.mrb[99].mxu1 }
 0x436   :  { %6285 = vst [vmem:[%s14205_s4 + $0xac0] sm:$0xff] %v3657_v21  ;;  %6287 = vst [vmem:[%s14205_s4 + $0xad0] sm:$0xff] %v4330_v23 }
 0x437   :  { %3920 = vmatmul.mubr.bf16.gmra.mrb[204].mxu0 %v7131_v28  ;;  %4593 = vmatmul.mubr.bf16.gmra.mrb[204].mxu1 %v7131_v28 }
 0x438   :  { %3929 = vmatprep.mubr.bf16.mxu0 %v7132_v29  ;;  %4602 = vmatprep.mubr.bf16.mxu1 %v7132_v29 }
 0x43a   :  { %v3661_v49 = vpop.f32.mrb[100].mxu0  ;;  %v4334_v62 = vpop.f32.mrb[100].mxu1 }
 0x43b   :  { %6291 = vst [vmem:[%s14205_s4 + $0xaf0] sm:$0xff] %v3661_v49  ;;  %6293 = vst [vmem:[%s14205_s4 + $0xb00] sm:$0xff] %v4334_v62  ;;  %v3663_v1 = vpop.f32.mrb[101].mxu0  ;;  %v4336_v11 = vpop.f32.mrb[101].mxu1  ;;  %v7152_v49 = vld [vmem:[#allocation2 + $0x3a0] ss:$8 sps:$4 sm:$0xff]  }
 0x43c   :  { %6292 = vst [vmem:[%s14205_s4 + $0xaf8] sm:$0xff] %v3663_v1  ;;  %6294 = vst [vmem:[%s14205_s4 + $0xb08] sm:$0xff] %v4336_v11  ;;  %v3665_v10 = vpop.f32.mrb[102].mxu0  ;;  %v4338_v55 = vpop.f32.mrb[102].mxu1  ;;  %v7153_v11 = vld [vmem:[#allocation2 + $0x3b4] ss:$8 sps:$4 sm:$0xff]  }
 0x43d   :  { %6298 = vst [vmem:[%s14205_s4 + $0xb28] sm:$0xff] %v3665_v10  ;;  %6300 = vst [vmem:[%s14205_s4 + $0xb38] sm:$0xff] %v4338_v55  ;;  %v3667_v56 = vpop.f32.mrb[103].mxu0  ;;  %v4340_v32 = vpop.f32.mrb[103].mxu1 }
 0x43e   :  { %6299 = vst [vmem:[%s14205_s4 + $0xb30] sm:$0xff] %v3667_v56  ;;  %6301 = vst [vmem:[%s14205_s4 + $0xb40] sm:$0xff] %v4340_v32 }
 0x43f   :  { %3930 = vmatmul.mubr.bf16.gmra.mrb[208].mxu0 %v7134_v63  ;;  %4603 = vmatmul.mubr.bf16.gmra.mrb[208].mxu1 %v7134_v63 }
 0x440   :  { %3939 = vmatprep.mubr.bf16.mxu0 %v7135_v53  ;;  %4612 = vmatprep.mubr.bf16.mxu1 %v7135_v53 }
 0x442   :  { %v3671_v59 = vpop.f32.mrb[104].mxu0  ;;  %v4344_v25 = vpop.f32.mrb[104].mxu1 }
 0x443   :  { %6305 = vst [vmem:[%s14205_s4 + $0xb60] sm:$0xff] %v3671_v59  ;;  %6307 = vst [vmem:[%s14205_s4 + $0xb70] sm:$0xff] %v4344_v25  ;;  %v3673_v12 = vpop.f32.mrb[105].mxu0  ;;  %v4346_v61 = vpop.f32.mrb[105].mxu1  ;;  %v7155_v59 = vld [vmem:[#allocation2 + $0x3b0] ss:$8 sps:$4 sm:$0xff]  }
 0x444   :  { %6306 = vst [vmem:[%s14205_s4 + $0xb68] sm:$0xff] %v3673_v12  ;;  %6308 = vst [vmem:[%s14205_s4 + $0xb78] sm:$0xff] %v4346_v61  ;;  %v3675_v16 = vpop.f32.mrb[106].mxu0  ;;  %v4348_v48 = vpop.f32.mrb[106].mxu1  ;;  %v7156_v61 = vld [vmem:[#allocation2 + $0x3c4] ss:$8 sps:$4 sm:$0xff]  }
 0x445   :  { %6312 = vst [vmem:[%s14205_s4 + $0xb98] sm:$0xff] %v3675_v16  ;;  %6314 = vst [vmem:[%s14205_s4 + $0xba8] sm:$0xff] %v4348_v48  ;;  %v3677_v51 = vpop.f32.mrb[107].mxu0  ;;  %v4350_v41 = vpop.f32.mrb[107].mxu1 }
 0x446   :  { %6313 = vst [vmem:[%s14205_s4 + $0xba0] sm:$0xff] %v3677_v51  ;;  %6315 = vst [vmem:[%s14205_s4 + $0xbb0] sm:$0xff] %v4350_v41 }
 0x447   :  { %3940 = vmatmul.mubr.bf16.gmra.mrb[212].mxu0 %v7137_v5  ;;  %4613 = vmatmul.mubr.bf16.gmra.mrb[212].mxu1 %v7137_v5 }
 0x448   :  { %3949 = vmatprep.mubr.bf16.mxu0 %v7138_v35  ;;  %4622 = vmatprep.mubr.bf16.mxu1 %v7138_v35 }
 0x44a   :  { %v3681_v19 = vpop.f32.mrb[108].mxu0  ;;  %v4354_v33 = vpop.f32.mrb[108].mxu1 }
 0x44b   :  { %6319 = vst [vmem:[%s14205_s4 + $0xbd0] sm:$0xff] %v3681_v19  ;;  %6321 = vst [vmem:[%s14205_s4 + $0xbe0] sm:$0xff] %v4354_v33  ;;  %v3683_v44 = vpop.f32.mrb[109].mxu0  ;;  %v4356_v14 = vpop.f32.mrb[109].mxu1  ;;  %v7158_v19 = vld [vmem:[#allocation2 + $0x3c0] ss:$8 sps:$4 sm:$0xff]  }
 0x44c   :  { %6320 = vst [vmem:[%s14205_s4 + $0xbd8] sm:$0xff] %v3683_v44  ;;  %6322 = vst [vmem:[%s14205_s4 + $0xbe8] sm:$0xff] %v4356_v14  ;;  %v3685_v20 = vpop.f32.mrb[110].mxu0  ;;  %v4358_v47 = vpop.f32.mrb[110].mxu1  ;;  %v7159_v14 = vld [vmem:[#allocation2 + $0x3d4] ss:$8 sps:$4 sm:$0xff]  }
 0x44d   :  { %6326 = vst [vmem:[%s14205_s4 + $0xc08] sm:$0xff] %v3685_v20  ;;  %6328 = vst [vmem:[%s14205_s4 + $0xc18] sm:$0xff] %v4358_v47  ;;  %v3687_v7 = vpop.f32.mrb[111].mxu0  ;;  %v4360_v26 = vpop.f32.mrb[111].mxu1 }
 0x44e   :  { %6327 = vst [vmem:[%s14205_s4 + $0xc10] sm:$0xff] %v3687_v7  ;;  %6329 = vst [vmem:[%s14205_s4 + $0xc20] sm:$0xff] %v4360_v26 }
 0x44f   :  { %3950 = vmatmul.mubr.bf16.gmra.mrb[216].mxu0 %v7140_v39  ;;  %4623 = vmatmul.mubr.bf16.gmra.mrb[216].mxu1 %v7140_v39 }
 0x450   :  { %3959 = vmatprep.mubr.bf16.mxu0 %v7141_v17  ;;  %4632 = vmatprep.mubr.bf16.mxu1 %v7141_v17 }
 0x452   :  { %v3691_v24 = vpop.f32.mrb[112].mxu0  ;;  %v4364_v58 = vpop.f32.mrb[112].mxu1 }
 0x453   :  { %6333 = vst [vmem:[%s14205_s4 + $0xc40] sm:$0xff] %v3691_v24  ;;  %6335 = vst [vmem:[%s14205_s4 + $0xc50] sm:$0xff] %v4364_v58  ;;  %v3693_v54 = vpop.f32.mrb[113].mxu0  ;;  %v4366_v40 = vpop.f32.mrb[113].mxu1  ;;  %v7161_v24 = vld [vmem:[#allocation2 + $0x3d0] ss:$8 sps:$4 sm:$0xff]  }
 0x454   :  { %6334 = vst [vmem:[%s14205_s4 + $0xc48] sm:$0xff] %v3693_v54  ;;  %6336 = vst [vmem:[%s14205_s4 + $0xc58] sm:$0xff] %v4366_v40  ;;  %v3695_v8 = vpop.f32.mrb[114].mxu0  ;;  %v4368_v15 = vpop.f32.mrb[114].mxu1  ;;  %v7162_v40 = vld [vmem:[#allocation2 + $0x3e4] ss:$8 sps:$4 sm:$0xff]  }
 0x455   :  { %6340 = vst [vmem:[%s14205_s4 + $0xc78] sm:$0xff] %v3695_v8  ;;  %6342 = vst [vmem:[%s14205_s4 + $0xc88] sm:$0xff] %v4368_v15  ;;  %v3697_v6 = vpop.f32.mrb[115].mxu0  ;;  %v4370_v52 = vpop.f32.mrb[115].mxu1 }
 0x456   :  { %6341 = vst [vmem:[%s14205_s4 + $0xc80] sm:$0xff] %v3697_v6  ;;  %6343 = vst [vmem:[%s14205_s4 + $0xc90] sm:$0xff] %v4370_v52 }
 0x457   :  { %3960 = vmatmul.mubr.bf16.gmra.mrb[220].mxu0 %v7143_v37  ;;  %4633 = vmatmul.mubr.bf16.gmra.mrb[220].mxu1 %v7143_v37 }
 0x458   :  { %3969 = vmatprep.mubr.bf16.mxu0 %v7144_v45  ;;  %4642 = vmatprep.mubr.bf16.mxu1 %v7144_v45 }
 0x45a   :  { %v3701_v43 = vpop.f32.mrb[116].mxu0  ;;  %v4374_v31 = vpop.f32.mrb[116].mxu1 }
 0x45b   :  { %6347 = vst [vmem:[%s14205_s4 + $0xcb0] sm:$0xff] %v3701_v43  ;;  %6349 = vst [vmem:[%s14205_s4 + $0xcc0] sm:$0xff] %v4374_v31  ;;  %v3703_v57 = vpop.f32.mrb[117].mxu0  ;;  %v4376_v27 = vpop.f32.mrb[117].mxu1  ;;  %v7164_v43 = vld [vmem:[#allocation2 + $0x3e0] ss:$8 sps:$4 sm:$0xff]  }
 0x45c   :  { %6348 = vst [vmem:[%s14205_s4 + $0xcb8] sm:$0xff] %v3703_v57  ;;  %6350 = vst [vmem:[%s14205_s4 + $0xcc8] sm:$0xff] %v4376_v27  ;;  %v3705_v34 = vpop.f32.mrb[118].mxu0  ;;  %v4378_v60 = vpop.f32.mrb[118].mxu1  ;;  %v7165_v27 = vld [vmem:[#allocation2 + $0x3f4] ss:$8 sps:$4 sm:$0xff]  }
 0x45d   :  { %6354 = vst [vmem:[%s14205_s4 + $0xce8] sm:$0xff] %v3705_v34  ;;  %6356 = vst [vmem:[%s14205_s4 + $0xcf8] sm:$0xff] %v4378_v60  ;;  %v3707_v13 = vpop.f32.mrb[119].mxu0  ;;  %v4380_v0 = vpop.f32.mrb[119].mxu1 }
 0x45e   :  { %6355 = vst [vmem:[%s14205_s4 + $0xcf0] sm:$0xff] %v3707_v13  ;;  %6357 = vst [vmem:[%s14205_s4 + $0xd00] sm:$0xff] %v4380_v0 }
 0x45f   :  { %3970 = vmatmul.mubr.bf16.gmra.mrb[224].mxu0 %v7146_v36  ;;  %4643 = vmatmul.mubr.bf16.gmra.mrb[224].mxu1 %v7146_v36 }
 0x460   :  { %3979 = vmatprep.mubr.bf16.mxu0 %v7147_v42  ;;  %4652 = vmatprep.mubr.bf16.mxu1 %v7147_v42 }
 0x462   :  { %v3711_v30 = vpop.f32.mrb[120].mxu0  ;;  %v4384_v46 = vpop.f32.mrb[120].mxu1 }
 0x463   :  { %6361 = vst [vmem:[%s14205_s4 + $0xd20] sm:$0xff] %v3711_v30  ;;  %6363 = vst [vmem:[%s14205_s4 + $0xd30] sm:$0xff] %v4384_v46  ;;  %v3713_v38 = vpop.f32.mrb[121].mxu0  ;;  %v4386_v18 = vpop.f32.mrb[121].mxu1  ;;  %v7167_v30 = vld [vmem:[#allocation2 + $0x3f0] ss:$8 sps:$4 sm:$0xff]  }
 0x464   :  { %6362 = vst [vmem:[%s14205_s4 + $0xd28] sm:$0xff] %v3713_v38  ;;  %6364 = vst [vmem:[%s14205_s4 + $0xd38] sm:$0xff] %v4386_v18  ;;  %v3715_v50 = vpop.f32.mrb[122].mxu0  ;;  %v4388_v2 = vpop.f32.mrb[122].mxu1 }
 0x465   :  { %6368 = vst [vmem:[%s14205_s4 + $0xd58] sm:$0xff] %v3715_v50  ;;  %6370 = vst [vmem:[%s14205_s4 + $0xd68] sm:$0xff] %v4388_v2  ;;  %v3717_v28 = vpop.f32.mrb[123].mxu0  ;;  %v4390_v22 = vpop.f32.mrb[123].mxu1  ;;  %v7456_v50 = vld [vmem:[#allocation2 + $0x4] ss:$8 sps:$4 sm:$0xff]  }
 0x466   :  { %6369 = vst [vmem:[%s14205_s4 + $0xd60] sm:$0xff] %v3717_v28  ;;  %6371 = vst [vmem:[%s14205_s4 + $0xd70] sm:$0xff] %v4390_v22 }
 0x467   :  { %3980 = vmatmul.mubr.bf16.gmra.mrb[228].mxu0 %v7149_v4  ;;  %4653 = vmatmul.mubr.bf16.gmra.mrb[228].mxu1 %v7149_v4 }
 0x468   :  { %3989 = vmatprep.mubr.bf16.mxu0 %v7150_v3  ;;  %4662 = vmatprep.mubr.bf16.mxu1 %v7150_v3 }
 0x46a   :  { %v3721_v9 = vpop.f32.mrb[124].mxu0  ;;  %v4394_v29 = vpop.f32.mrb[124].mxu1 }
 0x46b   :  { %6375 = vst [vmem:[%s14205_s4 + $0xd90] sm:$0xff] %v3721_v9  ;;  %6377 = vst [vmem:[%s14205_s4 + $0xda0] sm:$0xff] %v4394_v29  ;;  %v3723_v21 = vpop.f32.mrb[125].mxu0  ;;  %v4396_v23 = vpop.f32.mrb[125].mxu1 }
 0x46c   :  { %6376 = vst [vmem:[%s14205_s4 + $0xd98] sm:$0xff] %v3723_v21  ;;  %6378 = vst [vmem:[%s14205_s4 + $0xda8] sm:$0xff] %v4396_v23  ;;  %v3725_v62 = vpop.f32.mrb[126].mxu0  ;;  %v4398_v1 = vpop.f32.mrb[126].mxu1 }
 0x46d   :  { %6382 = vst [vmem:[%s14205_s4 + $0xdc8] sm:$0xff] %v3725_v62  ;;  %6384 = vst [vmem:[%s14205_s4 + $0xdd8] sm:$0xff] %v4398_v1  ;;  %v3727_v63 = vpop.f32.mrb[127].mxu0  ;;  %v4400_v10 = vpop.f32.mrb[127].mxu1  ;;  %v7458_v62 = vld [vmem:[#allocation2 + $0x14] ss:$8 sps:$4 sm:$0xff]  }
 0x46e   :  { %6383 = vst [vmem:[%s14205_s4 + $0xdd0] sm:$0xff] %v3727_v63  ;;  %6385 = vst [vmem:[%s14205_s4 + $0xde0] sm:$0xff] %v4400_v10 }
 0x46f   :  { %3990 = vmatmul.mubr.bf16.gmra.mrb[232].mxu0 %v7152_v49  ;;  %4663 = vmatmul.mubr.bf16.gmra.mrb[232].mxu1 %v7152_v49  ;;  %v7457_v49 = vld [vmem:[#allocation2] ss:$8 sps:$4 sm:$0xff]  }
 0x470   :  { %3999 = vmatprep.mubr.bf16.mxu0 %v7153_v11  ;;  %4672 = vmatprep.mubr.bf16.mxu1 %v7153_v11 }
 0x472   :  { %v3731_v55 = vpop.f32.mrb[128].mxu0  ;;  %v4404_v53 = vpop.f32.mrb[128].mxu1 }
 0x473   :  { %6389 = vst [vmem:[%s14205_s4 + $0xe00] sm:$0xff] %v3731_v55  ;;  %6391 = vst [vmem:[%s14205_s4 + $0xe10] sm:$0xff] %v4404_v53  ;;  %v3733_v56 = vpop.f32.mrb[129].mxu0  ;;  %v4406_v32 = vpop.f32.mrb[129].mxu1 }
 0x474   :  { %6390 = vst [vmem:[%s14205_s4 + $0xe08] sm:$0xff] %v3733_v56  ;;  %6392 = vst [vmem:[%s14205_s4 + $0xe18] sm:$0xff] %v4406_v32  ;;  %v3735_v25 = vpop.f32.mrb[130].mxu0  ;;  %v4408_v12 = vpop.f32.mrb[130].mxu1 }
 0x475   :  { %6396 = vst [vmem:[%s14205_s4 + $0xe38] sm:$0xff] %v3735_v25  ;;  %6398 = vst [vmem:[%s14205_s4 + $0xe48] sm:$0xff] %v4408_v12  ;;  %v3737_v5 = vpop.f32.mrb[131].mxu0  ;;  %v4410_v16 = vpop.f32.mrb[131].mxu1  ;;  %v7460_v25 = vld [vmem:[#allocation2 + $0x24] ss:$8 sps:$4 sm:$0xff]  }
 0x476   :  { %6397 = vst [vmem:[%s14205_s4 + $0xe40] sm:$0xff] %v3737_v5  ;;  %6399 = vst [vmem:[%s14205_s4 + $0xe50] sm:$0xff] %v4410_v16 }
 0x477   :  { %4000 = vmatmul.mubr.bf16.gmra.mrb[236].mxu0 %v7155_v59  ;;  %4673 = vmatmul.mubr.bf16.gmra.mrb[236].mxu1 %v7155_v59  ;;  %v7459_v59 = vld [vmem:[#allocation2 + $0x10] ss:$8 sps:$4 sm:$0xff]  }
 0x478   :  { %4009 = vmatprep.mubr.bf16.mxu0 %v7156_v61  ;;  %4682 = vmatprep.mubr.bf16.mxu1 %v7156_v61 }
 0x47a   :  { %v3741_v48 = vpop.f32.mrb[132].mxu0  ;;  %v4414_v35 = vpop.f32.mrb[132].mxu1 }
 0x47b   :  { %6403 = vst [vmem:[%s14205_s4 + $0xe70] sm:$0xff] %v3741_v48  ;;  %6405 = vst [vmem:[%s14205_s4 + $0xe80] sm:$0xff] %v4414_v35  ;;  %v3743_v51 = vpop.f32.mrb[133].mxu0  ;;  %v4416_v41 = vpop.f32.mrb[133].mxu1 }
 0x47c   :  { %6404 = vst [vmem:[%s14205_s4 + $0xe78] sm:$0xff] %v3743_v51  ;;  %6406 = vst [vmem:[%s14205_s4 + $0xe88] sm:$0xff] %v4416_v41  ;;  %v3745_v33 = vpop.f32.mrb[134].mxu0  ;;  %v4418_v44 = vpop.f32.mrb[134].mxu1 }
 0x47d   :  { %6410 = vst [vmem:[%s14205_s4 + $0xea8] sm:$0xff] %v3745_v33  ;;  %6412 = vst [vmem:[%s14205_s4 + $0xeb8] sm:$0xff] %v4418_v44  ;;  %v3747_v39 = vpop.f32.mrb[135].mxu0  ;;  %v4420_v20 = vpop.f32.mrb[135].mxu1  ;;  %v7462_v33 = vld [vmem:[#allocation2 + $0x34] ss:$8 sps:$4 sm:$0xff]  }
 0x47e   :  { %6411 = vst [vmem:[%s14205_s4 + $0xeb0] sm:$0xff] %v3747_v39  ;;  %6413 = vst [vmem:[%s14205_s4 + $0xec0] sm:$0xff] %v4420_v20 }
 0x47f   :  { %4010 = vmatmul.mubr.bf16.gmra.mrb[240].mxu0 %v7158_v19  ;;  %4683 = vmatmul.mubr.bf16.gmra.mrb[240].mxu1 %v7158_v19  ;;  %v7461_v19 = vld [vmem:[#allocation2 + $0x20] ss:$8 sps:$4 sm:$0xff]  }
 0x480   :  { %4019 = vmatprep.mubr.bf16.mxu0 %v7159_v14  ;;  %4692 = vmatprep.mubr.bf16.mxu1 %v7159_v14 }
 0x482   :  { %v3751_v47 = vpop.f32.mrb[136].mxu0  ;;  %v4424_v17 = vpop.f32.mrb[136].mxu1 }
 0x483   :  { %6417 = vst [vmem:[%s14205_s4 + $0xee0] sm:$0xff] %v3751_v47  ;;  %6419 = vst [vmem:[%s14205_s4 + $0xef0] sm:$0xff] %v4424_v17  ;;  %v3753_v7 = vpop.f32.mrb[137].mxu0  ;;  %v4426_v26 = vpop.f32.mrb[137].mxu1 }
 0x484   :  { %6418 = vst [vmem:[%s14205_s4 + $0xee8] sm:$0xff] %v3753_v7  ;;  %6420 = vst [vmem:[%s14205_s4 + $0xef8] sm:$0xff] %v4426_v26  ;;  %v3755_v58 = vpop.f32.mrb[138].mxu0  ;;  %v4428_v54 = vpop.f32.mrb[138].mxu1 }
 0x485   :  { %6424 = vst [vmem:[%s14205_s4 + $0xf18] sm:$0xff] %v3755_v58  ;;  %6426 = vst [vmem:[%s14205_s4 + $0xf28] sm:$0xff] %v4428_v54  ;;  %v3757_v37 = vpop.f32.mrb[139].mxu0  ;;  %v4430_v8 = vpop.f32.mrb[139].mxu1  ;;  %v7464_v58 = vld [vmem:[#allocation2 + $0x44] ss:$8 sps:$4 sm:$0xff]  }
 0x486   :  { %6425 = vst [vmem:[%s14205_s4 + $0xf20] sm:$0xff] %v3757_v37  ;;  %6427 = vst [vmem:[%s14205_s4 + $0xf30] sm:$0xff] %v4430_v8 }
 0x487   :  { %4020 = vmatmul.mubr.bf16.gmra.mrb[244].mxu0 %v7161_v24  ;;  %4693 = vmatmul.mubr.bf16.gmra.mrb[244].mxu1 %v7161_v24  ;;  %v7463_v24 = vld [vmem:[#allocation2 + $0x30] ss:$8 sps:$4 sm:$0xff]  }
 0x488   :  { %4029 = vmatprep.mubr.bf16.mxu0 %v7162_v40  ;;  %4702 = vmatprep.mubr.bf16.mxu1 %v7162_v40 }
 0x48a   :  { %v3761_v15 = vpop.f32.mrb[140].mxu0  ;;  %v4434_v45 = vpop.f32.mrb[140].mxu1 }
 0x48b   :  { %6431 = vst [vmem:[%s14205_s4 + $0xf50] sm:$0xff] %v3761_v15  ;;  %6433 = vst [vmem:[%s14205_s4 + $0xf60] sm:$0xff] %v4434_v45  ;;  %v3763_v6 = vpop.f32.mrb[141].mxu0  ;;  %v4436_v52 = vpop.f32.mrb[141].mxu1 }
 0x48c   :  { %6432 = vst [vmem:[%s14205_s4 + $0xf58] sm:$0xff] %v3763_v6  ;;  %6434 = vst [vmem:[%s14205_s4 + $0xf68] sm:$0xff] %v4436_v52  ;;  %v3765_v31 = vpop.f32.mrb[142].mxu0  ;;  %v4438_v57 = vpop.f32.mrb[142].mxu1 }
 0x48d   :  { %6438 = vst [vmem:[%s14205_s4 + $0xf88] sm:$0xff] %v3765_v31  ;;  %6440 = vst [vmem:[%s14205_s4 + $0xf98] sm:$0xff] %v4438_v57  ;;  %v3767_v36 = vpop.f32.mrb[143].mxu0  ;;  %v4440_v34 = vpop.f32.mrb[143].mxu1  ;;  %v7466_v31 = vld [vmem:[#allocation2 + $0x54] ss:$8 sps:$4 sm:$0xff]  }
 0x48e   :  { %6439 = vst [vmem:[%s14205_s4 + $0xf90] sm:$0xff] %v3767_v36  ;;  %6441 = vst [vmem:[%s14205_s4 + $0xfa0] sm:$0xff] %v4440_v34 }
 0x48f   :  { %4030 = vmatmul.mubr.bf16.gmra.mrb[248].mxu0 %v7164_v43  ;;  %4703 = vmatmul.mubr.bf16.gmra.mrb[248].mxu1 %v7164_v43  ;;  %v7465_v43 = vld [vmem:[#allocation2 + $0x40] ss:$8 sps:$4 sm:$0xff]  }
 0x490   :  { %4039 = vmatprep.mubr.bf16.mxu0 %v7165_v27  ;;  %4712 = vmatprep.mubr.bf16.mxu1 %v7165_v27 }
 0x492   :  { %v3771_v60 = vpop.f32.mrb[144].mxu0  ;;  %v4444_v42 = vpop.f32.mrb[144].mxu1 }
 0x493   :  { %6445 = vst [vmem:[%s14205_s4 + $0xfc0] sm:$0xff] %v3771_v60  ;;  %6447 = vst [vmem:[%s14205_s4 + $0xfd0] sm:$0xff] %v4444_v42  ;;  %v3773_v13 = vpop.f32.mrb[145].mxu0  ;;  %v4446_v0 = vpop.f32.mrb[145].mxu1 }
 0x494   :  { %6446 = vst [vmem:[%s14205_s4 + $0xfc8] sm:$0xff] %v3773_v13  ;;  %6448 = vst [vmem:[%s14205_s4 + $0xfd8] sm:$0xff] %v4446_v0  ;;  %v3775_v46 = vpop.f32.mrb[146].mxu0  ;;  %v4448_v38 = vpop.f32.mrb[146].mxu1 }
 0x495   :  { %6452 = vst [vmem:[%s14205_s4 + $0xff8] sm:$0xff] %v3775_v46  ;;  %6454 = vst [vmem:[%s14205_s4 + $0x1008] sm:$0xff] %v4448_v38  ;;  %v3777_v18 = vpop.f32.mrb[147].mxu0  ;;  %v4450_v4 = vpop.f32.mrb[147].mxu1  ;;  %v7468_v46 = vld [vmem:[#allocation2 + $0x64] ss:$8 sps:$4 sm:$0xff]  }
 0x496   :  { %6453 = vst [vmem:[%s14205_s4 + $0x1000] sm:$0xff] %v3777_v18  ;;  %6455 = vst [vmem:[%s14205_s4 + $0x1010] sm:$0xff] %v4450_v4 }
 0x497   :  { %4040 = vmatmul.mubr.bf16.gmra.mrb[252].mxu0 %v7167_v30  ;;  %4713 = vmatmul.mubr.bf16.gmra.mrb[252].mxu1 %v7167_v30  ;;  %v7467_v30 = vld [vmem:[#allocation2 + $0x50] ss:$8 sps:$4 sm:$0xff]  }
 0x498   :  { %4755 = vmatprep.mubr.bf16.mxu0 %v7456_v50  ;;  %5428 = vmatprep.mubr.bf16.mxu1 %v7456_v50 }
 0x49a   :  { %v3781_v2 = vpop.f32.mrb[148].mxu0  ;;  %v4454_v3 = vpop.f32.mrb[148].mxu1 }
 0x49b   :  { %6459 = vst [vmem:[%s14205_s4 + $0x1030] sm:$0xff] %v3781_v2  ;;  %6461 = vst [vmem:[%s14205_s4 + $0x1040] sm:$0xff] %v4454_v3  ;;  %v3783_v28 = vpop.f32.mrb[149].mxu0  ;;  %v4456_v22 = vpop.f32.mrb[149].mxu1 }
 0x49c   :  { %6460 = vst [vmem:[%s14205_s4 + $0x1038] sm:$0xff] %v3783_v28  ;;  %6462 = vst [vmem:[%s14205_s4 + $0x1048] sm:$0xff] %v4456_v22  ;;  %v3785_v9 = vpop.f32.mrb[150].mxu0  ;;  %v4458_v29 = vpop.f32.mrb[150].mxu1 }
 0x49d   :  { %6466 = vst [vmem:[%s14205_s4 + $0x1068] sm:$0xff] %v3785_v9  ;;  %6468 = vst [vmem:[%s14205_s4 + $0x1078] sm:$0xff] %v4458_v29  ;;  %v3787_v21 = vpop.f32.mrb[151].mxu0  ;;  %v4460_v23 = vpop.f32.mrb[151].mxu1  ;;  %v7469_v9 = vld [vmem:[#allocation2 + $0x60] ss:$8 sps:$4 sm:$0xff]  }
 0x49e   :  { %6467 = vst [vmem:[%s14205_s4 + $0x1070] sm:$0xff] %v3787_v21  ;;  %6469 = vst [vmem:[%s14205_s4 + $0x1080] sm:$0xff] %v4460_v23  ;;  %v7470_v29 = vld [vmem:[#allocation2 + $0x74] ss:$8 sps:$4 sm:$0xff]  }
 0x49f   :  { %4756 = vmatmul.mubr.bf16.vlgmr.msra.gmra.mrb[0].mxu0 %v7457_v49  ;;  %5429 = vmatmul.mubr.bf16.vlgmr.msra.gmra.mrb[0].mxu1 %v7457_v49 }
 0x4a0   :  { %4765 = vmatprep.mubr.bf16.mxu0 %v7458_v62  ;;  %5436 = vmatprep.mubr.bf16.mxu1 %v7458_v62 }
 0x4a2   :  { %v3791_v1 = vpop.f32.mrb[152].mxu0  ;;  %v4464_v11 = vpop.f32.mrb[152].mxu1 }
 0x4a3   :  { %6473 = vst [vmem:[%s14205_s4 + $0x10a0] sm:$0xff] %v3791_v1  ;;  %6475 = vst [vmem:[%s14205_s4 + $0x10b0] sm:$0xff] %v4464_v11  ;;  %v3793_v63 = vpop.f32.mrb[153].mxu0  ;;  %v4466_v10 = vpop.f32.mrb[153].mxu1 }
 0x4a4   :  { %6474 = vst [vmem:[%s14205_s4 + $0x10a8] sm:$0xff] %v3793_v63  ;;  %6476 = vst [vmem:[%s14205_s4 + $0x10b8] sm:$0xff] %v4466_v10  ;;  %v3795_v55 = vpop.f32.mrb[154].mxu0  ;;  %v4468_v53 = vpop.f32.mrb[154].mxu1 }
 0x4a5   :  { %6480 = vst [vmem:[%s14205_s4 + $0x10d8] sm:$0xff] %v3795_v55  ;;  %6482 = vst [vmem:[%s14205_s4 + $0x10e8] sm:$0xff] %v4468_v53  ;;  %v3797_v56 = vpop.f32.mrb[155].mxu0  ;;  %v4470_v32 = vpop.f32.mrb[155].mxu1  ;;  %v7471_v55 = vld [vmem:[#allocation2 + $0x70] ss:$8 sps:$4 sm:$0xff]  }
 0x4a6   :  { %6481 = vst [vmem:[%s14205_s4 + $0x10e0] sm:$0xff] %v3797_v56  ;;  %6483 = vst [vmem:[%s14205_s4 + $0x10f0] sm:$0xff] %v4470_v32  ;;  %v7472_v53 = vld [vmem:[#allocation2 + $0x84] ss:$8 sps:$4 sm:$0xff]  }
 0x4a7   :  { %4766 = vmatmul.mubr.bf16.gmra.mrb[4].mxu0 %v7459_v59  ;;  %5437 = vmatmul.mubr.bf16.gmra.mrb[4].mxu1 %v7459_v59 }
 0x4a8   :  { %4775 = vmatprep.mubr.bf16.mxu0 %v7460_v25  ;;  %5444 = vmatprep.mubr.bf16.mxu1 %v7460_v25 }
 0x4aa   :  { %v3801_v12 = vpop.f32.mrb[156].mxu0  ;;  %v4474_v61 = vpop.f32.mrb[156].mxu1 }
 0x4ab   :  { %6487 = vst [vmem:[%s14205_s4 + $0x1110] sm:$0xff] %v3801_v12  ;;  %6489 = vst [vmem:[%s14205_s4 + $0x1120] sm:$0xff] %v4474_v61  ;;  %v3803_v5 = vpop.f32.mrb[157].mxu0  ;;  %v4476_v16 = vpop.f32.mrb[157].mxu1 }
 0x4ac   :  { %6488 = vst [vmem:[%s14205_s4 + $0x1118] sm:$0xff] %v3803_v5  ;;  %6490 = vst [vmem:[%s14205_s4 + $0x1128] sm:$0xff] %v4476_v16  ;;  %v3805_v48 = vpop.f32.mrb[158].mxu0  ;;  %v4478_v35 = vpop.f32.mrb[158].mxu1 }
 0x4ad   :  { %6494 = vst [vmem:[%s14205_s4 + $0x1148] sm:$0xff] %v3805_v48  ;;  %6496 = vst [vmem:[%s14205_s4 + $0x1158] sm:$0xff] %v4478_v35  ;;  %v3807_v51 = vpop.f32.mrb[159].mxu0  ;;  %v4480_v41 = vpop.f32.mrb[159].mxu1  ;;  %v7473_v48 = vld [vmem:[#allocation2 + $0x80] ss:$8 sps:$4 sm:$0xff]  }
 0x4ae   :  { %6495 = vst [vmem:[%s14205_s4 + $0x1150] sm:$0xff] %v3807_v51  ;;  %6497 = vst [vmem:[%s14205_s4 + $0x1160] sm:$0xff] %v4480_v41  ;;  %v7474_v35 = vld [vmem:[#allocation2 + $0x94] ss:$8 sps:$4 sm:$0xff]  }
 0x4af   :  { %4776 = vmatmul.mubr.bf16.gmra.mrb[8].mxu0 %v7461_v19  ;;  %5445 = vmatmul.mubr.bf16.gmra.mrb[8].mxu1 %v7461_v19 }
 0x4b0   :  { %4785 = vmatprep.mubr.bf16.mxu0 %v7462_v33  ;;  %5452 = vmatprep.mubr.bf16.mxu1 %v7462_v33 }
 0x4b2   :  { %v3811_v44 = vpop.f32.mrb[160].mxu0  ;;  %v4484_v14 = vpop.f32.mrb[160].mxu1 }
 0x4b3   :  { %6501 = vst [vmem:[%s14205_s4 + $0x1180] sm:$0xff] %v3811_v44  ;;  %6503 = vst [vmem:[%s14205_s4 + $0x1190] sm:$0xff] %v4484_v14  ;;  %v3813_v39 = vpop.f32.mrb[161].mxu0  ;;  %v4486_v20 = vpop.f32.mrb[161].mxu1 }
 0x4b4   :  { %6502 = vst [vmem:[%s14205_s4 + $0x1188] sm:$0xff] %v3813_v39  ;;  %6504 = vst [vmem:[%s14205_s4 + $0x1198] sm:$0xff] %v4486_v20  ;;  %v3815_v47 = vpop.f32.mrb[162].mxu0  ;;  %v4488_v17 = vpop.f32.mrb[162].mxu1 }
 0x4b5   :  { %6508 = vst [vmem:[%s14205_s4 + $0x11b8] sm:$0xff] %v3815_v47  ;;  %6510 = vst [vmem:[%s14205_s4 + $0x11c8] sm:$0xff] %v4488_v17  ;;  %v3817_v7 = vpop.f32.mrb[163].mxu0  ;;  %v4490_v26 = vpop.f32.mrb[163].mxu1  ;;  %v7475_v47 = vld [vmem:[#allocation2 + $0x90] ss:$8 sps:$4 sm:$0xff]  }
 0x4b6   :  { %6509 = vst [vmem:[%s14205_s4 + $0x11c0] sm:$0xff] %v3817_v7  ;;  %6511 = vst [vmem:[%s14205_s4 + $0x11d0] sm:$0xff] %v4490_v26  ;;  %v7476_v17 = vld [vmem:[#allocation2 + $0xa4] ss:$8 sps:$4 sm:$0xff]  }
 0x4b7   :  { %4786 = vmatmul.mubr.bf16.gmra.mrb[12].mxu0 %v7463_v24  ;;  %5453 = vmatmul.mubr.bf16.gmra.mrb[12].mxu1 %v7463_v24 }
 0x4b8   :  { %4795 = vmatprep.mubr.bf16.mxu0 %v7464_v58  ;;  %5460 = vmatprep.mubr.bf16.mxu1 %v7464_v58 }
 0x4ba   :  { %v3821_v54 = vpop.f32.mrb[164].mxu0  ;;  %v4494_v40 = vpop.f32.mrb[164].mxu1 }
 0x4bb   :  { %6515 = vst [vmem:[%s14205_s4 + $0x11f0] sm:$0xff] %v3821_v54  ;;  %6517 = vst [vmem:[%s14205_s4 + $0x1200] sm:$0xff] %v4494_v40  ;;  %v3823_v37 = vpop.f32.mrb[165].mxu0  ;;  %v4496_v8 = vpop.f32.mrb[165].mxu1 }
 0x4bc   :  { %6516 = vst [vmem:[%s14205_s4 + $0x11f8] sm:$0xff] %v3823_v37  ;;  %6518 = vst [vmem:[%s14205_s4 + $0x1208] sm:$0xff] %v4496_v8  ;;  %v3825_v15 = vpop.f32.mrb[166].mxu0  ;;  %v4498_v45 = vpop.f32.mrb[166].mxu1 }
 0x4bd   :  { %6522 = vst [vmem:[%s14205_s4 + $0x1228] sm:$0xff] %v3825_v15  ;;  %6524 = vst [vmem:[%s14205_s4 + $0x1238] sm:$0xff] %v4498_v45  ;;  %v3827_v6 = vpop.f32.mrb[167].mxu0  ;;  %v4500_v52 = vpop.f32.mrb[167].mxu1  ;;  %v7477_v15 = vld [vmem:[#allocation2 + $0xa0] ss:$8 sps:$4 sm:$0xff]  }
 0x4be   :  { %6523 = vst [vmem:[%s14205_s4 + $0x1230] sm:$0xff] %v3827_v6  ;;  %6525 = vst [vmem:[%s14205_s4 + $0x1240] sm:$0xff] %v4500_v52  ;;  %v7478_v45 = vld [vmem:[#allocation2 + $0xb4] ss:$8 sps:$4 sm:$0xff]  }
 0x4bf   :  { %4796 = vmatmul.mubr.bf16.gmra.mrb[16].mxu0 %v7465_v43  ;;  %5461 = vmatmul.mubr.bf16.gmra.mrb[16].mxu1 %v7465_v43 }
 0x4c0   :  { %4805 = vmatprep.mubr.bf16.mxu0 %v7466_v31  ;;  %5468 = vmatprep.mubr.bf16.mxu1 %v7466_v31 }
 0x4c2   :  { %v3831_v57 = vpop.f32.mrb[168].mxu0  ;;  %v4504_v27 = vpop.f32.mrb[168].mxu1 }
 0x4c3   :  { %6529 = vst [vmem:[%s14205_s4 + $0x1260] sm:$0xff] %v3831_v57  ;;  %6531 = vst [vmem:[%s14205_s4 + $0x1270] sm:$0xff] %v4504_v27  ;;  %v3833_v36 = vpop.f32.mrb[169].mxu0  ;;  %v4506_v34 = vpop.f32.mrb[169].mxu1 }
 0x4c4   :  { %6530 = vst [vmem:[%s14205_s4 + $0x1268] sm:$0xff] %v3833_v36  ;;  %6532 = vst [vmem:[%s14205_s4 + $0x1278] sm:$0xff] %v4506_v34  ;;  %v3835_v60 = vpop.f32.mrb[170].mxu0  ;;  %v4508_v42 = vpop.f32.mrb[170].mxu1 }
 0x4c5   :  { %6536 = vst [vmem:[%s14205_s4 + $0x1298] sm:$0xff] %v3835_v60  ;;  %6538 = vst [vmem:[%s14205_s4 + $0x12a8] sm:$0xff] %v4508_v42  ;;  %v3837_v13 = vpop.f32.mrb[171].mxu0  ;;  %v4510_v0 = vpop.f32.mrb[171].mxu1  ;;  %v7479_v60 = vld [vmem:[#allocation2 + $0xb0] ss:$8 sps:$4 sm:$0xff]  }
 0x4c6   :  { %6537 = vst [vmem:[%s14205_s4 + $0x12a0] sm:$0xff] %v3837_v13  ;;  %6539 = vst [vmem:[%s14205_s4 + $0x12b0] sm:$0xff] %v4510_v0  ;;  %v7480_v42 = vld [vmem:[#allocation2 + $0xc4] ss:$8 sps:$4 sm:$0xff]  }
 0x4c7   :  { %4806 = vmatmul.mubr.bf16.gmra.mrb[20].mxu0 %v7467_v30  ;;  %5469 = vmatmul.mubr.bf16.gmra.mrb[20].mxu1 %v7467_v30 }
 0x4c8   :  { %4815 = vmatprep.mubr.bf16.mxu0 %v7468_v46  ;;  %5476 = vmatprep.mubr.bf16.mxu1 %v7468_v46 }
 0x4ca   :  { %v3841_v38 = vpop.f32.mrb[172].mxu0  ;;  %v4514_v18 = vpop.f32.mrb[172].mxu1 }
 0x4cb   :  { %6543 = vst [vmem:[%s14205_s4 + $0x12d0] sm:$0xff] %v3841_v38  ;;  %6545 = vst [vmem:[%s14205_s4 + $0x12e0] sm:$0xff] %v4514_v18  ;;  %v3843_v4 = vpop.f32.mrb[173].mxu0  ;;  %v4516_v50 = vpop.f32.mrb[173].mxu1 }
 0x4cc   :  { %6544 = vst [vmem:[%s14205_s4 + $0x12d8] sm:$0xff] %v3843_v4  ;;  %6546 = vst [vmem:[%s14205_s4 + $0x12e8] sm:$0xff] %v4516_v50  ;;  %v3845_v2 = vpop.f32.mrb[174].mxu0  ;;  %v4518_v3 = vpop.f32.mrb[174].mxu1 }
 0x4cd   :  { %6550 = vst [vmem:[%s14205_s4 + $0x1308] sm:$0xff] %v3845_v2  ;;  %6552 = vst [vmem:[%s14205_s4 + $0x1318] sm:$0xff] %v4518_v3  ;;  %v3847_v28 = vpop.f32.mrb[175].mxu0  ;;  %v4520_v22 = vpop.f32.mrb[175].mxu1  ;;  %v7481_v2 = vld [vmem:[#allocation2 + $0xc0] ss:$8 sps:$4 sm:$0xff]  }
 0x4ce   :  { %6551 = vst [vmem:[%s14205_s4 + $0x1310] sm:$0xff] %v3847_v28  ;;  %6553 = vst [vmem:[%s14205_s4 + $0x1320] sm:$0xff] %v4520_v22  ;;  %v7482_v3 = vld [vmem:[#allocation2 + $0xd4] ss:$8 sps:$4 sm:$0xff]  }
 0x4cf   :  { %4816 = vmatmul.mubr.bf16.gmra.mrb[24].mxu0 %v7469_v9  ;;  %5477 = vmatmul.mubr.bf16.gmra.mrb[24].mxu1 %v7469_v9 }
 0x4d0   :  { %4825 = vmatprep.mubr.bf16.mxu0 %v7470_v29  ;;  %5484 = vmatprep.mubr.bf16.mxu1 %v7470_v29 }
 0x4d2   :  { %v3851_v21 = vpop.f32.mrb[176].mxu0  ;;  %v4524_v23 = vpop.f32.mrb[176].mxu1 }
 0x4d3   :  { %6557 = vst [vmem:[%s14205_s4 + $0x1340] sm:$0xff] %v3851_v21  ;;  %6559 = vst [vmem:[%s14205_s4 + $0x1350] sm:$0xff] %v4524_v23  ;;  %v3853_v49 = vpop.f32.mrb[177].mxu0  ;;  %v4526_v62 = vpop.f32.mrb[177].mxu1 }
 0x4d4   :  { %6558 = vst [vmem:[%s14205_s4 + $0x1348] sm:$0xff] %v3853_v49  ;;  %6560 = vst [vmem:[%s14205_s4 + $0x1358] sm:$0xff] %v4526_v62  ;;  %v3855_v1 = vpop.f32.mrb[178].mxu0  ;;  %v4528_v11 = vpop.f32.mrb[178].mxu1 }
 0x4d5   :  { %6564 = vst [vmem:[%s14205_s4 + $0x1378] sm:$0xff] %v3855_v1  ;;  %6566 = vst [vmem:[%s14205_s4 + $0x1388] sm:$0xff] %v4528_v11  ;;  %v3857_v63 = vpop.f32.mrb[179].mxu0  ;;  %v4530_v10 = vpop.f32.mrb[179].mxu1  ;;  %v7483_v1 = vld [vmem:[#allocation2 + $0xd0] ss:$8 sps:$4 sm:$0xff]  }
 0x4d6   :  { %6565 = vst [vmem:[%s14205_s4 + $0x1380] sm:$0xff] %v3857_v63  ;;  %6567 = vst [vmem:[%s14205_s4 + $0x1390] sm:$0xff] %v4530_v10  ;;  %v7484_v11 = vld [vmem:[#allocation2 + $0xe4] ss:$8 sps:$4 sm:$0xff]  }
 0x4d7   :  { %4826 = vmatmul.mubr.bf16.gmra.mrb[28].mxu0 %v7471_v55  ;;  %5485 = vmatmul.mubr.bf16.gmra.mrb[28].mxu1 %v7471_v55 }
 0x4d8   :  { %4835 = vmatprep.mubr.bf16.mxu0 %v7472_v53  ;;  %5492 = vmatprep.mubr.bf16.mxu1 %v7472_v53 }
 0x4da   :  { %v3861_v56 = vpop.f32.mrb[180].mxu0  ;;  %v4534_v32 = vpop.f32.mrb[180].mxu1 }
 0x4db   :  { %6571 = vst [vmem:[%s14205_s4 + $0x13b0] sm:$0xff] %v3861_v56  ;;  %6573 = vst [vmem:[%s14205_s4 + $0x13c0] sm:$0xff] %v4534_v32  ;;  %v3863_v59 = vpop.f32.mrb[181].mxu0  ;;  %v4536_v25 = vpop.f32.mrb[181].mxu1 }
 0x4dc   :  { %6572 = vst [vmem:[%s14205_s4 + $0x13b8] sm:$0xff] %v3863_v59  ;;  %6574 = vst [vmem:[%s14205_s4 + $0x13c8] sm:$0xff] %v4536_v25  ;;  %v3865_v12 = vpop.f32.mrb[182].mxu0  ;;  %v4538_v61 = vpop.f32.mrb[182].mxu1 }
 0x4dd   :  { %6578 = vst [vmem:[%s14205_s4 + $0x13e8] sm:$0xff] %v3865_v12  ;;  %6580 = vst [vmem:[%s14205_s4 + $0x13f8] sm:$0xff] %v4538_v61  ;;  %v3867_v5 = vpop.f32.mrb[183].mxu0  ;;  %v4540_v16 = vpop.f32.mrb[183].mxu1  ;;  %v7485_v12 = vld [vmem:[#allocation2 + $0xe0] ss:$8 sps:$4 sm:$0xff]  }
 0x4de   :  { %6579 = vst [vmem:[%s14205_s4 + $0x13f0] sm:$0xff] %v3867_v5  ;;  %6581 = vst [vmem:[%s14205_s4 + $0x1400] sm:$0xff] %v4540_v16  ;;  %v7486_v61 = vld [vmem:[#allocation2 + $0xf4] ss:$8 sps:$4 sm:$0xff]  }
 0x4df   :  { %4836 = vmatmul.mubr.bf16.gmra.mrb[32].mxu0 %v7473_v48  ;;  %5493 = vmatmul.mubr.bf16.gmra.mrb[32].mxu1 %v7473_v48 }
 0x4e0   :  { %4845 = vmatprep.mubr.bf16.mxu0 %v7474_v35  ;;  %5500 = vmatprep.mubr.bf16.mxu1 %v7474_v35 }
 0x4e2   :  { %v3871_v51 = vpop.f32.mrb[184].mxu0  ;;  %v4544_v41 = vpop.f32.mrb[184].mxu1 }
 0x4e3   :  { %6585 = vst [vmem:[%s14205_s4 + $0x1420] sm:$0xff] %v3871_v51  ;;  %6587 = vst [vmem:[%s14205_s4 + $0x1430] sm:$0xff] %v4544_v41  ;;  %v3873_v19 = vpop.f32.mrb[185].mxu0  ;;  %v4546_v33 = vpop.f32.mrb[185].mxu1 }
 0x4e4   :  { %6586 = vst [vmem:[%s14205_s4 + $0x1428] sm:$0xff] %v3873_v19  ;;  %6588 = vst [vmem:[%s14205_s4 + $0x1438] sm:$0xff] %v4546_v33  ;;  %v3875_v44 = vpop.f32.mrb[186].mxu0  ;;  %v4548_v14 = vpop.f32.mrb[186].mxu1 }
 0x4e5   :  { %6592 = vst [vmem:[%s14205_s4 + $0x1458] sm:$0xff] %v3875_v44  ;;  %6594 = vst [vmem:[%s14205_s4 + $0x1468] sm:$0xff] %v4548_v14  ;;  %v3877_v39 = vpop.f32.mrb[187].mxu0  ;;  %v4550_v20 = vpop.f32.mrb[187].mxu1  ;;  %v7487_v44 = vld [vmem:[#allocation2 + $0xf0] ss:$8 sps:$4 sm:$0xff]  }
 0x4e6   :  { %6593 = vst [vmem:[%s14205_s4 + $0x1460] sm:$0xff] %v3877_v39  ;;  %6595 = vst [vmem:[%s14205_s4 + $0x1470] sm:$0xff] %v4550_v20  ;;  %v7488_v14 = vld [vmem:[#allocation2 + $0x104] ss:$8 sps:$4 sm:$0xff]  }
 0x4e7   :  { %4846 = vmatmul.mubr.bf16.gmra.mrb[36].mxu0 %v7475_v47  ;;  %5501 = vmatmul.mubr.bf16.gmra.mrb[36].mxu1 %v7475_v47 }
 0x4e8   :  { %4855 = vmatprep.mubr.bf16.mxu0 %v7476_v17  ;;  %5508 = vmatprep.mubr.bf16.mxu1 %v7476_v17 }
 0x4ea   :  { %v3881_v7 = vpop.f32.mrb[188].mxu0  ;;  %v4554_v26 = vpop.f32.mrb[188].mxu1 }
 0x4eb   :  { %6599 = vst [vmem:[%s14205_s4 + $0x1490] sm:$0xff] %v3881_v7  ;;  %6601 = vst [vmem:[%s14205_s4 + $0x14a0] sm:$0xff] %v4554_v26  ;;  %v3883_v24 = vpop.f32.mrb[189].mxu0  ;;  %v4556_v58 = vpop.f32.mrb[189].mxu1 }
 0x4ec   :  { %6600 = vst [vmem:[%s14205_s4 + $0x1498] sm:$0xff] %v3883_v24  ;;  %6602 = vst [vmem:[%s14205_s4 + $0x14a8] sm:$0xff] %v4556_v58  ;;  %v3885_v54 = vpop.f32.mrb[190].mxu0  ;;  %v4558_v40 = vpop.f32.mrb[190].mxu1 }
 0x4ed   :  { %6606 = vst [vmem:[%s14205_s4 + $0x14c8] sm:$0xff] %v3885_v54  ;;  %6608 = vst [vmem:[%s14205_s4 + $0x14d8] sm:$0xff] %v4558_v40  ;;  %v3887_v37 = vpop.f32.mrb[191].mxu0  ;;  %v4560_v8 = vpop.f32.mrb[191].mxu1  ;;  %v7489_v54 = vld [vmem:[#allocation2 + $0x100] ss:$8 sps:$4 sm:$0xff]  }
 0x4ee   :  { %6607 = vst [vmem:[%s14205_s4 + $0x14d0] sm:$0xff] %v3887_v37  ;;  %6609 = vst [vmem:[%s14205_s4 + $0x14e0] sm:$0xff] %v4560_v8  ;;  %v7490_v40 = vld [vmem:[#allocation2 + $0x114] ss:$8 sps:$4 sm:$0xff]  }
 0x4ef   :  { %4856 = vmatmul.mubr.bf16.gmra.mrb[40].mxu0 %v7477_v15  ;;  %5509 = vmatmul.mubr.bf16.gmra.mrb[40].mxu1 %v7477_v15 }
 0x4f0   :  { %4865 = vmatprep.mubr.bf16.mxu0 %v7478_v45  ;;  %5516 = vmatprep.mubr.bf16.mxu1 %v7478_v45 }
 0x4f2   :  { %v3891_v6 = vpop.f32.mrb[192].mxu0  ;;  %v4564_v52 = vpop.f32.mrb[192].mxu1 }
 0x4f3   :  { %6613 = vst [vmem:[%s14205_s4 + $0x1500] sm:$0xff] %v3891_v6  ;;  %6615 = vst [vmem:[%s14205_s4 + $0x1510] sm:$0xff] %v4564_v52  ;;  %v3893_v43 = vpop.f32.mrb[193].mxu0  ;;  %v4566_v31 = vpop.f32.mrb[193].mxu1 }
 0x4f4   :  { %6614 = vst [vmem:[%s14205_s4 + $0x1508] sm:$0xff] %v3893_v43  ;;  %6616 = vst [vmem:[%s14205_s4 + $0x1518] sm:$0xff] %v4566_v31  ;;  %v3895_v57 = vpop.f32.mrb[194].mxu0  ;;  %v4568_v27 = vpop.f32.mrb[194].mxu1 }
 0x4f5   :  { %6620 = vst [vmem:[%s14205_s4 + $0x1538] sm:$0xff] %v3895_v57  ;;  %6622 = vst [vmem:[%s14205_s4 + $0x1548] sm:$0xff] %v4568_v27  ;;  %v3897_v36 = vpop.f32.mrb[195].mxu0  ;;  %v4570_v34 = vpop.f32.mrb[195].mxu1  ;;  %v7491_v57 = vld [vmem:[#allocation2 + $0x110] ss:$8 sps:$4 sm:$0xff]  }
 0x4f6   :  { %6621 = vst [vmem:[%s14205_s4 + $0x1540] sm:$0xff] %v3897_v36  ;;  %6623 = vst [vmem:[%s14205_s4 + $0x1550] sm:$0xff] %v4570_v34  ;;  %v7492_v27 = vld [vmem:[#allocation2 + $0x124] ss:$8 sps:$4 sm:$0xff]  }
 0x4f7   :  { %4866 = vmatmul.mubr.bf16.gmra.mrb[44].mxu0 %v7479_v60  ;;  %5517 = vmatmul.mubr.bf16.gmra.mrb[44].mxu1 %v7479_v60 }
 0x4f8   :  { %4875 = vmatprep.mubr.bf16.mxu0 %v7480_v42  ;;  %5524 = vmatprep.mubr.bf16.mxu1 %v7480_v42 }
 0x4fa   :  { %v3901_v13 = vpop.f32.mrb[196].mxu0  ;;  %v4574_v0 = vpop.f32.mrb[196].mxu1 }
 0x4fb   :  { %6627 = vst [vmem:[%s14205_s4 + $0x1570] sm:$0xff] %v3901_v13  ;;  %6629 = vst [vmem:[%s14205_s4 + $0x1580] sm:$0xff] %v4574_v0  ;;  %v3903_v30 = vpop.f32.mrb[197].mxu0  ;;  %v4576_v46 = vpop.f32.mrb[197].mxu1 }
 0x4fc   :  { %6628 = vst [vmem:[%s14205_s4 + $0x1578] sm:$0xff] %v3903_v30  ;;  %6630 = vst [vmem:[%s14205_s4 + $0x1588] sm:$0xff] %v4576_v46  ;;  %v3905_v38 = vpop.f32.mrb[198].mxu0  ;;  %v4578_v18 = vpop.f32.mrb[198].mxu1 }
 0x4fd   :  { %6634 = vst [vmem:[%s14205_s4 + $0x15a8] sm:$0xff] %v3905_v38  ;;  %6636 = vst [vmem:[%s14205_s4 + $0x15b8] sm:$0xff] %v4578_v18  ;;  %v3907_v4 = vpop.f32.mrb[199].mxu0  ;;  %v4580_v50 = vpop.f32.mrb[199].mxu1  ;;  %v7493_v38 = vld [vmem:[#allocation2 + $0x120] ss:$8 sps:$4 sm:$0xff]  }
 0x4fe   :  { %6635 = vst [vmem:[%s14205_s4 + $0x15b0] sm:$0xff] %v3907_v4  ;;  %6637 = vst [vmem:[%s14205_s4 + $0x15c0] sm:$0xff] %v4580_v50  ;;  %v7494_v18 = vld [vmem:[#allocation2 + $0x134] ss:$8 sps:$4 sm:$0xff]  }
 0x4ff   :  { %4876 = vmatmul.mubr.bf16.gmra.mrb[48].mxu0 %v7481_v2  ;;  %5525 = vmatmul.mubr.bf16.gmra.mrb[48].mxu1 %v7481_v2 }
 0x500   :  { %4885 = vmatprep.mubr.bf16.mxu0 %v7482_v3  ;;  %5532 = vmatprep.mubr.bf16.mxu1 %v7482_v3 }
 0x502   :  { %v3911_v28 = vpop.f32.mrb[200].mxu0  ;;  %v4584_v22 = vpop.f32.mrb[200].mxu1 }
 0x503   :  { %6641 = vst [vmem:[%s14205_s4 + $0x15e0] sm:$0xff] %v3911_v28  ;;  %6643 = vst [vmem:[%s14205_s4 + $0x15f0] sm:$0xff] %v4584_v22  ;;  %v3913_v9 = vpop.f32.mrb[201].mxu0  ;;  %v4586_v29 = vpop.f32.mrb[201].mxu1 }
 0x504   :  { %6642 = vst [vmem:[%s14205_s4 + $0x15e8] sm:$0xff] %v3913_v9  ;;  %6644 = vst [vmem:[%s14205_s4 + $0x15f8] sm:$0xff] %v4586_v29  ;;  %v3915_v21 = vpop.f32.mrb[202].mxu0  ;;  %v4588_v23 = vpop.f32.mrb[202].mxu1 }
 0x505   :  { %6648 = vst [vmem:[%s14205_s4 + $0x1618] sm:$0xff] %v3915_v21  ;;  %6650 = vst [vmem:[%s14205_s4 + $0x1628] sm:$0xff] %v4588_v23  ;;  %v3917_v49 = vpop.f32.mrb[203].mxu0  ;;  %v4590_v62 = vpop.f32.mrb[203].mxu1  ;;  %v7495_v21 = vld [vmem:[#allocation2 + $0x130] ss:$8 sps:$4 sm:$0xff]  }
 0x506   :  { %6649 = vst [vmem:[%s14205_s4 + $0x1620] sm:$0xff] %v3917_v49  ;;  %6651 = vst [vmem:[%s14205_s4 + $0x1630] sm:$0xff] %v4590_v62  ;;  %v7496_v23 = vld [vmem:[#allocation2 + $0x144] ss:$8 sps:$4 sm:$0xff]  }
 0x507   :  { %4886 = vmatmul.mubr.bf16.gmra.mrb[52].mxu0 %v7483_v1  ;;  %5533 = vmatmul.mubr.bf16.gmra.mrb[52].mxu1 %v7483_v1 }
 0x508   :  { %4895 = vmatprep.mubr.bf16.mxu0 %v7484_v11  ;;  %5540 = vmatprep.mubr.bf16.mxu1 %v7484_v11 }
 0x50a   :  { %v3921_v63 = vpop.f32.mrb[204].mxu0  ;;  %v4594_v10 = vpop.f32.mrb[204].mxu1 }
 0x50b   :  { %6655 = vst [vmem:[%s14205_s4 + $0x1650] sm:$0xff] %v3921_v63  ;;  %6657 = vst [vmem:[%s14205_s4 + $0x1660] sm:$0xff] %v4594_v10  ;;  %v3923_v55 = vpop.f32.mrb[205].mxu0  ;;  %v4596_v53 = vpop.f32.mrb[205].mxu1 }
 0x50c   :  { %6656 = vst [vmem:[%s14205_s4 + $0x1658] sm:$0xff] %v3923_v55  ;;  %6658 = vst [vmem:[%s14205_s4 + $0x1668] sm:$0xff] %v4596_v53  ;;  %v3925_v56 = vpop.f32.mrb[206].mxu0  ;;  %v4598_v32 = vpop.f32.mrb[206].mxu1 }
 0x50d   :  { %6662 = vst [vmem:[%s14205_s4 + $0x1688] sm:$0xff] %v3925_v56  ;;  %6664 = vst [vmem:[%s14205_s4 + $0x1698] sm:$0xff] %v4598_v32  ;;  %v3927_v59 = vpop.f32.mrb[207].mxu0  ;;  %v4600_v25 = vpop.f32.mrb[207].mxu1  ;;  %v7497_v56 = vld [vmem:[#allocation2 + $0x140] ss:$8 sps:$4 sm:$0xff]  }
 0x50e   :  { %6663 = vst [vmem:[%s14205_s4 + $0x1690] sm:$0xff] %v3927_v59  ;;  %6665 = vst [vmem:[%s14205_s4 + $0x16a0] sm:$0xff] %v4600_v25  ;;  %v7498_v32 = vld [vmem:[#allocation2 + $0x154] ss:$8 sps:$4 sm:$0xff]  }
 0x50f   :  { %4896 = vmatmul.mubr.bf16.gmra.mrb[56].mxu0 %v7485_v12  ;;  %5541 = vmatmul.mubr.bf16.gmra.mrb[56].mxu1 %v7485_v12 }
 0x510   :  { %4905 = vmatprep.mubr.bf16.mxu0 %v7486_v61  ;;  %5548 = vmatprep.mubr.bf16.mxu1 %v7486_v61 }
 0x512   :  { %v3931_v5 = vpop.f32.mrb[208].mxu0  ;;  %v4604_v16 = vpop.f32.mrb[208].mxu1 }
 0x513   :  { %6669 = vst [vmem:[%s14205_s4 + $0x16c0] sm:$0xff] %v3931_v5  ;;  %6671 = vst [vmem:[%s14205_s4 + $0x16d0] sm:$0xff] %v4604_v16  ;;  %v3933_v48 = vpop.f32.mrb[209].mxu0  ;;  %v4606_v35 = vpop.f32.mrb[209].mxu1 }
 0x514   :  { %6670 = vst [vmem:[%s14205_s4 + $0x16c8] sm:$0xff] %v3933_v48  ;;  %6672 = vst [vmem:[%s14205_s4 + $0x16d8] sm:$0xff] %v4606_v35  ;;  %v3935_v51 = vpop.f32.mrb[210].mxu0  ;;  %v4608_v41 = vpop.f32.mrb[210].mxu1 }
 0x515   :  { %6676 = vst [vmem:[%s14205_s4 + $0x16f8] sm:$0xff] %v3935_v51  ;;  %6678 = vst [vmem:[%s14205_s4 + $0x1708] sm:$0xff] %v4608_v41  ;;  %v3937_v19 = vpop.f32.mrb[211].mxu0  ;;  %v4610_v33 = vpop.f32.mrb[211].mxu1  ;;  %v7499_v51 = vld [vmem:[#allocation2 + $0x150] ss:$8 sps:$4 sm:$0xff]  }
 0x516   :  { %6677 = vst [vmem:[%s14205_s4 + $0x1700] sm:$0xff] %v3937_v19  ;;  %6679 = vst [vmem:[%s14205_s4 + $0x1710] sm:$0xff] %v4610_v33  ;;  %v7500_v41 = vld [vmem:[#allocation2 + $0x164] ss:$8 sps:$4 sm:$0xff]  }
 0x517   :  { %4906 = vmatmul.mubr.bf16.gmra.mrb[60].mxu0 %v7487_v44  ;;  %5549 = vmatmul.mubr.bf16.gmra.mrb[60].mxu1 %v7487_v44 }
 0x518   :  { %4915 = vmatprep.mubr.bf16.mxu0 %v7488_v14  ;;  %5556 = vmatprep.mubr.bf16.mxu1 %v7488_v14 }
 0x51a   :  { %v3941_v39 = vpop.f32.mrb[212].mxu0  ;;  %v4614_v20 = vpop.f32.mrb[212].mxu1 }
 0x51b   :  { %6683 = vst [vmem:[%s14205_s4 + $0x1730] sm:$0xff] %v3941_v39  ;;  %6685 = vst [vmem:[%s14205_s4 + $0x1740] sm:$0xff] %v4614_v20  ;;  %v3943_v47 = vpop.f32.mrb[213].mxu0  ;;  %v4616_v17 = vpop.f32.mrb[213].mxu1 }
 0x51c   :  { %6684 = vst [vmem:[%s14205_s4 + $0x1738] sm:$0xff] %v3943_v47  ;;  %6686 = vst [vmem:[%s14205_s4 + $0x1748] sm:$0xff] %v4616_v17  ;;  %v3945_v7 = vpop.f32.mrb[214].mxu0  ;;  %v4618_v26 = vpop.f32.mrb[214].mxu1 }
 0x51d   :  { %6690 = vst [vmem:[%s14205_s4 + $0x1768] sm:$0xff] %v3945_v7  ;;  %6692 = vst [vmem:[%s14205_s4 + $0x1778] sm:$0xff] %v4618_v26  ;;  %v3947_v24 = vpop.f32.mrb[215].mxu0  ;;  %v4620_v58 = vpop.f32.mrb[215].mxu1  ;;  %v7501_v7 = vld [vmem:[#allocation2 + $0x160] ss:$8 sps:$4 sm:$0xff]  }
 0x51e   :  { %6691 = vst [vmem:[%s14205_s4 + $0x1770] sm:$0xff] %v3947_v24  ;;  %6693 = vst [vmem:[%s14205_s4 + $0x1780] sm:$0xff] %v4620_v58  ;;  %v7502_v26 = vld [vmem:[#allocation2 + $0x174] ss:$8 sps:$4 sm:$0xff]  }
 0x51f   :  { %4916 = vmatmul.mubr.bf16.gmra.mrb[64].mxu0 %v7489_v54  ;;  %5557 = vmatmul.mubr.bf16.gmra.mrb[64].mxu1 %v7489_v54 }
 0x520   :  { %4925 = vmatprep.mubr.bf16.mxu0 %v7490_v40  ;;  %5564 = vmatprep.mubr.bf16.mxu1 %v7490_v40 }
 0x522   :  { %v3951_v37 = vpop.f32.mrb[216].mxu0  ;;  %v4624_v8 = vpop.f32.mrb[216].mxu1 }
 0x523   :  { %6697 = vst [vmem:[%s14205_s4 + $0x17a0] sm:$0xff] %v3951_v37  ;;  %6699 = vst [vmem:[%s14205_s4 + $0x17b0] sm:$0xff] %v4624_v8  ;;  %v3953_v15 = vpop.f32.mrb[217].mxu0  ;;  %v4626_v45 = vpop.f32.mrb[217].mxu1 }
 0x524   :  { %6698 = vst [vmem:[%s14205_s4 + $0x17a8] sm:$0xff] %v3953_v15  ;;  %6700 = vst [vmem:[%s14205_s4 + $0x17b8] sm:$0xff] %v4626_v45  ;;  %v3955_v6 = vpop.f32.mrb[218].mxu0  ;;  %v4628_v52 = vpop.f32.mrb[218].mxu1 }
 0x525   :  { %6704 = vst [vmem:[%s14205_s4 + $0x17d8] sm:$0xff] %v3955_v6  ;;  %6706 = vst [vmem:[%s14205_s4 + $0x17e8] sm:$0xff] %v4628_v52  ;;  %v3957_v43 = vpop.f32.mrb[219].mxu0  ;;  %v4630_v31 = vpop.f32.mrb[219].mxu1  ;;  %v7503_v6 = vld [vmem:[#allocation2 + $0x170] ss:$8 sps:$4 sm:$0xff]  }
 0x526   :  { %6705 = vst [vmem:[%s14205_s4 + $0x17e0] sm:$0xff] %v3957_v43  ;;  %6707 = vst [vmem:[%s14205_s4 + $0x17f0] sm:$0xff] %v4630_v31  ;;  %v7504_v52 = vld [vmem:[#allocation2 + $0x184] ss:$8 sps:$4 sm:$0xff]  }
 0x527   :  { %4926 = vmatmul.mubr.bf16.gmra.mrb[68].mxu0 %v7491_v57  ;;  %5565 = vmatmul.mubr.bf16.gmra.mrb[68].mxu1 %v7491_v57 }
 0x528   :  { %4935 = vmatprep.mubr.bf16.mxu0 %v7492_v27  ;;  %5572 = vmatprep.mubr.bf16.mxu1 %v7492_v27 }
 0x52a   :  { %v3961_v36 = vpop.f32.mrb[220].mxu0  ;;  %v4634_v34 = vpop.f32.mrb[220].mxu1 }
 0x52b   :  { %6711 = vst [vmem:[%s14205_s4 + $0x1810] sm:$0xff] %v3961_v36  ;;  %6713 = vst [vmem:[%s14205_s4 + $0x1820] sm:$0xff] %v4634_v34  ;;  %v3963_v60 = vpop.f32.mrb[221].mxu0  ;;  %v4636_v42 = vpop.f32.mrb[221].mxu1 }
 0x52c   :  { %6712 = vst [vmem:[%s14205_s4 + $0x1818] sm:$0xff] %v3963_v60  ;;  %6714 = vst [vmem:[%s14205_s4 + $0x1828] sm:$0xff] %v4636_v42  ;;  %v3965_v13 = vpop.f32.mrb[222].mxu0  ;;  %v4638_v0 = vpop.f32.mrb[222].mxu1 }
 0x52d   :  { %6718 = vst [vmem:[%s14205_s4 + $0x1848] sm:$0xff] %v3965_v13  ;;  %6720 = vst [vmem:[%s14205_s4 + $0x1858] sm:$0xff] %v4638_v0  ;;  %v3967_v30 = vpop.f32.mrb[223].mxu0  ;;  %v4640_v46 = vpop.f32.mrb[223].mxu1  ;;  %v7505_v13 = vld [vmem:[#allocation2 + $0x180] ss:$8 sps:$4 sm:$0xff]  }
 0x52e   :  { %6719 = vst [vmem:[%s14205_s4 + $0x1850] sm:$0xff] %v3967_v30  ;;  %6721 = vst [vmem:[%s14205_s4 + $0x1860] sm:$0xff] %v4640_v46  ;;  %v7506_v0 = vld [vmem:[#allocation2 + $0x194] ss:$8 sps:$4 sm:$0xff]  }
 0x52f   :  { %4936 = vmatmul.mubr.bf16.gmra.mrb[72].mxu0 %v7493_v38  ;;  %5573 = vmatmul.mubr.bf16.gmra.mrb[72].mxu1 %v7493_v38 }
 0x530   :  { %4945 = vmatprep.mubr.bf16.mxu0 %v7494_v18  ;;  %5580 = vmatprep.mubr.bf16.mxu1 %v7494_v18 }
 0x532   :  { %v3971_v4 = vpop.f32.mrb[224].mxu0  ;;  %v4644_v50 = vpop.f32.mrb[224].mxu1 }
 0x533   :  { %6725 = vst [vmem:[%s14205_s4 + $0x1880] sm:$0xff] %v3971_v4  ;;  %6727 = vst [vmem:[%s14205_s4 + $0x1890] sm:$0xff] %v4644_v50  ;;  %v3973_v2 = vpop.f32.mrb[225].mxu0  ;;  %v4646_v3 = vpop.f32.mrb[225].mxu1 }
 0x534   :  { %6726 = vst [vmem:[%s14205_s4 + $0x1888] sm:$0xff] %v3973_v2  ;;  %6728 = vst [vmem:[%s14205_s4 + $0x1898] sm:$0xff] %v4646_v3  ;;  %v3975_v28 = vpop.f32.mrb[226].mxu0  ;;  %v4648_v22 = vpop.f32.mrb[226].mxu1 }
 0x535   :  { %6732 = vst [vmem:[%s14205_s4 + $0x18b8] sm:$0xff] %v3975_v28  ;;  %6734 = vst [vmem:[%s14205_s4 + $0x18c8] sm:$0xff] %v4648_v22  ;;  %v3977_v9 = vpop.f32.mrb[227].mxu0  ;;  %v4650_v29 = vpop.f32.mrb[227].mxu1  ;;  %v7507_v28 = vld [vmem:[#allocation2 + $0x190] ss:$8 sps:$4 sm:$0xff]  }
 0x536   :  { %6733 = vst [vmem:[%s14205_s4 + $0x18c0] sm:$0xff] %v3977_v9  ;;  %6735 = vst [vmem:[%s14205_s4 + $0x18d0] sm:$0xff] %v4650_v29  ;;  %v7508_v22 = vld [vmem:[#allocation2 + $0x1a4] ss:$8 sps:$4 sm:$0xff]  }
 0x537   :  { %4946 = vmatmul.mubr.bf16.gmra.mrb[76].mxu0 %v7495_v21  ;;  %5581 = vmatmul.mubr.bf16.gmra.mrb[76].mxu1 %v7495_v21 }
 0x538   :  { %4955 = vmatprep.mubr.bf16.mxu0 %v7496_v23  ;;  %5588 = vmatprep.mubr.bf16.mxu1 %v7496_v23 }
 0x53a   :  { %v3981_v49 = vpop.f32.mrb[228].mxu0  ;;  %v4654_v62 = vpop.f32.mrb[228].mxu1 }
 0x53b   :  { %6739 = vst [vmem:[%s14205_s4 + $0x18f0] sm:$0xff] %v3981_v49  ;;  %6741 = vst [vmem:[%s14205_s4 + $0x1900] sm:$0xff] %v4654_v62  ;;  %v3983_v1 = vpop.f32.mrb[229].mxu0  ;;  %v4656_v11 = vpop.f32.mrb[229].mxu1 }
 0x53c   :  { %6740 = vst [vmem:[%s14205_s4 + $0x18f8] sm:$0xff] %v3983_v1  ;;  %6742 = vst [vmem:[%s14205_s4 + $0x1908] sm:$0xff] %v4656_v11  ;;  %v3985_v63 = vpop.f32.mrb[230].mxu0  ;;  %v4658_v10 = vpop.f32.mrb[230].mxu1 }
 0x53d   :  { %6746 = vst [vmem:[%s14205_s4 + $0x1928] sm:$0xff] %v3985_v63  ;;  %6748 = vst [vmem:[%s14205_s4 + $0x1938] sm:$0xff] %v4658_v10  ;;  %v3987_v55 = vpop.f32.mrb[231].mxu0  ;;  %v4660_v53 = vpop.f32.mrb[231].mxu1  ;;  %v7509_v63 = vld [vmem:[#allocation2 + $0x1a0] ss:$8 sps:$4 sm:$0xff]  }
 0x53e   :  { %6747 = vst [vmem:[%s14205_s4 + $0x1930] sm:$0xff] %v3987_v55  ;;  %6749 = vst [vmem:[%s14205_s4 + $0x1940] sm:$0xff] %v4660_v53  ;;  %v7510_v10 = vld [vmem:[#allocation2 + $0x1b4] ss:$8 sps:$4 sm:$0xff]  }
 0x53f   :  { %4956 = vmatmul.mubr.bf16.gmra.mrb[80].mxu0 %v7497_v56  ;;  %5589 = vmatmul.mubr.bf16.gmra.mrb[80].mxu1 %v7497_v56 }
 0x540   :  { %4965 = vmatprep.mubr.bf16.mxu0 %v7498_v32  ;;  %5596 = vmatprep.mubr.bf16.mxu1 %v7498_v32 }
 0x542   :  { %v3991_v59 = vpop.f32.mrb[232].mxu0  ;;  %v4664_v25 = vpop.f32.mrb[232].mxu1 }
 0x543   :  { %6753 = vst [vmem:[%s14205_s4 + $0x1960] sm:$0xff] %v3991_v59  ;;  %6755 = vst [vmem:[%s14205_s4 + $0x1970] sm:$0xff] %v4664_v25  ;;  %v3993_v12 = vpop.f32.mrb[233].mxu0  ;;  %v4666_v61 = vpop.f32.mrb[233].mxu1 }
 0x544   :  { %6754 = vst [vmem:[%s14205_s4 + $0x1968] sm:$0xff] %v3993_v12  ;;  %6756 = vst [vmem:[%s14205_s4 + $0x1978] sm:$0xff] %v4666_v61  ;;  %v3995_v5 = vpop.f32.mrb[234].mxu0  ;;  %v4668_v16 = vpop.f32.mrb[234].mxu1 }
 0x545   :  { %6760 = vst [vmem:[%s14205_s4 + $0x1998] sm:$0xff] %v3995_v5  ;;  %6762 = vst [vmem:[%s14205_s4 + $0x19a8] sm:$0xff] %v4668_v16  ;;  %v3997_v48 = vpop.f32.mrb[235].mxu0  ;;  %v4670_v35 = vpop.f32.mrb[235].mxu1  ;;  %v7511_v5 = vld [vmem:[#allocation2 + $0x1b0] ss:$8 sps:$4 sm:$0xff]  }
 0x546   :  { %6761 = vst [vmem:[%s14205_s4 + $0x19a0] sm:$0xff] %v3997_v48  ;;  %6763 = vst [vmem:[%s14205_s4 + $0x19b0] sm:$0xff] %v4670_v35  ;;  %v7512_v16 = vld [vmem:[#allocation2 + $0x1c4] ss:$8 sps:$4 sm:$0xff]  }
 0x547   :  { %4966 = vmatmul.mubr.bf16.gmra.mrb[84].mxu0 %v7499_v51  ;;  %5597 = vmatmul.mubr.bf16.gmra.mrb[84].mxu1 %v7499_v51 }
 0x548   :  { %4975 = vmatprep.mubr.bf16.mxu0 %v7500_v41  ;;  %5604 = vmatprep.mubr.bf16.mxu1 %v7500_v41 }
 0x54a   :  { %v4001_v19 = vpop.f32.mrb[236].mxu0  ;;  %v4674_v33 = vpop.f32.mrb[236].mxu1 }
 0x54b   :  { %6767 = vst [vmem:[%s14205_s4 + $0x19d0] sm:$0xff] %v4001_v19  ;;  %6769 = vst [vmem:[%s14205_s4 + $0x19e0] sm:$0xff] %v4674_v33  ;;  %v4003_v44 = vpop.f32.mrb[237].mxu0  ;;  %v4676_v14 = vpop.f32.mrb[237].mxu1 }
 0x54c   :  { %6768 = vst [vmem:[%s14205_s4 + $0x19d8] sm:$0xff] %v4003_v44  ;;  %6770 = vst [vmem:[%s14205_s4 + $0x19e8] sm:$0xff] %v4676_v14  ;;  %v4005_v39 = vpop.f32.mrb[238].mxu0  ;;  %v4678_v20 = vpop.f32.mrb[238].mxu1 }
 0x54d   :  { %6774 = vst [vmem:[%s14205_s4 + $0x1a08] sm:$0xff] %v4005_v39  ;;  %6776 = vst [vmem:[%s14205_s4 + $0x1a18] sm:$0xff] %v4678_v20  ;;  %v4007_v47 = vpop.f32.mrb[239].mxu0  ;;  %v4680_v17 = vpop.f32.mrb[239].mxu1  ;;  %v7513_v39 = vld [vmem:[#allocation2 + $0x1c0] ss:$8 sps:$4 sm:$0xff]  }
 0x54e   :  { %6775 = vst [vmem:[%s14205_s4 + $0x1a10] sm:$0xff] %v4007_v47  ;;  %6777 = vst [vmem:[%s14205_s4 + $0x1a20] sm:$0xff] %v4680_v17  ;;  %v7514_v20 = vld [vmem:[#allocation2 + $0x1d4] ss:$8 sps:$4 sm:$0xff]  }
 0x54f   :  { %4976 = vmatmul.mubr.bf16.gmra.mrb[88].mxu0 %v7501_v7  ;;  %5605 = vmatmul.mubr.bf16.gmra.mrb[88].mxu1 %v7501_v7 }
 0x550   :  { %4985 = vmatprep.mubr.bf16.mxu0 %v7502_v26  ;;  %5612 = vmatprep.mubr.bf16.mxu1 %v7502_v26 }
 0x552   :  { %v4011_v24 = vpop.f32.mrb[240].mxu0  ;;  %v4684_v58 = vpop.f32.mrb[240].mxu1 }
 0x553   :  { %6781 = vst [vmem:[%s14205_s4 + $0x1a40] sm:$0xff] %v4011_v24  ;;  %6783 = vst [vmem:[%s14205_s4 + $0x1a50] sm:$0xff] %v4684_v58  ;;  %v4013_v54 = vpop.f32.mrb[241].mxu0  ;;  %v4686_v40 = vpop.f32.mrb[241].mxu1 }
 0x554   :  { %6782 = vst [vmem:[%s14205_s4 + $0x1a48] sm:$0xff] %v4013_v54  ;;  %6784 = vst [vmem:[%s14205_s4 + $0x1a58] sm:$0xff] %v4686_v40  ;;  %v4015_v37 = vpop.f32.mrb[242].mxu0  ;;  %v4688_v8 = vpop.f32.mrb[242].mxu1 }
 0x555   :  { %6788 = vst [vmem:[%s14205_s4 + $0x1a78] sm:$0xff] %v4015_v37  ;;  %6790 = vst [vmem:[%s14205_s4 + $0x1a88] sm:$0xff] %v4688_v8  ;;  %v4017_v15 = vpop.f32.mrb[243].mxu0  ;;  %v4690_v45 = vpop.f32.mrb[243].mxu1  ;;  %v7515_v37 = vld [vmem:[#allocation2 + $0x1d0] ss:$8 sps:$4 sm:$0xff]  }
 0x556   :  { %6789 = vst [vmem:[%s14205_s4 + $0x1a80] sm:$0xff] %v4017_v15  ;;  %6791 = vst [vmem:[%s14205_s4 + $0x1a90] sm:$0xff] %v4690_v45  ;;  %v7516_v8 = vld [vmem:[#allocation2 + $0x1e4] ss:$8 sps:$4 sm:$0xff]  }
 0x557   :  { %4986 = vmatmul.mubr.bf16.gmra.mrb[92].mxu0 %v7503_v6  ;;  %5613 = vmatmul.mubr.bf16.gmra.mrb[92].mxu1 %v7503_v6 }
 0x558   :  { %4995 = vmatprep.mubr.bf16.mxu0 %v7504_v52  ;;  %5620 = vmatprep.mubr.bf16.mxu1 %v7504_v52 }
 0x55a   :  { %v4021_v43 = vpop.f32.mrb[244].mxu0  ;;  %v4694_v31 = vpop.f32.mrb[244].mxu1 }
 0x55b   :  { %6795 = vst [vmem:[%s14205_s4 + $0x1ab0] sm:$0xff] %v4021_v43  ;;  %6797 = vst [vmem:[%s14205_s4 + $0x1ac0] sm:$0xff] %v4694_v31  ;;  %v4023_v57 = vpop.f32.mrb[245].mxu0  ;;  %v4696_v27 = vpop.f32.mrb[245].mxu1 }
 0x55c   :  { %6796 = vst [vmem:[%s14205_s4 + $0x1ab8] sm:$0xff] %v4023_v57  ;;  %6798 = vst [vmem:[%s14205_s4 + $0x1ac8] sm:$0xff] %v4696_v27  ;;  %v4025_v36 = vpop.f32.mrb[246].mxu0  ;;  %v4698_v34 = vpop.f32.mrb[246].mxu1 }
 0x55d   :  { %6802 = vst [vmem:[%s14205_s4 + $0x1ae8] sm:$0xff] %v4025_v36  ;;  %6804 = vst [vmem:[%s14205_s4 + $0x1af8] sm:$0xff] %v4698_v34  ;;  %v4027_v60 = vpop.f32.mrb[247].mxu0  ;;  %v4700_v42 = vpop.f32.mrb[247].mxu1  ;;  %v7517_v36 = vld [vmem:[#allocation2 + $0x1e0] ss:$8 sps:$4 sm:$0xff]  }
 0x55e   :  { %6803 = vst [vmem:[%s14205_s4 + $0x1af0] sm:$0xff] %v4027_v60  ;;  %6805 = vst [vmem:[%s14205_s4 + $0x1b00] sm:$0xff] %v4700_v42  ;;  %v7518_v34 = vld [vmem:[#allocation2 + $0x1f4] ss:$8 sps:$4 sm:$0xff]  }
 0x55f   :  { %4996 = vmatmul.mubr.bf16.gmra.mrb[96].mxu0 %v7505_v13  ;;  %5621 = vmatmul.mubr.bf16.gmra.mrb[96].mxu1 %v7505_v13 }
 0x560   :  { %5005 = vmatprep.mubr.bf16.mxu0 %v7506_v0  ;;  %5628 = vmatprep.mubr.bf16.mxu1 %v7506_v0 }
 0x562   :  { %v4031_v30 = vpop.f32.mrb[248].mxu0  ;;  %v4704_v46 = vpop.f32.mrb[248].mxu1 }
 0x563   :  { %6809 = vst [vmem:[%s14205_s4 + $0x1b20] sm:$0xff] %v4031_v30  ;;  %6811 = vst [vmem:[%s14205_s4 + $0x1b30] sm:$0xff] %v4704_v46  ;;  %v4033_v38 = vpop.f32.mrb[249].mxu0  ;;  %v4706_v18 = vpop.f32.mrb[249].mxu1 }
 0x564   :  { %6810 = vst [vmem:[%s14205_s4 + $0x1b28] sm:$0xff] %v4033_v38  ;;  %6812 = vst [vmem:[%s14205_s4 + $0x1b38] sm:$0xff] %v4706_v18  ;;  %v4035_v4 = vpop.f32.mrb[250].mxu0  ;;  %v4708_v50 = vpop.f32.mrb[250].mxu1 }
 0x565   :  { %6816 = vst [vmem:[%s14205_s4 + $0x1b58] sm:$0xff] %v4035_v4  ;;  %6818 = vst [vmem:[%s14205_s4 + $0x1b68] sm:$0xff] %v4708_v50  ;;  %v4037_v2 = vpop.f32.mrb[251].mxu0  ;;  %v4710_v3 = vpop.f32.mrb[251].mxu1  ;;  %v7519_v4 = vld [vmem:[#allocation2 + $0x1f0] ss:$8 sps:$4 sm:$0xff]  }
 0x566   :  { %6817 = vst [vmem:[%s14205_s4 + $0x1b60] sm:$0xff] %v4037_v2  ;;  %6819 = vst [vmem:[%s14205_s4 + $0x1b70] sm:$0xff] %v4710_v3  ;;  %v7520_v50 = vld [vmem:[#allocation2 + $0x204] ss:$8 sps:$4 sm:$0xff]  }
 0x567   :  { %5006 = vmatmul.mubr.bf16.gmra.mrb[100].mxu0 %v7507_v28  ;;  %5629 = vmatmul.mubr.bf16.gmra.mrb[100].mxu1 %v7507_v28 }
 0x568   :  { %5015 = vmatprep.mubr.bf16.mxu0 %v7508_v22  ;;  %5636 = vmatprep.mubr.bf16.mxu1 %v7508_v22 }
 0x56a   :  { %v4041_v9 = vpop.f32.mrb[252].mxu0  ;;  %v4714_v29 = vpop.f32.mrb[252].mxu1 }
 0x56b   :  { %6823 = vst [vmem:[%s14205_s4 + $0x1b90] sm:$0xff] %v4041_v9  ;;  %6825 = vst [vmem:[%s14205_s4 + $0x1ba0] sm:$0xff] %v4714_v29  ;;  %v4043_v21 = vpop.f32.mrb[253].mxu0  ;;  %v4716_v23 = vpop.f32.mrb[253].mxu1 }
 0x56c   :  { %6824 = vst [vmem:[%s14205_s4 + $0x1b98] sm:$0xff] %v4043_v21  ;;  %6826 = vst [vmem:[%s14205_s4 + $0x1ba8] sm:$0xff] %v4716_v23  ;;  %v4045_v49 = vpop.f32.mrb[254].mxu0  ;;  %v4718_v62 = vpop.f32.mrb[254].mxu1 }
 0x56d   :  { %6830 = vst [vmem:[%s14205_s4 + $0x1bc8] sm:$0xff] %v4045_v49  ;;  %6832 = vst [vmem:[%s14205_s4 + $0x1bd8] sm:$0xff] %v4718_v62  ;;  %v4047_v1 = vpop.f32.mrb[255].mxu0  ;;  %v4720_v11 = vpop.f32.mrb[255].mxu1  ;;  %v7521_v49 = vld [vmem:[#allocation2 + $0x200] ss:$8 sps:$4 sm:$0xff]  }
 0x56e   :  { %6831 = vst [vmem:[%s14205_s4 + $0x1bd0] sm:$0xff] %v4047_v1  ;;  %6833 = vst [vmem:[%s14205_s4 + $0x1be0] sm:$0xff] %v4720_v11  ;;  %v7522_v62 = vld [vmem:[#allocation2 + $0x214] ss:$8 sps:$4 sm:$0xff]  }
 0x56f   :  { %5016 = vmatmul.mubr.bf16.gmra.mrb[104].mxu0 %v7509_v63  ;;  %5637 = vmatmul.mubr.bf16.gmra.mrb[104].mxu1 %v7509_v63 }
 0x570   :  { %5025 = vmatprep.mubr.bf16.mxu0 %v7510_v10  ;;  %5644 = vmatprep.mubr.bf16.mxu1 %v7510_v10 }
 0x572   :  { %v4757_v55 = vpop.f32.mrb[0].mxu0  ;;  %v5430_v53 = vpop.f32.mrb[0].mxu1 }
 0x573   :  { %5945 = vst [vmem:[%s14205_s4 + $0x20] sm:$0xff] %v4757_v55  ;;  %5947 = vst.msk [vmem:[%s14205_s4 + $0x30] sm:$0xff] %vm261_vm0, %v5430_v53  ;;  %v4759_v56 = vpop.f32.mrb[1].mxu0  ;;  %v5432_v32 = vpop.f32.mrb[1].mxu1 }
 0x574   :  { %5946 = vst [vmem:[%s14205_s4 + $0x28] sm:$0xff] %v4759_v56  ;;  %v4761_v59 = vpop.f32.mrb[2].mxu0  ;;  %v5433_v25 = vpop.f32.mrb[2].mxu1 }
 0x575   :  { %5952 = vst [vmem:[%s14205_s4 + $0x58] sm:$0xff] %v4761_v59  ;;  %5954 = vst.msk [vmem:[%s14205_s4 + $0x68] sm:$0xff] %vm261_vm0, %v5433_v25  ;;  %v4763_v12 = vpop.f32.mrb[3].mxu0  ;;  %v5435_v61 = vpop.f32.mrb[3].mxu1  ;;  %v7523_v59 = vld [vmem:[#allocation2 + $0x210] ss:$8 sps:$4 sm:$0xff]  }
 0x576   :  { %5953 = vst [vmem:[%s14205_s4 + $0x60] sm:$0xff] %v4763_v12  ;;  %v7524_v25 = vld [vmem:[#allocation2 + $0x224] ss:$8 sps:$4 sm:$0xff]  }
 0x577   :  { %5026 = vmatmul.mubr.bf16.gmra.mrb[108].mxu0 %v7511_v5  ;;  %5645 = vmatmul.mubr.bf16.gmra.mrb[108].mxu1 %v7511_v5 }
 0x578   :  { %5035 = vmatprep.mubr.bf16.mxu0 %v7512_v16  ;;  %5652 = vmatprep.mubr.bf16.mxu1 %v7512_v16 }
 0x57a   :  { %v4767_v48 = vpop.f32.mrb[4].mxu0  ;;  %v5438_v35 = vpop.f32.mrb[4].mxu1 }
 0x57b   :  { %5959 = vst [vmem:[%s14205_s4 + $0x90] sm:$0xff] %v4767_v48  ;;  %5961 = vst.msk [vmem:[%s14205_s4 + $0xa0] sm:$0xff] %vm261_vm0, %v5438_v35  ;;  %v4769_v51 = vpop.f32.mrb[5].mxu0  ;;  %v5440_v41 = vpop.f32.mrb[5].mxu1 }
 0x57c   :  { %5960 = vst [vmem:[%s14205_s4 + $0x98] sm:$0xff] %v4769_v51  ;;  %v4771_v19 = vpop.f32.mrb[6].mxu0  ;;  %v5441_v33 = vpop.f32.mrb[6].mxu1 }
 0x57d   :  { %5966 = vst [vmem:[%s14205_s4 + $0xc8] sm:$0xff] %v4771_v19  ;;  %5968 = vst.msk [vmem:[%s14205_s4 + $0xd8] sm:$0xff] %vm261_vm0, %v5441_v33  ;;  %v4773_v44 = vpop.f32.mrb[7].mxu0  ;;  %v5443_v14 = vpop.f32.mrb[7].mxu1  ;;  %v7525_v19 = vld [vmem:[#allocation2 + $0x220] ss:$8 sps:$4 sm:$0xff]  }
 0x57e   :  { %5967 = vst [vmem:[%s14205_s4 + $0xd0] sm:$0xff] %v4773_v44  ;;  %v7526_v33 = vld [vmem:[#allocation2 + $0x234] ss:$8 sps:$4 sm:$0xff]  }
 0x57f   :  { %5036 = vmatmul.mubr.bf16.gmra.mrb[112].mxu0 %v7513_v39  ;;  %5653 = vmatmul.mubr.bf16.gmra.mrb[112].mxu1 %v7513_v39 }
 0x580   :  { %5045 = vmatprep.mubr.bf16.mxu0 %v7514_v20  ;;  %5660 = vmatprep.mubr.bf16.mxu1 %v7514_v20 }
 0x582   :  { %v4777_v47 = vpop.f32.mrb[8].mxu0  ;;  %v5446_v17 = vpop.f32.mrb[8].mxu1 }
 0x583   :  { %5973 = vst [vmem:[%s14205_s4 + $0x100] sm:$0xff] %v4777_v47  ;;  %5975 = vst.msk [vmem:[%s14205_s4 + $0x110] sm:$0xff] %vm261_vm0, %v5446_v17  ;;  %v4779_v7 = vpop.f32.mrb[9].mxu0  ;;  %v5448_v26 = vpop.f32.mrb[9].mxu1 }
 0x584   :  { %5974 = vst [vmem:[%s14205_s4 + $0x108] sm:$0xff] %v4779_v7  ;;  %v4781_v24 = vpop.f32.mrb[10].mxu0  ;;  %v5449_v58 = vpop.f32.mrb[10].mxu1 }
 0x585   :  { %5980 = vst [vmem:[%s14205_s4 + $0x138] sm:$0xff] %v4781_v24  ;;  %5982 = vst.msk [vmem:[%s14205_s4 + $0x148] sm:$0xff] %vm261_vm0, %v5449_v58  ;;  %v4783_v54 = vpop.f32.mrb[11].mxu0  ;;  %v5451_v40 = vpop.f32.mrb[11].mxu1  ;;  %v7527_v24 = vld [vmem:[#allocation2 + $0x230] ss:$8 sps:$4 sm:$0xff]  }
 0x586   :  { %5981 = vst [vmem:[%s14205_s4 + $0x140] sm:$0xff] %v4783_v54  ;;  %v7528_v58 = vld [vmem:[#allocation2 + $0x244] ss:$8 sps:$4 sm:$0xff]  }
 0x587   :  { %5046 = vmatmul.mubr.bf16.gmra.mrb[116].mxu0 %v7515_v37  ;;  %5661 = vmatmul.mubr.bf16.gmra.mrb[116].mxu1 %v7515_v37 }
 0x588   :  { %5055 = vmatprep.mubr.bf16.mxu0 %v7516_v8  ;;  %5668 = vmatprep.mubr.bf16.mxu1 %v7516_v8 }
 0x58a   :  { %v4787_v15 = vpop.f32.mrb[12].mxu0  ;;  %v5454_v45 = vpop.f32.mrb[12].mxu1 }
 0x58b   :  { %5987 = vst [vmem:[%s14205_s4 + $0x170] sm:$0xff] %v4787_v15  ;;  %5989 = vst.msk [vmem:[%s14205_s4 + $0x180] sm:$0xff] %vm261_vm0, %v5454_v45  ;;  %v4789_v6 = vpop.f32.mrb[13].mxu0  ;;  %v5456_v52 = vpop.f32.mrb[13].mxu1 }
 0x58c   :  { %5988 = vst [vmem:[%s14205_s4 + $0x178] sm:$0xff] %v4789_v6  ;;  %v4791_v43 = vpop.f32.mrb[14].mxu0  ;;  %v5457_v31 = vpop.f32.mrb[14].mxu1 }
 0x58d   :  { %5994 = vst [vmem:[%s14205_s4 + $0x1a8] sm:$0xff] %v4791_v43  ;;  %5996 = vst.msk [vmem:[%s14205_s4 + $0x1b8] sm:$0xff] %vm261_vm0, %v5457_v31  ;;  %v4793_v57 = vpop.f32.mrb[15].mxu0  ;;  %v5459_v27 = vpop.f32.mrb[15].mxu1  ;;  %v7529_v43 = vld [vmem:[#allocation2 + $0x240] ss:$8 sps:$4 sm:$0xff]  }
 0x58e   :  { %5995 = vst [vmem:[%s14205_s4 + $0x1b0] sm:$0xff] %v4793_v57  ;;  %v7530_v31 = vld [vmem:[#allocation2 + $0x254] ss:$8 sps:$4 sm:$0xff]  }
 0x58f   :  { %5056 = vmatmul.mubr.bf16.gmra.mrb[120].mxu0 %v7517_v36  ;;  %5669 = vmatmul.mubr.bf16.gmra.mrb[120].mxu1 %v7517_v36 }
 0x590   :  { %5065 = vmatprep.mubr.bf16.mxu0 %v7518_v34  ;;  %5676 = vmatprep.mubr.bf16.mxu1 %v7518_v34 }
 0x592   :  { %v4797_v60 = vpop.f32.mrb[16].mxu0  ;;  %v5462_v42 = vpop.f32.mrb[16].mxu1 }
 0x593   :  { %6001 = vst [vmem:[%s14205_s4 + $0x1e0] sm:$0xff] %v4797_v60  ;;  %6003 = vst.msk [vmem:[%s14205_s4 + $0x1f0] sm:$0xff] %vm261_vm0, %v5462_v42  ;;  %v4799_v13 = vpop.f32.mrb[17].mxu0  ;;  %v5464_v0 = vpop.f32.mrb[17].mxu1 }
 0x594   :  { %6002 = vst [vmem:[%s14205_s4 + $0x1e8] sm:$0xff] %v4799_v13  ;;  %v4801_v30 = vpop.f32.mrb[18].mxu0  ;;  %v5465_v46 = vpop.f32.mrb[18].mxu1 }
 0x595   :  { %6008 = vst [vmem:[%s14205_s4 + $0x218] sm:$0xff] %v4801_v30  ;;  %6010 = vst.msk [vmem:[%s14205_s4 + $0x228] sm:$0xff] %vm261_vm0, %v5465_v46  ;;  %v4803_v38 = vpop.f32.mrb[19].mxu0  ;;  %v5467_v18 = vpop.f32.mrb[19].mxu1  ;;  %v7531_v30 = vld [vmem:[#allocation2 + $0x250] ss:$8 sps:$4 sm:$0xff]  }
 0x596   :  { %6009 = vst [vmem:[%s14205_s4 + $0x220] sm:$0xff] %v4803_v38  ;;  %v7532_v46 = vld [vmem:[#allocation2 + $0x264] ss:$8 sps:$4 sm:$0xff]  }
 0x597   :  { %5066 = vmatmul.mubr.bf16.gmra.mrb[124].mxu0 %v7519_v4  ;;  %5677 = vmatmul.mubr.bf16.gmra.mrb[124].mxu1 %v7519_v4 }
 0x598   :  { %5075 = vmatprep.mubr.bf16.mxu0 %v7520_v50  ;;  %5684 = vmatprep.mubr.bf16.mxu1 %v7520_v50 }
 0x59a   :  { %v4807_v2 = vpop.f32.mrb[20].mxu0  ;;  %v5470_v3 = vpop.f32.mrb[20].mxu1 }
 0x59b   :  { %6015 = vst [vmem:[%s14205_s4 + $0x250] sm:$0xff] %v4807_v2  ;;  %6017 = vst.msk [vmem:[%s14205_s4 + $0x260] sm:$0xff] %vm261_vm0, %v5470_v3  ;;  %v4809_v28 = vpop.f32.mrb[21].mxu0  ;;  %v5472_v22 = vpop.f32.mrb[21].mxu1 }
 0x59c   :  { %6016 = vst [vmem:[%s14205_s4 + $0x258] sm:$0xff] %v4809_v28  ;;  %v4811_v9 = vpop.f32.mrb[22].mxu0  ;;  %v5473_v29 = vpop.f32.mrb[22].mxu1 }
 0x59d   :  { %6022 = vst [vmem:[%s14205_s4 + $0x288] sm:$0xff] %v4811_v9  ;;  %6024 = vst.msk [vmem:[%s14205_s4 + $0x298] sm:$0xff] %vm261_vm0, %v5473_v29  ;;  %v4813_v21 = vpop.f32.mrb[23].mxu0  ;;  %v5475_v23 = vpop.f32.mrb[23].mxu1  ;;  %v7533_v9 = vld [vmem:[#allocation2 + $0x260] ss:$8 sps:$4 sm:$0xff]  }
 0x59e   :  { %6023 = vst [vmem:[%s14205_s4 + $0x290] sm:$0xff] %v4813_v21  ;;  %v7534_v29 = vld [vmem:[#allocation2 + $0x274] ss:$8 sps:$4 sm:$0xff]  }
 0x59f   :  { %5076 = vmatmul.mubr.bf16.gmra.mrb[128].mxu0 %v7521_v49  ;;  %5685 = vmatmul.mubr.bf16.gmra.mrb[128].mxu1 %v7521_v49 }
 0x5a0   :  { %5085 = vmatprep.mubr.bf16.mxu0 %v7522_v62  ;;  %5692 = vmatprep.mubr.bf16.mxu1 %v7522_v62 }
 0x5a2   :  { %v4817_v1 = vpop.f32.mrb[24].mxu0  ;;  %v5478_v11 = vpop.f32.mrb[24].mxu1 }
 0x5a3   :  { %6029 = vst [vmem:[%s14205_s4 + $0x2c0] sm:$0xff] %v4817_v1  ;;  %6031 = vst.msk [vmem:[%s14205_s4 + $0x2d0] sm:$0xff] %vm261_vm0, %v5478_v11  ;;  %v4819_v63 = vpop.f32.mrb[25].mxu0  ;;  %v5480_v10 = vpop.f32.mrb[25].mxu1 }
 0x5a4   :  { %6030 = vst [vmem:[%s14205_s4 + $0x2c8] sm:$0xff] %v4819_v63  ;;  %v4821_v55 = vpop.f32.mrb[26].mxu0  ;;  %v5481_v53 = vpop.f32.mrb[26].mxu1 }
 0x5a5   :  { %6036 = vst [vmem:[%s14205_s4 + $0x2f8] sm:$0xff] %v4821_v55  ;;  %6038 = vst.msk [vmem:[%s14205_s4 + $0x308] sm:$0xff] %vm261_vm0, %v5481_v53  ;;  %v4823_v56 = vpop.f32.mrb[27].mxu0  ;;  %v5483_v32 = vpop.f32.mrb[27].mxu1  ;;  %v7535_v55 = vld [vmem:[#allocation2 + $0x270] ss:$8 sps:$4 sm:$0xff]  }
 0x5a6   :  { %6037 = vst [vmem:[%s14205_s4 + $0x300] sm:$0xff] %v4823_v56  ;;  %v7536_v53 = vld [vmem:[#allocation2 + $0x284] ss:$8 sps:$4 sm:$0xff]  }
 0x5a7   :  { %5086 = vmatmul.mubr.bf16.gmra.mrb[132].mxu0 %v7523_v59  ;;  %5693 = vmatmul.mubr.bf16.gmra.mrb[132].mxu1 %v7523_v59 }
 0x5a8   :  { %5095 = vmatprep.mubr.bf16.mxu0 %v7524_v25  ;;  %5700 = vmatprep.mubr.bf16.mxu1 %v7524_v25 }
 0x5aa   :  { %v4827_v12 = vpop.f32.mrb[28].mxu0  ;;  %v5486_v61 = vpop.f32.mrb[28].mxu1 }
 0x5ab   :  { %6043 = vst [vmem:[%s14205_s4 + $0x330] sm:$0xff] %v4827_v12  ;;  %6045 = vst.msk [vmem:[%s14205_s4 + $0x340] sm:$0xff] %vm261_vm0, %v5486_v61  ;;  %v4829_v5 = vpop.f32.mrb[29].mxu0  ;;  %v5488_v16 = vpop.f32.mrb[29].mxu1 }
 0x5ac   :  { %6044 = vst [vmem:[%s14205_s4 + $0x338] sm:$0xff] %v4829_v5  ;;  %v4831_v48 = vpop.f32.mrb[30].mxu0  ;;  %v5489_v35 = vpop.f32.mrb[30].mxu1 }
 0x5ad   :  { %6050 = vst [vmem:[%s14205_s4 + $0x368] sm:$0xff] %v4831_v48  ;;  %6052 = vst.msk [vmem:[%s14205_s4 + $0x378] sm:$0xff] %vm261_vm0, %v5489_v35  ;;  %v4833_v51 = vpop.f32.mrb[31].mxu0  ;;  %v5491_v41 = vpop.f32.mrb[31].mxu1  ;;  %v7537_v48 = vld [vmem:[#allocation2 + $0x280] ss:$8 sps:$4 sm:$0xff]  }
 0x5ae   :  { %6051 = vst [vmem:[%s14205_s4 + $0x370] sm:$0xff] %v4833_v51  ;;  %v7538_v35 = vld [vmem:[#allocation2 + $0x294] ss:$8 sps:$4 sm:$0xff]  }
 0x5af   :  { %5096 = vmatmul.mubr.bf16.gmra.mrb[136].mxu0 %v7525_v19  ;;  %5701 = vmatmul.mubr.bf16.gmra.mrb[136].mxu1 %v7525_v19 }
 0x5b0   :  { %5105 = vmatprep.mubr.bf16.mxu0 %v7526_v33  ;;  %5708 = vmatprep.mubr.bf16.mxu1 %v7526_v33 }
 0x5b2   :  { %v4837_v44 = vpop.f32.mrb[32].mxu0  ;;  %v5494_v14 = vpop.f32.mrb[32].mxu1 }
 0x5b3   :  { %6057 = vst [vmem:[%s14205_s4 + $0x3a0] sm:$0xff] %v4837_v44  ;;  %6059 = vst.msk [vmem:[%s14205_s4 + $0x3b0] sm:$0xff] %vm261_vm0, %v5494_v14  ;;  %v4839_v39 = vpop.f32.mrb[33].mxu0  ;;  %v5496_v20 = vpop.f32.mrb[33].mxu1 }
 0x5b4   :  { %6058 = vst [vmem:[%s14205_s4 + $0x3a8] sm:$0xff] %v4839_v39  ;;  %v4841_v47 = vpop.f32.mrb[34].mxu0  ;;  %v5497_v17 = vpop.f32.mrb[34].mxu1 }
 0x5b5   :  { %6064 = vst [vmem:[%s14205_s4 + $0x3d8] sm:$0xff] %v4841_v47  ;;  %6066 = vst.msk [vmem:[%s14205_s4 + $0x3e8] sm:$0xff] %vm261_vm0, %v5497_v17  ;;  %v4843_v7 = vpop.f32.mrb[35].mxu0  ;;  %v5499_v26 = vpop.f32.mrb[35].mxu1  ;;  %v7539_v47 = vld [vmem:[#allocation2 + $0x290] ss:$8 sps:$4 sm:$0xff]  }
 0x5b6   :  { %6065 = vst [vmem:[%s14205_s4 + $0x3e0] sm:$0xff] %v4843_v7  ;;  %v7540_v17 = vld [vmem:[#allocation2 + $0x2a4] ss:$8 sps:$4 sm:$0xff]  }
 0x5b7   :  { %5106 = vmatmul.mubr.bf16.gmra.mrb[140].mxu0 %v7527_v24  ;;  %5709 = vmatmul.mubr.bf16.gmra.mrb[140].mxu1 %v7527_v24 }
 0x5b8   :  { %5115 = vmatprep.mubr.bf16.mxu0 %v7528_v58  ;;  %5716 = vmatprep.mubr.bf16.mxu1 %v7528_v58 }
 0x5ba   :  { %v4847_v54 = vpop.f32.mrb[36].mxu0  ;;  %v5502_v40 = vpop.f32.mrb[36].mxu1 }
 0x5bb   :  { %6071 = vst [vmem:[%s14205_s4 + $0x410] sm:$0xff] %v4847_v54  ;;  %6073 = vst.msk [vmem:[%s14205_s4 + $0x420] sm:$0xff] %vm261_vm0, %v5502_v40  ;;  %v4849_v37 = vpop.f32.mrb[37].mxu0  ;;  %v5504_v8 = vpop.f32.mrb[37].mxu1 }
 0x5bc   :  { %6072 = vst [vmem:[%s14205_s4 + $0x418] sm:$0xff] %v4849_v37  ;;  %v4851_v15 = vpop.f32.mrb[38].mxu0  ;;  %v5505_v45 = vpop.f32.mrb[38].mxu1 }
 0x5bd   :  { %6078 = vst [vmem:[%s14205_s4 + $0x448] sm:$0xff] %v4851_v15  ;;  %6080 = vst.msk [vmem:[%s14205_s4 + $0x458] sm:$0xff] %vm261_vm0, %v5505_v45  ;;  %v4853_v6 = vpop.f32.mrb[39].mxu0  ;;  %v5507_v52 = vpop.f32.mrb[39].mxu1  ;;  %v7541_v15 = vld [vmem:[#allocation2 + $0x2a0] ss:$8 sps:$4 sm:$0xff]  }
 0x5be   :  { %6079 = vst [vmem:[%s14205_s4 + $0x450] sm:$0xff] %v4853_v6  ;;  %v7542_v45 = vld [vmem:[#allocation2 + $0x2b4] ss:$8 sps:$4 sm:$0xff]  }
 0x5bf   :  { %5116 = vmatmul.mubr.bf16.gmra.mrb[144].mxu0 %v7529_v43  ;;  %5717 = vmatmul.mubr.bf16.gmra.mrb[144].mxu1 %v7529_v43 }
 0x5c0   :  { %5125 = vmatprep.mubr.bf16.mxu0 %v7530_v31  ;;  %5724 = vmatprep.mubr.bf16.mxu1 %v7530_v31 }
 0x5c2   :  { %v4857_v57 = vpop.f32.mrb[40].mxu0  ;;  %v5510_v27 = vpop.f32.mrb[40].mxu1 }
 0x5c3   :  { %6085 = vst [vmem:[%s14205_s4 + $0x480] sm:$0xff] %v4857_v57  ;;  %6087 = vst.msk [vmem:[%s14205_s4 + $0x490] sm:$0xff] %vm261_vm0, %v5510_v27  ;;  %v4859_v36 = vpop.f32.mrb[41].mxu0  ;;  %v5512_v34 = vpop.f32.mrb[41].mxu1 }
 0x5c4   :  { %6086 = vst [vmem:[%s14205_s4 + $0x488] sm:$0xff] %v4859_v36  ;;  %v4861_v60 = vpop.f32.mrb[42].mxu0  ;;  %v5513_v42 = vpop.f32.mrb[42].mxu1 }
 0x5c5   :  { %6092 = vst [vmem:[%s14205_s4 + $0x4b8] sm:$0xff] %v4861_v60  ;;  %6094 = vst.msk [vmem:[%s14205_s4 + $0x4c8] sm:$0xff] %vm261_vm0, %v5513_v42  ;;  %v4863_v13 = vpop.f32.mrb[43].mxu0  ;;  %v5515_v0 = vpop.f32.mrb[43].mxu1  ;;  %v7543_v60 = vld [vmem:[#allocation2 + $0x2b0] ss:$8 sps:$4 sm:$0xff]  }
 0x5c6   :  { %6093 = vst [vmem:[%s14205_s4 + $0x4c0] sm:$0xff] %v4863_v13  ;;  %v7544_v42 = vld [vmem:[#allocation2 + $0x2c4] ss:$8 sps:$4 sm:$0xff]  }
 0x5c7   :  { %5126 = vmatmul.mubr.bf16.gmra.mrb[148].mxu0 %v7531_v30  ;;  %5725 = vmatmul.mubr.bf16.gmra.mrb[148].mxu1 %v7531_v30 }
 0x5c8   :  { %5135 = vmatprep.mubr.bf16.mxu0 %v7532_v46  ;;  %5732 = vmatprep.mubr.bf16.mxu1 %v7532_v46 }
 0x5ca   :  { %v4867_v38 = vpop.f32.mrb[44].mxu0  ;;  %v5518_v18 = vpop.f32.mrb[44].mxu1 }
 0x5cb   :  { %6099 = vst [vmem:[%s14205_s4 + $0x4f0] sm:$0xff] %v4867_v38  ;;  %6101 = vst.msk [vmem:[%s14205_s4 + $0x500] sm:$0xff] %vm261_vm0, %v5518_v18  ;;  %v4869_v4 = vpop.f32.mrb[45].mxu0  ;;  %v5520_v50 = vpop.f32.mrb[45].mxu1 }
 0x5cc   :  { %6100 = vst [vmem:[%s14205_s4 + $0x4f8] sm:$0xff] %v4869_v4  ;;  %v4871_v2 = vpop.f32.mrb[46].mxu0  ;;  %v5521_v3 = vpop.f32.mrb[46].mxu1 }
 0x5cd   :  { %6106 = vst [vmem:[%s14205_s4 + $0x528] sm:$0xff] %v4871_v2  ;;  %6108 = vst.msk [vmem:[%s14205_s4 + $0x538] sm:$0xff] %vm261_vm0, %v5521_v3  ;;  %v4873_v28 = vpop.f32.mrb[47].mxu0  ;;  %v5523_v22 = vpop.f32.mrb[47].mxu1  ;;  %v7545_v2 = vld [vmem:[#allocation2 + $0x2c0] ss:$8 sps:$4 sm:$0xff]  }
 0x5ce   :  { %6107 = vst [vmem:[%s14205_s4 + $0x530] sm:$0xff] %v4873_v28  ;;  %v7546_v3 = vld [vmem:[#allocation2 + $0x2d4] ss:$8 sps:$4 sm:$0xff]  }
 0x5cf   :  { %5136 = vmatmul.mubr.bf16.gmra.mrb[152].mxu0 %v7533_v9  ;;  %5733 = vmatmul.mubr.bf16.gmra.mrb[152].mxu1 %v7533_v9 }
 0x5d0   :  { %5145 = vmatprep.mubr.bf16.mxu0 %v7534_v29  ;;  %5740 = vmatprep.mubr.bf16.mxu1 %v7534_v29 }
 0x5d2   :  { %v4877_v21 = vpop.f32.mrb[48].mxu0  ;;  %v5526_v23 = vpop.f32.mrb[48].mxu1 }
 0x5d3   :  { %6113 = vst [vmem:[%s14205_s4 + $0x560] sm:$0xff] %v4877_v21  ;;  %6115 = vst.msk [vmem:[%s14205_s4 + $0x570] sm:$0xff] %vm261_vm0, %v5526_v23  ;;  %v4879_v49 = vpop.f32.mrb[49].mxu0  ;;  %v5528_v62 = vpop.f32.mrb[49].mxu1 }
 0x5d4   :  { %6114 = vst [vmem:[%s14205_s4 + $0x568] sm:$0xff] %v4879_v49  ;;  %v4881_v1 = vpop.f32.mrb[50].mxu0  ;;  %v5529_v11 = vpop.f32.mrb[50].mxu1 }
 0x5d5   :  { %6120 = vst [vmem:[%s14205_s4 + $0x598] sm:$0xff] %v4881_v1  ;;  %6122 = vst.msk [vmem:[%s14205_s4 + $0x5a8] sm:$0xff] %vm261_vm0, %v5529_v11  ;;  %v4883_v63 = vpop.f32.mrb[51].mxu0  ;;  %v5531_v10 = vpop.f32.mrb[51].mxu1  ;;  %v7547_v1 = vld [vmem:[#allocation2 + $0x2d0] ss:$8 sps:$4 sm:$0xff]  }
 0x5d6   :  { %6121 = vst [vmem:[%s14205_s4 + $0x5a0] sm:$0xff] %v4883_v63  ;;  %v7548_v11 = vld [vmem:[#allocation2 + $0x2e4] ss:$8 sps:$4 sm:$0xff]  }
 0x5d7   :  { %5146 = vmatmul.mubr.bf16.gmra.mrb[156].mxu0 %v7535_v55  ;;  %5741 = vmatmul.mubr.bf16.gmra.mrb[156].mxu1 %v7535_v55 }
 0x5d8   :  { %5155 = vmatprep.mubr.bf16.mxu0 %v7536_v53  ;;  %5748 = vmatprep.mubr.bf16.mxu1 %v7536_v53 }
 0x5da   :  { %v4887_v56 = vpop.f32.mrb[52].mxu0  ;;  %v5534_v32 = vpop.f32.mrb[52].mxu1 }
 0x5db   :  { %6127 = vst [vmem:[%s14205_s4 + $0x5d0] sm:$0xff] %v4887_v56  ;;  %6129 = vst.msk [vmem:[%s14205_s4 + $0x5e0] sm:$0xff] %vm261_vm0, %v5534_v32  ;;  %v4889_v59 = vpop.f32.mrb[53].mxu0  ;;  %v5536_v25 = vpop.f32.mrb[53].mxu1 }
 0x5dc   :  { %6128 = vst [vmem:[%s14205_s4 + $0x5d8] sm:$0xff] %v4889_v59  ;;  %v4891_v12 = vpop.f32.mrb[54].mxu0  ;;  %v5537_v61 = vpop.f32.mrb[54].mxu1 }
 0x5dd   :  { %6134 = vst [vmem:[%s14205_s4 + $0x608] sm:$0xff] %v4891_v12  ;;  %6136 = vst.msk [vmem:[%s14205_s4 + $0x618] sm:$0xff] %vm261_vm0, %v5537_v61  ;;  %v4893_v5 = vpop.f32.mrb[55].mxu0  ;;  %v5539_v16 = vpop.f32.mrb[55].mxu1  ;;  %v7549_v12 = vld [vmem:[#allocation2 + $0x2e0] ss:$8 sps:$4 sm:$0xff]  }
 0x5de   :  { %6135 = vst [vmem:[%s14205_s4 + $0x610] sm:$0xff] %v4893_v5  ;;  %v7550_v61 = vld [vmem:[#allocation2 + $0x2f4] ss:$8 sps:$4 sm:$0xff]  }
 0x5df   :  { %5156 = vmatmul.mubr.bf16.gmra.mrb[160].mxu0 %v7537_v48  ;;  %5749 = vmatmul.mubr.bf16.gmra.mrb[160].mxu1 %v7537_v48 }
 0x5e0   :  { %5165 = vmatprep.mubr.bf16.mxu0 %v7538_v35  ;;  %5756 = vmatprep.mubr.bf16.mxu1 %v7538_v35 }
 0x5e2   :  { %v4897_v51 = vpop.f32.mrb[56].mxu0  ;;  %v5542_v41 = vpop.f32.mrb[56].mxu1 }
 0x5e3   :  { %6141 = vst [vmem:[%s14205_s4 + $0x640] sm:$0xff] %v4897_v51  ;;  %6143 = vst.msk [vmem:[%s14205_s4 + $0x650] sm:$0xff] %vm261_vm0, %v5542_v41  ;;  %v4899_v19 = vpop.f32.mrb[57].mxu0  ;;  %v5544_v33 = vpop.f32.mrb[57].mxu1 }
 0x5e4   :  { %6142 = vst [vmem:[%s14205_s4 + $0x648] sm:$0xff] %v4899_v19  ;;  %v4901_v44 = vpop.f32.mrb[58].mxu0  ;;  %v5545_v14 = vpop.f32.mrb[58].mxu1 }
 0x5e5   :  { %6148 = vst [vmem:[%s14205_s4 + $0x678] sm:$0xff] %v4901_v44  ;;  %6150 = vst.msk [vmem:[%s14205_s4 + $0x688] sm:$0xff] %vm261_vm0, %v5545_v14  ;;  %v4903_v39 = vpop.f32.mrb[59].mxu0  ;;  %v5547_v20 = vpop.f32.mrb[59].mxu1  ;;  %v7551_v44 = vld [vmem:[#allocation2 + $0x2f0] ss:$8 sps:$4 sm:$0xff]  }
 0x5e6   :  { %6149 = vst [vmem:[%s14205_s4 + $0x680] sm:$0xff] %v4903_v39  ;;  %v7552_v14 = vld [vmem:[#allocation2 + $0x304] ss:$8 sps:$4 sm:$0xff]  }
 0x5e7   :  { %5166 = vmatmul.mubr.bf16.gmra.mrb[164].mxu0 %v7539_v47  ;;  %5757 = vmatmul.mubr.bf16.gmra.mrb[164].mxu1 %v7539_v47 }
 0x5e8   :  { %5175 = vmatprep.mubr.bf16.mxu0 %v7540_v17  ;;  %5764 = vmatprep.mubr.bf16.mxu1 %v7540_v17 }
 0x5ea   :  { %v4907_v7 = vpop.f32.mrb[60].mxu0  ;;  %v5550_v26 = vpop.f32.mrb[60].mxu1 }
 0x5eb   :  { %6155 = vst [vmem:[%s14205_s4 + $0x6b0] sm:$0xff] %v4907_v7  ;;  %6157 = vst.msk [vmem:[%s14205_s4 + $0x6c0] sm:$0xff] %vm261_vm0, %v5550_v26  ;;  %v4909_v24 = vpop.f32.mrb[61].mxu0  ;;  %v5552_v58 = vpop.f32.mrb[61].mxu1 }
 0x5ec   :  { %6156 = vst [vmem:[%s14205_s4 + $0x6b8] sm:$0xff] %v4909_v24  ;;  %v4911_v54 = vpop.f32.mrb[62].mxu0  ;;  %v5553_v40 = vpop.f32.mrb[62].mxu1 }
 0x5ed   :  { %6162 = vst [vmem:[%s14205_s4 + $0x6e8] sm:$0xff] %v4911_v54  ;;  %6164 = vst.msk [vmem:[%s14205_s4 + $0x6f8] sm:$0xff] %vm261_vm0, %v5553_v40  ;;  %v4913_v37 = vpop.f32.mrb[63].mxu0  ;;  %v5555_v8 = vpop.f32.mrb[63].mxu1  ;;  %v7553_v54 = vld [vmem:[#allocation2 + $0x300] ss:$8 sps:$4 sm:$0xff]  }
 0x5ee   :  { %6163 = vst [vmem:[%s14205_s4 + $0x6f0] sm:$0xff] %v4913_v37  ;;  %v7554_v40 = vld [vmem:[#allocation2 + $0x314] ss:$8 sps:$4 sm:$0xff]  }
 0x5ef   :  { %5176 = vmatmul.mubr.bf16.gmra.mrb[168].mxu0 %v7541_v15  ;;  %5765 = vmatmul.mubr.bf16.gmra.mrb[168].mxu1 %v7541_v15 }
 0x5f0   :  { %5185 = vmatprep.mubr.bf16.mxu0 %v7542_v45  ;;  %5772 = vmatprep.mubr.bf16.mxu1 %v7542_v45 }
 0x5f2   :  { %v4917_v6 = vpop.f32.mrb[64].mxu0  ;;  %v5558_v52 = vpop.f32.mrb[64].mxu1 }
 0x5f3   :  { %6169 = vst [vmem:[%s14205_s4 + $0x720] sm:$0xff] %v4917_v6  ;;  %6171 = vst.msk [vmem:[%s14205_s4 + $0x730] sm:$0xff] %vm261_vm0, %v5558_v52  ;;  %v4919_v43 = vpop.f32.mrb[65].mxu0  ;;  %v5560_v31 = vpop.f32.mrb[65].mxu1 }
 0x5f4   :  { %6170 = vst [vmem:[%s14205_s4 + $0x728] sm:$0xff] %v4919_v43  ;;  %v4921_v57 = vpop.f32.mrb[66].mxu0  ;;  %v5561_v27 = vpop.f32.mrb[66].mxu1 }
 0x5f5   :  { %6176 = vst [vmem:[%s14205_s4 + $0x758] sm:$0xff] %v4921_v57  ;;  %6178 = vst.msk [vmem:[%s14205_s4 + $0x768] sm:$0xff] %vm261_vm0, %v5561_v27  ;;  %v4923_v36 = vpop.f32.mrb[67].mxu0  ;;  %v5563_v34 = vpop.f32.mrb[67].mxu1  ;;  %v7555_v57 = vld [vmem:[#allocation2 + $0x310] ss:$8 sps:$4 sm:$0xff]  }
 0x5f6   :  { %6177 = vst [vmem:[%s14205_s4 + $0x760] sm:$0xff] %v4923_v36  ;;  %v7556_v27 = vld [vmem:[#allocation2 + $0x324] ss:$8 sps:$4 sm:$0xff]  }
 0x5f7   :  { %5186 = vmatmul.mubr.bf16.gmra.mrb[172].mxu0 %v7543_v60  ;;  %5773 = vmatmul.mubr.bf16.gmra.mrb[172].mxu1 %v7543_v60 }
 0x5f8   :  { %5195 = vmatprep.mubr.bf16.mxu0 %v7544_v42  ;;  %5780 = vmatprep.mubr.bf16.mxu1 %v7544_v42 }
 0x5fa   :  { %v4927_v13 = vpop.f32.mrb[68].mxu0  ;;  %v5566_v0 = vpop.f32.mrb[68].mxu1 }
 0x5fb   :  { %6183 = vst [vmem:[%s14205_s4 + $0x790] sm:$0xff] %v4927_v13  ;;  %6185 = vst.msk [vmem:[%s14205_s4 + $0x7a0] sm:$0xff] %vm261_vm0, %v5566_v0  ;;  %v4929_v30 = vpop.f32.mrb[69].mxu0  ;;  %v5568_v46 = vpop.f32.mrb[69].mxu1 }
 0x5fc   :  { %6184 = vst [vmem:[%s14205_s4 + $0x798] sm:$0xff] %v4929_v30  ;;  %v4931_v38 = vpop.f32.mrb[70].mxu0  ;;  %v5569_v18 = vpop.f32.mrb[70].mxu1 }
 0x5fd   :  { %6190 = vst [vmem:[%s14205_s4 + $0x7c8] sm:$0xff] %v4931_v38  ;;  %6192 = vst.msk [vmem:[%s14205_s4 + $0x7d8] sm:$0xff] %vm261_vm0, %v5569_v18  ;;  %v4933_v4 = vpop.f32.mrb[71].mxu0  ;;  %v5571_v50 = vpop.f32.mrb[71].mxu1  ;;  %v7557_v38 = vld [vmem:[#allocation2 + $0x320] ss:$8 sps:$4 sm:$0xff]  }
 0x5fe   :  { %6191 = vst [vmem:[%s14205_s4 + $0x7d0] sm:$0xff] %v4933_v4  ;;  %v7558_v18 = vld [vmem:[#allocation2 + $0x334] ss:$8 sps:$4 sm:$0xff]  }
 0x5ff   :  { %5196 = vmatmul.mubr.bf16.gmra.mrb[176].mxu0 %v7545_v2  ;;  %5781 = vmatmul.mubr.bf16.gmra.mrb[176].mxu1 %v7545_v2 }
 0x600   :  { %5205 = vmatprep.mubr.bf16.mxu0 %v7546_v3  ;;  %5788 = vmatprep.mubr.bf16.mxu1 %v7546_v3 }
 0x602   :  { %v4937_v28 = vpop.f32.mrb[72].mxu0  ;;  %v5574_v22 = vpop.f32.mrb[72].mxu1 }
 0x603   :  { %6197 = vst [vmem:[%s14205_s4 + $0x800] sm:$0xff] %v4937_v28  ;;  %6199 = vst.msk [vmem:[%s14205_s4 + $0x810] sm:$0xff] %vm261_vm0, %v5574_v22  ;;  %v4939_v9 = vpop.f32.mrb[73].mxu0  ;;  %v5576_v29 = vpop.f32.mrb[73].mxu1 }
 0x604   :  { %6198 = vst [vmem:[%s14205_s4 + $0x808] sm:$0xff] %v4939_v9  ;;  %v4941_v21 = vpop.f32.mrb[74].mxu0  ;;  %v5577_v23 = vpop.f32.mrb[74].mxu1 }
 0x605   :  { %6204 = vst [vmem:[%s14205_s4 + $0x838] sm:$0xff] %v4941_v21  ;;  %6206 = vst.msk [vmem:[%s14205_s4 + $0x848] sm:$0xff] %vm261_vm0, %v5577_v23  ;;  %v4943_v49 = vpop.f32.mrb[75].mxu0  ;;  %v5579_v62 = vpop.f32.mrb[75].mxu1  ;;  %v7559_v21 = vld [vmem:[#allocation2 + $0x330] ss:$8 sps:$4 sm:$0xff]  }
 0x606   :  { %6205 = vst [vmem:[%s14205_s4 + $0x840] sm:$0xff] %v4943_v49  ;;  %v7560_v23 = vld [vmem:[#allocation2 + $0x344] ss:$8 sps:$4 sm:$0xff]  }
 0x607   :  { %5206 = vmatmul.mubr.bf16.gmra.mrb[180].mxu0 %v7547_v1  ;;  %5789 = vmatmul.mubr.bf16.gmra.mrb[180].mxu1 %v7547_v1 }
 0x608   :  { %5215 = vmatprep.mubr.bf16.mxu0 %v7548_v11  ;;  %5796 = vmatprep.mubr.bf16.mxu1 %v7548_v11 }
 0x60a   :  { %v4947_v63 = vpop.f32.mrb[76].mxu0  ;;  %v5582_v10 = vpop.f32.mrb[76].mxu1 }
 0x60b   :  { %6211 = vst [vmem:[%s14205_s4 + $0x870] sm:$0xff] %v4947_v63  ;;  %6213 = vst.msk [vmem:[%s14205_s4 + $0x880] sm:$0xff] %vm261_vm0, %v5582_v10  ;;  %v4949_v55 = vpop.f32.mrb[77].mxu0  ;;  %v5584_v53 = vpop.f32.mrb[77].mxu1 }
 0x60c   :  { %6212 = vst [vmem:[%s14205_s4 + $0x878] sm:$0xff] %v4949_v55  ;;  %v4951_v56 = vpop.f32.mrb[78].mxu0  ;;  %v5585_v32 = vpop.f32.mrb[78].mxu1 }
 0x60d   :  { %6218 = vst [vmem:[%s14205_s4 + $0x8a8] sm:$0xff] %v4951_v56  ;;  %6220 = vst.msk [vmem:[%s14205_s4 + $0x8b8] sm:$0xff] %vm261_vm0, %v5585_v32  ;;  %v4953_v59 = vpop.f32.mrb[79].mxu0  ;;  %v5587_v25 = vpop.f32.mrb[79].mxu1  ;;  %v7561_v56 = vld [vmem:[#allocation2 + $0x340] ss:$8 sps:$4 sm:$0xff]  }
 0x60e   :  { %6219 = vst [vmem:[%s14205_s4 + $0x8b0] sm:$0xff] %v4953_v59  ;;  %v7562_v32 = vld [vmem:[#allocation2 + $0x354] ss:$8 sps:$4 sm:$0xff]  }
 0x60f   :  { %5216 = vmatmul.mubr.bf16.gmra.mrb[184].mxu0 %v7549_v12  ;;  %5797 = vmatmul.mubr.bf16.gmra.mrb[184].mxu1 %v7549_v12 }
 0x610   :  { %5225 = vmatprep.mubr.bf16.mxu0 %v7550_v61  ;;  %5804 = vmatprep.mubr.bf16.mxu1 %v7550_v61 }
 0x612   :  { %v4957_v5 = vpop.f32.mrb[80].mxu0  ;;  %v5590_v16 = vpop.f32.mrb[80].mxu1 }
 0x613   :  { %6225 = vst [vmem:[%s14205_s4 + $0x8e0] sm:$0xff] %v4957_v5  ;;  %6227 = vst.msk [vmem:[%s14205_s4 + $0x8f0] sm:$0xff] %vm261_vm0, %v5590_v16  ;;  %v4959_v48 = vpop.f32.mrb[81].mxu0  ;;  %v5592_v35 = vpop.f32.mrb[81].mxu1 }
 0x614   :  { %6226 = vst [vmem:[%s14205_s4 + $0x8e8] sm:$0xff] %v4959_v48  ;;  %v4961_v51 = vpop.f32.mrb[82].mxu0  ;;  %v5593_v41 = vpop.f32.mrb[82].mxu1 }
 0x615   :  { %6232 = vst [vmem:[%s14205_s4 + $0x918] sm:$0xff] %v4961_v51  ;;  %6234 = vst.msk [vmem:[%s14205_s4 + $0x928] sm:$0xff] %vm261_vm0, %v5593_v41  ;;  %v4963_v19 = vpop.f32.mrb[83].mxu0  ;;  %v5595_v33 = vpop.f32.mrb[83].mxu1  ;;  %v7563_v51 = vld [vmem:[#allocation2 + $0x350] ss:$8 sps:$4 sm:$0xff]  }
 0x616   :  { %6233 = vst [vmem:[%s14205_s4 + $0x920] sm:$0xff] %v4963_v19  ;;  %v7564_v41 = vld [vmem:[#allocation2 + $0x364] ss:$8 sps:$4 sm:$0xff]  }
 0x617   :  { %5226 = vmatmul.mubr.bf16.gmra.mrb[188].mxu0 %v7551_v44  ;;  %5805 = vmatmul.mubr.bf16.gmra.mrb[188].mxu1 %v7551_v44 }
 0x618   :  { %5235 = vmatprep.mubr.bf16.mxu0 %v7552_v14  ;;  %5812 = vmatprep.mubr.bf16.mxu1 %v7552_v14 }
 0x61a   :  { %v4967_v39 = vpop.f32.mrb[84].mxu0  ;;  %v5598_v20 = vpop.f32.mrb[84].mxu1 }
 0x61b   :  { %6239 = vst [vmem:[%s14205_s4 + $0x950] sm:$0xff] %v4967_v39  ;;  %6241 = vst.msk [vmem:[%s14205_s4 + $0x960] sm:$0xff] %vm261_vm0, %v5598_v20  ;;  %v4969_v47 = vpop.f32.mrb[85].mxu0  ;;  %v5600_v17 = vpop.f32.mrb[85].mxu1 }
 0x61c   :  { %6240 = vst [vmem:[%s14205_s4 + $0x958] sm:$0xff] %v4969_v47  ;;  %v4971_v7 = vpop.f32.mrb[86].mxu0  ;;  %v5601_v26 = vpop.f32.mrb[86].mxu1 }
 0x61d   :  { %6246 = vst [vmem:[%s14205_s4 + $0x988] sm:$0xff] %v4971_v7  ;;  %6248 = vst.msk [vmem:[%s14205_s4 + $0x998] sm:$0xff] %vm261_vm0, %v5601_v26  ;;  %v4973_v24 = vpop.f32.mrb[87].mxu0  ;;  %v5603_v58 = vpop.f32.mrb[87].mxu1  ;;  %v7565_v7 = vld [vmem:[#allocation2 + $0x360] ss:$8 sps:$4 sm:$0xff]  }
 0x61e   :  { %6247 = vst [vmem:[%s14205_s4 + $0x990] sm:$0xff] %v4973_v24  ;;  %v7566_v26 = vld [vmem:[#allocation2 + $0x374] ss:$8 sps:$4 sm:$0xff]  }
 0x61f   :  { %5236 = vmatmul.mubr.bf16.gmra.mrb[192].mxu0 %v7553_v54  ;;  %5813 = vmatmul.mubr.bf16.gmra.mrb[192].mxu1 %v7553_v54 }
 0x620   :  { %5245 = vmatprep.mubr.bf16.mxu0 %v7554_v40  ;;  %5820 = vmatprep.mubr.bf16.mxu1 %v7554_v40 }
 0x622   :  { %v4977_v37 = vpop.f32.mrb[88].mxu0  ;;  %v5606_v8 = vpop.f32.mrb[88].mxu1 }
 0x623   :  { %6253 = vst [vmem:[%s14205_s4 + $0x9c0] sm:$0xff] %v4977_v37  ;;  %6255 = vst.msk [vmem:[%s14205_s4 + $0x9d0] sm:$0xff] %vm261_vm0, %v5606_v8  ;;  %v4979_v15 = vpop.f32.mrb[89].mxu0  ;;  %v5608_v45 = vpop.f32.mrb[89].mxu1 }
 0x624   :  { %6254 = vst [vmem:[%s14205_s4 + $0x9c8] sm:$0xff] %v4979_v15  ;;  %v4981_v6 = vpop.f32.mrb[90].mxu0  ;;  %v5609_v52 = vpop.f32.mrb[90].mxu1 }
 0x625   :  { %6260 = vst [vmem:[%s14205_s4 + $0x9f8] sm:$0xff] %v4981_v6  ;;  %6262 = vst.msk [vmem:[%s14205_s4 + $0xa08] sm:$0xff] %vm261_vm0, %v5609_v52  ;;  %v4983_v43 = vpop.f32.mrb[91].mxu0  ;;  %v5611_v31 = vpop.f32.mrb[91].mxu1  ;;  %v7567_v6 = vld [vmem:[#allocation2 + $0x370] ss:$8 sps:$4 sm:$0xff]  }
 0x626   :  { %6261 = vst [vmem:[%s14205_s4 + $0xa00] sm:$0xff] %v4983_v43  ;;  %v7568_v52 = vld [vmem:[#allocation2 + $0x384] ss:$8 sps:$4 sm:$0xff]  }
 0x627   :  { %5246 = vmatmul.mubr.bf16.gmra.mrb[196].mxu0 %v7555_v57  ;;  %5821 = vmatmul.mubr.bf16.gmra.mrb[196].mxu1 %v7555_v57 }
 0x628   :  { %5255 = vmatprep.mubr.bf16.mxu0 %v7556_v27  ;;  %5828 = vmatprep.mubr.bf16.mxu1 %v7556_v27 }
 0x62a   :  { %v4987_v36 = vpop.f32.mrb[92].mxu0  ;;  %v5614_v34 = vpop.f32.mrb[92].mxu1 }
 0x62b   :  { %6267 = vst [vmem:[%s14205_s4 + $0xa30] sm:$0xff] %v4987_v36  ;;  %6269 = vst.msk [vmem:[%s14205_s4 + $0xa40] sm:$0xff] %vm261_vm0, %v5614_v34  ;;  %v4989_v60 = vpop.f32.mrb[93].mxu0  ;;  %v5616_v42 = vpop.f32.mrb[93].mxu1 }
 0x62c   :  { %6268 = vst [vmem:[%s14205_s4 + $0xa38] sm:$0xff] %v4989_v60  ;;  %v4991_v13 = vpop.f32.mrb[94].mxu0  ;;  %v5617_v0 = vpop.f32.mrb[94].mxu1 }
 0x62d   :  { %6274 = vst [vmem:[%s14205_s4 + $0xa68] sm:$0xff] %v4991_v13  ;;  %6276 = vst.msk [vmem:[%s14205_s4 + $0xa78] sm:$0xff] %vm261_vm0, %v5617_v0  ;;  %v4993_v30 = vpop.f32.mrb[95].mxu0  ;;  %v5619_v46 = vpop.f32.mrb[95].mxu1  ;;  %v7569_v13 = vld [vmem:[#allocation2 + $0x380] ss:$8 sps:$4 sm:$0xff]  }
 0x62e   :  { %6275 = vst [vmem:[%s14205_s4 + $0xa70] sm:$0xff] %v4993_v30  ;;  %v7570_v0 = vld [vmem:[#allocation2 + $0x394] ss:$8 sps:$4 sm:$0xff]  }
 0x62f   :  { %5256 = vmatmul.mubr.bf16.gmra.mrb[200].mxu0 %v7557_v38  ;;  %5829 = vmatmul.mubr.bf16.gmra.mrb[200].mxu1 %v7557_v38 }
 0x630   :  { %5265 = vmatprep.mubr.bf16.mxu0 %v7558_v18  ;;  %5836 = vmatprep.mubr.bf16.mxu1 %v7558_v18 }
 0x632   :  { %v4997_v4 = vpop.f32.mrb[96].mxu0  ;;  %v5622_v50 = vpop.f32.mrb[96].mxu1 }
 0x633   :  { %6281 = vst [vmem:[%s14205_s4 + $0xaa0] sm:$0xff] %v4997_v4  ;;  %6283 = vst.msk [vmem:[%s14205_s4 + $0xab0] sm:$0xff] %vm261_vm0, %v5622_v50  ;;  %v4999_v2 = vpop.f32.mrb[97].mxu0  ;;  %v5624_v3 = vpop.f32.mrb[97].mxu1 }
 0x634   :  { %6282 = vst [vmem:[%s14205_s4 + $0xaa8] sm:$0xff] %v4999_v2  ;;  %v5001_v28 = vpop.f32.mrb[98].mxu0  ;;  %v5625_v22 = vpop.f32.mrb[98].mxu1 }
 0x635   :  { %6288 = vst [vmem:[%s14205_s4 + $0xad8] sm:$0xff] %v5001_v28  ;;  %6290 = vst.msk [vmem:[%s14205_s4 + $0xae8] sm:$0xff] %vm261_vm0, %v5625_v22  ;;  %v5003_v9 = vpop.f32.mrb[99].mxu0  ;;  %v5627_v29 = vpop.f32.mrb[99].mxu1  ;;  %v7571_v28 = vld [vmem:[#allocation2 + $0x390] ss:$8 sps:$4 sm:$0xff]  }
 0x636   :  { %6289 = vst [vmem:[%s14205_s4 + $0xae0] sm:$0xff] %v5003_v9  ;;  %v7572_v22 = vld [vmem:[#allocation2 + $0x3a4] ss:$8 sps:$4 sm:$0xff]  }
 0x637   :  { %5266 = vmatmul.mubr.bf16.gmra.mrb[204].mxu0 %v7559_v21  ;;  %5837 = vmatmul.mubr.bf16.gmra.mrb[204].mxu1 %v7559_v21 }
 0x638   :  { %5275 = vmatprep.mubr.bf16.mxu0 %v7560_v23  ;;  %5844 = vmatprep.mubr.bf16.mxu1 %v7560_v23 }
 0x63a   :  { %v5007_v49 = vpop.f32.mrb[100].mxu0  ;;  %v5630_v62 = vpop.f32.mrb[100].mxu1 }
 0x63b   :  { %6295 = vst [vmem:[%s14205_s4 + $0xb10] sm:$0xff] %v5007_v49  ;;  %6297 = vst.msk [vmem:[%s14205_s4 + $0xb20] sm:$0xff] %vm261_vm0, %v5630_v62  ;;  %v5009_v1 = vpop.f32.mrb[101].mxu0  ;;  %v5632_v11 = vpop.f32.mrb[101].mxu1 }
 0x63c   :  { %6296 = vst [vmem:[%s14205_s4 + $0xb18] sm:$0xff] %v5009_v1  ;;  %v5011_v63 = vpop.f32.mrb[102].mxu0  ;;  %v5633_v10 = vpop.f32.mrb[102].mxu1 }
 0x63d   :  { %6302 = vst [vmem:[%s14205_s4 + $0xb48] sm:$0xff] %v5011_v63  ;;  %6304 = vst.msk [vmem:[%s14205_s4 + $0xb58] sm:$0xff] %vm261_vm0, %v5633_v10  ;;  %v5013_v55 = vpop.f32.mrb[103].mxu0  ;;  %v5635_v53 = vpop.f32.mrb[103].mxu1  ;;  %v7573_v63 = vld [vmem:[#allocation2 + $0x3a0] ss:$8 sps:$4 sm:$0xff]  }
 0x63e   :  { %6303 = vst [vmem:[%s14205_s4 + $0xb50] sm:$0xff] %v5013_v55  ;;  %v7574_v10 = vld [vmem:[#allocation2 + $0x3b4] ss:$8 sps:$4 sm:$0xff]  }
 0x63f   :  { %5276 = vmatmul.mubr.bf16.gmra.mrb[208].mxu0 %v7561_v56  ;;  %5845 = vmatmul.mubr.bf16.gmra.mrb[208].mxu1 %v7561_v56 }
 0x640   :  { %5285 = vmatprep.mubr.bf16.mxu0 %v7562_v32  ;;  %5852 = vmatprep.mubr.bf16.mxu1 %v7562_v32 }
 0x642   :  { %v5017_v59 = vpop.f32.mrb[104].mxu0  ;;  %v5638_v25 = vpop.f32.mrb[104].mxu1 }
 0x643   :  { %6309 = vst [vmem:[%s14205_s4 + $0xb80] sm:$0xff] %v5017_v59  ;;  %6311 = vst.msk [vmem:[%s14205_s4 + $0xb90] sm:$0xff] %vm261_vm0, %v5638_v25  ;;  %v5019_v12 = vpop.f32.mrb[105].mxu0  ;;  %v5640_v61 = vpop.f32.mrb[105].mxu1 }
 0x644   :  { %6310 = vst [vmem:[%s14205_s4 + $0xb88] sm:$0xff] %v5019_v12  ;;  %v5021_v5 = vpop.f32.mrb[106].mxu0  ;;  %v5641_v16 = vpop.f32.mrb[106].mxu1 }
 0x645   :  { %6316 = vst [vmem:[%s14205_s4 + $0xbb8] sm:$0xff] %v5021_v5  ;;  %6318 = vst.msk [vmem:[%s14205_s4 + $0xbc8] sm:$0xff] %vm261_vm0, %v5641_v16  ;;  %v5023_v48 = vpop.f32.mrb[107].mxu0  ;;  %v5643_v35 = vpop.f32.mrb[107].mxu1  ;;  %v7575_v5 = vld [vmem:[#allocation2 + $0x3b0] ss:$8 sps:$4 sm:$0xff]  }
 0x646   :  { %6317 = vst [vmem:[%s14205_s4 + $0xbc0] sm:$0xff] %v5023_v48  ;;  %v7576_v16 = vld [vmem:[#allocation2 + $0x3c4] ss:$8 sps:$4 sm:$0xff]  }
 0x647   :  { %5286 = vmatmul.mubr.bf16.gmra.mrb[212].mxu0 %v7563_v51  ;;  %5853 = vmatmul.mubr.bf16.gmra.mrb[212].mxu1 %v7563_v51 }
 0x648   :  { %5295 = vmatprep.mubr.bf16.mxu0 %v7564_v41  ;;  %5860 = vmatprep.mubr.bf16.mxu1 %v7564_v41 }
 0x64a   :  { %v5027_v19 = vpop.f32.mrb[108].mxu0  ;;  %v5646_v33 = vpop.f32.mrb[108].mxu1 }
 0x64b   :  { %6323 = vst [vmem:[%s14205_s4 + $0xbf0] sm:$0xff] %v5027_v19  ;;  %6325 = vst.msk [vmem:[%s14205_s4 + $0xc00] sm:$0xff] %vm261_vm0, %v5646_v33  ;;  %v5029_v44 = vpop.f32.mrb[109].mxu0  ;;  %v5648_v14 = vpop.f32.mrb[109].mxu1 }
 0x64c   :  { %6324 = vst [vmem:[%s14205_s4 + $0xbf8] sm:$0xff] %v5029_v44  ;;  %v5031_v39 = vpop.f32.mrb[110].mxu0  ;;  %v5649_v20 = vpop.f32.mrb[110].mxu1 }
 0x64d   :  { %6330 = vst [vmem:[%s14205_s4 + $0xc28] sm:$0xff] %v5031_v39  ;;  %6332 = vst.msk [vmem:[%s14205_s4 + $0xc38] sm:$0xff] %vm261_vm0, %v5649_v20  ;;  %v5033_v47 = vpop.f32.mrb[111].mxu0  ;;  %v5651_v17 = vpop.f32.mrb[111].mxu1  ;;  %v7577_v39 = vld [vmem:[#allocation2 + $0x3c0] ss:$8 sps:$4 sm:$0xff]  }
 0x64e   :  { %6331 = vst [vmem:[%s14205_s4 + $0xc30] sm:$0xff] %v5033_v47  ;;  %v7578_v20 = vld [vmem:[#allocation2 + $0x3d4] ss:$8 sps:$4 sm:$0xff]  }
 0x64f   :  { %5296 = vmatmul.mubr.bf16.gmra.mrb[216].mxu0 %v7565_v7  ;;  %5861 = vmatmul.mubr.bf16.gmra.mrb[216].mxu1 %v7565_v7 }
 0x650   :  { %5305 = vmatprep.mubr.bf16.mxu0 %v7566_v26  ;;  %5868 = vmatprep.mubr.bf16.mxu1 %v7566_v26 }
 0x652   :  { %v5037_v24 = vpop.f32.mrb[112].mxu0  ;;  %v5654_v58 = vpop.f32.mrb[112].mxu1 }
 0x653   :  { %6337 = vst [vmem:[%s14205_s4 + $0xc60] sm:$0xff] %v5037_v24  ;;  %6339 = vst.msk [vmem:[%s14205_s4 + $0xc70] sm:$0xff] %vm261_vm0, %v5654_v58  ;;  %v5039_v54 = vpop.f32.mrb[113].mxu0  ;;  %v5656_v40 = vpop.f32.mrb[113].mxu1 }
 0x654   :  { %6338 = vst [vmem:[%s14205_s4 + $0xc68] sm:$0xff] %v5039_v54  ;;  %v5041_v37 = vpop.f32.mrb[114].mxu0  ;;  %v5657_v8 = vpop.f32.mrb[114].mxu1 }
 0x655   :  { %6344 = vst [vmem:[%s14205_s4 + $0xc98] sm:$0xff] %v5041_v37  ;;  %6346 = vst.msk [vmem:[%s14205_s4 + $0xca8] sm:$0xff] %vm261_vm0, %v5657_v8  ;;  %v5043_v15 = vpop.f32.mrb[115].mxu0  ;;  %v5659_v45 = vpop.f32.mrb[115].mxu1  ;;  %v7579_v37 = vld [vmem:[#allocation2 + $0x3d0] ss:$8 sps:$4 sm:$0xff]  }
 0x656   :  { %6345 = vst [vmem:[%s14205_s4 + $0xca0] sm:$0xff] %v5043_v15  ;;  %v7580_v8 = vld [vmem:[#allocation2 + $0x3e4] ss:$8 sps:$4 sm:$0xff]  }
 0x657   :  { %5306 = vmatmul.mubr.bf16.gmra.mrb[220].mxu0 %v7567_v6  ;;  %5869 = vmatmul.mubr.bf16.gmra.mrb[220].mxu1 %v7567_v6 }
 0x658   :  { %5315 = vmatprep.mubr.bf16.mxu0 %v7568_v52  ;;  %5876 = vmatprep.mubr.bf16.mxu1 %v7568_v52 }
 0x65a   :  { %v5047_v43 = vpop.f32.mrb[116].mxu0  ;;  %v5662_v31 = vpop.f32.mrb[116].mxu1 }
 0x65b   :  { %6351 = vst [vmem:[%s14205_s4 + $0xcd0] sm:$0xff] %v5047_v43  ;;  %6353 = vst.msk [vmem:[%s14205_s4 + $0xce0] sm:$0xff] %vm261_vm0, %v5662_v31  ;;  %v5049_v57 = vpop.f32.mrb[117].mxu0  ;;  %v5664_v27 = vpop.f32.mrb[117].mxu1 }
 0x65c   :  { %6352 = vst [vmem:[%s14205_s4 + $0xcd8] sm:$0xff] %v5049_v57  ;;  %v5051_v36 = vpop.f32.mrb[118].mxu0  ;;  %v5665_v34 = vpop.f32.mrb[118].mxu1 }
 0x65d   :  { %6358 = vst [vmem:[%s14205_s4 + $0xd08] sm:$0xff] %v5051_v36  ;;  %6360 = vst.msk [vmem:[%s14205_s4 + $0xd18] sm:$0xff] %vm261_vm0, %v5665_v34  ;;  %v5053_v60 = vpop.f32.mrb[119].mxu0  ;;  %v5667_v42 = vpop.f32.mrb[119].mxu1  ;;  %v7581_v36 = vld [vmem:[#allocation2 + $0x3e0] ss:$8 sps:$4 sm:$0xff]  }
 0x65e   :  { %6359 = vst [vmem:[%s14205_s4 + $0xd10] sm:$0xff] %v5053_v60  ;;  %v7582_v34 = vld [vmem:[#allocation2 + $0x3f4] ss:$8 sps:$4 sm:$0xff]  }
 0x65f   :  { %5316 = vmatmul.mubr.bf16.gmra.mrb[224].mxu0 %v7569_v13  ;;  %5877 = vmatmul.mubr.bf16.gmra.mrb[224].mxu1 %v7569_v13 }
 0x660   :  { %5325 = vmatprep.mubr.bf16.mxu0 %v7570_v0  ;;  %5884 = vmatprep.mubr.bf16.mxu1 %v7570_v0 }
 0x662   :  { %v5057_v30 = vpop.f32.mrb[120].mxu0  ;;  %v5670_v46 = vpop.f32.mrb[120].mxu1 }
 0x663   :  { %6365 = vst [vmem:[%s14205_s4 + $0xd40] sm:$0xff] %v5057_v30  ;;  %6367 = vst.msk [vmem:[%s14205_s4 + $0xd50] sm:$0xff] %vm261_vm0, %v5670_v46  ;;  %v5059_v38 = vpop.f32.mrb[121].mxu0  ;;  %v5672_v18 = vpop.f32.mrb[121].mxu1 }
 0x664   :  { %6366 = vst [vmem:[%s14205_s4 + $0xd48] sm:$0xff] %v5059_v38  ;;  %v5061_v4 = vpop.f32.mrb[122].mxu0  ;;  %v5673_v50 = vpop.f32.mrb[122].mxu1 }
 0x665   :  { %6372 = vst [vmem:[%s14205_s4 + $0xd78] sm:$0xff] %v5061_v4  ;;  %6374 = vst.msk [vmem:[%s14205_s4 + $0xd88] sm:$0xff] %vm261_vm0, %v5673_v50  ;;  %v5063_v2 = vpop.f32.mrb[123].mxu0  ;;  %v5675_v3 = vpop.f32.mrb[123].mxu1  ;;  %v7583_v4 = vld [vmem:[#allocation2 + $0x3f0] ss:$8 sps:$4 sm:$0xff]  }
 0x666   :  { %6373 = vst [vmem:[%s14205_s4 + $0xd80] sm:$0xff] %v5063_v2 }
 0x667   :  { %5326 = vmatmul.mubr.bf16.gmra.mrb[228].mxu0 %v7571_v28  ;;  %5885 = vmatmul.mubr.bf16.gmra.mrb[228].mxu1 %v7571_v28 }
 0x668   :  { %5335 = vmatprep.mubr.bf16.mxu0 %v7572_v22  ;;  %5892 = vmatprep.mubr.bf16.mxu1 %v7572_v22 }
 0x66a   :  { %v5067_v9 = vpop.f32.mrb[124].mxu0  ;;  %v5678_v29 = vpop.f32.mrb[124].mxu1 }
 0x66b   :  { %6379 = vst [vmem:[%s14205_s4 + $0xdb0] sm:$0xff] %v5067_v9  ;;  %6381 = vst.msk [vmem:[%s14205_s4 + $0xdc0] sm:$0xff] %vm261_vm0, %v5678_v29  ;;  %v5069_v21 = vpop.f32.mrb[125].mxu0  ;;  %v5680_v23 = vpop.f32.mrb[125].mxu1 }
 0x66c   :  { %6380 = vst [vmem:[%s14205_s4 + $0xdb8] sm:$0xff] %v5069_v21  ;;  %v5071_v49 = vpop.f32.mrb[126].mxu0  ;;  %v5681_v62 = vpop.f32.mrb[126].mxu1 }
 0x66d   :  { %6386 = vst [vmem:[%s14205_s4 + $0xde8] sm:$0xff] %v5071_v49  ;;  %6388 = vst.msk [vmem:[%s14205_s4 + $0xdf8] sm:$0xff] %vm261_vm0, %v5681_v62  ;;  %v5073_v1 = vpop.f32.mrb[127].mxu0  ;;  %v5683_v11 = vpop.f32.mrb[127].mxu1 }
 0x66e   :  { %6387 = vst [vmem:[%s14205_s4 + $0xdf0] sm:$0xff] %v5073_v1 }
 0x66f   :  { %5336 = vmatmul.mubr.bf16.gmra.mrb[232].mxu0 %v7573_v63  ;;  %5893 = vmatmul.mubr.bf16.gmra.mrb[232].mxu1 %v7573_v63 }
 0x670   :  { %5345 = vmatprep.mubr.bf16.mxu0 %v7574_v10  ;;  %5900 = vmatprep.mubr.bf16.mxu1 %v7574_v10 }
 0x672   :  { %v5077_v55 = vpop.f32.mrb[128].mxu0  ;;  %v5686_v53 = vpop.f32.mrb[128].mxu1 }
 0x673   :  { %6393 = vst [vmem:[%s14205_s4 + $0xe20] sm:$0xff] %v5077_v55  ;;  %6395 = vst.msk [vmem:[%s14205_s4 + $0xe30] sm:$0xff] %vm261_vm0, %v5686_v53  ;;  %v5079_v56 = vpop.f32.mrb[129].mxu0  ;;  %v5688_v32 = vpop.f32.mrb[129].mxu1 }
 0x674   :  { %6394 = vst [vmem:[%s14205_s4 + $0xe28] sm:$0xff] %v5079_v56  ;;  %v5081_v59 = vpop.f32.mrb[130].mxu0  ;;  %v5689_v25 = vpop.f32.mrb[130].mxu1 }
 0x675   :  { %6400 = vst [vmem:[%s14205_s4 + $0xe58] sm:$0xff] %v5081_v59  ;;  %6402 = vst.msk [vmem:[%s14205_s4 + $0xe68] sm:$0xff] %vm261_vm0, %v5689_v25  ;;  %v5083_v12 = vpop.f32.mrb[131].mxu0  ;;  %v5691_v61 = vpop.f32.mrb[131].mxu1 }
 0x676   :  { %6401 = vst [vmem:[%s14205_s4 + $0xe60] sm:$0xff] %v5083_v12 }
 0x677   :  { %5346 = vmatmul.mubr.bf16.gmra.mrb[236].mxu0 %v7575_v5  ;;  %5901 = vmatmul.mubr.bf16.gmra.mrb[236].mxu1 %v7575_v5 }
 0x678   :  { %5355 = vmatprep.mubr.bf16.mxu0 %v7576_v16  ;;  %5908 = vmatprep.mubr.bf16.mxu1 %v7576_v16 }
 0x67a   :  { %v5087_v48 = vpop.f32.mrb[132].mxu0  ;;  %v5694_v35 = vpop.f32.mrb[132].mxu1 }
 0x67b   :  { %6407 = vst [vmem:[%s14205_s4 + $0xe90] sm:$0xff] %v5087_v48  ;;  %6409 = vst.msk [vmem:[%s14205_s4 + $0xea0] sm:$0xff] %vm261_vm0, %v5694_v35  ;;  %v5089_v51 = vpop.f32.mrb[133].mxu0  ;;  %v5696_v41 = vpop.f32.mrb[133].mxu1 }
 0x67c   :  { %6408 = vst [vmem:[%s14205_s4 + $0xe98] sm:$0xff] %v5089_v51  ;;  %v5091_v19 = vpop.f32.mrb[134].mxu0  ;;  %v5697_v33 = vpop.f32.mrb[134].mxu1 }
 0x67d   :  { %6414 = vst [vmem:[%s14205_s4 + $0xec8] sm:$0xff] %v5091_v19  ;;  %6416 = vst.msk [vmem:[%s14205_s4 + $0xed8] sm:$0xff] %vm261_vm0, %v5697_v33  ;;  %v5093_v44 = vpop.f32.mrb[135].mxu0  ;;  %v5699_v14 = vpop.f32.mrb[135].mxu1 }
 0x67e   :  { %6415 = vst [vmem:[%s14205_s4 + $0xed0] sm:$0xff] %v5093_v44 }
 0x67f   :  { %5356 = vmatmul.mubr.bf16.gmra.mrb[240].mxu0 %v7577_v39  ;;  %5909 = vmatmul.mubr.bf16.gmra.mrb[240].mxu1 %v7577_v39 }
 0x680   :  { %5365 = vmatprep.mubr.bf16.mxu0 %v7578_v20  ;;  %5916 = vmatprep.mubr.bf16.mxu1 %v7578_v20 }
 0x682   :  { %v5097_v47 = vpop.f32.mrb[136].mxu0  ;;  %v5702_v17 = vpop.f32.mrb[136].mxu1 }
 0x683   :  { %6421 = vst [vmem:[%s14205_s4 + $0xf00] sm:$0xff] %v5097_v47  ;;  %6423 = vst.msk [vmem:[%s14205_s4 + $0xf10] sm:$0xff] %vm261_vm0, %v5702_v17  ;;  %v5099_v7 = vpop.f32.mrb[137].mxu0  ;;  %v5704_v26 = vpop.f32.mrb[137].mxu1 }
 0x684   :  { %6422 = vst [vmem:[%s14205_s4 + $0xf08] sm:$0xff] %v5099_v7  ;;  %v5101_v24 = vpop.f32.mrb[138].mxu0  ;;  %v5705_v58 = vpop.f32.mrb[138].mxu1 }
 0x685   :  { %6428 = vst [vmem:[%s14205_s4 + $0xf38] sm:$0xff] %v5101_v24  ;;  %6430 = vst.msk [vmem:[%s14205_s4 + $0xf48] sm:$0xff] %vm261_vm0, %v5705_v58  ;;  %v5103_v54 = vpop.f32.mrb[139].mxu0  ;;  %v5707_v40 = vpop.f32.mrb[139].mxu1 }
 0x686   :  { %6429 = vst [vmem:[%s14205_s4 + $0xf40] sm:$0xff] %v5103_v54 }
 0x687   :  { %5366 = vmatmul.mubr.bf16.gmra.mrb[244].mxu0 %v7579_v37  ;;  %5917 = vmatmul.mubr.bf16.gmra.mrb[244].mxu1 %v7579_v37 }
 0x688   :  { %5375 = vmatprep.mubr.bf16.mxu0 %v7580_v8  ;;  %5924 = vmatprep.mubr.bf16.mxu1 %v7580_v8 }
 0x68a   :  { %v5107_v15 = vpop.f32.mrb[140].mxu0  ;;  %v5710_v45 = vpop.f32.mrb[140].mxu1 }
 0x68b   :  { %6435 = vst [vmem:[%s14205_s4 + $0xf70] sm:$0xff] %v5107_v15  ;;  %6437 = vst.msk [vmem:[%s14205_s4 + $0xf80] sm:$0xff] %vm261_vm0, %v5710_v45  ;;  %v5109_v6 = vpop.f32.mrb[141].mxu0  ;;  %v5712_v52 = vpop.f32.mrb[141].mxu1 }
 0x68c   :  { %6436 = vst [vmem:[%s14205_s4 + $0xf78] sm:$0xff] %v5109_v6  ;;  %v5111_v43 = vpop.f32.mrb[142].mxu0  ;;  %v5713_v31 = vpop.f32.mrb[142].mxu1 }
 0x68d   :  { %6442 = vst [vmem:[%s14205_s4 + $0xfa8] sm:$0xff] %v5111_v43  ;;  %6444 = vst.msk [vmem:[%s14205_s4 + $0xfb8] sm:$0xff] %vm261_vm0, %v5713_v31  ;;  %v5113_v57 = vpop.f32.mrb[143].mxu0  ;;  %v5715_v27 = vpop.f32.mrb[143].mxu1 }
 0x68e   :  { %6443 = vst [vmem:[%s14205_s4 + $0xfb0] sm:$0xff] %v5113_v57 }
 0x68f   :  { %5376 = vmatmul.mubr.bf16.gmra.mrb[248].mxu0 %v7581_v36  ;;  %5925 = vmatmul.mubr.bf16.gmra.mrb[248].mxu1 %v7581_v36 }
 0x690   :  { %5385 = vmatprep.mubr.bf16.mxu0 %v7582_v34  ;;  %5932 = vmatprep.mubr.bf16.mxu1 %v7582_v34 }
 0x692   :  { %v5117_v60 = vpop.f32.mrb[144].mxu0  ;;  %v5718_v42 = vpop.f32.mrb[144].mxu1 }
 0x693   :  { %6449 = vst [vmem:[%s14205_s4 + $0xfe0] sm:$0xff] %v5117_v60  ;;  %6451 = vst.msk [vmem:[%s14205_s4 + $0xff0] sm:$0xff] %vm261_vm0, %v5718_v42  ;;  %v5119_v13 = vpop.f32.mrb[145].mxu0  ;;  %v5720_v0 = vpop.f32.mrb[145].mxu1 }
 0x694   :  { %6450 = vst [vmem:[%s14205_s4 + $0xfe8] sm:$0xff] %v5119_v13  ;;  %v5121_v30 = vpop.f32.mrb[146].mxu0  ;;  %v5721_v46 = vpop.f32.mrb[146].mxu1 }
 0x695   :  { %6456 = vst [vmem:[%s14205_s4 + $0x1018] sm:$0xff] %v5121_v30  ;;  %6458 = vst.msk [vmem:[%s14205_s4 + $0x1028] sm:$0xff] %vm261_vm0, %v5721_v46  ;;  %v5123_v38 = vpop.f32.mrb[147].mxu0  ;;  %v5723_v18 = vpop.f32.mrb[147].mxu1 }
 0x696   :  { %6457 = vst [vmem:[%s14205_s4 + $0x1020] sm:$0xff] %v5123_v38 }
 0x697   :  { %5386 = vmatmul.mubr.bf16.gmra.mrb[252].mxu0 %v7583_v4  ;;  %5933 = vmatmul.mubr.bf16.gmra.mrb[252].mxu1 %v7583_v4 }
 0x69a   :  { %v5127_v50 = vpop.f32.mrb[148].mxu0  ;;  %v5726_v2 = vpop.f32.mrb[148].mxu1 }
 0x69b   :  { %6463 = vst [vmem:[%s14205_s4 + $0x1050] sm:$0xff] %v5127_v50  ;;  %6465 = vst.msk [vmem:[%s14205_s4 + $0x1060] sm:$0xff] %vm261_vm0, %v5726_v2  ;;  %v5129_v3 = vpop.f32.mrb[149].mxu0  ;;  %v5728_v28 = vpop.f32.mrb[149].mxu1 }
 0x69c   :  { %6464 = vst [vmem:[%s14205_s4 + $0x1058] sm:$0xff] %v5129_v3  ;;  %v5131_v22 = vpop.f32.mrb[150].mxu0  ;;  %v5729_v9 = vpop.f32.mrb[150].mxu1 }
 0x69d   :  { %6470 = vst [vmem:[%s14205_s4 + $0x1088] sm:$0xff] %v5131_v22  ;;  %6472 = vst.msk [vmem:[%s14205_s4 + $0x1098] sm:$0xff] %vm261_vm0, %v5729_v9  ;;  %v5133_v29 = vpop.f32.mrb[151].mxu0  ;;  %v5731_v21 = vpop.f32.mrb[151].mxu1 }
 0x69e   :  { %6471 = vst [vmem:[%s14205_s4 + $0x1090] sm:$0xff] %v5133_v29 }
 0x6a2   :  { %v5137_v23 = vpop.f32.mrb[152].mxu0  ;;  %v5734_v49 = vpop.f32.mrb[152].mxu1 }
 0x6a3   :  { %6477 = vst [vmem:[%s14205_s4 + $0x10c0] sm:$0xff] %v5137_v23  ;;  %6479 = vst.msk [vmem:[%s14205_s4 + $0x10d0] sm:$0xff] %vm261_vm0, %v5734_v49  ;;  %v5139_v62 = vpop.f32.mrb[153].mxu0  ;;  %v5736_v1 = vpop.f32.mrb[153].mxu1 }
 0x6a4   :  { %6478 = vst [vmem:[%s14205_s4 + $0x10c8] sm:$0xff] %v5139_v62  ;;  %v5141_v11 = vpop.f32.mrb[154].mxu0  ;;  %v5737_v63 = vpop.f32.mrb[154].mxu1 }
 0x6a5   :  { %6484 = vst [vmem:[%s14205_s4 + $0x10f8] sm:$0xff] %v5141_v11  ;;  %6486 = vst.msk [vmem:[%s14205_s4 + $0x1108] sm:$0xff] %vm261_vm0, %v5737_v63  ;;  %v5143_v10 = vpop.f32.mrb[155].mxu0  ;;  %v5739_v55 = vpop.f32.mrb[155].mxu1 }
 0x6a6   :  { %6485 = vst [vmem:[%s14205_s4 + $0x1100] sm:$0xff] %v5143_v10 }
 0x6aa   :  { %v5147_v53 = vpop.f32.mrb[156].mxu0  ;;  %v5742_v56 = vpop.f32.mrb[156].mxu1 }
 0x6ab   :  { %6491 = vst [vmem:[%s14205_s4 + $0x1130] sm:$0xff] %v5147_v53  ;;  %6493 = vst.msk [vmem:[%s14205_s4 + $0x1140] sm:$0xff] %vm261_vm0, %v5742_v56  ;;  %v5149_v32 = vpop.f32.mrb[157].mxu0  ;;  %v5744_v59 = vpop.f32.mrb[157].mxu1 }
 0x6ac   :  { %6492 = vst [vmem:[%s14205_s4 + $0x1138] sm:$0xff] %v5149_v32  ;;  %v5151_v25 = vpop.f32.mrb[158].mxu0  ;;  %v5745_v12 = vpop.f32.mrb[158].mxu1 }
 0x6ad   :  { %6498 = vst [vmem:[%s14205_s4 + $0x1168] sm:$0xff] %v5151_v25  ;;  %6500 = vst.msk [vmem:[%s14205_s4 + $0x1178] sm:$0xff] %vm261_vm0, %v5745_v12  ;;  %v5153_v61 = vpop.f32.mrb[159].mxu0  ;;  %v5747_v5 = vpop.f32.mrb[159].mxu1 }
 0x6ae   :  { %6499 = vst [vmem:[%s14205_s4 + $0x1170] sm:$0xff] %v5153_v61 }
 0x6b2   :  { %v5157_v16 = vpop.f32.mrb[160].mxu0  ;;  %v5750_v48 = vpop.f32.mrb[160].mxu1 }
 0x6b3   :  { %6505 = vst [vmem:[%s14205_s4 + $0x11a0] sm:$0xff] %v5157_v16  ;;  %6507 = vst.msk [vmem:[%s14205_s4 + $0x11b0] sm:$0xff] %vm261_vm0, %v5750_v48  ;;  %v5159_v35 = vpop.f32.mrb[161].mxu0  ;;  %v5752_v51 = vpop.f32.mrb[161].mxu1 }
 0x6b4   :  { %6506 = vst [vmem:[%s14205_s4 + $0x11a8] sm:$0xff] %v5159_v35  ;;  %v5161_v41 = vpop.f32.mrb[162].mxu0  ;;  %v5753_v19 = vpop.f32.mrb[162].mxu1 }
 0x6b5   :  { %6512 = vst [vmem:[%s14205_s4 + $0x11d8] sm:$0xff] %v5161_v41  ;;  %6514 = vst.msk [vmem:[%s14205_s4 + $0x11e8] sm:$0xff] %vm261_vm0, %v5753_v19  ;;  %v5163_v33 = vpop.f32.mrb[163].mxu0  ;;  %v5755_v44 = vpop.f32.mrb[163].mxu1 }
 0x6b6   :  { %6513 = vst [vmem:[%s14205_s4 + $0x11e0] sm:$0xff] %v5163_v33 }
 0x6ba   :  { %v5167_v14 = vpop.f32.mrb[164].mxu0  ;;  %v5758_v39 = vpop.f32.mrb[164].mxu1 }
 0x6bb   :  { %6519 = vst [vmem:[%s14205_s4 + $0x1210] sm:$0xff] %v5167_v14  ;;  %6521 = vst.msk [vmem:[%s14205_s4 + $0x1220] sm:$0xff] %vm261_vm0, %v5758_v39  ;;  %v5169_v20 = vpop.f32.mrb[165].mxu0  ;;  %v5760_v47 = vpop.f32.mrb[165].mxu1 }
 0x6bc   :  { %6520 = vst [vmem:[%s14205_s4 + $0x1218] sm:$0xff] %v5169_v20  ;;  %v5171_v17 = vpop.f32.mrb[166].mxu0  ;;  %v5761_v7 = vpop.f32.mrb[166].mxu1 }
 0x6bd   :  { %6526 = vst [vmem:[%s14205_s4 + $0x1248] sm:$0xff] %v5171_v17  ;;  %6528 = vst.msk [vmem:[%s14205_s4 + $0x1258] sm:$0xff] %vm261_vm0, %v5761_v7  ;;  %v5173_v26 = vpop.f32.mrb[167].mxu0  ;;  %v5763_v24 = vpop.f32.mrb[167].mxu1 }
 0x6be   :  { %6527 = vst [vmem:[%s14205_s4 + $0x1250] sm:$0xff] %v5173_v26 }
 0x6c2   :  { %v5177_v58 = vpop.f32.mrb[168].mxu0  ;;  %v5766_v54 = vpop.f32.mrb[168].mxu1 }
 0x6c3   :  { %6533 = vst [vmem:[%s14205_s4 + $0x1280] sm:$0xff] %v5177_v58  ;;  %6535 = vst.msk [vmem:[%s14205_s4 + $0x1290] sm:$0xff] %vm261_vm0, %v5766_v54  ;;  %v5179_v40 = vpop.f32.mrb[169].mxu0  ;;  %v5768_v37 = vpop.f32.mrb[169].mxu1 }
 0x6c4   :  { %6534 = vst [vmem:[%s14205_s4 + $0x1288] sm:$0xff] %v5179_v40  ;;  %v5181_v8 = vpop.f32.mrb[170].mxu0  ;;  %v5769_v15 = vpop.f32.mrb[170].mxu1 }
 0x6c5   :  { %6540 = vst [vmem:[%s14205_s4 + $0x12b8] sm:$0xff] %v5181_v8  ;;  %6542 = vst.msk [vmem:[%s14205_s4 + $0x12c8] sm:$0xff] %vm261_vm0, %v5769_v15  ;;  %v5183_v45 = vpop.f32.mrb[171].mxu0  ;;  %v5771_v6 = vpop.f32.mrb[171].mxu1 }
 0x6c6   :  { %6541 = vst [vmem:[%s14205_s4 + $0x12c0] sm:$0xff] %v5183_v45 }
 0x6ca   :  { %v5187_v52 = vpop.f32.mrb[172].mxu0  ;;  %v5774_v43 = vpop.f32.mrb[172].mxu1 }
 0x6cb   :  { %6547 = vst [vmem:[%s14205_s4 + $0x12f0] sm:$0xff] %v5187_v52  ;;  %6549 = vst.msk [vmem:[%s14205_s4 + $0x1300] sm:$0xff] %vm261_vm0, %v5774_v43  ;;  %v5189_v31 = vpop.f32.mrb[173].mxu0  ;;  %v5776_v57 = vpop.f32.mrb[173].mxu1 }
 0x6cc   :  { %6548 = vst [vmem:[%s14205_s4 + $0x12f8] sm:$0xff] %v5189_v31  ;;  %v5191_v27 = vpop.f32.mrb[174].mxu0  ;;  %v5777_v36 = vpop.f32.mrb[174].mxu1 }
 0x6cd   :  { %6554 = vst [vmem:[%s14205_s4 + $0x1328] sm:$0xff] %v5191_v27  ;;  %6556 = vst.msk [vmem:[%s14205_s4 + $0x1338] sm:$0xff] %vm261_vm0, %v5777_v36  ;;  %v5193_v34 = vpop.f32.mrb[175].mxu0  ;;  %v5779_v60 = vpop.f32.mrb[175].mxu1 }
 0x6ce   :  { %6555 = vst [vmem:[%s14205_s4 + $0x1330] sm:$0xff] %v5193_v34 }
 0x6d2   :  { %v5197_v42 = vpop.f32.mrb[176].mxu0  ;;  %v5782_v13 = vpop.f32.mrb[176].mxu1 }
 0x6d3   :  { %6561 = vst [vmem:[%s14205_s4 + $0x1360] sm:$0xff] %v5197_v42  ;;  %6563 = vst.msk [vmem:[%s14205_s4 + $0x1370] sm:$0xff] %vm261_vm0, %v5782_v13  ;;  %v5199_v0 = vpop.f32.mrb[177].mxu0  ;;  %v5784_v30 = vpop.f32.mrb[177].mxu1 }
 0x6d4   :  { %6562 = vst [vmem:[%s14205_s4 + $0x1368] sm:$0xff] %v5199_v0  ;;  %v5201_v46 = vpop.f32.mrb[178].mxu0  ;;  %v5785_v38 = vpop.f32.mrb[178].mxu1 }
 0x6d5   :  { %6568 = vst [vmem:[%s14205_s4 + $0x1398] sm:$0xff] %v5201_v46  ;;  %6570 = vst.msk [vmem:[%s14205_s4 + $0x13a8] sm:$0xff] %vm261_vm0, %v5785_v38  ;;  %v5203_v18 = vpop.f32.mrb[179].mxu0  ;;  %v5787_v4 = vpop.f32.mrb[179].mxu1 }
 0x6d6   :  { %6569 = vst [vmem:[%s14205_s4 + $0x13a0] sm:$0xff] %v5203_v18 }
 0x6da   :  { %v5207_v50 = vpop.f32.mrb[180].mxu0  ;;  %v5790_v2 = vpop.f32.mrb[180].mxu1 }
 0x6db   :  { %6575 = vst [vmem:[%s14205_s4 + $0x13d0] sm:$0xff] %v5207_v50  ;;  %6577 = vst.msk [vmem:[%s14205_s4 + $0x13e0] sm:$0xff] %vm261_vm0, %v5790_v2  ;;  %v5209_v3 = vpop.f32.mrb[181].mxu0  ;;  %v5792_v28 = vpop.f32.mrb[181].mxu1 }
 0x6dc   :  { %6576 = vst [vmem:[%s14205_s4 + $0x13d8] sm:$0xff] %v5209_v3  ;;  %v5211_v22 = vpop.f32.mrb[182].mxu0  ;;  %v5793_v9 = vpop.f32.mrb[182].mxu1 }
 0x6dd   :  { %6582 = vst [vmem:[%s14205_s4 + $0x1408] sm:$0xff] %v5211_v22  ;;  %6584 = vst.msk [vmem:[%s14205_s4 + $0x1418] sm:$0xff] %vm261_vm0, %v5793_v9  ;;  %v5213_v29 = vpop.f32.mrb[183].mxu0  ;;  %v5795_v21 = vpop.f32.mrb[183].mxu1 }
 0x6de   :  { %6583 = vst [vmem:[%s14205_s4 + $0x1410] sm:$0xff] %v5213_v29 }
 0x6e2   :  { %v5217_v23 = vpop.f32.mrb[184].mxu0  ;;  %v5798_v49 = vpop.f32.mrb[184].mxu1 }
 0x6e3   :  { %6589 = vst [vmem:[%s14205_s4 + $0x1440] sm:$0xff] %v5217_v23  ;;  %6591 = vst.msk [vmem:[%s14205_s4 + $0x1450] sm:$0xff] %vm261_vm0, %v5798_v49  ;;  %v5219_v62 = vpop.f32.mrb[185].mxu0  ;;  %v5800_v1 = vpop.f32.mrb[185].mxu1 }
 0x6e4   :  { %6590 = vst [vmem:[%s14205_s4 + $0x1448] sm:$0xff] %v5219_v62  ;;  %v5221_v11 = vpop.f32.mrb[186].mxu0  ;;  %v5801_v63 = vpop.f32.mrb[186].mxu1 }
 0x6e5   :  { %6596 = vst [vmem:[%s14205_s4 + $0x1478] sm:$0xff] %v5221_v11  ;;  %6598 = vst.msk [vmem:[%s14205_s4 + $0x1488] sm:$0xff] %vm261_vm0, %v5801_v63  ;;  %v5223_v10 = vpop.f32.mrb[187].mxu0  ;;  %v5803_v55 = vpop.f32.mrb[187].mxu1 }
 0x6e6   :  { %6597 = vst [vmem:[%s14205_s4 + $0x1480] sm:$0xff] %v5223_v10 }
 0x6ea   :  { %v5227_v53 = vpop.f32.mrb[188].mxu0  ;;  %v5806_v56 = vpop.f32.mrb[188].mxu1 }
 0x6eb   :  { %6603 = vst [vmem:[%s14205_s4 + $0x14b0] sm:$0xff] %v5227_v53  ;;  %6605 = vst.msk [vmem:[%s14205_s4 + $0x14c0] sm:$0xff] %vm261_vm0, %v5806_v56  ;;  %v5229_v32 = vpop.f32.mrb[189].mxu0  ;;  %v5808_v59 = vpop.f32.mrb[189].mxu1 }
 0x6ec   :  { %6604 = vst [vmem:[%s14205_s4 + $0x14b8] sm:$0xff] %v5229_v32  ;;  %v5231_v25 = vpop.f32.mrb[190].mxu0  ;;  %v5809_v12 = vpop.f32.mrb[190].mxu1 }
 0x6ed   :  { %6610 = vst [vmem:[%s14205_s4 + $0x14e8] sm:$0xff] %v5231_v25  ;;  %6612 = vst.msk [vmem:[%s14205_s4 + $0x14f8] sm:$0xff] %vm261_vm0, %v5809_v12  ;;  %v5233_v61 = vpop.f32.mrb[191].mxu0  ;;  %v5811_v5 = vpop.f32.mrb[191].mxu1 }
 0x6ee   :  { %6611 = vst [vmem:[%s14205_s4 + $0x14f0] sm:$0xff] %v5233_v61 }
 0x6f2   :  { %v5237_v16 = vpop.f32.mrb[192].mxu0  ;;  %v5814_v48 = vpop.f32.mrb[192].mxu1 }
 0x6f3   :  { %6617 = vst [vmem:[%s14205_s4 + $0x1520] sm:$0xff] %v5237_v16  ;;  %6619 = vst.msk [vmem:[%s14205_s4 + $0x1530] sm:$0xff] %vm261_vm0, %v5814_v48  ;;  %v5239_v35 = vpop.f32.mrb[193].mxu0  ;;  %v5816_v51 = vpop.f32.mrb[193].mxu1 }
 0x6f4   :  { %6618 = vst [vmem:[%s14205_s4 + $0x1528] sm:$0xff] %v5239_v35  ;;  %v5241_v41 = vpop.f32.mrb[194].mxu0  ;;  %v5817_v19 = vpop.f32.mrb[194].mxu1 }
 0x6f5   :  { %6624 = vst [vmem:[%s14205_s4 + $0x1558] sm:$0xff] %v5241_v41  ;;  %6626 = vst.msk [vmem:[%s14205_s4 + $0x1568] sm:$0xff] %vm261_vm0, %v5817_v19  ;;  %v5243_v33 = vpop.f32.mrb[195].mxu0  ;;  %v5819_v44 = vpop.f32.mrb[195].mxu1 }
 0x6f6   :  { %6625 = vst [vmem:[%s14205_s4 + $0x1560] sm:$0xff] %v5243_v33 }
 0x6fa   :  { %v5247_v14 = vpop.f32.mrb[196].mxu0  ;;  %v5822_v39 = vpop.f32.mrb[196].mxu1 }
 0x6fb   :  { %6631 = vst [vmem:[%s14205_s4 + $0x1590] sm:$0xff] %v5247_v14  ;;  %6633 = vst.msk [vmem:[%s14205_s4 + $0x15a0] sm:$0xff] %vm261_vm0, %v5822_v39  ;;  %v5249_v20 = vpop.f32.mrb[197].mxu0  ;;  %v5824_v47 = vpop.f32.mrb[197].mxu1 }
 0x6fc   :  { %6632 = vst [vmem:[%s14205_s4 + $0x1598] sm:$0xff] %v5249_v20  ;;  %v5251_v17 = vpop.f32.mrb[198].mxu0  ;;  %v5825_v7 = vpop.f32.mrb[198].mxu1 }
 0x6fd   :  { %6638 = vst [vmem:[%s14205_s4 + $0x15c8] sm:$0xff] %v5251_v17  ;;  %6640 = vst.msk [vmem:[%s14205_s4 + $0x15d8] sm:$0xff] %vm261_vm0, %v5825_v7  ;;  %v5253_v26 = vpop.f32.mrb[199].mxu0  ;;  %v5827_v24 = vpop.f32.mrb[199].mxu1 }
 0x6fe   :  { %6639 = vst [vmem:[%s14205_s4 + $0x15d0] sm:$0xff] %v5253_v26 }
 0x702   :  { %v5257_v58 = vpop.f32.mrb[200].mxu0  ;;  %v5830_v54 = vpop.f32.mrb[200].mxu1 }
 0x703   :  { %6645 = vst [vmem:[%s14205_s4 + $0x1600] sm:$0xff] %v5257_v58  ;;  %6647 = vst.msk [vmem:[%s14205_s4 + $0x1610] sm:$0xff] %vm261_vm0, %v5830_v54  ;;  %v5259_v40 = vpop.f32.mrb[201].mxu0  ;;  %v5832_v37 = vpop.f32.mrb[201].mxu1 }
 0x704   :  { %6646 = vst [vmem:[%s14205_s4 + $0x1608] sm:$0xff] %v5259_v40  ;;  %v5261_v8 = vpop.f32.mrb[202].mxu0  ;;  %v5833_v15 = vpop.f32.mrb[202].mxu1 }
 0x705   :  { %6652 = vst [vmem:[%s14205_s4 + $0x1638] sm:$0xff] %v5261_v8  ;;  %6654 = vst.msk [vmem:[%s14205_s4 + $0x1648] sm:$0xff] %vm261_vm0, %v5833_v15  ;;  %v5263_v45 = vpop.f32.mrb[203].mxu0  ;;  %v5835_v6 = vpop.f32.mrb[203].mxu1 }
 0x706   :  { %6653 = vst [vmem:[%s14205_s4 + $0x1640] sm:$0xff] %v5263_v45 }
 0x70a   :  { %v5267_v52 = vpop.f32.mrb[204].mxu0  ;;  %v5838_v43 = vpop.f32.mrb[204].mxu1 }
 0x70b   :  { %6659 = vst [vmem:[%s14205_s4 + $0x1670] sm:$0xff] %v5267_v52  ;;  %6661 = vst.msk [vmem:[%s14205_s4 + $0x1680] sm:$0xff] %vm261_vm0, %v5838_v43  ;;  %v5269_v31 = vpop.f32.mrb[205].mxu0  ;;  %v5840_v57 = vpop.f32.mrb[205].mxu1 }
 0x70c   :  { %6660 = vst [vmem:[%s14205_s4 + $0x1678] sm:$0xff] %v5269_v31  ;;  %v5271_v27 = vpop.f32.mrb[206].mxu0  ;;  %v5841_v36 = vpop.f32.mrb[206].mxu1 }
 0x70d   :  { %6666 = vst [vmem:[%s14205_s4 + $0x16a8] sm:$0xff] %v5271_v27  ;;  %6668 = vst.msk [vmem:[%s14205_s4 + $0x16b8] sm:$0xff] %vm261_vm0, %v5841_v36  ;;  %v5273_v34 = vpop.f32.mrb[207].mxu0  ;;  %v5843_v60 = vpop.f32.mrb[207].mxu1 }
 0x70e   :  { %6667 = vst [vmem:[%s14205_s4 + $0x16b0] sm:$0xff] %v5273_v34 }
 0x712   :  { %v5277_v42 = vpop.f32.mrb[208].mxu0  ;;  %v5846_v13 = vpop.f32.mrb[208].mxu1 }
 0x713   :  { %6673 = vst [vmem:[%s14205_s4 + $0x16e0] sm:$0xff] %v5277_v42  ;;  %6675 = vst.msk [vmem:[%s14205_s4 + $0x16f0] sm:$0xff] %vm261_vm0, %v5846_v13  ;;  %v5279_v0 = vpop.f32.mrb[209].mxu0  ;;  %v5848_v30 = vpop.f32.mrb[209].mxu1 }
 0x714   :  { %6674 = vst [vmem:[%s14205_s4 + $0x16e8] sm:$0xff] %v5279_v0  ;;  %v5281_v46 = vpop.f32.mrb[210].mxu0  ;;  %v5849_v38 = vpop.f32.mrb[210].mxu1 }
 0x715   :  { %6680 = vst [vmem:[%s14205_s4 + $0x1718] sm:$0xff] %v5281_v46  ;;  %6682 = vst.msk [vmem:[%s14205_s4 + $0x1728] sm:$0xff] %vm261_vm0, %v5849_v38  ;;  %v5283_v18 = vpop.f32.mrb[211].mxu0  ;;  %v5851_v4 = vpop.f32.mrb[211].mxu1 }
 0x716   :  { %6681 = vst [vmem:[%s14205_s4 + $0x1720] sm:$0xff] %v5283_v18 }
 0x71a   :  { %v5287_v50 = vpop.f32.mrb[212].mxu0  ;;  %v5854_v2 = vpop.f32.mrb[212].mxu1 }
 0x71b   :  { %6687 = vst [vmem:[%s14205_s4 + $0x1750] sm:$0xff] %v5287_v50  ;;  %6689 = vst.msk [vmem:[%s14205_s4 + $0x1760] sm:$0xff] %vm261_vm0, %v5854_v2  ;;  %v5289_v3 = vpop.f32.mrb[213].mxu0  ;;  %v5856_v28 = vpop.f32.mrb[213].mxu1 }
 0x71c   :  { %6688 = vst [vmem:[%s14205_s4 + $0x1758] sm:$0xff] %v5289_v3  ;;  %v5291_v22 = vpop.f32.mrb[214].mxu0  ;;  %v5857_v9 = vpop.f32.mrb[214].mxu1 }
 0x71d   :  { %6694 = vst [vmem:[%s14205_s4 + $0x1788] sm:$0xff] %v5291_v22  ;;  %6696 = vst.msk [vmem:[%s14205_s4 + $0x1798] sm:$0xff] %vm261_vm0, %v5857_v9  ;;  %v5293_v29 = vpop.f32.mrb[215].mxu0  ;;  %v5859_v21 = vpop.f32.mrb[215].mxu1 }
 0x71e   :  { %6695 = vst [vmem:[%s14205_s4 + $0x1790] sm:$0xff] %v5293_v29 }
 0x722   :  { %v5297_v23 = vpop.f32.mrb[216].mxu0  ;;  %v5862_v49 = vpop.f32.mrb[216].mxu1 }
 0x723   :  { %6701 = vst [vmem:[%s14205_s4 + $0x17c0] sm:$0xff] %v5297_v23  ;;  %6703 = vst.msk [vmem:[%s14205_s4 + $0x17d0] sm:$0xff] %vm261_vm0, %v5862_v49  ;;  %v5299_v62 = vpop.f32.mrb[217].mxu0  ;;  %v5864_v1 = vpop.f32.mrb[217].mxu1 }
 0x724   :  { %6702 = vst [vmem:[%s14205_s4 + $0x17c8] sm:$0xff] %v5299_v62  ;;  %v5301_v11 = vpop.f32.mrb[218].mxu0  ;;  %v5865_v63 = vpop.f32.mrb[218].mxu1 }
 0x725   :  { %6708 = vst [vmem:[%s14205_s4 + $0x17f8] sm:$0xff] %v5301_v11  ;;  %6710 = vst.msk [vmem:[%s14205_s4 + $0x1808] sm:$0xff] %vm261_vm0, %v5865_v63  ;;  %v5303_v10 = vpop.f32.mrb[219].mxu0  ;;  %v5867_v55 = vpop.f32.mrb[219].mxu1 }
 0x726   :  { %6709 = vst [vmem:[%s14205_s4 + $0x1800] sm:$0xff] %v5303_v10 }
 0x72a   :  { %v5307_v53 = vpop.f32.mrb[220].mxu0  ;;  %v5870_v56 = vpop.f32.mrb[220].mxu1 }
 0x72b   :  { %6715 = vst [vmem:[%s14205_s4 + $0x1830] sm:$0xff] %v5307_v53  ;;  %6717 = vst.msk [vmem:[%s14205_s4 + $0x1840] sm:$0xff] %vm261_vm0, %v5870_v56  ;;  %v5309_v32 = vpop.f32.mrb[221].mxu0  ;;  %v5872_v59 = vpop.f32.mrb[221].mxu1 }
 0x72c   :  { %6716 = vst [vmem:[%s14205_s4 + $0x1838] sm:$0xff] %v5309_v32  ;;  %v5311_v25 = vpop.f32.mrb[222].mxu0  ;;  %v5873_v12 = vpop.f32.mrb[222].mxu1 }
 0x72d   :  { %6722 = vst [vmem:[%s14205_s4 + $0x1868] sm:$0xff] %v5311_v25  ;;  %6724 = vst.msk [vmem:[%s14205_s4 + $0x1878] sm:$0xff] %vm261_vm0, %v5873_v12  ;;  %v5313_v61 = vpop.f32.mrb[223].mxu0  ;;  %v5875_v5 = vpop.f32.mrb[223].mxu1 }
 0x72e   :  { %6723 = vst [vmem:[%s14205_s4 + $0x1870] sm:$0xff] %v5313_v61 }
 0x732   :  { %v5317_v16 = vpop.f32.mrb[224].mxu0  ;;  %v5878_v48 = vpop.f32.mrb[224].mxu1 }
 0x733   :  { %6729 = vst [vmem:[%s14205_s4 + $0x18a0] sm:$0xff] %v5317_v16  ;;  %6731 = vst.msk [vmem:[%s14205_s4 + $0x18b0] sm:$0xff] %vm261_vm0, %v5878_v48  ;;  %v5319_v35 = vpop.f32.mrb[225].mxu0  ;;  %v5880_v51 = vpop.f32.mrb[225].mxu1 }
 0x734   :  { %6730 = vst [vmem:[%s14205_s4 + $0x18a8] sm:$0xff] %v5319_v35  ;;  %v5321_v41 = vpop.f32.mrb[226].mxu0  ;;  %v5881_v19 = vpop.f32.mrb[226].mxu1 }
 0x735   :  { %6736 = vst [vmem:[%s14205_s4 + $0x18d8] sm:$0xff] %v5321_v41  ;;  %6738 = vst.msk [vmem:[%s14205_s4 + $0x18e8] sm:$0xff] %vm261_vm0, %v5881_v19  ;;  %v5323_v33 = vpop.f32.mrb[227].mxu0  ;;  %v5883_v44 = vpop.f32.mrb[227].mxu1 }
 0x736   :  { %6737 = vst [vmem:[%s14205_s4 + $0x18e0] sm:$0xff] %v5323_v33 }
 0x73a   :  { %v5327_v14 = vpop.f32.mrb[228].mxu0  ;;  %v5886_v39 = vpop.f32.mrb[228].mxu1 }
 0x73b   :  { %6743 = vst [vmem:[%s14205_s4 + $0x1910] sm:$0xff] %v5327_v14  ;;  %6745 = vst.msk [vmem:[%s14205_s4 + $0x1920] sm:$0xff] %vm261_vm0, %v5886_v39  ;;  %v5329_v20 = vpop.f32.mrb[229].mxu0  ;;  %v5888_v47 = vpop.f32.mrb[229].mxu1 }
 0x73c   :  { %6744 = vst [vmem:[%s14205_s4 + $0x1918] sm:$0xff] %v5329_v20  ;;  %v5331_v17 = vpop.f32.mrb[230].mxu0  ;;  %v5889_v7 = vpop.f32.mrb[230].mxu1 }
 0x73d   :  { %6750 = vst [vmem:[%s14205_s4 + $0x1948] sm:$0xff] %v5331_v17  ;;  %6752 = vst.msk [vmem:[%s14205_s4 + $0x1958] sm:$0xff] %vm261_vm0, %v5889_v7  ;;  %v5333_v26 = vpop.f32.mrb[231].mxu0  ;;  %v5891_v24 = vpop.f32.mrb[231].mxu1 }
 0x73e   :  { %6751 = vst [vmem:[%s14205_s4 + $0x1950] sm:$0xff] %v5333_v26 }
 0x742   :  { %v5337_v58 = vpop.f32.mrb[232].mxu0  ;;  %v5894_v54 = vpop.f32.mrb[232].mxu1 }
 0x743   :  { %6757 = vst [vmem:[%s14205_s4 + $0x1980] sm:$0xff] %v5337_v58  ;;  %6759 = vst.msk [vmem:[%s14205_s4 + $0x1990] sm:$0xff] %vm261_vm0, %v5894_v54  ;;  %v5339_v40 = vpop.f32.mrb[233].mxu0  ;;  %v5896_v37 = vpop.f32.mrb[233].mxu1 }
 0x744   :  { %6758 = vst [vmem:[%s14205_s4 + $0x1988] sm:$0xff] %v5339_v40  ;;  %v5341_v8 = vpop.f32.mrb[234].mxu0  ;;  %v5897_v15 = vpop.f32.mrb[234].mxu1 }
 0x745   :  { %6764 = vst [vmem:[%s14205_s4 + $0x19b8] sm:$0xff] %v5341_v8  ;;  %6766 = vst.msk [vmem:[%s14205_s4 + $0x19c8] sm:$0xff] %vm261_vm0, %v5897_v15  ;;  %v5343_v45 = vpop.f32.mrb[235].mxu0  ;;  %v5899_v6 = vpop.f32.mrb[235].mxu1 }
 0x746   :  { %6765 = vst [vmem:[%s14205_s4 + $0x19c0] sm:$0xff] %v5343_v45 }
 0x74a   :  { %v5347_v52 = vpop.f32.mrb[236].mxu0  ;;  %v5902_v43 = vpop.f32.mrb[236].mxu1 }
 0x74b   :  { %6771 = vst [vmem:[%s14205_s4 + $0x19f0] sm:$0xff] %v5347_v52  ;;  %6773 = vst.msk [vmem:[%s14205_s4 + $0x1a00] sm:$0xff] %vm261_vm0, %v5902_v43  ;;  %v5349_v31 = vpop.f32.mrb[237].mxu0  ;;  %v5904_v57 = vpop.f32.mrb[237].mxu1 }
 0x74c   :  { %6772 = vst [vmem:[%s14205_s4 + $0x19f8] sm:$0xff] %v5349_v31  ;;  %v5351_v27 = vpop.f32.mrb[238].mxu0  ;;  %v5905_v36 = vpop.f32.mrb[238].mxu1 }
 0x74d   :  { %6778 = vst [vmem:[%s14205_s4 + $0x1a28] sm:$0xff] %v5351_v27  ;;  %6780 = vst.msk [vmem:[%s14205_s4 + $0x1a38] sm:$0xff] %vm261_vm0, %v5905_v36  ;;  %v5353_v34 = vpop.f32.mrb[239].mxu0  ;;  %v5907_v60 = vpop.f32.mrb[239].mxu1 }
 0x74e   :  { %6779 = vst [vmem:[%s14205_s4 + $0x1a30] sm:$0xff] %v5353_v34 }
 0x752   :  { %v5357_v42 = vpop.f32.mrb[240].mxu0  ;;  %v5910_v13 = vpop.f32.mrb[240].mxu1 }
 0x753   :  { %6785 = vst [vmem:[%s14205_s4 + $0x1a60] sm:$0xff] %v5357_v42  ;;  %6787 = vst.msk [vmem:[%s14205_s4 + $0x1a70] sm:$0xff] %vm261_vm0, %v5910_v13  ;;  %v5359_v0 = vpop.f32.mrb[241].mxu0  ;;  %v5912_v30 = vpop.f32.mrb[241].mxu1 }
 0x754   :  { %6786 = vst [vmem:[%s14205_s4 + $0x1a68] sm:$0xff] %v5359_v0  ;;  %v5361_v46 = vpop.f32.mrb[242].mxu0  ;;  %v5913_v38 = vpop.f32.mrb[242].mxu1 }
 0x755   :  { %6792 = vst [vmem:[%s14205_s4 + $0x1a98] sm:$0xff] %v5361_v46  ;;  %6794 = vst.msk [vmem:[%s14205_s4 + $0x1aa8] sm:$0xff] %vm261_vm0, %v5913_v38  ;;  %v5363_v18 = vpop.f32.mrb[243].mxu0  ;;  %v5915_v4 = vpop.f32.mrb[243].mxu1 }
 0x756   :  { %6793 = vst [vmem:[%s14205_s4 + $0x1aa0] sm:$0xff] %v5363_v18 }
 0x75a   :  { %v5367_v50 = vpop.f32.mrb[244].mxu0  ;;  %v5918_v2 = vpop.f32.mrb[244].mxu1 }
 0x75b   :  { %6799 = vst [vmem:[%s14205_s4 + $0x1ad0] sm:$0xff] %v5367_v50  ;;  %6801 = vst.msk [vmem:[%s14205_s4 + $0x1ae0] sm:$0xff] %vm261_vm0, %v5918_v2  ;;  %v5369_v3 = vpop.f32.mrb[245].mxu0  ;;  %v5920_v28 = vpop.f32.mrb[245].mxu1 }
 0x75c   :  { %6800 = vst [vmem:[%s14205_s4 + $0x1ad8] sm:$0xff] %v5369_v3  ;;  %v5371_v22 = vpop.f32.mrb[246].mxu0  ;;  %v5921_v9 = vpop.f32.mrb[246].mxu1 }
 0x75d   :  { %6806 = vst [vmem:[%s14205_s4 + $0x1b08] sm:$0xff] %v5371_v22  ;;  %6808 = vst.msk [vmem:[%s14205_s4 + $0x1b18] sm:$0xff] %vm261_vm0, %v5921_v9  ;;  %v5373_v29 = vpop.f32.mrb[247].mxu0  ;;  %v5923_v21 = vpop.f32.mrb[247].mxu1 }
 0x75e   :  { %6807 = vst [vmem:[%s14205_s4 + $0x1b10] sm:$0xff] %v5373_v29 }
 0x762   :  { %v5377_v23 = vpop.f32.mrb[248].mxu0  ;;  %v5926_v49 = vpop.f32.mrb[248].mxu1 }
 0x763   :  { %6813 = vst [vmem:[%s14205_s4 + $0x1b40] sm:$0xff] %v5377_v23  ;;  %6815 = vst.msk [vmem:[%s14205_s4 + $0x1b50] sm:$0xff] %vm261_vm0, %v5926_v49  ;;  %v5379_v62 = vpop.f32.mrb[249].mxu0  ;;  %v5928_v1 = vpop.f32.mrb[249].mxu1 }
 0x764   :  { %6814 = vst [vmem:[%s14205_s4 + $0x1b48] sm:$0xff] %v5379_v62  ;;  %v5381_v11 = vpop.f32.mrb[250].mxu0  ;;  %v5929_v63 = vpop.f32.mrb[250].mxu1 }
 0x765   :  { %6820 = vst [vmem:[%s14205_s4 + $0x1b78] sm:$0xff] %v5381_v11  ;;  %6822 = vst.msk [vmem:[%s14205_s4 + $0x1b88] sm:$0xff] %vm261_vm0, %v5929_v63  ;;  %v5383_v10 = vpop.f32.mrb[251].mxu0  ;;  %v5931_v55 = vpop.f32.mrb[251].mxu1 }
 0x766   :  { %6821 = vst [vmem:[%s14205_s4 + $0x1b80] sm:$0xff] %v5383_v10 }
 0x76a   :  { %v5387_v53 = vpop.f32.mrb[252].mxu0  ;;  %v5934_v56 = vpop.f32.mrb[252].mxu1 }
 0x76b   :  { %6827 = vst [vmem:[%s14205_s4 + $0x1bb0] sm:$0xff] %v5387_v53  ;;  %6829 = vst.msk [vmem:[%s14205_s4 + $0x1bc0] sm:$0xff] %vm261_vm0, %v5934_v56  ;;  %v5389_v32 = vpop.f32.mrb[253].mxu0  ;;  %v5936_v59 = vpop.f32.mrb[253].mxu1 }
 0x76c   :  { %6828 = vst [vmem:[%s14205_s4 + $0x1bb8] sm:$0xff] %v5389_v32  ;;  %v5391_v25 = vpop.f32.mrb[254].mxu0  ;;  %v5937_v12 = vpop.f32.mrb[254].mxu1 }
 0x76d   :  { %6834 = vst [vmem:[%s14205_s4 + $0x1be8] sm:$0xff] %v5391_v25  ;;  %6836 = vst.msk [vmem:[%s14205_s4 + $0x1bf8] sm:$0xff] %vm261_vm0, %v5937_v12  ;;  %v5393_v61 = vpop.f32.mrb[255].mxu0  ;;  %v5939_v5 = vpop.f32.mrb[255].mxu1 }
 0x76e   :  { %6835 = vst [vmem:[%s14205_s4 + $0x1bf0] sm:$0xff] %v5393_v61 }
 0x76f   :  { %6841 = vsyncpa [#allocation3], 1 }

</bundles_post_ra>
